<compile_context>
chip_gen: v7x
topology: tpu7x:2x2x1
jax: 0.10.0
libtpu: 0.0.40
codegen_flags: <defaults>
</compile_context>

<pallas_src>
import jax
import jax.numpy as jnp
from jax import lax
from jax.experimental import pallas as pl
from jax.experimental.pallas import tpu as pltpu

NUM_FTRS = 1536      # convnext_large head.fc.in_features
HID1 = 1024
HID2 = 512
NUM_CLASSES = 5
PATCH = 4            # ConvNeXt patchify stem: 4x4, stride 4
IN_CH = 3
PATCH_DIM = IN_CH * PATCH * PATCH    # 48 (no K-pad: MXU pads K internally)
OUT_PAD = 128                        # lane-pad 5 -> 128 (zero cols in w3/b3)
SUBLANE_BF16 = 16                    # bf16 packs 16 sublanes per vreg
TM_MAX = 256                         # batch tile for the grid


def _round_up(x, m):
    return ((x + m - 1) // m) * m


def _gelu_exact(x):
    # nn.GELU() default: exact erf-based GELU.
    return 0.5 * x * (1.0 + lax.erf(x * jnp.float32(0.7071067811865476)))


def _layernorm(x, gamma, beta, eps):
    # Two-pass form kept on purpose (stem output can have a large mean;
    # E[x^2]-mu^2 would cancel badly).
    mu = jnp.mean(x, axis=-1, keepdims=True)
    var = jnp.mean((x - mu) * (x - mu), axis=-1, keepdims=True)
    return (x - mu) * lax.rsqrt(var + eps) * gamma + beta


def classifier_kernel(pooled_ref, w_stem_ref, b_stem_ref,
                      g0_ref, beta0_ref, g1_ref, beta1_ref,
                      w1_ref, b1_ref, w2_ref, b2_ref, w3_ref, b3_ref,
                      out_ref):
    # Stem conv applied directly to the pooled patch features (exact:
    # mean(X) W + b == mean(X W + b) since the stem is linear).  bf16 inputs,
    # f32 MXU accumulation.
    feat = jnp.dot(pooled_ref[...], w_stem_ref[...],
                   preferred_element_type=jnp.float32) + b_stem_ref[...]

    # timm head norm (LayerNorm eps=1e-6), then custom fc LayerNorm (eps=1e-5).
    x = _layernorm(feat, g0_ref[...], beta0_ref[...], 1e-6)
    x = _layernorm(x, g1_ref[...], beta1_ref[...], 1e-5)

    # Linear(1536,1024) -> GELU     (Dropout(0.4): identity at inference)
    x = _gelu_exact(jnp.dot(x.astype(jnp.bfloat16), w1_ref[...],
                            preferred_element_type=jnp.float32) + b1_ref[...])
    # Linear(1024,512) -> GELU      (Dropout(0.3): identity at inference)
    x = _gelu_exact(jnp.dot(x.astype(jnp.bfloat16), w2_ref[...],
                            preferred_element_type=jnp.float32) + b2_ref[...])
    # Linear(512, num_classes), lane-padded to 128 -> unmasked full-lane store.
    out_ref[...] = jnp.dot(x.astype(jnp.bfloat16), w3_ref[...],
                           preferred_element_type=jnp.float32) + b3_ref[...]


def init_params(key):
    """Logical (PyTorch-shaped) f32 parameters."""
    ks = jax.random.split(key, 8)
    s = 0.02
    return {
        "w_stem": s * jax.random.normal(ks[0], (PATCH_DIM, NUM_FTRS), jnp.float32),
        "b_stem": jnp.zeros((NUM_FTRS,), jnp.float32),
        "g0": jnp.ones((NUM_FTRS,), jnp.float32),        # head.norm weight
        "beta0": jnp.zeros((NUM_FTRS,), jnp.float32),    # head.norm bias
        "g1": jnp.ones((NUM_FTRS,), jnp.float32),        # fc LayerNorm weight
        "beta1": jnp.zeros((NUM_FTRS,), jnp.float32),    # fc LayerNorm bias
        "w1": s * jax.random.normal(ks[1], (NUM_FTRS, HID1), jnp.float32),
        "b1": s * jax.random.normal(ks[2], (HID1,), jnp.float32),
        "w2": s * jax.random.normal(ks[3], (HID1, HID2), jnp.float32),
        "b2": s * jax.random.normal(ks[4], (HID2,), jnp.float32),
        "w3": s * jax.random.normal(ks[5], (HID2, NUM_CLASSES), jnp.float32),
        "b3": s * jax.random.normal(ks[6], (NUM_CLASSES,), jnp.float32),
    }


def pack_params(p):
    """One-time packing: lane-pad the tiny class dim, cast weights to bf16."""
    w3 = jnp.zeros((HID2, OUT_PAD), jnp.float32)
    w3 = w3.at[:, :NUM_CLASSES].set(p["w3"]).astype(jnp.bfloat16)
    b3 = jnp.zeros((1, OUT_PAD), jnp.float32).at[0, :NUM_CLASSES].set(p["b3"])
    row = lambda v: v.reshape(1, -1).astype(jnp.float32)
    return {
        "w_stem": p["w_stem"].astype(jnp.bfloat16),      # (48, 1536), no K-pad
        "b_stem": row(p["b_stem"]),
        "g0": row(p["g0"]), "beta0": row(p["beta0"]),
        "g1": row(p["g1"]), "beta1": row(p["beta1"]),
        "w1": p["w1"].astype(jnp.bfloat16), "b1": row(p["b1"]),
        "w2": p["w2"].astype(jnp.bfloat16), "b2": row(p["b2"]),
        "w3": w3, "b3": b3,
    }


@jax.jit
def flower_classifier_forward(x, packed):
    """x: NCHW float32 image batch, H and W divisible by 4."""
    B, C, H, W = x.shape
    ph, pw = H // PATCH, W // PATCH
    # Global-average-pool the 4x4 patches BEFORE the (linear) stem matmul:
    # pooled[b, (c,kh,kw)] = mean_{i,j} x[b, c, 4i+kh, 4j+kw]
    # Feature order (c, kh, kw) matches the Conv2d weight flattening.
    pooled = jnp.mean(
        x.astype(jnp.float32).reshape(B, C, ph, PATCH, pw, PATCH),
        axis=(2, 4)).reshape(B, C * PATCH * PATCH)

    # Batch tiling: rows padded to a multiple of 16 (bf16 sublane pack); tile
    # of up to TM_MAX rows per grid step so activations stay small in VMEM and
    # v7x can shard the batch axis across its two TensorCores.
    tm = min(TM_MAX, _round_up(B, SUBLANE_BF16))
    b_pad = _round_up(B, tm)
    pooled = jnp.pad(pooled, ((0, b_pad - B), (0, 0))).astype(jnp.bfloat16)
    grid = (b_pad // tm,)

    # Weight blocks: full array, constant index_map -> resident in VMEM across
    # all grid steps (no re-DMA per tile).
    full = lambda arr: pl.BlockSpec(arr.shape, lambda i: (0, 0))
    ins = (pooled,
           packed["w_stem"], packed["b_stem"],
           packed["g0"], packed["beta0"],
           packed["g1"], packed["beta1"],
           packed["w1"], packed["b1"],
           packed["w2"], packed["b2"],
           packed["w3"], packed["b3"])
    in_specs = [pl.BlockSpec((tm, PATCH_DIM), lambda i: (i, 0))]
    in_specs += [full(a) for a in ins[1:]]

    weight_bytes = sum(int(a.size) * a.dtype.itemsize for a in ins[1:])
    flops = 2 * b_pad * (PATCH_DIM * NUM_FTRS + NUM_FTRS * HID1
                         + HID1 * HID2 + HID2 * OUT_PAD)
    cost = pl.CostEstimate(
        flops=flops,
        transcendentals=b_pad * (HID1 + HID2),
        bytes_accessed=weight_bytes + pooled.size * 2 + b_pad * OUT_PAD * 4)

    out = pl.pallas_call(
        classifier_kernel,
        out_shape=jax.ShapeDtypeStruct((b_pad, OUT_PAD), jnp.float32),
        grid=grid,
        in_specs=in_specs,
        out_specs=pl.BlockSpec((tm, OUT_PAD), lambda i: (i, 0)),
        compiler_params=pltpu.CompilerParams(
            dimension_semantics=("parallel",),
            vmem_limit_bytes=32 * 1024 * 1024),
        cost_estimate=cost,
    )(*ins)
    return out[:B, :NUM_CLASSES]


if __name__ == "__main__":
    key = jax.random.PRNGKey(0)
    k_x, k_p = jax.random.split(key)
    # Small NCHW input consistent with an RGB image classifier.
    x = jax.random.normal(k_x, (2, IN_CH, 16, 16), jnp.float32)
    params = init_params(k_p)
    packed = pack_params(params)

    out = flower_classifier_forward(x, packed)
    out = jax.block_until_ready(out)
    assert out.shape == (2, NUM_CLASSES) and out.dtype == jnp.float32
    print("KERNEL_OK")
</pallas_src>

<mosaic_0001>
module attributes {stable_mosaic.version = 11 : i64} {
  func.func @classifier_kernel(%arg0: i32, %arg1: memref<16x48xbf16, #tpu.memory_space<vmem>>, %arg2: memref<48x1536xbf16, #tpu.memory_space<vmem>>, %arg3: memref<1x1536xf32, #tpu.memory_space<vmem>>, %arg4: memref<1x1536xf32, #tpu.memory_space<vmem>>, %arg5: memref<1x1536xf32, #tpu.memory_space<vmem>>, %arg6: memref<1x1536xf32, #tpu.memory_space<vmem>>, %arg7: memref<1x1536xf32, #tpu.memory_space<vmem>>, %arg8: memref<1536x1024xbf16, #tpu.memory_space<vmem>>, %arg9: memref<1x1024xf32, #tpu.memory_space<vmem>>, %arg10: memref<1024x512xbf16, #tpu.memory_space<vmem>>, %arg11: memref<1x512xf32, #tpu.memory_space<vmem>>, %arg12: memref<512x128xbf16, #tpu.memory_space<vmem>>, %arg13: memref<1x128xf32, #tpu.memory_space<vmem>>, %arg14: memref<16x128xf32, #tpu.memory_space<vmem>>) attributes {dimension_semantics = [#tpu.dimension_semantics<parallel>], iteration_bounds = array<i64: 1>, scalar_prefetch = 0 : i64, scratch_operands = 0 : i64, tpu.core_type = #tpu.core_type<tc>, window_params = [{transform_indices = @transform_0, window_bounds = array<i64: 16, 48>}, {pipeline_mode = #tpu.pipeline_mode<synchronous>, transform_indices = @transform_1, window_bounds = array<i64: 48, 1536>}, {pipeline_mode = #tpu.pipeline_mode<synchronous>, transform_indices = @transform_2, window_bounds = array<i64: 1, 1536>}, {pipeline_mode = #tpu.pipeline_mode<synchronous>, transform_indices = @transform_3, window_bounds = array<i64: 1, 1536>}, {pipeline_mode = #tpu.pipeline_mode<synchronous>, transform_indices = @transform_4, window_bounds = array<i64: 1, 1536>}, {pipeline_mode = #tpu.pipeline_mode<synchronous>, transform_indices = @transform_5, window_bounds = array<i64: 1, 1536>}, {pipeline_mode = #tpu.pipeline_mode<synchronous>, transform_indices = @transform_6, window_bounds = array<i64: 1, 1536>}, {pipeline_mode = #tpu.pipeline_mode<synchronous>, transform_indices = @transform_7, window_bounds = array<i64: 1536, 1024>}, {pipeline_mode = #tpu.pipeline_mode<synchronous>, transform_indices = @transform_8, window_bounds = array<i64: 1, 1024>}, {pipeline_mode = #tpu.pipeline_mode<synchronous>, transform_indices = @transform_9, window_bounds = array<i64: 1024, 512>}, {pipeline_mode = #tpu.pipeline_mode<synchronous>, transform_indices = @transform_10, window_bounds = array<i64: 1, 512>}, {pipeline_mode = #tpu.pipeline_mode<synchronous>, transform_indices = @transform_11, window_bounds = array<i64: 512, 128>}, {pipeline_mode = #tpu.pipeline_mode<synchronous>, transform_indices = @transform_12, window_bounds = array<i64: 1, 128>}, {transform_indices = @transform_13, window_bounds = array<i64: 16, 128>}]} {
    %c0 = arith.constant 0 : index
    %c0_0 = arith.constant 0 : index
    %0 = vector.load %arg1[%c0, %c0_0] : memref<16x48xbf16, #tpu.memory_space<vmem>>, vector<16x48xbf16>
    %c0_1 = arith.constant 0 : index
    %c0_2 = arith.constant 0 : index
    %1 = vector.load %arg2[%c0_1, %c0_2] : memref<48x1536xbf16, #tpu.memory_space<vmem>>, vector<48x1536xbf16>
    %cst = arith.constant dense<0.000000e+00> : vector<16x1536xf32>
    %2 = tpu.matmul %0, %1, %cst {dimension_numbers = #tpu.dot_dimension_numbers<[1], [0], [0], [1], [0, 0, 1, 1], [], []>} : vector<16x48xbf16>, vector<48x1536xbf16>, vector<16x1536xf32> -> vector<16x1536xf32>
    %c0_3 = arith.constant 0 : index
    %c0_4 = arith.constant 0 : index
    %3 = vector.load %arg3[%c0_3, %c0_4] : memref<1x1536xf32, #tpu.memory_space<vmem>>, vector<1x1536xf32>
    %4 = vector.broadcast %3 : vector<1x1536xf32> to vector<16x1536xf32>
    %5 = arith.addf %2, %4 : vector<16x1536xf32>
    %c0_5 = arith.constant 0 : index
    %c0_6 = arith.constant 0 : index
    %6 = vector.load %arg4[%c0_5, %c0_6] : memref<1x1536xf32, #tpu.memory_space<vmem>>, vector<1x1536xf32>
    %c0_7 = arith.constant 0 : index
    %c0_8 = arith.constant 0 : index
    %7 = vector.load %arg5[%c0_7, %c0_8] : memref<1x1536xf32, #tpu.memory_space<vmem>>, vector<1x1536xf32>
    %cst_9 = arith.constant dense<0.000000e+00> : vector<16xf32>
    %8 = vector.multi_reduction <add>, %5, %cst_9 [1] : vector<16x1536xf32> to vector<16xf32>
    %9 = vector.shape_cast %8 : vector<16xf32> to vector<16x1xf32>
    %cst_10 = arith.constant 1.536000e+03 : f32
    %10 = vector.broadcast %cst_10 : f32 to vector<16x1xf32>
    %11 = arith.divf %9, %10 : vector<16x1xf32>
    %12 = vector.broadcast %11 : vector<16x1xf32> to vector<16x1536xf32>
    %13 = arith.subf %5, %12 : vector<16x1536xf32>
    %14 = vector.broadcast %11 : vector<16x1xf32> to vector<16x1536xf32>
    %15 = arith.subf %5, %14 : vector<16x1536xf32>
    %16 = arith.mulf %13, %15 : vector<16x1536xf32>
    %cst_11 = arith.constant dense<0.000000e+00> : vector<16xf32>
    %17 = vector.multi_reduction <add>, %16, %cst_11 [1] : vector<16x1536xf32> to vector<16xf32>
    %18 = vector.shape_cast %17 : vector<16xf32> to vector<16x1xf32>
    %cst_12 = arith.constant 1.536000e+03 : f32
    %19 = vector.broadcast %cst_12 : f32 to vector<16x1xf32>
    %20 = arith.divf %18, %19 : vector<16x1xf32>
    %21 = vector.broadcast %11 : vector<16x1xf32> to vector<16x1536xf32>
    %22 = arith.subf %5, %21 : vector<16x1536xf32>
    %cst_13 = arith.constant 9.99999997E-7 : f32
    %23 = vector.broadcast %cst_13 : f32 to vector<16x1xf32>
    %24 = arith.addf %20, %23 : vector<16x1xf32>
    %25 = math.rsqrt %24 : vector<16x1xf32>
    %26 = vector.broadcast %25 : vector<16x1xf32> to vector<16x1536xf32>
    %27 = arith.mulf %22, %26 : vector<16x1536xf32>
    %28 = vector.broadcast %6 : vector<1x1536xf32> to vector<16x1536xf32>
    %29 = arith.mulf %27, %28 : vector<16x1536xf32>
    %30 = vector.broadcast %7 : vector<1x1536xf32> to vector<16x1536xf32>
    %31 = arith.addf %29, %30 : vector<16x1536xf32>
    %c0_14 = arith.constant 0 : index
    %c0_15 = arith.constant 0 : index
    %32 = vector.load %arg6[%c0_14, %c0_15] : memref<1x1536xf32, #tpu.memory_space<vmem>>, vector<1x1536xf32>
    %c0_16 = arith.constant 0 : index
    %c0_17 = arith.constant 0 : index
    %33 = vector.load %arg7[%c0_16, %c0_17] : memref<1x1536xf32, #tpu.memory_space<vmem>>, vector<1x1536xf32>
    %cst_18 = arith.constant dense<0.000000e+00> : vector<16xf32>
    %34 = vector.multi_reduction <add>, %31, %cst_18 [1] : vector<16x1536xf32> to vector<16xf32>
    %35 = vector.shape_cast %34 : vector<16xf32> to vector<16x1xf32>
    %cst_19 = arith.constant 1.536000e+03 : f32
    %36 = vector.broadcast %cst_19 : f32 to vector<16x1xf32>
    %37 = arith.divf %35, %36 : vector<16x1xf32>
    %38 = vector.broadcast %37 : vector<16x1xf32> to vector<16x1536xf32>
    %39 = arith.subf %31, %38 : vector<16x1536xf32>
    %40 = vector.broadcast %37 : vector<16x1xf32> to vector<16x1536xf32>
    %41 = arith.subf %31, %40 : vector<16x1536xf32>
    %42 = arith.mulf %39, %41 : vector<16x1536xf32>
    %cst_20 = arith.constant dense<0.000000e+00> : vector<16xf32>
    %43 = vector.multi_reduction <add>, %42, %cst_20 [1] : vector<16x1536xf32> to vector<16xf32>
    %44 = vector.shape_cast %43 : vector<16xf32> to vector<16x1xf32>
    %cst_21 = arith.constant 1.536000e+03 : f32
    %45 = vector.broadcast %cst_21 : f32 to vector<16x1xf32>
    %46 = arith.divf %44, %45 : vector<16x1xf32>
    %47 = vector.broadcast %37 : vector<16x1xf32> to vector<16x1536xf32>
    %48 = arith.subf %31, %47 : vector<16x1536xf32>
    %cst_22 = arith.constant 9.99999974E-6 : f32
    %49 = vector.broadcast %cst_22 : f32 to vector<16x1xf32>
    %50 = arith.addf %46, %49 : vector<16x1xf32>
    %51 = math.rsqrt %50 : vector<16x1xf32>
    %52 = vector.broadcast %51 : vector<16x1xf32> to vector<16x1536xf32>
    %53 = arith.mulf %48, %52 : vector<16x1536xf32>
    %54 = vector.broadcast %32 : vector<1x1536xf32> to vector<16x1536xf32>
    %55 = arith.mulf %53, %54 : vector<16x1536xf32>
    %56 = vector.broadcast %33 : vector<1x1536xf32> to vector<16x1536xf32>
    %57 = arith.addf %55, %56 : vector<16x1536xf32>
    %58 = arith.truncf %57 : vector<16x1536xf32> to vector<16x1536xbf16>
    %c0_23 = arith.constant 0 : index
    %c0_24 = arith.constant 0 : index
    %59 = vector.load %arg8[%c0_23, %c0_24] : memref<1536x1024xbf16, #tpu.memory_space<vmem>>, vector<1536x1024xbf16>
    %cst_25 = arith.constant dense<0.000000e+00> : vector<16x1024xf32>
    %60 = tpu.matmul %58, %59, %cst_25 {dimension_numbers = #tpu.dot_dimension_numbers<[1], [0], [0], [1], [0, 0, 1, 1], [], []>} : vector<16x1536xbf16>, vector<1536x1024xbf16>, vector<16x1024xf32> -> vector<16x1024xf32>
    %c0_26 = arith.constant 0 : index
    %c0_27 = arith.constant 0 : index
    %61 = vector.load %arg9[%c0_26, %c0_27] : memref<1x1024xf32, #tpu.memory_space<vmem>>, vector<1x1024xf32>
    %62 = vector.broadcast %61 : vector<1x1024xf32> to vector<16x1024xf32>
    %63 = arith.addf %60, %62 : vector<16x1024xf32>
    %cst_28 = arith.constant 5.000000e-01 : f32
    %64 = vector.broadcast %cst_28 : f32 to vector<16x1024xf32>
    %65 = arith.mulf %64, %63 : vector<16x1024xf32>
    %cst_29 = arith.constant 0.707106769 : f32
    %66 = vector.broadcast %cst_29 : f32 to vector<16x1024xf32>
    %67 = arith.mulf %63, %66 : vector<16x1024xf32>
    %68 = math.erf %67 : vector<16x1024xf32>
    %cst_30 = arith.constant 1.000000e+00 : f32
    %69 = vector.broadcast %cst_30 : f32 to vector<16x1024xf32>
    %70 = arith.addf %69, %68 : vector<16x1024xf32>
    %71 = arith.mulf %65, %70 : vector<16x1024xf32>
    %72 = arith.truncf %71 : vector<16x1024xf32> to vector<16x1024xbf16>
    %c0_31 = arith.constant 0 : index
    %c0_32 = arith.constant 0 : index
    %73 = vector.load %arg10[%c0_31, %c0_32] : memref<1024x512xbf16, #tpu.memory_space<vmem>>, vector<1024x512xbf16>
    %cst_33 = arith.constant dense<0.000000e+00> : vector<16x512xf32>
    %74 = tpu.matmul %72, %73, %cst_33 {dimension_numbers = #tpu.dot_dimension_numbers<[1], [0], [0], [1], [0, 0, 1, 1], [], []>} : vector<16x1024xbf16>, vector<1024x512xbf16>, vector<16x512xf32> -> vector<16x512xf32>
    %c0_34 = arith.constant 0 : index
    %c0_35 = arith.constant 0 : index
    %75 = vector.load %arg11[%c0_34, %c0_35] : memref<1x512xf32, #tpu.memory_space<vmem>>, vector<1x512xf32>
    %76 = vector.broadcast %75 : vector<1x512xf32> to vector<16x512xf32>
    %77 = arith.addf %74, %76 : vector<16x512xf32>
    %cst_36 = arith.constant 5.000000e-01 : f32
    %78 = vector.broadcast %cst_36 : f32 to vector<16x512xf32>
    %79 = arith.mulf %78, %77 : vector<16x512xf32>
    %cst_37 = arith.constant 0.707106769 : f32
    %80 = vector.broadcast %cst_37 : f32 to vector<16x512xf32>
    %81 = arith.mulf %77, %80 : vector<16x512xf32>
    %82 = math.erf %81 : vector<16x512xf32>
    %cst_38 = arith.constant 1.000000e+00 : f32
    %83 = vector.broadcast %cst_38 : f32 to vector<16x512xf32>
    %84 = arith.addf %83, %82 : vector<16x512xf32>
    %85 = arith.mulf %79, %84 : vector<16x512xf32>
    %86 = arith.truncf %85 : vector<16x512xf32> to vector<16x512xbf16>
    %c0_39 = arith.constant 0 : index
    %c0_40 = arith.constant 0 : index
    %87 = vector.load %arg12[%c0_39, %c0_40] : memref<512x128xbf16, #tpu.memory_space<vmem>>, vector<512x128xbf16>
    %cst_41 = arith.constant dense<0.000000e+00> : vector<16x128xf32>
    %88 = tpu.matmul %86, %87, %cst_41 {dimension_numbers = #tpu.dot_dimension_numbers<[1], [0], [0], [1], [0, 0, 1, 1], [], []>} : vector<16x512xbf16>, vector<512x128xbf16>, vector<16x128xf32> -> vector<16x128xf32>
    %c0_42 = arith.constant 0 : index
    %c0_43 = arith.constant 0 : index
    %89 = vector.load %arg13[%c0_42, %c0_43] : memref<1x128xf32, #tpu.memory_space<vmem>>, vector<1x128xf32>
    %90 = vector.broadcast %89 : vector<1x128xf32> to vector<16x128xf32>
    %91 = arith.addf %88, %90 : vector<16x128xf32>
    %c0_44 = arith.constant 0 : index
    %c0_45 = arith.constant 0 : index
    %92 = vector.load %arg14[%c0_44, %c0_45] : memref<16x128xf32, #tpu.memory_space<vmem>>, vector<16x128xf32>
    tpu.vector_store %arg14[%c0_44, %c0_45], %91 {strides = array<i32>} : memref<16x128xf32, #tpu.memory_space<vmem>>, vector<16x128xf32>,
    return
  }
  func.func @transform_0(%arg0: i32) -> (i32, i32) {
    %c0_i32 = arith.constant 0 : i32
    %c0_i32_0 = arith.constant 0 : i32
    return %arg0, %c0_i32 : i32, i32
  }
  func.func @transform_1(%arg0: i32) -> (i32, i32) {
    %c0_i32 = arith.constant 0 : i32
    %c0_i32_0 = arith.constant 0 : i32
    %c0_i32_1 = arith.constant 0 : i32
    return %c0_i32, %c0_i32_0 : i32, i32
  }
  func.func @transform_2(%arg0: i32) -> (i32, i32) {
    %c0_i32 = arith.constant 0 : i32
    %c0_i32_0 = arith.constant 0 : i32
    %c0_i32_1 = arith.constant 0 : i32
    return %c0_i32, %c0_i32_0 : i32, i32
  }
  func.func @transform_3(%arg0: i32) -> (i32, i32) {
    %c0_i32 = arith.constant 0 : i32
    %c0_i32_0 = arith.constant 0 : i32
    %c0_i32_1 = arith.constant 0 : i32
    return %c0_i32, %c0_i32_0 : i32, i32
  }
  func.func @transform_4(%arg0: i32) -> (i32, i32) {
    %c0_i32 = arith.constant 0 : i32
    %c0_i32_0 = arith.constant 0 : i32
    %c0_i32_1 = arith.constant 0 : i32
    return %c0_i32, %c0_i32_0 : i32, i32
  }
  func.func @transform_5(%arg0: i32) -> (i32, i32) {
    %c0_i32 = arith.constant 0 : i32
    %c0_i32_0 = arith.constant 0 : i32
    %c0_i32_1 = arith.constant 0 : i32
    return %c0_i32, %c0_i32_0 : i32, i32
  }
  func.func @transform_6(%arg0: i32) -> (i32, i32) {
    %c0_i32 = arith.constant 0 : i32
    %c0_i32_0 = arith.constant 0 : i32
    %c0_i32_1 = arith.constant 0 : i32
    return %c0_i32, %c0_i32_0 : i32, i32
  }
  func.func @transform_7(%arg0: i32) -> (i32, i32) {
    %c0_i32 = arith.constant 0 : i32
    %c0_i32_0 = arith.constant 0 : i32
    %c0_i32_1 = arith.constant 0 : i32
    return %c0_i32, %c0_i32_0 : i32, i32
  }
  func.func @transform_8(%arg0: i32) -> (i32, i32) {
    %c0_i32 = arith.constant 0 : i32
    %c0_i32_0 = arith.constant 0 : i32
    %c0_i32_1 = arith.constant 0 : i32
    return %c0_i32, %c0_i32_0 : i32, i32
  }
  func.func @transform_9(%arg0: i32) -> (i32, i32) {
    %c0_i32 = arith.constant 0 : i32
    %c0_i32_0 = arith.constant 0 : i32
    %c0_i32_1 = arith.constant 0 : i32
    return %c0_i32, %c0_i32_0 : i32, i32
  }
  func.func @transform_10(%arg0: i32) -> (i32, i32) {
    %c0_i32 = arith.constant 0 : i32
    %c0_i32_0 = arith.constant 0 : i32
    %c0_i32_1 = arith.constant 0 : i32
    return %c0_i32, %c0_i32_0 : i32, i32
  }
  func.func @transform_11(%arg0: i32) -> (i32, i32) {
    %c0_i32 = arith.constant 0 : i32
    %c0_i32_0 = arith.constant 0 : i32
    %c0_i32_1 = arith.constant 0 : i32
    return %c0_i32, %c0_i32_0 : i32, i32
  }
  func.func @transform_12(%arg0: i32) -> (i32, i32) {
    %c0_i32 = arith.constant 0 : i32
    %c0_i32_0 = arith.constant 0 : i32
    %c0_i32_1 = arith.constant 0 : i32
    return %c0_i32, %c0_i32_0 : i32, i32
  }
  func.func @transform_13(%arg0: i32) -> (i32, i32) {
    %c0_i32 = arith.constant 0 : i32
    %c0_i32_0 = arith.constant 0 : i32
    return %arg0, %c0_i32 : i32, i32
  }
}

</mosaic_0001>

<bundles_post_ra>
// kernel: flower_classifier_forward.1
= control target key start
LH: loop header
LB: loop body
LE: loop exit
PB: predicated region body
PF: predicated region fallthrough
CT: control target
= control target key end

     0   :  { %18 = vsyncpa [#allocation3], 0  ;;  %s12713_s0 = inlined_call_operand.vmem [shape: bf16[16,48], index: 0, kind: input, shape index: {}]   ;;  %s12714_s1 = inlined_call_operand.hbm [shape: bf16[48,1536], index: 1, kind: input, shape index: {}]   ;;  %s12715_s2 = inlined_call_operand.hbm [shape: f32[1,1536], index: 2, kind: input, shape index: {}]   ;;  %s12716_s3 = inlined_call_operand.hbm [shape: f32[1,1536], index: 3, kind: input, shape index: {}]   ;;  %s12717_s4 = inlined_call_operand.hbm [shape: f32[1,1536], index: 4, kind: input, shape index: {}]   ;;  %s12718_s5 = inlined_call_operand.hbm [shape: f32[1,1536], index: 5, kind: input, shape index: {}]   ;;  %s12719_s6 = inlined_call_operand.hbm [shape: f32[1,1536], index: 6, kind: input, shape index: {}]   ;;  %s12720_s7 = inlined_call_operand.hbm [shape: bf16[1536,1024], index: 7, kind: input, shape index: {}]   ;;  %s12721_s8 = inlined_call_operand.hbm [shape: f32[1,1024], index: 8, kind: input, shape index: {}]   ;;  %s12722_s9 = inlined_call_operand.hbm [shape: bf16[1024,512], index: 9, kind: input, shape index: {}]   ;;  %s12723_s10 = inlined_call_operand.hbm [shape: f32[1,512], index: 10, kind: input, shape index: {}]   ;;  %s12724_s11 = inlined_call_operand.hbm [shape: bf16[512,128], index: 11, kind: input, shape index: {}]   ;;  %s12725_s12 = inlined_call_operand.hbm [shape: f32[1,128], index: 12, kind: input, shape index: {}]   ;;  %s12726_s13 = inlined_call_operand.vmem [shape: f32[16,128], index: 13, kind: output, shape index: {}]  }
   0x1   :  { %19 = vsyncpa [#allocation5], 0 }
   0x2   :  { %20 = vsyncpa [#allocation8], 0 }
   0x3   :  { %21 = vsyncpa [#allocation11], 0 }
   0x4   :  { %22 = vsyncpa [#allocation14], 0 }
   0x5   :  { %23 = vsyncpa [#allocation17], 0 }
   0x6   :  { %24 = vsyncpa [#allocation20], 0  ;;  %s11543_s25 = smov [#allocation4]   ;;  %s11544_s27 = smov [#allocation7]  }
   0x7   :  { %s45_s26 = sshll.u32 %s11543_s25, 4  ;;  %s65_s28 = sshll.u32 %s11544_s27, 4  ;;  %s46_s26 = int_to_ptr.vmem [resolvable:$true] %s45_s26  ;;  %s66_s28 = int_to_ptr.vmem [resolvable:$true] %s65_s28 }
   0x8   :  { %s11265_s14 = scalar_lea.hbm %s12715_s2, 192 }
   0x9   :  { %p11266_p0 = scmp.ne.s32.totalorder %s12715_s2, %s11265_s14  ;;  %p11269_p1 = scmp.lt.u32.totalorder %s11265_s14, %s12715_s2 }
   0xb   :  { %p11271_p2 = pnand %p11269_p1, %p11266_p0 }
   0xd   :  { %11274 = shalt.err (!%p11271_p2)
}
   0xe   :  { %s11275_s19 = scalar_lea.vmem %s46_s26, 192  ;;  %p11280_p4 = scmp.lt.s32.totalorder %s46_s26, %s46_s26 }
   0xf   :  { %p11276_p3 = scmp.ne.s32.totalorder %s46_s26, %s11275_s19  ;;  %p11281_p5 = scmp.lt.s32.totalorder %s11275_s19, %s11275_s19 }
  0x11   :  { %p11282_p6 = por %p11281_p5, %p11280_p4 }
  0x13   :  { %p11283_p7 = pnand %p11282_p6, %p11276_p3 }
  0x15   :  { %11286 = shalt.err (!%p11283_p7)
}
  0x16   :  { %48 = dma.hbm_to_vmem [thread:$0]  %s12715_s2, 192, %s46_s26, [#allocation5]  }
  0x17   :  { %s11287_s24 = scalar_lea.hbm %s12717_s4, 192 }
  0x18   :  { %p11288_p8 = scmp.ne.s32.totalorder %s12717_s4, %s11287_s24  ;;  %p11291_p9 = scmp.lt.u32.totalorder %s11287_s24, %s12717_s4 }
  0x1a   :  { %p11293_p10 = pnand %p11291_p9, %p11288_p8 }
  0x1c   :  { %11296 = shalt.err (!%p11293_p10)
}
  0x1d   :  { %s11297_s14 = scalar_lea.vmem %s66_s28, 192  ;;  %p11302_p12 = scmp.lt.s32.totalorder %s66_s28, %s66_s28 }
  0x1e   :  { %p11298_p11 = scmp.ne.s32.totalorder %s66_s28, %s11297_s14  ;;  %p11303_p13 = scmp.lt.s32.totalorder %s11297_s14, %s11297_s14 }
  0x20   :  { %p11304_p0 = por %p11303_p13, %p11302_p12 }
  0x22   :  { %p11305_p1 = pnand %p11304_p0, %p11298_p11 }
  0x24   :  { %11308 = shalt.err (!%p11305_p1)
}
  0x25   :  { %68 = dma.hbm_to_vmem [thread:$0]  %s12717_s4, 192, %s66_s28, [#allocation8]  }
  0x26   :  { %s11545_s15 = smov [#allocation10]   ;;  %s11546_s17 = smov [#allocation13]  }
  0x27   :  { %s85_s16 = sshll.u32 %s11545_s15, 4  ;;  %s107_s18 = sshll.u32 %s11546_s17, 4  ;;  %s86_s16 = int_to_ptr.vmem [resolvable:$true] %s85_s16  ;;  %s108_s18 = int_to_ptr.vmem [resolvable:$true] %s107_s18 }
  0x28   :  { %s11309_s21 = scalar_lea.hbm %s12719_s6, 192 }
  0x29   :  { %p11310_p2 = scmp.ne.s32.totalorder %s12719_s6, %s11309_s21  ;;  %p11313_p3 = scmp.lt.u32.totalorder %s11309_s21, %s12719_s6 }
  0x2b   :  { %p11315_p4 = pnand %p11313_p3, %p11310_p2 }
  0x2d   :  { %11318 = shalt.err (!%p11315_p4)
}
  0x2e   :  { %s11319_s4 = scalar_lea.vmem %s86_s16, 192  ;;  %p11324_p6 = scmp.lt.s32.totalorder %s86_s16, %s86_s16 }
  0x2f   :  { %p11320_p5 = scmp.ne.s32.totalorder %s86_s16, %s11319_s4  ;;  %p11325_p7 = scmp.lt.s32.totalorder %s11319_s4, %s11319_s4 }
  0x31   :  { %p11326_p8 = por %p11325_p7, %p11324_p6 }
  0x33   :  { %p11327_p9 = pnand %p11326_p8, %p11320_p5 }
  0x35   :  { %11330 = shalt.err (!%p11327_p9)
}
  0x36   :  { %88 = dma.hbm_to_vmem [thread:$0]  %s12719_s6, 192, %s86_s16, [#allocation11]  }
  0x37   :  { %s11331_s14 = scalar_lea.hbm %s12721_s8, 128 }
  0x38   :  { %p11332_p10 = scmp.ne.s32.totalorder %s12721_s8, %s11331_s14  ;;  %p11335_p11 = scmp.lt.u32.totalorder %s11331_s14, %s12721_s8 }
  0x3a   :  { %p11337_p12 = pnand %p11335_p11, %p11332_p10 }
  0x3c   :  { %11340 = shalt.err (!%p11337_p12)
}
  0x3d   :  { %s11341_s19 = scalar_lea.vmem %s108_s18, 128  ;;  %p11346_p0 = scmp.lt.s32.totalorder %s108_s18, %s108_s18 }
  0x3e   :  { %p11342_p13 = scmp.ne.s32.totalorder %s108_s18, %s11341_s19  ;;  %p11347_p1 = scmp.lt.s32.totalorder %s11341_s19, %s11341_s19 }
  0x40   :  { %p11348_p2 = por %p11347_p1, %p11346_p0 }
  0x42   :  { %p11349_p3 = pnand %p11348_p2, %p11342_p13 }
  0x44   :  { %11352 = shalt.err (!%p11349_p3)
}
  0x45   :  { %110 = dma.hbm_to_vmem [thread:$0]  %s12721_s8, 128, %s108_s18, [#allocation14]  }
  0x46   :  { %s11547_s20 = smov [#allocation16]   ;;  %s11548_s22 = smov [#allocation2]  }
  0x47   :  { %s129_s21 = sshll.u32 %s11547_s20, 4  ;;  %s32_s23 = sshll.u32 %s11548_s22, 4  ;;  %s130_s21 = int_to_ptr.vmem [resolvable:$true] %s129_s21  ;;  %s11682_s23 = int_to_ptr.vmem [resolvable:$true] %s32_s23 }
  0x48   :  { %s11353_s4 = scalar_lea.hbm %s12723_s10, 64 }
  0x49   :  { %p11354_p4 = scmp.ne.s32.totalorder %s12723_s10, %s11353_s4  ;;  %p11357_p5 = scmp.lt.u32.totalorder %s11353_s4, %s12723_s10 }
  0x4b   :  { %p11359_p6 = pnand %p11357_p5, %p11354_p4 }
  0x4d   :  { %11362 = shalt.err (!%p11359_p6)
}
  0x4e   :  { %s11363_s8 = scalar_lea.vmem %s130_s21, 64  ;;  %p11368_p8 = scmp.lt.s32.totalorder %s130_s21, %s130_s21 }
  0x4f   :  { %p11364_p7 = scmp.ne.s32.totalorder %s130_s21, %s11363_s8  ;;  %p11369_p9 = scmp.lt.s32.totalorder %s11363_s8, %s11363_s8 }
  0x51   :  { %p11370_p10 = por %p11369_p9, %p11368_p8 }
  0x53   :  { %p11371_p11 = pnand %p11370_p10, %p11364_p7 }
  0x55   :  { %11374 = shalt.err (!%p11371_p11)
}
  0x56   :  { %132 = dma.hbm_to_vmem [thread:$0]  %s12723_s10, 64, %s130_s21, [#allocation17]  }
  0x57   :  { %s11375_s15 = scalar_lea.hbm %s12714_s1, 4608 }
  0x58   :  { %p11376_p12 = scmp.ne.s32.totalorder %s12714_s1, %s11375_s15  ;;  %p11379_p13 = scmp.lt.u32.totalorder %s11375_s15, %s12714_s1 }
  0x5a   :  { %p11381_p0 = pnand %p11379_p13, %p11376_p12 }
  0x5c   :  { %11384 = shalt.err (!%p11381_p0)
}
  0x5d   :  { %s11385_s20 = scalar_lea.vmem %s11682_s23, 4608  ;;  %p11390_p2 = scmp.lt.s32.totalorder %s11682_s23, %s11682_s23 }
  0x5e   :  { %p11386_p1 = scmp.ne.s32.totalorder %s11682_s23, %s11385_s20  ;;  %p11391_p3 = scmp.lt.s32.totalorder %s11385_s20, %s11385_s20 }
  0x60   :  { %p11392_p4 = por %p11391_p3, %p11390_p2 }
  0x62   :  { %p11393_p5 = pnand %p11392_p4, %p11386_p1 }
  0x64   :  { %11396 = shalt.err (!%p11393_p5)
}
  0x65   :  { %s11549_s10 = smov 768   ;;  %s11550_s21 = smov 48  }
  0x66   :  { %38 = dma.hbm_to_vmem [thread:$0]  %s12714_s1, 4608, %s11682_s23, [#allocation3], %s11549_s10, %s11549_s10, %s11550_s21  }
  0x67   :  { %s11551_s25 = smov [#allocation6]   ;;  %s11552_s28 = smov [#allocation9]  }
  0x68   :  { %s55_s4 = sshll.u32 %s11551_s25, 4  ;;  %s75_s27 = sshll.u32 %s11552_s28, 4  ;;  %s56_s4 = int_to_ptr.vmem [resolvable:$true] %s55_s4  ;;  %s76_s27 = int_to_ptr.vmem [resolvable:$true] %s75_s27 }
  0x69   :  { %s11397_s8 = scalar_lea.hbm %s12716_s3, 192 }
  0x6a   :  { %p11398_p6 = scmp.ne.s32.totalorder %s12716_s3, %s11397_s8  ;;  %p11401_p7 = scmp.lt.u32.totalorder %s11397_s8, %s12716_s3 }
  0x6c   :  { %p11403_p8 = pnand %p11401_p7, %p11398_p6 }
  0x6e   :  { %11406 = shalt.err (!%p11403_p8)
}
  0x6f   :  { %s11407_s1 = scalar_lea.vmem %s56_s4, 192  ;;  %p11412_p10 = scmp.lt.s32.totalorder %s56_s4, %s56_s4 }
  0x70   :  { %p11408_p9 = scmp.ne.s32.totalorder %s56_s4, %s11407_s1  ;;  %p11413_p11 = scmp.lt.s32.totalorder %s11407_s1, %s11407_s1 }
  0x72   :  { %p11414_p12 = por %p11413_p11, %p11412_p10 }
  0x74   :  { %p11415_p13 = pnand %p11414_p12, %p11408_p9 }
  0x76   :  { %11418 = shalt.err (!%p11415_p13)
}
  0x77   :  { %58 = dma.hbm_to_vmem [thread:$0]  %s12716_s3, 192, %s56_s4, [#allocation5]  }
  0x78   :  { %s11419_s6 = scalar_lea.hbm %s12718_s5, 192 }
  0x79   :  { %p11420_p0 = scmp.ne.s32.totalorder %s12718_s5, %s11419_s6  ;;  %p11423_p1 = scmp.lt.u32.totalorder %s11419_s6, %s12718_s5 }
  0x7b   :  { %p11425_p2 = pnand %p11423_p1, %p11420_p0 }
  0x7d   :  { %11428 = shalt.err (!%p11425_p2)
}
  0x7e   :  { %s11429_s22 = scalar_lea.vmem %s76_s27, 192  ;;  %p11434_p4 = scmp.lt.s32.totalorder %s76_s27, %s76_s27 }
  0x7f   :  { %p11430_p3 = scmp.ne.s32.totalorder %s76_s27, %s11429_s22  ;;  %p11435_p5 = scmp.lt.s32.totalorder %s11429_s22, %s11429_s22 }
  0x81   :  { %p11436_p6 = por %p11435_p5, %p11434_p4 }
  0x83   :  { %p11437_p7 = pnand %p11436_p6, %p11430_p3 }
  0x85   :  { %11440 = shalt.err (!%p11437_p7)
}
  0x86   :  { %78 = dma.hbm_to_vmem [thread:$0]  %s12718_s5, 192, %s76_s27, [#allocation8]  }
  0x87   :  { %s11553_s25 = smov [#allocation12]   ;;  %s11441_s30 = scalar_lea.hbm %s12720_s7, 98304 }
  0x88   :  { %s94_s4 = sshll.u32 %s11553_s25, 4  ;;  %p11442_p8 = scmp.ne.s32.totalorder %s12720_s7, %s11441_s30  ;;  %s95_s4 = int_to_ptr.vmem [resolvable:$true] %s94_s4 }
  0x89   :  { %p11445_p9 = scmp.lt.u32.totalorder %s11441_s30, %s12720_s7 }
  0x8b   :  { %p11447_p10 = pnand %p11445_p9, %p11442_p8 }
  0x8d   :  { %11450 = shalt.err (!%p11447_p10)
}
  0x8e   :  { %s11451_s26 = scalar_lea.vmem %s95_s4, 98304  ;;  %p11456_p12 = scmp.lt.s32.totalorder %s95_s4, %s95_s4 }
  0x8f   :  { %p11452_p11 = scmp.ne.s32.totalorder %s95_s4, %s11451_s26  ;;  %p11457_p13 = scmp.lt.s32.totalorder %s11451_s26, %s11451_s26 }
  0x91   :  { %p11458_p0 = por %p11457_p13, %p11456_p12 }
  0x93   :  { %p11459_p1 = pnand %p11458_p0, %p11452_p11 }
  0x95   :  { %11462 = shalt.err (!%p11459_p1)
}
  0x96   :  { %s11554_s5 = smov 512   ;;  %s11555_s27 = smov 32  }
  0x97   :  { %100 = dma.hbm_to_vmem [thread:$0]  %s12720_s7, 98304, %s95_s4, [#allocation11], %s11554_s5, %s11554_s5, %s11555_s27  }
  0x98   :  { %s11556_s15 = smov [#allocation15]   ;;  %s11463_s16 = scalar_lea.hbm %s12722_s9, 32768 }
  0x99   :  { %s116_s17 = sshll.u32 %s11556_s15, 4  ;;  %p11464_p2 = scmp.ne.s32.totalorder %s12722_s9, %s11463_s16  ;;  %s117_s17 = int_to_ptr.vmem [resolvable:$true] %s116_s17 }
  0x9a   :  { %p11467_p3 = scmp.lt.u32.totalorder %s11463_s16, %s12722_s9 }
  0x9c   :  { %p11469_p4 = pnand %p11467_p3, %p11464_p2 }
  0x9e   :  { %11472 = shalt.err (!%p11469_p4)
}
  0x9f   :  { %s11473_s3 = scalar_lea.vmem %s117_s17, 32768  ;;  %p11478_p6 = scmp.lt.s32.totalorder %s117_s17, %s117_s17 }
  0xa0   :  { %p11474_p5 = scmp.ne.s32.totalorder %s117_s17, %s11473_s3  ;;  %p11479_p7 = scmp.lt.s32.totalorder %s11473_s3, %s11473_s3 }
  0xa2   :  { %p11480_p8 = por %p11479_p7, %p11478_p6 }
  0xa4   :  { %p11481_p9 = pnand %p11480_p8, %p11474_p5 }
  0xa6   :  { %11484 = shalt.err (!%p11481_p9)
}
  0xa7   :  { %s11557_s7 = smov 256   ;;  %s11558_s24 = smov 16  }
  0xa8   :  { %122 = dma.hbm_to_vmem [thread:$0]  %s12722_s9, 32768, %s117_s17, [#allocation14], %s11557_s7, %s11557_s7, %s11558_s24  }
  0xa9   :  { %s11559_s28 = smov [#allocation18]   ;;  %s11485_s18 = scalar_lea.hbm %s12724_s11, 4096 }
  0xaa   :  { %s138_s29 = sshll.u32 %s11559_s28, 4  ;;  %p11486_p10 = scmp.ne.s32.totalorder %s12724_s11, %s11485_s18  ;;  %s139_s29 = int_to_ptr.vmem [resolvable:$true] %s138_s29 }
  0xab   :  { %p11489_p11 = scmp.lt.u32.totalorder %s11485_s18, %s12724_s11 }
  0xad   :  { %p11491_p12 = pnand %p11489_p11, %p11486_p10 }
  0xaf   :  { %11494 = shalt.err (!%p11491_p12)
}
  0xb0   :  { %s11495_s27 = scalar_lea.vmem %s139_s29, 4096  ;;  %p11500_p0 = scmp.lt.s32.totalorder %s139_s29, %s139_s29 }
  0xb1   :  { %p11496_p13 = scmp.ne.s32.totalorder %s139_s29, %s11495_s27  ;;  %p11501_p1 = scmp.lt.s32.totalorder %s11495_s27, %s11495_s27 }
  0xb3   :  { %p11502_p2 = por %p11501_p1, %p11500_p0 }
  0xb5   :  { %p11503_p3 = pnand %p11502_p2, %p11496_p13 }
  0xb7   :  { %11506 = shalt.err (!%p11503_p3)
}
  0xb8   :  { %s11560_s9 = smov 64   ;;  %s11561_s1 = smov 4  }
  0xb9   :  { %144 = dma.hbm_to_vmem [thread:$0]  %s12724_s11, 4096, %s139_s29, [#allocation17], %s11560_s9, %s11560_s9, %s11561_s1  }
  0xba   :  { %s11562_s17 = smov [#allocation19]   ;;  %s11507_s20 = scalar_lea.hbm %s12725_s12, 16 }
  0xbb   :  { %s151_s19 = sshll.u32 %s11562_s17, 4  ;;  %p11508_p4 = scmp.ne.s32.totalorder %s12725_s12, %s11507_s20  ;;  %s152_s19 = int_to_ptr.vmem [resolvable:$true] %s151_s19 }
  0xbc   :  { %p11511_p5 = scmp.lt.u32.totalorder %s11507_s20, %s12725_s12 }
  0xbe   :  { %p11513_p6 = pnand %p11511_p5, %p11508_p4 }
  0xc0   :  { %11516 = shalt.err (!%p11513_p6)
}
  0xc1   :  { %s11517_s7 = scalar_lea.vmem %s152_s19, 16  ;;  %s11521_s11 = scalar_lea.vmem %s152_s19, 32 }
  0xc2   :  { %p11518_p7 = scmp.ne.s32.totalorder %s152_s19, %s11517_s7  ;;  %p11522_p8 = scmp.lt.s32.totalorder %s152_s19, %s152_s19 }
  0xc3   :  { %p11523_p9 = scmp.lt.s32.totalorder %s11521_s11, %s11517_s7 }
  0xc5   :  { %p11524_p10 = por %p11523_p9, %p11522_p8 }
  0xc7   :  { %p11525_p11 = pnand %p11524_p10, %p11518_p7 }
  0xc9   :  { %11528 = shalt.err (!%p11525_p11)
}
  0xca   :  { %154 = dma.hbm_to_vmem [thread:$0]  %s12725_s12, 16, %s152_s19, [#allocation20]  }
  0xcb   :  { %11529 = dma.done.wait [#allocation3], 4608  }
  0xcc   :  { %11530 = vsyncadd [#allocation3], 4294962688 }
  0xcd   :  { %11531 = dma.done.wait [#allocation5], 384  }
  0xce   :  { %11532 = vsyncadd [#allocation5], 4294966912 }
  0xcf   :  { %11533 = dma.done.wait [#allocation8], 384  }
  0xd0   :  { %11534 = vsyncadd [#allocation8], 4294966912 }
  0xd1   :  { %11535 = dma.done.wait [#allocation11], 98496  }
  0xd2   :  { %11536 = vsyncadd [#allocation11], 4294868800 }
  0xd3   :  { %11537 = dma.done.wait [#allocation14], 32896  }
  0xd4   :  { %11538 = vsyncadd [#allocation14], 4294934400 }
  0xd5   :  { %11539 = dma.done.wait [#allocation17], 4160  }
  0xd6   :  { %11540 = vsyncadd [#allocation17], 4294963136 }
  0xd7   :  { %11541 = dma.done.wait [#allocation20], 16  }
  0xd8   :  { %11542 = vsyncadd [#allocation20], 4294967280  ;;  %v11563_v0 = vmov 0   ;;  %v10737_v1 = vld [vmem:[#allocation2 + $0x4] ss:$48 sps:$4 sm:$0xff]   ;;  %vm479_vm0 = vcmask 392192   ;;  %v234_v38 = vlaneseq }
  0xd9   :  { %515 = vmatprep.mubr.bf16.mxu0 %v11563_v0  ;;  %558 = vmatprep.mubr.bf16.mxu1 %v11563_v0  ;;  %v10739_v2 = vld [vmem:[#allocation2] ss:$48 sps:$4 sm:$0xff]   ;;  %v10740_v3 = vld [vmem:[#allocation2 + $0xc] ss:$48 sps:$4 sm:$0xff]   ;;  %v10742_v4 = vld [vmem:[#allocation2 + $0x8] ss:$48 sps:$4 sm:$0xff]  }
  0xda   :  { %483 = vmatprep.subr.bf16.mxu0 %v10737_v1  ;;  %v10743_v5 = vld [vmem:[#allocation2 + $0x64] ss:$48 sps:$4 sm:$0xff]   ;;  %v10745_v6 = vld [vmem:[#allocation2 + $0x60] ss:$48 sps:$4 sm:$0xff]   ;;  %526 = vmatprep.subr.bf16.mxu1 %v10740_v3  ;;  %v10746_v7 = vld [vmem:[#allocation2 + $0x6c] ss:$48 sps:$4 sm:$0xff]  }
  0xdb   :  { %484 = vmatpush1.bf16.msra.mxu0 %v10739_v2  ;;  %527 = vmatpush1.bf16.msra.mxu1 %v10742_v4  ;;  %v10748_v8 = vld [vmem:[#allocation2 + $0x68] ss:$48 sps:$4 sm:$0xff]   ;;  %v10749_v9 = vld [vmem:[#allocation2 + $0xc4] ss:$48 sps:$4 sm:$0xff]   ;;  %v10751_v10 = vld [vmem:[#allocation2 + $0xc0] ss:$48 sps:$4 sm:$0xff]  }
  0xdc   :  { %485 = vmatprep.subr.bf16.mxu0 %v10743_v5  ;;  %528 = vmatprep.subr.bf16.mxu1 %v10746_v7  ;;  %v10752_v11 = vld [vmem:[#allocation2 + $0xcc] ss:$48 sps:$4 sm:$0xff]   ;;  %v10754_v12 = vld [vmem:[#allocation2 + $0xc8] ss:$48 sps:$4 sm:$0xff]   ;;  %v10755_v13 = vld [vmem:[%s12713_s0] sm:$0xff]   ;;  %v235_v39 = vshrl.u32 %v234_v38, 7 }
  0xdd   :  { %v10758_v14 = vld [vmem:[#allocation2 + $0x14] ss:$48 sps:$4 sm:$0xff]   ;;  %v10756_v15 = vld [vmem:[#allocation2 + $0x10] ss:$48 sps:$4 sm:$0xff]   ;;  %v10761_v16 = vld [vmem:[#allocation2 + $0x1c] ss:$48 sps:$4 sm:$0xff]  }
  0xde   :  { %v10764_v17 = vld [vmem:[#allocation2 + $0x74] ss:$48 sps:$4 sm:$0xff]   ;;  %v10759_v18 = vld [vmem:[#allocation2 + $0x18] ss:$48 sps:$4 sm:$0xff]   ;;  %v10767_v19 = vld [vmem:[#allocation2 + $0x7c] ss:$48 sps:$4 sm:$0xff]  }
  0xdf   :  { %486 = vmatpush1.bf16.msra.mxu0 %v10745_v6  ;;  %529 = vmatpush1.bf16.msra.mxu1 %v10748_v8  ;;  %v10762_v20 = vld [vmem:[#allocation2 + $0x70] ss:$48 sps:$4 sm:$0xff]   ;;  %v10770_v21 = vld [vmem:[#allocation2 + $0xd4] ss:$48 sps:$4 sm:$0xff]   ;;  %v10765_v22 = vld [vmem:[#allocation2 + $0x78] ss:$48 sps:$4 sm:$0xff]  }
  0xe0   :  { %487 = vmatprep.subr.bf16.mxu0 %v10749_v9  ;;  %530 = vmatprep.subr.bf16.mxu1 %v10752_v11  ;;  %v10773_v23 = vld [vmem:[#allocation2 + $0xdc] ss:$48 sps:$4 sm:$0xff]   ;;  %v10768_v24 = vld [vmem:[#allocation2 + $0xd0] ss:$48 sps:$4 sm:$0xff]   ;;  %v10776_v25 = vld [vmem:[#allocation2 + $0x24] ss:$48 sps:$4 sm:$0xff]  }
  0xe1   :  { %v10771_v26 = vld [vmem:[#allocation2 + $0xd8] ss:$48 sps:$4 sm:$0xff]   ;;  %v10779_v27 = vld [vmem:[#allocation2 + $0x2c] ss:$48 sps:$4 sm:$0xff]   ;;  %v10774_v28 = vld [vmem:[#allocation2 + $0x20] ss:$48 sps:$4 sm:$0xff]  }
  0xe2   :  { %v10777_v29 = vld [vmem:[#allocation2 + $0x28] ss:$48 sps:$4 sm:$0xff]   ;;  %v10782_v30 = vld [vmem:[#allocation2 + $0x84] ss:$48 sps:$4 sm:$0xff]   ;;  %v10780_v31 = vld [vmem:[#allocation2 + $0x80] ss:$48 sps:$4 sm:$0xff]  }
  0xe3   :  { %488 = vmatpush1.bf16.msra.mxu0 %v10751_v10  ;;  %531 = vmatpush1.bf16.msra.mxu1 %v10754_v12  ;;  %v10785_v32 = vld [vmem:[#allocation2 + $0x8c] ss:$48 sps:$4 sm:$0xff]   ;;  %v10788_v33 = vld [vmem:[#allocation2 + $0xe4] ss:$48 sps:$4 sm:$0xff]   ;;  %v10783_v34 = vld [vmem:[#allocation2 + $0x88] ss:$48 sps:$4 sm:$0xff]  }
  0xe4   :  { %569 = vmatprep.subr.bf16.mxu0 %v10758_v14  ;;  %612 = vmatprep.subr.bf16.mxu1 %v10761_v16  ;;  %v10791_v35 = vld [vmem:[#allocation2 + $0xec] ss:$48 sps:$4 sm:$0xff]   ;;  %v10786_v36 = vld [vmem:[#allocation2 + $0xe0] ss:$48 sps:$4 sm:$0xff]   ;;  %v10789_v37 = vld [vmem:[#allocation2 + $0xe8] ss:$48 sps:$4 sm:$0xff]  }
  0xe5   :  { %v11800_v40 = vsub.s32 0, %v235_v39  ;;  %v230_v41 = vld [vmem:[#allocation4] sm:$0xff]  ;;  %v11802_v42 = vsub.s32 1, %v235_v39  ;;  %v11805_v44 = vsub.s32 2, %v235_v39  ;;  %v11811_v50 = vsub.s32 3, %v235_v39 }
  0xe6   :  { %9481 = vmatmul.mubr.msk.bf16.vlgmr.msra.gmra.mrb[0].mxu0 %vm479_vm0, %v10755_v13  ;;  %9482 = vmatmul.mubr.msk.bf16.vlgmr.msra.gmra.mrb[0].mxu1 %vm479_vm0, %v10755_v13  ;;  %v11824_v63 = vsub.s32 4, %v235_v39  ;;  %v11836_v6 = vsub.s32 6, %v235_v39  ;;  %v11840_v10 = vsub.s32 7, %v235_v39 }
  0xe7   :  { %570 = vmatpush1.bf16.msra.mxu0 %v10756_v15  ;;  %601 = vmatprep.mubr.bf16.mxu0 %v11563_v0  ;;  %12745 = vst [vmem:[#allocation28_spill] sm:$0xff] %v11800_v40  ;;  %12746 = vst [vmem:[#allocation29_spill] sm:$0xff] %v11802_v42  ;;  %v237_v43 = vrot.slane %v230_v41, %v11800_v40  ;;  %v241_v45 = vrot.slane %v230_v41, %v11802_v42 }
  0xe8   :  { %571 = vmatprep.subr.bf16.mxu0 %v10764_v17  ;;  %613 = vmatpush1.bf16.msra.mxu1 %v10759_v18  ;;  %v245_v49 = vrot.slane %v230_v41, %v11805_v44  ;;  %12747 = vst [vmem:[#allocation30_spill] sm:$0xff] %v11811_v50  ;;  %v249_v61 = vrot.slane %v230_v41, %v11811_v50  ;;  %12748 = vst [vmem:[#allocation31_spill] sm:$0xff] %v11824_v63 }
  0xe9   :  { %644 = vmatprep.mubr.bf16.mxu1 %v11563_v0  ;;  %614 = vmatprep.subr.bf16.mxu1 %v10767_v19  ;;  %v253_v5 = vrot.slane %v230_v41, %v11824_v63  ;;  %12750 = vst [vmem:[#allocation33_spill] sm:$0xff] %v11836_v6  ;;  %12751 = vst [vmem:[#allocation34_spill] sm:$0xff] %v11840_v10  ;;  %v261_v15 = vrot.slane %v230_v41, %v11836_v6 }
  0xeb   :  { %572 = vmatpush1.bf16.msra.mxu0 %v10762_v20 }
  0xec   :  { %573 = vmatprep.subr.bf16.mxu0 %v10770_v21  ;;  %615 = vmatpush1.bf16.msra.mxu1 %v10765_v22 }
  0xed   :  { %616 = vmatprep.subr.bf16.mxu1 %v10773_v23 }
  0xef   :  { %574 = vmatpush1.bf16.msra.mxu0 %v10768_v24 }
  0xf0   :  { %655 = vmatprep.subr.bf16.mxu0 %v10776_v25  ;;  %617 = vmatpush1.bf16.msra.mxu1 %v10771_v26 }
  0xf1   :  { %698 = vmatprep.subr.bf16.mxu1 %v10779_v27 }
  0xf2   :  { %9483 = vmatmul.mubr.msk.bf16.vlgmr.msra.gmra.mrb[4].mxu0 %vm479_vm0, %v10755_v13 }
  0xf3   :  { %656 = vmatpush1.bf16.msra.mxu0 %v10774_v28  ;;  %687 = vmatprep.mubr.bf16.mxu0 %v11563_v0 }
  0xf4   :  { %9484 = vmatmul.mubr.msk.bf16.vlgmr.msra.gmra.mrb[4].mxu1 %vm479_vm0, %v10755_v13  ;;  %657 = vmatprep.subr.bf16.mxu0 %v10782_v30 }
  0xf5   :  { %699 = vmatpush1.bf16.msra.mxu1 %v10777_v29  ;;  %730 = vmatprep.mubr.bf16.mxu1 %v11563_v0  ;;  %v11826_v0 = vsub.s32 5, %v235_v39  ;;  %v265_v29 = vrot.slane %v230_v41, %v11840_v10 }
  0xf6   :  { %700 = vmatprep.subr.bf16.mxu1 %v10785_v32 }
  0xf7   :  { %658 = vmatpush1.bf16.msra.mxu0 %v10780_v31  ;;  %12749 = vst [vmem:[#allocation32_spill] sm:$0xff] %v11826_v0  ;;  %v257_v7 = vrot.slane %v230_v41, %v11826_v0  ;;  %v231_v31 = vld [vmem:[#allocation4 + $0x8] sm:$0xf] }
  0xf8   :  { %659 = vmatprep.subr.bf16.mxu0 %v10788_v33  ;;  %v277_v39 = vrot.slane %v231_v31, %v11805_v44 }
  0xf9   :  { %701 = vmatpush1.bf16.msra.mxu1 %v10783_v34 }
  0xfa   :  { %702 = vmatprep.subr.bf16.mxu1 %v10791_v35 }
  0xfb   :  { %660 = vmatpush1.bf16.msra.mxu0 %v10786_v36  ;;  %v269_v36 = vrot.slane %v231_v31, %v11800_v40 }
  0xfd   :  { %703 = vmatpush1.bf16.msra.mxu1 %v10789_v37  ;;  %v273_v37 = vrot.slane %v231_v31, %v11802_v42 }
  0xfe   :  { %9485 = vmatmul.mubr.msk.bf16.vlgmr.msra.gmra.mrb[8].mxu0 %vm479_vm0, %v10755_v13 }
 0x100   :  { %9486 = vmatmul.mubr.msk.bf16.vlgmr.msra.gmra.mrb[8].mxu1 %vm479_vm0, %v10755_v13 }
 0x1b9   :  { %v517_v46 = vpop.f32.mrb[0].mxu0  ;;  %v560_v53 = vpop.f32.mrb[0].mxu1 }
 0x1ba   :  { %v11808_v47 = vadd.f32 %v517_v46, %v237_v43  ;;  %v519_v48 = vpop.f32.mrb[1].mxu0  ;;  %v562_v56 = vpop.f32.mrb[1].mxu1  ;;  %v11821_v60 = vadd.f32 %v560_v53, %v245_v49 }
 0x1bb   :  { %v11813_v51 = vadd.f32 %v519_v48, %v241_v45  ;;  %v521_v52 = vpop.f32.mrb[2].mxu0  ;;  %v564_v58 = vpop.f32.mrb[2].mxu1  ;;  %v11833_v4 = vadd.f32 %v562_v56, %v249_v61 }
 0x1bc   :  { %v11815_v54 = vadd.f32 %v521_v52, %v237_v43  ;;  %v523_v55 = vpop.f32.mrb[3].mxu0  ;;  %v566_v62 = vpop.f32.mrb[3].mxu1  ;;  %v11830_v2 = vadd.f32 %v564_v58, %v245_v49 }
 0x1bd   :  { %v11817_v57 = vadd.f32 %v523_v55, %v241_v45  ;;  %v745_v59 = vadd.f32 %v11813_v51, %v11808_v47  ;;  %v11843_v12 = vadd.f32 %v566_v62, %v249_v61  ;;  %v281_v55 = vrot.slane %v231_v31, %v11811_v50 }
 0x1bf   :  { %v758_v1 = vadd.f32 %v11817_v57, %v11815_v54  ;;  %v746_v3 = vadd.f32 %v745_v59, %v11821_v60 }
 0x1c1   :  { %v759_v8 = vadd.f32 %v758_v1, %v11830_v2  ;;  %v747_v11 = vadd.f32 %v746_v3, %v11833_v4 }
 0x1c3   :  { %v760_v19 = vadd.f32 %v759_v8, %v11843_v12 }
 0x1c5   :  { %v603_v9 = vpop.f32.mrb[4].mxu0 }
 0x1c6   :  { %v11845_v13 = vadd.f32 %v603_v9, %v253_v5  ;;  %v605_v14 = vpop.f32.mrb[5].mxu0 }
 0x1c7   :  { %v11848_v16 = vadd.f32 %v605_v14, %v257_v7  ;;  %v607_v17 = vpop.f32.mrb[6].mxu0  ;;  %v646_v18 = vpop.f32.mrb[4].mxu1 }
 0x1c8   :  { %v748_v20 = vadd.f32 %v747_v11, %v11845_v13  ;;  %v11852_v21 = vadd.f32 %v607_v17, %v253_v5  ;;  %v609_v22 = vpop.f32.mrb[7].mxu0  ;;  %v648_v23 = vpop.f32.mrb[5].mxu1  ;;  %v647_v28 = vadd.f32 %v646_v18, %v261_v15 }
 0x1c9   :  { %v11854_v24 = vadd.f32 %v609_v22, %v257_v7  ;;  %v650_v25 = vpop.f32.mrb[6].mxu1  ;;  %v649_v35 = vadd.f32 %v648_v23, %v265_v29 }
 0x1ca   :  { %v749_v26 = vadd.f32 %v748_v20, %v11848_v16  ;;  %v761_v27 = vadd.f32 %v760_v19, %v11852_v21  ;;  %v652_v30 = vpop.f32.mrb[7].mxu1  ;;  %v11860_v33 = vadd.f32 %v650_v25, %v261_v15 }
 0x1cb   :  { %v11866_v46 = vadd.f32 %v652_v30, %v265_v29 }
 0x1cc   :  { %v762_v32 = vadd.f32 %v761_v27, %v11854_v24  ;;  %v750_v34 = vadd.f32 %v749_v26, %v647_v28 }
 0x1ce   :  { %v763_v38 = vadd.f32 %v762_v32, %v11860_v33  ;;  %v751_v45 = vadd.f32 %v750_v34, %v649_v35 }
 0x1d0   :  { %v764_v56 = vadd.f32 %v763_v38, %v11866_v46 }
 0x1d1   :  { %v689_v43 = vpop.f32.mrb[8].mxu0 }
 0x1d2   :  { %v690_v41 = vadd.f32 %v689_v43, %v269_v36  ;;  %v691_v48 = vpop.f32.mrb[9].mxu0 }
 0x1d3   :  { %v692_v49 = vadd.f32 %v691_v48, %v273_v37  ;;  %v732_v52 = vpop.f32.mrb[8].mxu1  ;;  %v693_v53 = vpop.f32.mrb[10].mxu0 }
 0x1d4   :  { %v752_v58 = vadd.f32 %v751_v45, %v690_v41  ;;  %v733_v59 = vadd.f32 %v732_v52, %v277_v39  ;;  %v11870_v61 = vadd.f32 %v693_v53, %v269_v36  ;;  %v734_v62 = vpop.f32.mrb[9].mxu1  ;;  %v695_v1 = vpop.f32.mrb[11].mxu0 }
 0x1d5   :  { %v11872_v3 = vadd.f32 %v695_v1, %v273_v37  ;;  %v736_v5 = vpop.f32.mrb[10].mxu1  ;;  %v735_v11 = vadd.f32 %v734_v62, %v281_v55 }
 0x1d6   :  { %v753_v7 = vadd.f32 %v752_v58, %v692_v49  ;;  %v765_v8 = vadd.f32 %v764_v56, %v11870_v61  ;;  %v738_v9 = vpop.f32.mrb[11].mxu1  ;;  %v11876_v15 = vadd.f32 %v736_v5, %v277_v39 }
 0x1d7   :  { %v11879_v20 = vadd.f32 %v738_v9, %v281_v55 }
 0x1d8   :  { %v766_v14 = vadd.f32 %v765_v8, %v11872_v3  ;;  %v754_v17 = vadd.f32 %v753_v7, %v733_v59 }
 0x1da   :  { %v767_v18 = vadd.f32 %v766_v14, %v11876_v15  ;;  %v755_v19 = vadd.f32 %v754_v17, %v735_v11 }
 0x1dc   :  { %756 = vadd.xlane.f32.xlu0 %v755_v19  ;;  %v768_v22 = vadd.f32 %v767_v18, %v11879_v20 }
 0x1e0   :  { %769 = vadd.xlane.f32.xlu0 %v768_v22 }
 0x269   :  { %v757_v23 = vpop.xlane.xlu0 %756 }
 0x26a   :  { %v772_v25 = vmul.f32 0.0006510417, %v757_v23 }
 0x26c   :  { %v11883_v26 = vsub.f32 %v11808_v47, %v772_v25  ;;  %v11886_v27 = vsub.f32 %v11813_v51, %v772_v25  ;;  %v11889_v31 = vsub.f32 %v11821_v60, %v772_v25  ;;  %v11896_v36 = vsub.f32 %v11833_v4, %v772_v25 }
 0x26d   :  { %v770_v29 = vpop.xlane.xlu0 %769  ;;  %v11899_v47 = vsub.f32 %v11845_v13, %v772_v25  ;;  %v11910_v39 = vsub.f32 %v11848_v16, %v772_v25  ;;  %v11919_v48 = vsub.f32 %v647_v28, %v772_v25  ;;  %v11928_v53 = vsub.f32 %v649_v35, %v772_v25 }
 0x26e   :  { %v773_v30 = vmul.f32 0.0006510417, %v770_v29  ;;  %v798_v32 = vmul.f32 %v11883_v26, %v11883_v26  ;;  %v799_v34 = vmul.f32 %v11886_v27, %v11886_v27  ;;  %v800_v51 = vmul.f32 %v11889_v31, %v11889_v31 }
 0x26f   :  { %v801_v4 = vmul.f32 %v11896_v36, %v11896_v36  ;;  %v11937_v62 = vsub.f32 %v690_v41, %v772_v25  ;;  %v804_v1 = vmul.f32 %v11919_v48, %v11919_v48  ;;  %v11946_v8 = vsub.f32 %v692_v49, %v772_v25 }
 0x270   :  { %v822_v37 = vadd.f32 %v799_v34, %v798_v32  ;;  %v11904_v38 = vsub.f32 %v11815_v54, %v773_v30  ;;  %v11907_v60 = vsub.f32 %v11817_v57, %v773_v30  ;;  %v11915_v13 = vsub.f32 %v11830_v2, %v773_v30 }
 0x271   :  { %v802_v54 = vmul.f32 %v11899_v47, %v11899_v47  ;;  %v11926_v52 = vsub.f32 %v11843_v12, %v773_v30  ;;  %v803_v2 = vmul.f32 %v11910_v39, %v11910_v39  ;;  %v11933_v56 = vsub.f32 %v11852_v21, %v773_v30 }
 0x272   :  { %v823_v43 = vadd.f32 %v822_v37, %v800_v51  ;;  %v810_v45 = vmul.f32 %v11904_v38, %v11904_v38  ;;  %v811_v16 = vmul.f32 %v11907_v60, %v11907_v60  ;;  %v812_v28 = vmul.f32 %v11915_v13, %v11915_v13 }
 0x273   :  { %v11942_v35 = vsub.f32 %v11854_v24, %v773_v30  ;;  %v813_v5 = vmul.f32 %v11926_v52, %v11926_v52  ;;  %v805_v21 = vmul.f32 %v11928_v53, %v11928_v53  ;;  %v11951_v41 = vsub.f32 %v11860_v33, %v773_v30 }
 0x274   :  { %v824_v57 = vadd.f32 %v823_v43, %v801_v4  ;;  %v835_v58 = vadd.f32 %v811_v16, %v810_v45  ;;  %v814_v14 = vmul.f32 %v11933_v56, %v11933_v56  ;;  %v11955_v18 = vsub.f32 %v733_v59, %v772_v25 }
 0x275   :  { %v806_v24 = vmul.f32 %v11937_v62, %v11937_v62  ;;  %v11960_v49 = vsub.f32 %v11866_v46, %v773_v30  ;;  %v815_v22 = vmul.f32 %v11942_v35, %v11942_v35  ;;  %v11964_v29 = vsub.f32 %v735_v11, %v772_v25 }
 0x276   :  { %v825_v55 = vadd.f32 %v824_v57, %v802_v54  ;;  %v836_v7 = vadd.f32 %v835_v58, %v812_v28  ;;  %v807_v33 = vmul.f32 %v11946_v8, %v11946_v8  ;;  %v11969_v59 = vsub.f32 %v11870_v61, %v773_v30 }
 0x277   :  { %v816_v34 = vmul.f32 %v11951_v41, %v11951_v41  ;;  %v808_v46 = vmul.f32 %v11955_v18, %v11955_v18  ;;  %v11976_v4 = vsub.f32 %v11872_v3, %v773_v30  ;;  %v817_v11 = vmul.f32 %v11960_v49, %v11960_v49 }
 0x278   :  { %v826_v12 = vadd.f32 %v825_v55, %v803_v2  ;;  %v837_v17 = vadd.f32 %v836_v7, %v813_v5  ;;  %v809_v43 = vmul.f32 %v11964_v29, %v11964_v29  ;;  %v11983_v45 = vsub.f32 %v11876_v15, %v773_v30 }
 0x279   :  { %v818_v54 = vmul.f32 %v11969_v59, %v11969_v59  ;;  %v11988_v2 = vsub.f32 %v11879_v20, %v773_v30  ;;  %v819_v3 = vmul.f32 %v11976_v4, %v11976_v4 }
 0x27a   :  { %v827_v9 = vadd.f32 %v826_v12, %v804_v1  ;;  %v838_v23 = vadd.f32 %v837_v17, %v814_v14  ;;  %v820_v28 = vmul.f32 %v11983_v45, %v11983_v45  ;;  %v741_v14 = vld [vmem:[#allocation6] sm:$0xff] }
 0x27b   :  { %v821_v15 = vmul.f32 %v11988_v2, %v11988_v2 }
 0x27c   :  { %v828_v19 = vadd.f32 %v827_v9, %v805_v21  ;;  %v839_v51 = vadd.f32 %v838_v23, %v815_v22  ;;  %v887_v22 = vrot.slane %v741_v14, %v11802_v42 }
 0x27e   :  { %v829_v32 = vadd.f32 %v828_v19, %v806_v24  ;;  %v840_v25 = vadd.f32 %v839_v51, %v816_v34  ;;  %v743_v24 = vld [vmem:[#allocation7] sm:$0xff]  ;;  %v883_v19 = vrot.slane %v741_v14, %v11800_v40  ;;  %v891_v34 = vrot.slane %v741_v14, %v11805_v44 }
 0x27f   :  { %v969_v51 = vrot.slane %v743_v24, %v11800_v40 }
 0x280   :  { %v830_v37 = vadd.f32 %v829_v32, %v807_v33  ;;  %v841_v57 = vadd.f32 %v840_v25, %v817_v11  ;;  %v895_v25 = vrot.slane %v741_v14, %v11811_v50 }
 0x282   :  { %v831_v61 = vadd.f32 %v830_v37, %v808_v46  ;;  %v842_v55 = vadd.f32 %v841_v57, %v818_v54  ;;  %v973_v46 = vrot.slane %v743_v24, %v11802_v42  ;;  %v742_v37 = vld [vmem:[#allocation6 + $0x8] sm:$0xf]  ;;  %v12019_v54 = vrot.slane %v741_v14, %v11836_v6 }
 0x284   :  { %v832_v16 = vadd.f32 %v831_v61, %v809_v43  ;;  %v843_v58 = vadd.f32 %v842_v55, %v819_v3  ;;  %v899_v61 = vrot.slane %v741_v14, %v11824_v63  ;;  %v12028_v55 = vrot.slane %v742_v37, %v11800_v40 }
 0x286   :  { %833 = vadd.xlane.f32.xlu1 %v832_v16  ;;  %v844_v1 = vadd.f32 %v843_v58, %v820_v28  ;;  %v977_v16 = vrot.slane %v743_v24, %v11805_v44 }
 0x288   :  { %v845_v12 = vadd.f32 %v844_v1, %v821_v15  ;;  %v12037_v15 = vrot.slane %v742_v37, %v11802_v42 }
 0x28a   :  { %846 = vadd.xlane.f32.xlu1 %v845_v12  ;;  %v981_v12 = vrot.slane %v743_v24, %v11811_v50 }
 0x313   :  { %v834_v5 = vpop.xlane.xlu1 %833 }
 0x314   :  { %v848_v7 = vmul.f32 0.0006510417, %v834_v5 }
 0x316   :  { %v850_v21 = vadd.f32 1e-06, %v848_v7  ;;  %v12043_v7 = vrot.slane %v742_v37, %v11805_v44 }
 0x317   :  { %v847_v20 = vpop.xlane.xlu1 %846 }
 0x318   :  { %11208 = vrsqrt.f32 %v850_v21  ;;  %v849_v30 = vmul.f32 0.0006510417, %v847_v20  ;;  %v985_v20 = vrot.slane %v743_v24, %v11824_v63 }
 0x31a   :  { %v851_v9 = vadd.f32 1e-06, %v849_v30 }
 0x31c   :  { %11210 = vrsqrt.f32 %v851_v9 }
 0x322   :  { %v11996_v17 = vpop.eup %11208 }
 0x323   :  { %v854_v23 = vmul.f32 %v11996_v17, %v11883_v26  ;;  %v855_v33 = vmul.f32 %v11996_v17, %v11886_v27  ;;  %v856_v32 = vmul.f32 %v11996_v17, %v11889_v31  ;;  %v857_v11 = vmul.f32 %v11996_v17, %v11896_v36 }
 0x324   :  { %v858_v27 = vmul.f32 %v11996_v17, %v11899_v47  ;;  %v12016_v31 = vrot.slane %v741_v14, %v11826_v0  ;;  %v12025_v36 = vrot.slane %v741_v14, %v11840_v10  ;;  %v859_v58 = vmul.f32 %v11996_v17, %v11910_v39 }
 0x325   :  { %v940_v43 = vmul.f32 %v883_v19, %v854_v23  ;;  %v941_v26 = vmul.f32 %v887_v22, %v855_v33  ;;  %v942_v57 = vmul.f32 %v891_v34, %v856_v32  ;;  %v943_v1 = vmul.f32 %v895_v25, %v857_v11  ;;  %v744_v11 = vld [vmem:[#allocation7 + $0x8] sm:$0xf] }
 0x326   :  { %v12022_v3 = vpop.eup %11210  ;;  %v860_v5 = vmul.f32 %v11996_v17, %v11919_v48  ;;  %v944_v21 = vmul.f32 %v899_v61, %v858_v27  ;;  %v861_v48 = vmul.f32 %v11996_v17, %v11928_v53  ;;  %v12057_v23 = vrot.slane %v742_v37, %v11811_v50 }
 0x327   :  { %v12030_v47 = vadd.f32 %v969_v51, %v940_v43  ;;  %v12032_v28 = vadd.f32 %v973_v46, %v941_v26  ;;  %v12046_v30 = vadd.f32 %v977_v16, %v942_v57  ;;  %v866_v9 = vmul.f32 %v12022_v3, %v11904_v38 }
 0x328   :  { %v867_v14 = vmul.f32 %v12022_v3, %v11907_v60  ;;  %v989_v33 = vrot.slane %v743_v24, %v11826_v0  ;;  %v12061_v32 = vrot.slane %v743_v24, %v11836_v6  ;;  %v945_v43 = vmul.f32 %v12016_v31, %v859_v58 }
 0x329   :  { %v1054_v39 = vadd.f32 %v12032_v28, %v12030_v47  ;;  %v12064_v26 = vadd.f32 %v981_v12, %v943_v1  ;;  %v868_v60 = vmul.f32 %v12022_v3, %v11915_v13  ;;  %v862_v53 = vmul.f32 %v11996_v17, %v11937_v62 }
 0x32a   :  { %v997_v37 = vrot.slane %v743_v24, %v11840_v10  ;;  %v952_v27 = vmul.f32 %v883_v19, %v866_v9  ;;  %v953_v57 = vmul.f32 %v887_v22, %v867_v14  ;;  %v946_v6 = vmul.f32 %v12019_v54, %v860_v5 }
 0x32b   :  { %v1055_v38 = vadd.f32 %v1054_v39, %v12046_v30  ;;  %v12073_v63 = vadd.f32 %v985_v20, %v944_v21  ;;  %v869_v1 = vmul.f32 %v12022_v3, %v11926_v52  ;;  %v863_v39 = vmul.f32 %v11996_v17, %v11946_v8 }
 0x32c   :  { %v947_v13 = vmul.f32 %v12025_v36, %v861_v48  ;;  %v1001_v62 = vrot.slane %v744_v11, %v11800_v40  ;;  %v1005_v24 = vrot.slane %v744_v11, %v11802_v42  ;;  %v12083_v19 = vadd.f32 %v989_v33, %v945_v43 }
 0x32d   :  { %v1056_v58 = vadd.f32 %v1055_v38, %v12064_v26  ;;  %v870_v5 = vmul.f32 %v12022_v3, %v11933_v56  ;;  %v954_v21 = vmul.f32 %v891_v34, %v868_v60  ;;  %v864_v52 = vmul.f32 %v11996_v17, %v11955_v18 }
 0x32e   :  { %v948_v9 = vmul.f32 %v12028_v55, %v862_v53  ;;  %v12091_v8 = vadd.f32 %v969_v51, %v952_v27  ;;  %v12093_v14 = vadd.f32 %v973_v46, %v953_v57  ;;  %v12096_v48 = vadd.f32 %v12061_v32, %v946_v6 }
 0x32f   :  { %v1057_v22 = vadd.f32 %v1056_v58, %v12073_v63  ;;  %v871_v38 = vmul.f32 %v12022_v3, %v11942_v35  ;;  %v955_v58 = vmul.f32 %v895_v25, %v869_v1  ;;  %v865_v56 = vmul.f32 %v11996_v17, %v11964_v29 }
 0x330   :  { %v949_v18 = vmul.f32 %v12037_v15, %v863_v39  ;;  %v12104_v34 = vadd.f32 %v997_v37, %v947_v13  ;;  %v872_v51 = vmul.f32 %v12022_v3, %v11951_v41  ;;  %v956_v6 = vmul.f32 %v899_v61, %v870_v5 }
 0x331   :  { %v1058_v43 = vadd.f32 %v1057_v22, %v12083_v19  ;;  %v12109_v60 = vadd.f32 %v977_v16, %v954_v21  ;;  %v1067_v53 = vadd.f32 %v12093_v14, %v12091_v8  ;;  %v950_v35 = vmul.f32 %v12043_v7, %v864_v52 }
 0x332   :  { %v1009_v25 = vrot.slane %v744_v11, %v11805_v44  ;;  %v12115_v29 = vadd.f32 %v1001_v62, %v948_v9  ;;  %v873_v17 = vmul.f32 %v12022_v3, %v11960_v49  ;;  %v957_v41 = vmul.f32 %v12016_v31, %v871_v38 }
 0x333   :  { %v1059_v46 = vadd.f32 %v1058_v43, %v12096_v48  ;;  %v12121_v57 = vadd.f32 %v981_v12, %v955_v58  ;;  %v1068_v61 = vadd.f32 %v1067_v53, %v12109_v60  ;;  %v951_v16 = vmul.f32 %v12057_v23, %v865_v56 }
 0x334   :  { %v1013_v1 = vrot.slane %v744_v11, %v11811_v50  ;;  %v12126_v39 = vadd.f32 %v1005_v24, %v949_v18  ;;  %v874_v13 = vmul.f32 %v12022_v3, %v11969_v59  ;;  %v958_v49 = vmul.f32 %v12019_v54, %v872_v51 }
 0x335   :  { %v1060_v27 = vadd.f32 %v1059_v46, %v12104_v34  ;;  %v12132_v5 = vadd.f32 %v985_v20, %v956_v6  ;;  %v1069_v31 = vadd.f32 %v1068_v61, %v12121_v57  ;;  %v12135_v12 = vadd.f32 %v1009_v25, %v950_v35  ;;  %v1374_v35 = vld [vmem:[#allocation12 + $0x20] sm:$0xff] }
 0x336   :  { %v875_v21 = vmul.f32 %v12022_v3, %v11976_v4  ;;  %v959_v52 = vmul.f32 %v12025_v36, %v873_v17  ;;  %v12141_v9 = vadd.f32 %v989_v33, %v957_v41  ;;  %v12144_v43 = vadd.f32 %v1013_v1, %v951_v16  ;;  %v1371_v17 = vld [vmem:[#allocation12 + $0x8] sm:$0xff]  ;;  %v1378_v41 = vld [vmem:[#allocation12 + $0x40] sm:$0xff] }
 0x337   :  { %v1061_v22 = vadd.f32 %v1060_v27, %v12115_v29  ;;  %v1070_v59 = vadd.f32 %v1069_v31, %v12132_v5  ;;  %v876_v54 = vmul.f32 %v12022_v3, %v11983_v45  ;;  %v960_v38 = vmul.f32 %v12028_v55, %v874_v13  ;;  %v1382_v61 = vld [vmem:[#allocation12 + $0x60] sm:$0xff] }
 0x338   :  { %v12151_v58 = vadd.f32 %v12061_v32, %v958_v49  ;;  %v877_v36 = vmul.f32 %v12022_v3, %v11988_v2  ;;  %v961_v56 = vmul.f32 %v12037_v15, %v875_v21  ;;  %v12158_v18 = vadd.f32 %v997_v37, %v959_v52  ;;  %v1383_v49 = vld [vmem:[#allocation12 + $0x68] sm:$0xff]  ;;  %v1390_v21 = vld [vmem:[#allocation12 + $0xa0] sm:$0xff] }
 0x339   :  { %v1062_v11 = vadd.f32 %v1061_v22, %v12126_v39  ;;  %v1071_v4 = vadd.f32 %v1070_v59, %v12141_v9  ;;  %v962_v51 = vmul.f32 %v12043_v7, %v876_v54  ;;  %v12162_v55 = vadd.f32 %v1001_v62, %v960_v38  ;;  %v1370_v62 = vld [vmem:[#allocation12] sm:$0xff]  ;;  %v1379_v22 = vld [vmem:[#allocation12 + $0x48] sm:$0xff] }
 0x33a   :  { %v963_v46 = vmul.f32 %v12057_v23, %v877_v36  ;;  %v12166_v6 = vadd.f32 %v1005_v24, %v961_v56  ;;  %v9487_v27 = vcombine.low %v1370_v62, %v1374_v35  ;;  %v9488_v23 = vcombine.high %v1370_v62, %v1374_v35  ;;  %v1375_v24 = vld [vmem:[#allocation12 + $0x28] sm:$0xff]  ;;  %v1398_v36 = vld [vmem:[#allocation12 + $0xe0] sm:$0xff] }
 0x33b   :  { %v1063_v20 = vadd.f32 %v1062_v11, %v12135_v12  ;;  %v1072_v45 = vadd.f32 %v1071_v4, %v12151_v58  ;;  %v12169_v3 = vadd.f32 %v1009_v25, %v962_v51  ;;  %v9489_v16 = vcombine.low %v1371_v17, %v1375_v24  ;;  %v1387_v11 = vld [vmem:[#allocation12 + $0x88] sm:$0xff]  ;;  %v1394_v4 = vld [vmem:[#allocation12 + $0xc0] sm:$0xff] }
 0x33c   :  { %v12172_v37 = vadd.f32 %v1013_v1, %v963_v46  ;;  %v9490_v25 = vcombine.high %v1371_v17, %v1375_v24  ;;  %v9496_v13 = vcombine.high %v1378_v41, %v1382_v61  ;;  %v1386_v1 = vld [vmem:[#allocation12 + $0x80] sm:$0xff]  ;;  %6020 = vmatprep.subr.bf16.mxu0 %v9488_v23  ;;  %v9498_v31 = vcombine.high %v1379_v22, %v1383_v49  ;;  %v1391_v52 = vld [vmem:[#allocation12 + $0xa8] sm:$0xff] }
 0x33d   :  { %v1064_v33 = vadd.f32 %v1063_v20, %v12144_v43  ;;  %v1073_v32 = vadd.f32 %v1072_v45, %v12158_v18  ;;  %6021 = vmatpush1.bf16.msra.mxu0 %v9487_v27  ;;  %v9495_v59 = vcombine.low %v1378_v41, %v1382_v61  ;;  %v9497_v54 = vcombine.low %v1379_v22, %v1383_v49  ;;  %v1399_v56 = vld [vmem:[#allocation12 + $0xe8] sm:$0xff]  ;;  %v1410_v23 = vld [vmem:[#allocation12 + $0x140] sm:$0xff] }
 0x33e   :  { %6278 = vmatprep.subr.bf16.mxu1 %v9490_v25  ;;  %6022 = vmatprep.subr.bf16.mxu0 %v9496_v13  ;;  %v9504_v20 = vcombine.high %v1386_v1, %v1390_v21  ;;  %v9506_v38 = vcombine.high %v1387_v11, %v1391_v52  ;;  %v9503_v45 = vcombine.low %v1386_v1, %v1390_v21  ;;  %v1414_v24 = vld [vmem:[#allocation12 + $0x160] sm:$0xff]  ;;  %v1411_v41 = vld [vmem:[#allocation12 + $0x148] sm:$0xff] }
 0x33f   :  { %1065 = vadd.xlane.f32.xlu0 %v1064_v33  ;;  %v1074_v2 = vadd.f32 %v1073_v32, %v12162_v55  ;;  %6279 = vmatpush1.bf16.msra.mxu1 %v9489_v16  ;;  %v1395_v33 = vld [vmem:[#allocation12 + $0xc8] sm:$0xff]  ;;  %v9505_v51 = vcombine.low %v1387_v11, %v1391_v52  ;;  %v9512_v32 = vcombine.high %v1394_v4, %v1398_v36  ;;  %v1418_v49 = vld [vmem:[#allocation12 + $0x180] sm:$0xff] }
 0x340   :  { %6280 = vmatprep.subr.bf16.mxu1 %v9498_v31  ;;  %v9514_v46 = vcombine.high %v1395_v33, %v1399_v56  ;;  %v9511_v62 = vcombine.low %v1394_v4, %v1398_v36  ;;  %v9513_v35 = vcombine.low %v1395_v33, %v1399_v56  ;;  %v1415_v61 = vld [vmem:[#allocation12 + $0x168] sm:$0xff]  ;;  %v9528_v13 = vcombine.high %v1410_v23, %v1414_v24  ;;  %v1422_v1 = vld [vmem:[#allocation12 + $0x1a0] sm:$0xff] }
 0x341   :  { %v1075_v15 = vadd.f32 %v1074_v2, %v12166_v6  ;;  %6023 = vmatpush1.bf16.msra.mxu0 %v9495_v59  ;;  %v1402_v2 = vld [vmem:[#allocation12 + $0x100] sm:$0xff]  ;;  %v9530_v22 = vcombine.high %v1411_v41, %v1415_v61  ;;  %v1419_v31 = vld [vmem:[#allocation12 + $0x188] sm:$0xff]  ;;  %v9527_v11 = vcombine.low %v1410_v23, %v1414_v24  ;;  %v9529_v52 = vcombine.low %v1411_v41, %v1415_v61 }
 0x342   :  { %6024 = vmatprep.subr.bf16.mxu0 %v9504_v20  ;;  %v1423_v21 = vld [vmem:[#allocation12 + $0x1a8] sm:$0xff]  ;;  %v9536_v59 = vcombine.high %v1418_v49, %v1422_v1  ;;  %v1426_v20 = vld [vmem:[#allocation12 + $0x1c0] sm:$0xff]  ;;  %v9535_v33 = vcombine.low %v1418_v49, %v1422_v1 }
 0x343   :  { %v1076_v53 = vadd.f32 %v1075_v15, %v12169_v3  ;;  %6281 = vmatpush1.bf16.msra.mxu1 %v9497_v54  ;;  %v1406_v15 = vld [vmem:[#allocation12 + $0x120] sm:$0xff]  ;;  %v9538_v54 = vcombine.high %v1419_v31, %v1423_v21  ;;  %v1427_v4 = vld [vmem:[#allocation12 + $0x1c8] sm:$0xff]  ;;  %v9537_v56 = vcombine.low %v1419_v31, %v1423_v21 }
 0x344   :  { %6282 = vmatprep.subr.bf16.mxu1 %v9506_v38  ;;  %v9520_v17 = vcombine.high %v1402_v2, %v1406_v15  ;;  %v9519_v16 = vcombine.low %v1402_v2, %v1406_v15  ;;  %v1430_v38 = vld [vmem:[#allocation12 + $0x1e0] sm:$0xff]  ;;  %v1431_v36 = vld [vmem:[#allocation12 + $0x1e8] sm:$0xff] }
 0x345   :  { %v1077_v7 = vadd.f32 %v1076_v53, %v12172_v37  ;;  %v1403_v53 = vld [vmem:[#allocation12 + $0x108] sm:$0xff]  ;;  %6025 = vmatpush1.bf16.msra.mxu0 %v9503_v45  ;;  %v9544_v45 = vcombine.high %v1426_v20, %v1430_v38 }
 0x346   :  { %6026 = vmatprep.subr.bf16.mxu0 %v9512_v32  ;;  %v1434_v32 = vld [vmem:[#allocation12 + $0x200] sm:$0xff]  ;;  %v1435_v2 = vld [vmem:[#allocation12 + $0x208] sm:$0xff] }
 0x347   :  { %1078 = vadd.xlane.f32.xlu1 %v1077_v7  ;;  %v1407_v7 = vld [vmem:[#allocation12 + $0x128] sm:$0xff]  ;;  %6283 = vmatpush1.bf16.msra.mxu1 %v9505_v51  ;;  %v9546_v51 = vcombine.high %v1427_v4, %v1431_v36 }
 0x348   :  { %6284 = vmatprep.subr.bf16.mxu1 %v9514_v46  ;;  %v9522_v27 = vcombine.high %v1403_v53, %v1407_v7  ;;  %v9521_v25 = vcombine.low %v1403_v53, %v1407_v7  ;;  %v1438_v46 = vld [vmem:[#allocation12 + $0x220] sm:$0xff]  ;;  %v1439_v15 = vld [vmem:[#allocation12 + $0x228] sm:$0xff]  ;;  %v9543_v53 = vcombine.low %v1426_v20, %v1430_v38  ;;  %v9545_v7 = vcombine.low %v1427_v4, %v1431_v36 }
 0x349   :  { %6027 = vmatpush1.bf16.msra.mxu0 %v9511_v62  ;;  %v9552_v62 = vcombine.high %v1434_v32, %v1438_v46  ;;  %v1443_v23 = vld [vmem:[#allocation12 + $0x248] sm:$0xff]  ;;  %v9551_v41 = vcombine.low %v1434_v32, %v1438_v46  ;;  %v9553_v61 = vcombine.low %v1435_v2, %v1439_v15 }
 0x34a   :  { %6028 = vmatprep.subr.bf16.mxu0 %v9520_v17  ;;  %v1442_v17 = vld [vmem:[#allocation12 + $0x240] sm:$0xff]  ;;  %v1447_v24 = vld [vmem:[#allocation12 + $0x268] sm:$0xff] }
 0x34b   :  { %6285 = vmatpush1.bf16.msra.mxu1 %v9513_v35  ;;  %v9554_v35 = vcombine.high %v1435_v2, %v1439_v15 }
 0x34c   :  { %6286 = vmatprep.subr.bf16.mxu1 %v9522_v27  ;;  %v1446_v27 = vld [vmem:[#allocation12 + $0x260] sm:$0xff] }
 0x34d   :  { %6029 = vmatpush1.bf16.msra.mxu0 %v9519_v16  ;;  %v9560_v16 = vcombine.high %v1442_v17, %v1446_v27 }
 0x34e   :  { %6030 = vmatprep.subr.bf16.mxu0 %v9528_v13  ;;  %v9559_v13 = vcombine.low %v1442_v17, %v1446_v27 }
 0x34f   :  { %6287 = vmatpush1.bf16.msra.mxu1 %v9521_v25  ;;  %v9562_v25 = vcombine.high %v1443_v23, %v1447_v24 }
 0x350   :  { %6288 = vmatprep.subr.bf16.mxu1 %v9530_v22  ;;  %v9561_v22 = vcombine.low %v1443_v23, %v1447_v24 }
 0x351   :  { %6031 = vmatpush1.bf16.msra.mxu0 %v9527_v11 }
 0x352   :  { %6032 = vmatprep.subr.bf16.mxu0 %v9536_v59 }
 0x353   :  { %6289 = vmatpush1.bf16.msra.mxu1 %v9529_v52 }
 0x354   :  { %6290 = vmatprep.subr.bf16.mxu1 %v9538_v54 }
 0x355   :  { %6033 = vmatpush1.bf16.msra.mxu0 %v9535_v33 }
 0x356   :  { %6034 = vmatprep.subr.bf16.mxu0 %v9544_v45 }
 0x357   :  { %6291 = vmatpush1.bf16.msra.mxu1 %v9537_v56 }
 0x358   :  { %6292 = vmatprep.subr.bf16.mxu1 %v9546_v51 }
 0x359   :  { %6035 = vmatpush1.bf16.msra.mxu0 %v9543_v53 }
 0x35a   :  { %6036 = vmatprep.subr.bf16.mxu0 %v9552_v62 }
 0x35b   :  { %6293 = vmatpush1.bf16.msra.mxu1 %v9545_v7 }
 0x35c   :  { %6294 = vmatprep.subr.bf16.mxu1 %v9554_v35 }
 0x35d   :  { %6037 = vmatpush1.bf16.msra.mxu0 %v9551_v41 }
 0x35e   :  { %6038 = vmatprep.subr.bf16.mxu0 %v9560_v16 }
 0x35f   :  { %6295 = vmatpush1.bf16.msra.mxu1 %v9553_v61 }
 0x360   :  { %6296 = vmatprep.subr.bf16.mxu1 %v9562_v25 }
 0x361   :  { %6039 = vmatpush1.bf16.msra.mxu0 %v9559_v13 }
 0x363   :  { %6297 = vmatpush1.bf16.msra.mxu1 %v9561_v22 }
 0x3cc   :  { %v1066_v49 = vpop.xlane.xlu0 %1065 }
 0x3cd   :  { %v1080_v1 = vmul.f32 0.0006510417, %v1066_v49 }
 0x3cf   :  { %v12177_v31 = vsub.f32 %v12030_v47, %v1080_v1  ;;  %v12180_v21 = vsub.f32 %v12032_v28, %v1080_v1  ;;  %v12183_v11 = vsub.f32 %v12046_v30, %v1080_v1  ;;  %v12190_v54 = vsub.f32 %v12064_v26, %v1080_v1 }
 0x3d0   :  { %v12193_v20 = vsub.f32 %v12073_v63, %v1080_v1  ;;  %v12198_v30 = vsub.f32 %v12083_v19, %v1080_v1  ;;  %v12203_v56 = vsub.f32 %v12096_v48, %v1080_v1  ;;  %v12214_v19 = vsub.f32 %v12104_v34, %v1080_v1 }
 0x3d1   :  { %v1106_v52 = vmul.f32 %v12177_v31, %v12177_v31  ;;  %v1107_v59 = vmul.f32 %v12180_v21, %v12180_v21  ;;  %v1108_v47 = vmul.f32 %v12183_v11, %v12183_v11  ;;  %v1109_v36 = vmul.f32 %v12190_v54, %v12190_v54 }
 0x3d2   :  { %v1110_v63 = vmul.f32 %v12193_v20, %v12193_v20  ;;  %v1111_v32 = vmul.f32 %v12198_v30, %v12198_v30  ;;  %v12226_v15 = vsub.f32 %v12115_v29, %v1080_v1  ;;  %v12234_v7 = vsub.f32 %v12126_v39, %v1080_v1 }
 0x3d3   :  { %v1130_v28 = vadd.f32 %v1107_v59, %v1106_v52  ;;  %v12244_v27 = vsub.f32 %v12135_v12, %v1080_v1 }
 0x3d4   :  { %v1079_v38 = vpop.xlane.xlu1 %1078  ;;  %v1115_v61 = vmul.f32 %v12234_v7, %v12234_v7 }
 0x3d5   :  { %v1081_v4 = vmul.f32 0.0006510417, %v1079_v38  ;;  %v1131_v33 = vadd.f32 %v1130_v28, %v1108_v47 }
 0x3d7   :  { %v1132_v26 = vadd.f32 %v1131_v33, %v1109_v36  ;;  %v12208_v45 = vsub.f32 %v12091_v8, %v1081_v4  ;;  %v12211_v51 = vsub.f32 %v12093_v14, %v1081_v4  ;;  %v12219_v48 = vsub.f32 %v12109_v60, %v1081_v4 }
 0x3d8   :  { %v1112_v14 = vmul.f32 %v12203_v56, %v12203_v56  ;;  %v12231_v53 = vsub.f32 %v12121_v57, %v1081_v4  ;;  %v1113_v60 = vmul.f32 %v12214_v19, %v12214_v19  ;;  %v12239_v35 = vsub.f32 %v12132_v5, %v1081_v4 }
 0x3d9   :  { %v1133_v46 = vadd.f32 %v1132_v26, %v1110_v63  ;;  %v1118_v2 = vmul.f32 %v12208_v45, %v12208_v45  ;;  %v1119_v8 = vmul.f32 %v12211_v51, %v12211_v51  ;;  %v1120_v29 = vmul.f32 %v12219_v48, %v12219_v48 }
 0x3da   :  { %v1114_v57 = vmul.f32 %v12226_v15, %v12226_v15  ;;  %v12249_v39 = vsub.f32 %v12141_v9, %v1081_v4  ;;  %v1121_v24 = vmul.f32 %v12231_v53, %v12231_v53  ;;  %v12254_v5 = vsub.f32 %v12144_v43, %v1080_v1 }
 0x3db   :  { %v1134_v34 = vadd.f32 %v1133_v46, %v1111_v32  ;;  %v1143_v17 = vadd.f32 %v1119_v8, %v1118_v2  ;;  %v12259_v12 = vsub.f32 %v12151_v58, %v1081_v4  ;;  %v1122_v25 = vmul.f32 %v12239_v35, %v12239_v35 }
 0x3dc   :  { %v1116_v9 = vmul.f32 %v12244_v27, %v12244_v27  ;;  %v12266_v49 = vsub.f32 %v12158_v18, %v1081_v4  ;;  %v1123_v43 = vmul.f32 %v12249_v39, %v12249_v39  ;;  %v1117_v52 = vmul.f32 %v12254_v5, %v12254_v5 }
 0x3dd   :  { %v1135_v62 = vadd.f32 %v1134_v34, %v1112_v14  ;;  %v1144_v41 = vadd.f32 %v1143_v17, %v1120_v29  ;;  %v12273_v59 = vsub.f32 %v12162_v55, %v1081_v4  ;;  %v1124_v47 = vmul.f32 %v12259_v12, %v12259_v12  ;;  %v1451_v29 = vld [vmem:[#allocation12 + $0x288] sm:$0xff] }
 0x3de   :  { %v12278_v36 = vsub.f32 %v12166_v6, %v1081_v4  ;;  %v1125_v18 = vmul.f32 %v12266_v49, %v12266_v49  ;;  %v12283_v63 = vsub.f32 %v12169_v3, %v1081_v4  ;;  %v12288_v32 = vsub.f32 %v12172_v37, %v1081_v4  ;;  %v1455_v4 = vld [vmem:[#allocation12 + $0x2a8] sm:$0xff] }
 0x3df   :  { %v1136_v23 = vadd.f32 %v1135_v62, %v1113_v60  ;;  %v1145_v13 = vadd.f32 %v1144_v41, %v1121_v24  ;;  %v1126_v55 = vmul.f32 %v12273_v59, %v12273_v59  ;;  %v1450_v60 = vld [vmem:[#allocation12 + $0x280] sm:$0xff] }
 0x3e0   :  { %12752 = vst [vmem:[#allocation35_spill] sm:$0xff] %v12283_v63  ;;  %12753 = vst [vmem:[#allocation36_spill] sm:$0xff] %v12288_v32  ;;  %v1127_v46 = vmul.f32 %v12278_v36, %v12278_v36  ;;  %v1128_v2 = vmul.f32 %v12283_v63, %v12283_v63  ;;  %v1129_v14 = vmul.f32 %v12288_v32, %v12288_v32  ;;  %v1454_v62 = vld [vmem:[#allocation12 + $0x2a0] sm:$0xff] }
 0x3e1   :  { %v1137_v16 = vadd.f32 %v1136_v23, %v1114_v57  ;;  %v1146_v1 = vadd.f32 %v1145_v13, %v1122_v25  ;;  %v9567_v17 = vcombine.low %v1450_v60, %v1454_v62  ;;  %v9568_v37 = vcombine.high %v1450_v60, %v1454_v62  ;;  %v1458_v24 = vld [vmem:[#allocation12 + $0x2c0] sm:$0xff]  ;;  %v1463_v25 = vld [vmem:[#allocation12 + $0x2e8] sm:$0xff] }
 0x3e2   :  { %v9569_v57 = vcombine.low %v1451_v29, %v1455_v4  ;;  %v9570_v23 = vcombine.high %v1451_v29, %v1455_v4  ;;  %v1462_v41 = vld [vmem:[#allocation12 + $0x2e0] sm:$0xff] }
 0x3e3   :  { %v1138_v22 = vadd.f32 %v1137_v16, %v1115_v61  ;;  %v1147_v28 = vadd.f32 %v1146_v1, %v1123_v43  ;;  %6040 = vmatprep.subr.bf16.mxu0 %v9568_v37  ;;  %v1459_v61 = vld [vmem:[#allocation12 + $0x2c8] sm:$0xff]  ;;  %v9576_v16 = vcombine.high %v1458_v24, %v1462_v41  ;;  %v9575_v13 = vcombine.low %v1458_v24, %v1462_v41  ;;  %v1466_v43 = vld [vmem:[#allocation12 + $0x300] sm:$0xff] }
 0x3e4   :  { %6298 = vmatprep.subr.bf16.mxu1 %v9570_v23  ;;  %6041 = vmatpush1.bf16.msra.mxu0 %v9567_v17  ;;  %v1470_v1 = vld [vmem:[#allocation12 + $0x320] sm:$0xff]  ;;  %v1495_v23 = vld [vmem:[#allocation12 + $0x3e8] sm:$0xff] }
 0x3e5   :  { %v1139_v58 = vadd.f32 %v1138_v22, %v1116_v9  ;;  %v1148_v33 = vadd.f32 %v1147_v28, %v1124_v47  ;;  %6299 = vmatpush1.bf16.msra.mxu1 %v9569_v57  ;;  %v9577_v9 = vcombine.low %v1459_v61, %v1463_v25  ;;  %v9578_v22 = vcombine.high %v1459_v61, %v1463_v25  ;;  %v1471_v28 = vld [vmem:[#allocation12 + $0x328] sm:$0xff]  ;;  %v1490_v37 = vld [vmem:[#allocation12 + $0x3c0] sm:$0xff] }
 0x3e6   :  { %6042 = vmatprep.subr.bf16.mxu0 %v9576_v16  ;;  %v9584_v47 = vcombine.high %v1466_v43, %v1470_v1  ;;  %v1494_v4 = vld [vmem:[#allocation12 + $0x3e0] sm:$0xff]  ;;  %v1491_v57 = vld [vmem:[#allocation12 + $0x3c8] sm:$0xff] }
 0x3e7   :  { %v1140_v38 = vadd.f32 %v1139_v58, %v1117_v52  ;;  %v1149_v26 = vadd.f32 %v1148_v33, %v1125_v18  ;;  %v1467_v52 = vld [vmem:[#allocation12 + $0x308] sm:$0xff]  ;;  %6300 = vmatprep.subr.bf16.mxu1 %v9578_v22  ;;  %v9583_v58 = vcombine.low %v1466_v43, %v1470_v1  ;;  %v1478_v18 = vld [vmem:[#allocation12 + $0x360] sm:$0xff]  ;;  %v9608_v61 = vcombine.high %v1490_v37, %v1494_v4 }
 0x3e8   :  { %6043 = vmatpush1.bf16.msra.mxu0 %v9575_v13  ;;  %v9585_v33 = vcombine.low %v1467_v52, %v1471_v28  ;;  %v9610_v16 = vcombine.high %v1491_v57, %v1495_v23  ;;  %v9607_v25 = vcombine.low %v1490_v37, %v1494_v4  ;;  %v9609_v13 = vcombine.low %v1491_v57, %v1495_v23  ;;  %v12298_v22 = vld [vmem:[#allocation12 + $0x420] sm:$0xff]  ;;  %v12300_v43 = vld [vmem:[#allocation12 + $0x408] sm:$0xff] }
 0x3e9   :  { %1141 = vadd.xlane.f32.xlu0 %v1140_v38  ;;  %v1150_v6 = vadd.f32 %v1149_v26, %v1126_v55  ;;  %v1474_v38 = vld [vmem:[#allocation12 + $0x340] sm:$0xff]  ;;  %6301 = vmatpush1.bf16.msra.mxu1 %v9577_v9  ;;  %v9586_v55 = vcombine.high %v1467_v52, %v1471_v28  ;;  %v12304_v52 = vld [vmem:[#allocation12 + $0x428] sm:$0xff] }
 0x3ea   :  { %v9592_v26 = vcombine.high %v1474_v38, %v1478_v18  ;;  %6044 = vmatprep.subr.bf16.mxu0 %v9584_v47  ;;  %v9591_v60 = vcombine.low %v1474_v38, %v1478_v18  ;;  %v12296_v9 = vld [vmem:[#allocation12 + $0x400] sm:$0xff]  ;;  %v9618_v28 = vcombine.high %v12300_v43, %v12304_v52 }
 0x3eb   :  { %v1151_v8 = vadd.f32 %v1150_v6, %v1127_v46  ;;  %v1475_v46 = vld [vmem:[#allocation12 + $0x348] sm:$0xff]  ;;  %6302 = vmatprep.subr.bf16.mxu1 %v9586_v55  ;;  %v9616_v1 = vcombine.high %v12296_v9, %v12298_v22 }
 0x3ec   :  { %v1479_v6 = vld [vmem:[#allocation12 + $0x368] sm:$0xff]  ;;  %6045 = vmatpush1.bf16.msra.mxu0 %v9583_v58 }
 0x3ed   :  { %v1152_v3 = vadd.f32 %v1151_v8, %v1128_v2  ;;  %v9594_v2 = vcombine.high %v1475_v46, %v1479_v6  ;;  %v1482_v8 = vld [vmem:[#allocation12 + $0x380] sm:$0xff]  ;;  %6303 = vmatpush1.bf16.msra.mxu1 %v9585_v33  ;;  %6046 = vmatprep.subr.bf16.mxu0 %v9592_v26  ;;  %v9593_v62 = vcombine.low %v1475_v46, %v1479_v6  ;;  %v1050_v26 = vld [vmem:[#allocation9] sm:$0xff]  ;;  %v1052_v6 = vld [vmem:[#allocation10] sm:$0xff] }
 0x3ee   :  { %v12336_v37 = vrot.slane %v1052_v6, %v11805_v44  ;;  %v12343_v23 = vrot.slane %v1052_v6, %v11826_v0 }
 0x3ef   :  { %v1153_v34 = vadd.f32 %v1152_v3, %v1129_v14  ;;  %v1486_v14 = vld [vmem:[#allocation12 + $0x3a0] sm:$0xff]  ;;  %v1483_v3 = vld [vmem:[#allocation12 + $0x388] sm:$0xff]  ;;  %6304 = vmatprep.subr.bf16.mxu1 %v9594_v2 }
 0x3f0   :  { %v9600_v29 = vcombine.high %v1482_v8, %v1486_v14  ;;  %6047 = vmatpush1.bf16.msra.mxu0 %v9591_v60  ;;  %v9599_v24 = vcombine.low %v1482_v8, %v1486_v14  ;;  %v12313_v8 = vrot.slane %v1050_v26, %v11802_v42  ;;  %v12324_v60 = vrot.slane %v1050_v26, %v11805_v44 }
 0x3f1   :  { %1154 = vadd.xlane.f32.xlu1 %v1153_v34  ;;  %v1487_v34 = vld [vmem:[#allocation12 + $0x3a8] sm:$0xff]  ;;  %6305 = vmatpush1.bf16.msra.mxu1 %v9593_v62  ;;  %v12327_v62 = vrot.slane %v1050_v26, %v11826_v0 }
 0x3f2   :  { %v9602_v17 = vcombine.high %v1483_v3, %v1487_v34  ;;  %6048 = vmatprep.subr.bf16.mxu0 %v9600_v29  ;;  %v9601_v41 = vcombine.low %v1483_v3, %v1487_v34  ;;  %v12318_v3 = vrot.slane %v1050_v26, %v11800_v40  ;;  %v12321_v34 = vrot.slane %v1050_v26, %v11811_v50  ;;  %v12394_v0 = vld [vmem:[#allocation12 + $0x468] sm:$0xff] }
 0x3f3   :  { %v12330_v29 = vrot.slane %v1052_v6, %v11802_v42 }
 0x3f4   :  { %6306 = vmatprep.subr.bf16.mxu1 %v9602_v17  ;;  %6049 = vmatpush1.bf16.msra.mxu0 %v9599_v24  ;;  %v12333_v17 = vrot.slane %v1052_v6, %v11800_v40  ;;  %v12754_v24 = vld [vmem:[#allocation31_spill] sm:$0xff] }
 0x3f5   :  { %6307 = vmatpush1.bf16.msra.mxu1 %v9601_v41  ;;  %6050 = vmatprep.subr.bf16.mxu0 %v9608_v61  ;;  %v12346_v41 = vrot.slane %v1050_v26, %v12754_v24  ;;  %v1051_v61 = vld [vmem:[#allocation9 + $0x8] sm:$0xf] }
 0x3f6   :  { %6308 = vmatprep.subr.bf16.mxu1 %v9610_v16  ;;  %v12349_v16 = vrot.slane %v1052_v6, %v11811_v50 }
 0x3f8   :  { %6051 = vmatpush1.bf16.msra.mxu0 %v9607_v25 }
 0x3f9   :  { %6309 = vmatpush1.bf16.msra.mxu1 %v9609_v13  ;;  %6063 = vmatprep.subr.bf16.mxu0 %v9616_v1  ;;  %v12354_v13 = vrot.slane %v1052_v6, %v12754_v24 }
 0x3fa   :  { %6321 = vmatprep.subr.bf16.mxu1 %v9618_v28  ;;  %v12362_v28 = vrot.slane %v1052_v6, %v11840_v10 }
 0x476   :  { %v1142_v38 = vpop.xlane.xlu0 %1141 }
 0x477   :  { %v1156_v18 = vmul.f32 0.0006510417, %v1142_v38  ;;  %v12755_v38 = vld [vmem:[#allocation33_spill] sm:$0xff] }
 0x479   :  { %v1158_v33 = vadd.f32 1e-05, %v1156_v18  ;;  %v12365_v18 = vrot.slane %v1050_v26, %v12755_v38 }
 0x47b   :  { %11212 = vrsqrt.f32 %v1158_v33  ;;  %v12367_v33 = vld [vmem:[#allocation10 + $0x8] sm:$0xf] }
 0x47e   :  { %v1155_v55 = vpop.xlane.xlu1 %1154 }
 0x47f   :  { %v1157_v46 = vmul.f32 0.0006510417, %v1155_v55  ;;  %v12371_v55 = vld [vmem:[#allocation12 + $0x440] sm:$0xff] }
 0x481   :  { %v1159_v2 = vadd.f32 1e-05, %v1157_v46  ;;  %v12373_v46 = vld [vmem:[#allocation12 + $0x460] sm:$0xff] }
 0x483   :  { %11214 = vrsqrt.f32 %v1159_v2  ;;  %v12376_v2 = vrot.slane %v1052_v6, %v12755_v38  ;;  %v12392_v6 = vld [vmem:[#allocation12 + $0x448] sm:$0xff] }
 0x485   :  { %v12315_v14 = vpop.eup %11212 }
 0x486   :  { %v1164_v4 = vmul.f32 %v12315_v14, %v12183_v11  ;;  %v1167_v57 = vmul.f32 %v12315_v14, %v12198_v30  ;;  %v1166_v25 = vmul.f32 %v12315_v14, %v12193_v20  ;;  %v12357_v11 = vrot.slane %v1050_v26, %v11840_v10 }
 0x487   :  { %v1163_v20 = vmul.f32 %v12315_v14, %v12180_v21  ;;  %v12388_v21 = vrot.slane %v1051_v61, %v11811_v50  ;;  %v1162_v10 = vmul.f32 %v12315_v14, %v12177_v31  ;;  %v1169_v38 = vmul.f32 %v12315_v14, %v12214_v19 }
 0x488   :  { %v1250_v30 = vmul.f32 %v12324_v60, %v1164_v4  ;;  %v1253_v1 = vmul.f32 %v12327_v62, %v1167_v57  ;;  %v12379_v4 = vrot.slane %v1051_v61, %v11802_v42  ;;  %v12382_v57 = vrot.slane %v1051_v61, %v11800_v40 }
 0x489   :  { %v1252_v58 = vmul.f32 %v12346_v41, %v1166_v25  ;;  %12756 = vst [vmem:[#allocation37_spill] sm:$0xff] %v12388_v21  ;;  %v12411_v31 = vrot.slane %v12367_v33, %v11800_v40  ;;  %v1173_v19 = vmul.f32 %v12315_v14, %v12254_v5  ;;  %v1249_v63 = vmul.f32 %v12313_v8, %v1163_v20 }
 0x48a   :  { %v1336_v26 = vadd.f32 %v12336_v37, %v1250_v30  ;;  %v1339_v47 = vadd.f32 %v12343_v23, %v1253_v1  ;;  %v1168_v30 = vmul.f32 %v12315_v14, %v12203_v56  ;;  %v12402_v1 = vrot.slane %v12367_v33, %v11802_v42 }
 0x48b   :  { %v12407_v24 = vadd.f32 %v12354_v13, %v1252_v58  ;;  %v1165_v56 = vmul.f32 %v12315_v14, %v12190_v54  ;;  %v1255_v42 = vmul.f32 %v12357_v11, %v1169_v38  ;;  %v12427_v5 = vmul.f32 %v12388_v21, %v1173_v19  ;;  %v12460_v21 = vld [vmem:[#allocation12 + $0x480] sm:$0xff] }
 0x48c   :  { %v1254_v32 = vmul.f32 %v12365_v18, %v1168_v30  ;;  %v1248_v54 = vmul.f32 %v12318_v3, %v1162_v10  ;;  %v12439_v58 = vrot.slane %v1051_v61, %v11805_v44 }
 0x48d   :  { %v12429_v20 = vpop.eup %11214  ;;  %v12433_v38 = vadd.f32 %v12362_v28, %v1255_v42  ;;  %v1335_v42 = vadd.f32 %v12330_v29, %v1249_v63 }
 0x48e   :  { %v12436_v30 = vadd.f32 %v12376_v2, %v1254_v32  ;;  %12757 = vst [vmem:[#allocation38_spill] sm:$0xff] %v12439_v58  ;;  %v1175_v25 = vmul.f32 %v12429_v20, %v12211_v51  ;;  %v1174_v19 = vmul.f32 %v12429_v20, %v12208_v45  ;;  %v1177_v40 = vmul.f32 %v12429_v20, %v12231_v53 }
 0x48f   :  { %v1176_v10 = vmul.f32 %v12429_v20, %v12219_v48  ;;  %v1251_v32 = vmul.f32 %v12321_v34, %v1165_v56  ;;  %v1179_v61 = vmul.f32 %v12429_v20, %v12249_v39  ;;  %v12455_v58 = vrot.slane %v12367_v33, %v11811_v50  ;;  %v12462_v48 = vld [vmem:[#allocation12 + $0x4a0] sm:$0xff] }
 0x490   :  { %v1261_v51 = vmul.f32 %v12313_v8, %v1175_v25  ;;  %v1260_v45 = vmul.f32 %v12318_v3, %v1174_v19  ;;  %v1263_v53 = vmul.f32 %v12321_v34, %v1177_v40  ;;  %v1334_v56 = vadd.f32 %v12333_v17, %v1248_v54 }
 0x491   :  { %v1262_v63 = vmul.f32 %v12324_v60, %v1176_v10  ;;  %v1265_v39 = vmul.f32 %v12327_v62, %v1179_v61  ;;  %v1178_v50 = vmul.f32 %v12429_v20, %v12239_v35  ;;  %v1181_v8 = vmul.f32 %v12429_v20, %v12266_v49 }
 0x492   :  { %v1347_v3 = vadd.f32 %v12330_v29, %v1261_v51  ;;  %v1346_v40 = vadd.f32 %v12333_v17, %v1260_v45  ;;  %v1349_v34 = vadd.f32 %v12349_v16, %v1263_v53  ;;  %v1337_v60 = vadd.f32 %v12349_v16, %v1251_v32  ;;  %v1523_v51 = vld [vmem:[#allocation12 + $0x4c8] sm:$0xff] }
 0x493   :  { %v1348_v25 = vadd.f32 %v12336_v37, %v1262_v63  ;;  %v9631_v54 = vcombine.low %v12460_v21, %v12462_v48  ;;  %v1351_v62 = vadd.f32 %v12343_v23, %v1265_v39  ;;  %v1171_v35 = vmul.f32 %v12315_v14, %v12234_v7  ;;  %v1527_v45 = vld [vmem:[#allocation12 + $0x4e8] sm:$0xff] }
 0x494   :  { %v12481_v19 = vpack.c.bf16 %v1347_v3, %v1335_v42  ;;  %v12483_v49 = vpack.c.bf16 %v1346_v40, %v1334_v56  ;;  %v1170_v17 = vmul.f32 %v12315_v14, %v12226_v15  ;;  %v9632_v37 = vcombine.high %v12460_v21, %v12462_v48  ;;  %v1519_v42 = vld [vmem:[#allocation12 + $0x4a8] sm:$0xff] }
 0x495   :  { %v12485_v29 = vpack.c.bf16 %v1348_v25, %v1336_v26  ;;  %v12491_v16 = vpack.c.bf16 %v1351_v62, %v1339_v47  ;;  %v1264_v10 = vmul.f32 %v12346_v41, %v1178_v50  ;;  %v1267_v23 = vmul.f32 %v12357_v11, %v1181_v8  ;;  %v1515_v26 = vld [vmem:[#allocation12 + $0x488] sm:$0xff]  ;;  %v12505_v50 = vld [vmem:[#allocation12 + $0x4c0] sm:$0xff] }
 0x496   :  { %6052 = vmatprep.mubr.bf16.mxu0 %v12481_v19  ;;  %6310 = vmatprep.mubr.bf16.mxu1 %v12481_v19  ;;  %v12497_v7 = vpack.c.bf16 %v1349_v34, %v1337_v60  ;;  %v1180_v15 = vmul.f32 %v12429_v20, %v12259_v12  ;;  %v1183_v32 = vmul.f32 %v12429_v20, %v12278_v36  ;;  %v1526_v36 = vld [vmem:[#allocation12 + $0x4e0] sm:$0xff] }
 0x497   :  { %6053 = vmatmul.mubr.bf16.vlgmr.msra.gmra.mrb[12].mxu0 %v12483_v49  ;;  %6311 = vmatmul.mubr.bf16.vlgmr.msra.gmra.mrb[12].mxu1 %v12483_v49  ;;  %v1350_v47 = vadd.f32 %v12354_v13, %v1264_v10  ;;  %v1353_v41 = vadd.f32 %v12362_v28, %v1267_v23  ;;  %v1182_v11 = vmul.f32 %v12429_v20, %v12273_v59  ;;  %v1534_v25 = vld [vmem:[#allocation12 + $0x520] sm:$0xff]  ;;  %v12766_v10 = vld [vmem:[#allocation37_spill] sm:$0xff] }
 0x498   :  { %v12758_v61 = vcombine.low %v12296_v9, %v12298_v22  ;;  %v12759_v12 = vcombine.low %v12300_v43, %v12304_v52  ;;  %v1266_v53 = vmul.f32 %v12365_v18, %v1180_v15  ;;  %v1257_v13 = vmul.f32 %v12379_v4, %v1171_v35  ;;  %6095 = vmatprep.mubr.bf16.mxu0 %v12497_v7  ;;  %v12765_v60 = vld [vmem:[#allocation35_spill] sm:$0xff]  ;;  %v12767_v23 = vld [vmem:[#allocation38_spill] sm:$0xff] }
 0x499   :  { %v1256_v28 = vmul.f32 %v12382_v57, %v1170_v17  ;;  %6353 = vmatprep.mubr.bf16.mxu1 %v12497_v7  ;;  %v9633_v59 = vcombine.low %v1515_v26, %v1519_v42  ;;  %v9634_v9 = vcombine.high %v1515_v26, %v1519_v42  ;;  %v12523_v22 = vpack.c.bf16 %v1350_v47, %v12407_v24  ;;  %v1538_v15 = vld [vmem:[#allocation12 + $0x540] sm:$0xff]  ;;  %v1543_v47 = vld [vmem:[#allocation12 + $0x568] sm:$0xff] }
 0x49a   :  { %6064 = vmatpush1.bf16.msra.mxu0 %v12758_v61  ;;  %6322 = vmatpush1.bf16.msra.mxu1 %v12759_v12  ;;  %v12760_v43 = vcombine.high %v12371_v55, %v12373_v46  ;;  %v12761_v52 = vcombine.high %v12392_v6, %v12394_v0  ;;  %v12532_v18 = vpack.c.bf16 %v1353_v41, %v12433_v38 }
 0x49b   :  { %v1352_v63 = vadd.f32 %v12376_v2, %v1266_v53  ;;  %v1269_v56 = vmul.f32 %v12379_v4, %v1183_v32  ;;  %v9640_v39 = vcombine.high %v12505_v50, %v1526_v36  ;;  %v9642_v8 = vcombine.high %v1523_v51, %v1527_v45  ;;  %v1542_v32 = vld [vmem:[#allocation12 + $0x560] sm:$0xff] }
 0x49c   :  { %6065 = vmatprep.subr.bf16.mxu0 %v12760_v43  ;;  %6323 = vmatprep.subr.bf16.mxu1 %v12761_v52  ;;  %v1268_v24 = vmul.f32 %v12382_v57, %v1182_v11  ;;  %v1172_v3 = vmul.f32 %v12315_v14, %v12244_v27  ;;  %v12762_v40 = vcombine.low %v12371_v55, %v12373_v46  ;;  %v1530_v57 = vld [vmem:[#allocation12 + $0x500] sm:$0xff]  ;;  %v12764_v55 = vld [vmem:[#allocation36_spill] sm:$0xff] }
 0x49d   :  { %v12763_v38 = vcombine.low %v12392_v6, %v12394_v0  ;;  %v12547_v2 = vpack.c.bf16 %v1352_v63, %v12436_v30  ;;  %v1343_v4 = vadd.f32 %v12402_v1, %v1257_v13  ;;  %v1342_v34 = vadd.f32 %v12411_v31, %v1256_v28  ;;  %v1531_v0 = vld [vmem:[#allocation12 + $0x508] sm:$0xff]  ;;  %v1550_v53 = vld [vmem:[#allocation12 + $0x5a0] sm:$0xff] }
 0x49e   :  { %6066 = vmatpush1.bf16.msra.mxu0 %v12762_v40  ;;  %v1355_v27 = vadd.f32 %v12402_v1, %v1269_v56  ;;  %v1354_v14 = vadd.f32 %v12411_v31, %v1268_v24  ;;  %v1185_v46 = vmul.f32 %v12429_v20, %v12764_v55  ;;  %v1535_v6 = vld [vmem:[#allocation12 + $0x528] sm:$0xff]  ;;  %v1345_v30 = vadd.f32 %v12455_v58, %v12427_v5  ;;  %v1554_v52 = vld [vmem:[#allocation12 + $0x5c0] sm:$0xff] }
 0x49f   :  { %6324 = vmatpush1.bf16.msra.mxu1 %v12763_v38  ;;  %6067 = vmatprep.subr.bf16.mxu0 %v9632_v37  ;;  %v1184_v62 = vmul.f32 %v12429_v20, %v12765_v60  ;;  %v1317_v35 = vrot.slane %v12367_v33, %v11805_v44  ;;  %v9639_v17 = vcombine.low %v12505_v50, %v1526_v36  ;;  %v1539_v50 = vld [vmem:[#allocation12 + $0x548] sm:$0xff]  ;;  %v1558_v63 = vld [vmem:[#allocation12 + $0x5e0] sm:$0xff] }
 0x4a0   :  { %6325 = vmatprep.subr.bf16.mxu1 %v9634_v9  ;;  %v9641_v1 = vcombine.low %v1523_v51, %v1527_v45  ;;  %v12562_v37 = vpack.c.bf16 %v1355_v27, %v1343_v4  ;;  %v12564_v31 = vpack.c.bf16 %v1354_v14, %v1342_v34  ;;  %v1271_v5 = vmul.f32 %v12766_v10, %v1185_v46  ;;  %v1546_v51 = vld [vmem:[#allocation12 + $0x580] sm:$0xff]  ;;  %v1547_v13 = vld [vmem:[#allocation12 + $0x588] sm:$0xff] }
 0x4a1   :  { %v1258_v26 = vmul.f32 %v12767_v23, %v1172_v3  ;;  %v1270_v20 = vmul.f32 %v12767_v23, %v1184_v62  ;;  %v9648_v33 = vcombine.high %v1530_v57, %v1534_v25  ;;  %v9650_v42 = vcombine.high %v1531_v0, %v1535_v6  ;;  %v1551_v28 = vld [vmem:[#allocation12 + $0x5a8] sm:$0xff]  ;;  %v1562_v38 = vld [vmem:[#allocation12 + $0x600] sm:$0xff] }
 0x4a2   :  { %6068 = vmatpush1.bf16.msra.mxu0 %v9631_v54  ;;  %v1357_v41 = vadd.f32 %v12455_v58, %v1271_v5  ;;  %v9647_v48 = vcombine.low %v1530_v57, %v1534_v25  ;;  %v9649_v54 = vcombine.low %v1531_v0, %v1535_v6  ;;  %v9656_v12 = vcombine.high %v1538_v15, %v1542_v32  ;;  %v1555_v56 = vld [vmem:[#allocation12 + $0x5c8] sm:$0xff]  ;;  %v1566_v4 = vld [vmem:[#allocation12 + $0x620] sm:$0xff] }
 0x4a3   :  { %6326 = vmatpush1.bf16.msra.mxu1 %v9633_v59  ;;  %6069 = vmatprep.subr.bf16.mxu0 %v9640_v39  ;;  %v1344_v11 = vadd.f32 %v1317_v35, %v1258_v26  ;;  %v1356_v21 = vadd.f32 %v1317_v35, %v1270_v20  ;;  %v9658_v36 = vcombine.high %v1539_v50, %v1543_v47  ;;  %v1559_v39 = vld [vmem:[#allocation12 + $0x5e8] sm:$0xff]  ;;  %v1570_v25 = vld [vmem:[#allocation12 + $0x640] sm:$0xff] }
 0x4a4   :  { %6327 = vmatprep.subr.bf16.mxu1 %v9642_v8  ;;  %v12573_v61 = vpack.c.bf16 %v1357_v41, %v1345_v30  ;;  %v9655_v58 = vcombine.low %v1538_v15, %v1542_v32  ;;  %v9657_v59 = vcombine.low %v1539_v50, %v1543_v47  ;;  %v9664_v9 = vcombine.high %v1546_v51, %v1550_v53  ;;  %v1563_v34 = vld [vmem:[#allocation12 + $0x608] sm:$0xff]  ;;  %v1574_v0 = vld [vmem:[#allocation12 + $0x660] sm:$0xff] }
 0x4a5   :  { %v12575_v45 = vpack.c.bf16 %v1356_v21, %v1344_v11  ;;  %v9666_v43 = vcombine.high %v1547_v13, %v1551_v28  ;;  %v9663_v8 = vcombine.low %v1546_v51, %v1550_v53  ;;  %v9665_v24 = vcombine.low %v1547_v13, %v1551_v28  ;;  %v1567_v57 = vld [vmem:[#allocation12 + $0x628] sm:$0xff]  ;;  %v1582_v10 = vld [vmem:[#allocation12 + $0x6a0] sm:$0xff] }
 0x4a6   :  { %6070 = vmatpush1.bf16.msra.mxu0 %v9639_v17  ;;  %v9672_v3 = vcombine.high %v1554_v52, %v1558_v63  ;;  %v9674_v40 = vcombine.high %v1555_v56, %v1559_v39  ;;  %v9671_v27 = vcombine.low %v1554_v52, %v1558_v63  ;;  %v9673_v14 = vcombine.low %v1555_v56, %v1559_v39  ;;  %v1571_v6 = vld [vmem:[#allocation12 + $0x648] sm:$0xff]  ;;  %v1586_v15 = vld [vmem:[#allocation12 + $0x6c0] sm:$0xff] }
 0x4a7   :  { %6328 = vmatpush1.bf16.msra.mxu1 %v9641_v1  ;;  %6071 = vmatprep.subr.bf16.mxu0 %v9648_v33  ;;  %v9680_v55 = vcombine.high %v1562_v38, %v1566_v4  ;;  %v9682_v46 = vcombine.high %v1563_v34, %v1567_v57  ;;  %v1575_v30 = vld [vmem:[#allocation12 + $0x668] sm:$0xff]  ;;  %v9679_v60 = vcombine.low %v1562_v38, %v1566_v4  ;;  %v1578_v1 = vld [vmem:[#allocation12 + $0x680] sm:$0xff] }
 0x4a8   :  { %6329 = vmatprep.subr.bf16.mxu1 %v9650_v42  ;;  %v9681_v62 = vcombine.low %v1563_v34, %v1567_v57  ;;  %v9688_v35 = vcombine.high %v1570_v25, %v1574_v0  ;;  %v9690_v17 = vcombine.high %v1571_v6, %v1575_v30  ;;  %v1579_v5 = vld [vmem:[#allocation12 + $0x688] sm:$0xff]  ;;  %v9687_v26 = vcombine.low %v1570_v25, %v1574_v0  ;;  %v1590_v32 = vld [vmem:[#allocation12 + $0x6e0] sm:$0xff] }
 0x4a9   :  { %v1583_v23 = vld [vmem:[#allocation12 + $0x6a8] sm:$0xff]  ;;  %v9689_v20 = vcombine.low %v1571_v6, %v1575_v30  ;;  %v9696_v33 = vcombine.high %v1578_v1, %v1582_v10  ;;  %v9695_v41 = vcombine.low %v1578_v1, %v1582_v10  ;;  %v9704_v21 = vcombine.high %v1586_v15, %v1590_v32 }
 0x4aa   :  { %6072 = vmatpush1.bf16.msra.mxu0 %v9647_v48  ;;  %v9698_v42 = vcombine.high %v1579_v5, %v1583_v23  ;;  %v1587_v50 = vld [vmem:[#allocation12 + $0x6c8] sm:$0xff]  ;;  %v9697_v11 = vcombine.low %v1579_v5, %v1583_v23  ;;  %v9703_v53 = vcombine.low %v1586_v15, %v1590_v32 }
 0x4ab   :  { %6330 = vmatpush1.bf16.msra.mxu1 %v9649_v54  ;;  %6073 = vmatprep.subr.bf16.mxu0 %v9656_v12  ;;  %v1591_v47 = vld [vmem:[#allocation12 + $0x6e8] sm:$0xff]  ;;  %v1594_v54 = vld [vmem:[#allocation12 + $0x700] sm:$0xff] }
 0x4ac   :  { %6331 = vmatprep.subr.bf16.mxu1 %v9658_v36  ;;  %v9706_v48 = vcombine.high %v1587_v50, %v1591_v47  ;;  %v1598_v12 = vld [vmem:[#allocation12 + $0x720] sm:$0xff]  ;;  %v1595_v36 = vld [vmem:[#allocation12 + $0x708] sm:$0xff]  ;;  %v9705_v13 = vcombine.low %v1587_v50, %v1591_v47 }
 0x4ad   :  { %v1599_v51 = vld [vmem:[#allocation12 + $0x728] sm:$0xff]  ;;  %v9712_v28 = vcombine.high %v1594_v54, %v1598_v12  ;;  %v9711_v63 = vcombine.low %v1594_v54, %v1598_v12 }
 0x4ae   :  { %6074 = vmatpush1.bf16.msra.mxu0 %v9655_v58  ;;  %v9714_v58 = vcombine.high %v1595_v36, %v1599_v51  ;;  %v1607_v52 = vld [vmem:[#allocation12 + $0x768] sm:$0xff]  ;;  %v9713_v56 = vcombine.low %v1595_v36, %v1599_v51 }
 0x4af   :  { %6332 = vmatpush1.bf16.msra.mxu1 %v9657_v59  ;;  %6075 = vmatprep.subr.bf16.mxu0 %v9664_v9  ;;  %v1602_v59 = vld [vmem:[#allocation12 + $0x740] sm:$0xff]  ;;  %v1615_v38 = vld [vmem:[#allocation12 + $0x7a8] sm:$0xff] }
 0x4b0   :  { %6333 = vmatprep.subr.bf16.mxu1 %v9666_v43  ;;  %v1606_v9 = vld [vmem:[#allocation12 + $0x760] sm:$0xff]  ;;  %v1603_v43 = vld [vmem:[#allocation12 + $0x748] sm:$0xff] }
 0x4b1   :  { %v9720_v39 = vcombine.high %v1602_v59, %v1606_v9  ;;  %v9719_v4 = vcombine.low %v1602_v59, %v1606_v9  ;;  %v9721_v34 = vcombine.low %v1603_v43, %v1607_v52  ;;  %v1623_v25 = vld [vmem:[#allocation12 + $0x7e8] sm:$0xff] }
 0x4b2   :  { %6076 = vmatpush1.bf16.msra.mxu0 %v9663_v8  ;;  %v9722_v8 = vcombine.high %v1603_v43, %v1607_v52  ;;  %v1631_v1 = vld [vmem:[#allocation12 + $0x828] sm:$0xff] }
 0x4b3   :  { %6334 = vmatpush1.bf16.msra.mxu1 %v9665_v24  ;;  %6077 = vmatprep.subr.bf16.mxu0 %v9672_v3  ;;  %v1610_v24 = vld [vmem:[#allocation12 + $0x780] sm:$0xff]  ;;  %v1639_v15 = vld [vmem:[#allocation12 + $0x868] sm:$0xff] }
 0x4b4   :  { %6335 = vmatprep.subr.bf16.mxu1 %v9674_v40  ;;  %v1614_v3 = vld [vmem:[#allocation12 + $0x7a0] sm:$0xff]  ;;  %v1611_v40 = vld [vmem:[#allocation12 + $0x788] sm:$0xff] }
 0x4b5   :  { %v9728_v57 = vcombine.high %v1610_v24, %v1614_v3  ;;  %v9727_v0 = vcombine.low %v1610_v24, %v1614_v3  ;;  %v9729_v6 = vcombine.low %v1611_v40, %v1615_v38  ;;  %v1647_v54 = vld [vmem:[#allocation12 + $0x8a8] sm:$0xff] }
 0x4b6   :  { %6078 = vmatpush1.bf16.msra.mxu0 %v9671_v27  ;;  %v9730_v27 = vcombine.high %v1611_v40, %v1615_v38  ;;  %v1655_v59 = vld [vmem:[#allocation12 + $0x8e8] sm:$0xff] }
 0x4b7   :  { %6336 = vmatpush1.bf16.msra.mxu1 %v9673_v14  ;;  %6079 = vmatprep.subr.bf16.mxu0 %v9680_v55  ;;  %v1618_v14 = vld [vmem:[#allocation12 + $0x7c0] sm:$0xff]  ;;  %v1663_v24 = vld [vmem:[#allocation12 + $0x928] sm:$0xff] }
 0x4b8   :  { %6337 = vmatprep.subr.bf16.mxu1 %v9682_v46  ;;  %v1622_v55 = vld [vmem:[#allocation12 + $0x7e0] sm:$0xff]  ;;  %v1619_v46 = vld [vmem:[#allocation12 + $0x7c8] sm:$0xff] }
 0x4b9   :  { %v9736_v30 = vcombine.high %v1618_v14, %v1622_v55  ;;  %v9735_v10 = vcombine.low %v1618_v14, %v1622_v55  ;;  %v9737_v5 = vcombine.low %v1619_v46, %v1623_v25  ;;  %v1671_v14 = vld [vmem:[#allocation12 + $0x968] sm:$0xff] }
 0x4ba   :  { %6080 = vmatpush1.bf16.msra.mxu0 %v9679_v60  ;;  %v9738_v60 = vcombine.high %v1619_v46, %v1623_v25 }
 0x4bb   :  { %6338 = vmatpush1.bf16.msra.mxu1 %v9681_v62  ;;  %6081 = vmatprep.subr.bf16.mxu0 %v9688_v35  ;;  %v1626_v62 = vld [vmem:[#allocation12 + $0x800] sm:$0xff] }
 0x4bc   :  { %6339 = vmatprep.subr.bf16.mxu1 %v9690_v17  ;;  %v1630_v35 = vld [vmem:[#allocation12 + $0x820] sm:$0xff]  ;;  %v1627_v17 = vld [vmem:[#allocation12 + $0x808] sm:$0xff] }
 0x4bd   :  { %v9744_v23 = vcombine.high %v1626_v62, %v1630_v35  ;;  %v9743_v32 = vcombine.low %v1626_v62, %v1630_v35  ;;  %v9745_v50 = vcombine.low %v1627_v17, %v1631_v1  ;;  %v1679_v62 = vld [vmem:[#allocation12 + $0x9a8] sm:$0xff] }
 0x4be   :  { %6082 = vmatpush1.bf16.msra.mxu0 %v9687_v26  ;;  %v9746_v26 = vcombine.high %v1627_v17, %v1631_v1 }
 0x4bf   :  { %6340 = vmatpush1.bf16.msra.mxu1 %v9689_v20  ;;  %6083 = vmatprep.subr.bf16.mxu0 %v9696_v33  ;;  %v1634_v20 = vld [vmem:[#allocation12 + $0x840] sm:$0xff] }
 0x4c0   :  { %6341 = vmatprep.subr.bf16.mxu1 %v9698_v42  ;;  %v1638_v33 = vld [vmem:[#allocation12 + $0x860] sm:$0xff]  ;;  %v1635_v42 = vld [vmem:[#allocation12 + $0x848] sm:$0xff] }
 0x4c1   :  { %v9752_v47 = vcombine.high %v1634_v20, %v1638_v33  ;;  %v9751_v12 = vcombine.low %v1634_v20, %v1638_v33  ;;  %v9753_v36 = vcombine.low %v1635_v42, %v1639_v15  ;;  %v1687_v20 = vld [vmem:[#allocation12 + $0x9e8] sm:$0xff] }
 0x4c2   :  { %6084 = vmatpush1.bf16.msra.mxu0 %v9695_v41  ;;  %v9754_v41 = vcombine.high %v1635_v42, %v1639_v15 }
 0x4c3   :  { %6342 = vmatpush1.bf16.msra.mxu1 %v9697_v11  ;;  %6085 = vmatprep.subr.bf16.mxu0 %v9704_v21  ;;  %v1642_v11 = vld [vmem:[#allocation12 + $0x880] sm:$0xff] }
 0x4c4   :  { %6343 = vmatprep.subr.bf16.mxu1 %v9706_v48  ;;  %v1646_v21 = vld [vmem:[#allocation12 + $0x8a0] sm:$0xff]  ;;  %v1643_v48 = vld [vmem:[#allocation12 + $0x888] sm:$0xff] }
 0x4c5   :  { %v9760_v51 = vcombine.high %v1642_v11, %v1646_v21  ;;  %v9759_v9 = vcombine.low %v1642_v11, %v1646_v21  ;;  %v9761_v43 = vcombine.low %v1643_v48, %v1647_v54  ;;  %v1695_v11 = vld [vmem:[#allocation12 + $0xa28] sm:$0xff] }
 0x4c6   :  { %6086 = vmatpush1.bf16.msra.mxu0 %v9703_v53  ;;  %v9762_v53 = vcombine.high %v1643_v48, %v1647_v54 }
 0x4c7   :  { %6344 = vmatpush1.bf16.msra.mxu1 %v9705_v13  ;;  %6087 = vmatprep.subr.bf16.mxu0 %v9712_v28  ;;  %v1650_v13 = vld [vmem:[#allocation12 + $0x8c0] sm:$0xff] }
 0x4c8   :  { %6345 = vmatprep.subr.bf16.mxu1 %v9714_v58  ;;  %v1654_v28 = vld [vmem:[#allocation12 + $0x8e0] sm:$0xff]  ;;  %v1651_v58 = vld [vmem:[#allocation12 + $0x8c8] sm:$0xff] }
 0x4c9   :  { %v9768_v52 = vcombine.high %v1650_v13, %v1654_v28  ;;  %v9767_v3 = vcombine.low %v1650_v13, %v1654_v28  ;;  %v9769_v40 = vcombine.low %v1651_v58, %v1655_v59  ;;  %v1703_v13 = vld [vmem:[#allocation12 + $0xa68] sm:$0xff] }
 0x4ca   :  { %6088 = vmatpush1.bf16.msra.mxu0 %v9711_v63  ;;  %v9770_v63 = vcombine.high %v1651_v58, %v1655_v59 }
 0x4cb   :  { %6346 = vmatpush1.bf16.msra.mxu1 %v9713_v56  ;;  %6089 = vmatprep.subr.bf16.mxu0 %v9720_v39  ;;  %v1658_v56 = vld [vmem:[#allocation12 + $0x900] sm:$0xff] }
 0x4cc   :  { %6347 = vmatprep.subr.bf16.mxu1 %v9722_v8  ;;  %v1662_v39 = vld [vmem:[#allocation12 + $0x920] sm:$0xff]  ;;  %v1659_v8 = vld [vmem:[#allocation12 + $0x908] sm:$0xff] }
 0x4cd   :  { %v9776_v38 = vcombine.high %v1658_v56, %v1662_v39  ;;  %v9775_v55 = vcombine.low %v1658_v56, %v1662_v39  ;;  %v9777_v46 = vcombine.low %v1659_v8, %v1663_v24  ;;  %v1711_v56 = vld [vmem:[#allocation12 + $0xaa8] sm:$0xff] }
 0x4ce   :  { %6090 = vmatpush1.bf16.msra.mxu0 %v9719_v4  ;;  %v9778_v4 = vcombine.high %v1659_v8, %v1663_v24 }
 0x4cf   :  { %6348 = vmatpush1.bf16.msra.mxu1 %v9721_v34  ;;  %6091 = vmatprep.subr.bf16.mxu0 %v9728_v57  ;;  %v1666_v34 = vld [vmem:[#allocation12 + $0x940] sm:$0xff] }
 0x4d0   :  { %6349 = vmatprep.subr.bf16.mxu1 %v9730_v27  ;;  %v1670_v57 = vld [vmem:[#allocation12 + $0x960] sm:$0xff]  ;;  %v1667_v27 = vld [vmem:[#allocation12 + $0x948] sm:$0xff] }
 0x4d1   :  { %v9784_v25 = vcombine.high %v1666_v34, %v1670_v57  ;;  %v9783_v35 = vcombine.low %v1666_v34, %v1670_v57  ;;  %v9785_v17 = vcombine.low %v1667_v27, %v1671_v14  ;;  %v1719_v34 = vld [vmem:[#allocation12 + $0xae8] sm:$0xff] }
 0x4d2   :  { %6092 = vmatpush1.bf16.msra.mxu0 %v9727_v0  ;;  %v9786_v0 = vcombine.high %v1667_v27, %v1671_v14 }
 0x4d3   :  { %6350 = vmatpush1.bf16.msra.mxu1 %v9729_v6  ;;  %6093 = vmatprep.subr.bf16.mxu0 %v9736_v30  ;;  %v1674_v6 = vld [vmem:[#allocation12 + $0x980] sm:$0xff] }
 0x4d4   :  { %6351 = vmatprep.subr.bf16.mxu1 %v9738_v60  ;;  %v1678_v30 = vld [vmem:[#allocation12 + $0x9a0] sm:$0xff]  ;;  %v1675_v60 = vld [vmem:[#allocation12 + $0x988] sm:$0xff] }
 0x4d5   :  { %v9792_v1 = vcombine.high %v1674_v6, %v1678_v30  ;;  %v9791_v33 = vcombine.low %v1674_v6, %v1678_v30  ;;  %v9793_v42 = vcombine.low %v1675_v60, %v1679_v62  ;;  %v1727_v6 = vld [vmem:[#allocation12 + $0xb28] sm:$0xff] }
 0x4d6   :  { %6094 = vmatpush1.bf16.msra.mxu0 %v9735_v10  ;;  %v9794_v10 = vcombine.high %v1675_v60, %v1679_v62 }
 0x4d7   :  { %6352 = vmatpush1.bf16.msra.mxu1 %v9737_v5  ;;  %6106 = vmatprep.subr.bf16.mxu0 %v9744_v23  ;;  %v1682_v5 = vld [vmem:[#allocation12 + $0x9c0] sm:$0xff] }
 0x4d8   :  { %6364 = vmatprep.subr.bf16.mxu1 %v9746_v26  ;;  %v1686_v23 = vld [vmem:[#allocation12 + $0x9e0] sm:$0xff]  ;;  %v1683_v26 = vld [vmem:[#allocation12 + $0x9c8] sm:$0xff] }
 0x4d9   :  { %6096 = vmatmul.mubr.bf16.vlgmr.msra.gmra.mrb[12].mxu0 %v12485_v29  ;;  %v9800_v15 = vcombine.high %v1682_v5, %v1686_v23  ;;  %v9799_v21 = vcombine.low %v1682_v5, %v1686_v23  ;;  %v9801_v48 = vcombine.low %v1683_v26, %v1687_v20  ;;  %v1735_v5 = vld [vmem:[#allocation12 + $0xb68] sm:$0xff] }
 0x4da   :  { %6354 = vmatmul.mubr.bf16.vlgmr.msra.gmra.mrb[12].mxu1 %v12485_v29  ;;  %6107 = vmatpush1.bf16.msra.mxu0 %v9743_v32  ;;  %v9802_v32 = vcombine.high %v1683_v26, %v1687_v20 }
 0x4db   :  { %6138 = vmatprep.mubr.bf16.mxu0 %v12491_v16  ;;  %6365 = vmatpush1.bf16.msra.mxu1 %v9745_v50  ;;  %v1690_v50 = vld [vmem:[#allocation12 + $0xa00] sm:$0xff] }
 0x4dc   :  { %6396 = vmatprep.mubr.bf16.mxu1 %v12491_v16  ;;  %6108 = vmatprep.subr.bf16.mxu0 %v9752_v47  ;;  %v1694_v47 = vld [vmem:[#allocation12 + $0xa20] sm:$0xff] }
 0x4dd   :  { %6366 = vmatprep.subr.bf16.mxu1 %v9754_v41  ;;  %v1691_v41 = vld [vmem:[#allocation12 + $0xa08] sm:$0xff]  ;;  %v9808_v54 = vcombine.high %v1690_v50, %v1694_v47  ;;  %v9807_v28 = vcombine.low %v1690_v50, %v1694_v47 }
 0x4de   :  { %6109 = vmatpush1.bf16.msra.mxu0 %v9751_v12  ;;  %v9810_v12 = vcombine.high %v1691_v41, %v1695_v11  ;;  %v9809_v58 = vcombine.low %v1691_v41, %v1695_v11  ;;  %v1743_v50 = vld [vmem:[#allocation12 + $0xba8] sm:$0xff] }
 0x4df   :  { %6367 = vmatpush1.bf16.msra.mxu1 %v9753_v36  ;;  %6110 = vmatprep.subr.bf16.mxu0 %v9760_v51  ;;  %v1698_v36 = vld [vmem:[#allocation12 + $0xa40] sm:$0xff] }
 0x4e0   :  { %6368 = vmatprep.subr.bf16.mxu1 %v9762_v53  ;;  %v1702_v51 = vld [vmem:[#allocation12 + $0xa60] sm:$0xff]  ;;  %v1699_v53 = vld [vmem:[#allocation12 + $0xa48] sm:$0xff] }
 0x4e1   :  { %v9816_v59 = vcombine.high %v1698_v36, %v1702_v51  ;;  %v9815_v39 = vcombine.low %v1698_v36, %v1702_v51  ;;  %v9817_v8 = vcombine.low %v1699_v53, %v1703_v13  ;;  %v1751_v36 = vld [vmem:[#allocation12 + $0xbe8] sm:$0xff] }
 0x4e2   :  { %6111 = vmatpush1.bf16.msra.mxu0 %v9759_v9  ;;  %v9818_v9 = vcombine.high %v1699_v53, %v1703_v13 }
 0x4e3   :  { %6369 = vmatpush1.bf16.msra.mxu1 %v9761_v43  ;;  %6112 = vmatprep.subr.bf16.mxu0 %v9768_v52  ;;  %v1706_v43 = vld [vmem:[#allocation12 + $0xa80] sm:$0xff] }
 0x4e4   :  { %6370 = vmatprep.subr.bf16.mxu1 %v9770_v63  ;;  %v1710_v52 = vld [vmem:[#allocation12 + $0xaa0] sm:$0xff]  ;;  %v1707_v63 = vld [vmem:[#allocation12 + $0xa88] sm:$0xff] }
 0x4e5   :  { %v9824_v24 = vcombine.high %v1706_v43, %v1710_v52  ;;  %v9823_v57 = vcombine.low %v1706_v43, %v1710_v52  ;;  %v9825_v27 = vcombine.low %v1707_v63, %v1711_v56  ;;  %v1759_v43 = vld [vmem:[#allocation12 + $0xc28] sm:$0xff] }
 0x4e6   :  { %6113 = vmatpush1.bf16.msra.mxu0 %v9767_v3  ;;  %v9826_v3 = vcombine.high %v1707_v63, %v1711_v56 }
 0x4e7   :  { %6371 = vmatpush1.bf16.msra.mxu1 %v9769_v40  ;;  %6114 = vmatprep.subr.bf16.mxu0 %v9776_v38  ;;  %v1714_v40 = vld [vmem:[#allocation12 + $0xac0] sm:$0xff] }
 0x4e8   :  { %6372 = vmatprep.subr.bf16.mxu1 %v9778_v4  ;;  %v1718_v38 = vld [vmem:[#allocation12 + $0xae0] sm:$0xff]  ;;  %v1715_v4 = vld [vmem:[#allocation12 + $0xac8] sm:$0xff] }
 0x4e9   :  { %v9832_v14 = vcombine.high %v1714_v40, %v1718_v38  ;;  %v9831_v30 = vcombine.low %v1714_v40, %v1718_v38  ;;  %v9833_v60 = vcombine.low %v1715_v4, %v1719_v34  ;;  %v1763_v40 = vld [vmem:[#allocation12 + $0xc48] sm:$0xff] }
 0x4ea   :  { %6115 = vmatpush1.bf16.msra.mxu0 %v9775_v55  ;;  %v9834_v55 = vcombine.high %v1715_v4, %v1719_v34  ;;  %v1767_v38 = vld [vmem:[#allocation12 + $0xc68] sm:$0xff] }
 0x4eb   :  { %6373 = vmatpush1.bf16.msra.mxu1 %v9777_v46  ;;  %6116 = vmatprep.subr.bf16.mxu0 %v9784_v25  ;;  %v1722_v46 = vld [vmem:[#allocation12 + $0xb00] sm:$0xff] }
 0x4ec   :  { %6374 = vmatprep.subr.bf16.mxu1 %v9786_v0  ;;  %v1726_v25 = vld [vmem:[#allocation12 + $0xb20] sm:$0xff]  ;;  %v1723_v0 = vld [vmem:[#allocation12 + $0xb08] sm:$0xff] }
 0x4ed   :  { %v9840_v62 = vcombine.high %v1722_v46, %v1726_v25  ;;  %v9839_v23 = vcombine.low %v1722_v46, %v1726_v25  ;;  %v9841_v26 = vcombine.low %v1723_v0, %v1727_v6  ;;  %v1775_v46 = vld [vmem:[#allocation12 + $0xca8] sm:$0xff] }
 0x4ee   :  { %6117 = vmatpush1.bf16.msra.mxu0 %v9783_v35  ;;  %v9842_v35 = vcombine.high %v1723_v0, %v1727_v6  ;;  %v9881_v0 = vcombine.low %v1763_v40, %v1767_v38 }
 0x4ef   :  { %6375 = vmatpush1.bf16.msra.mxu1 %v9785_v17  ;;  %6118 = vmatprep.subr.bf16.mxu0 %v9792_v1  ;;  %v1730_v17 = vld [vmem:[#allocation12 + $0xb40] sm:$0xff] }
 0x4f0   :  { %6376 = vmatprep.subr.bf16.mxu1 %v9794_v10  ;;  %v1734_v1 = vld [vmem:[#allocation12 + $0xb60] sm:$0xff]  ;;  %v1731_v10 = vld [vmem:[#allocation12 + $0xb48] sm:$0xff] }
 0x4f1   :  { %v9848_v20 = vcombine.high %v1730_v17, %v1734_v1  ;;  %v9847_v47 = vcombine.low %v1730_v17, %v1734_v1  ;;  %v9849_v41 = vcombine.low %v1731_v10, %v1735_v5  ;;  %v1783_v17 = vld [vmem:[#allocation12 + $0xce8] sm:$0xff] }
 0x4f2   :  { %6119 = vmatpush1.bf16.msra.mxu0 %v9791_v33  ;;  %v9850_v33 = vcombine.high %v1731_v10, %v1735_v5 }
 0x4f3   :  { %6377 = vmatpush1.bf16.msra.mxu1 %v9793_v42  ;;  %6120 = vmatprep.subr.bf16.mxu0 %v9800_v15  ;;  %v1738_v42 = vld [vmem:[#allocation12 + $0xb80] sm:$0xff] }
 0x4f4   :  { %6378 = vmatprep.subr.bf16.mxu1 %v9802_v32  ;;  %v1742_v15 = vld [vmem:[#allocation12 + $0xba0] sm:$0xff]  ;;  %v1739_v32 = vld [vmem:[#allocation12 + $0xb88] sm:$0xff] }
 0x4f5   :  { %v9856_v11 = vcombine.high %v1738_v42, %v1742_v15  ;;  %v9855_v51 = vcombine.low %v1738_v42, %v1742_v15  ;;  %v9857_v53 = vcombine.low %v1739_v32, %v1743_v50  ;;  %v1791_v42 = vld [vmem:[#allocation12 + $0xd28] sm:$0xff] }
 0x4f6   :  { %6121 = vmatpush1.bf16.msra.mxu0 %v9799_v21  ;;  %v9858_v21 = vcombine.high %v1739_v32, %v1743_v50 }
 0x4f7   :  { %6379 = vmatpush1.bf16.msra.mxu1 %v9801_v48  ;;  %6122 = vmatprep.subr.bf16.mxu0 %v9808_v54  ;;  %v1746_v48 = vld [vmem:[#allocation12 + $0xbc0] sm:$0xff] }
 0x4f8   :  { %6380 = vmatprep.subr.bf16.mxu1 %v9810_v12  ;;  %v1750_v54 = vld [vmem:[#allocation12 + $0xbe0] sm:$0xff]  ;;  %v1747_v12 = vld [vmem:[#allocation12 + $0xbc8] sm:$0xff] }
 0x4f9   :  { %v9864_v13 = vcombine.high %v1746_v48, %v1750_v54  ;;  %v9863_v52 = vcombine.low %v1746_v48, %v1750_v54  ;;  %v9865_v63 = vcombine.low %v1747_v12, %v1751_v36  ;;  %v1799_v48 = vld [vmem:[#allocation12 + $0xd68] sm:$0xff] }
 0x4fa   :  { %6123 = vmatpush1.bf16.msra.mxu0 %v9807_v28  ;;  %v9866_v28 = vcombine.high %v1747_v12, %v1751_v36 }
 0x4fb   :  { %6381 = vmatpush1.bf16.msra.mxu1 %v9809_v58  ;;  %6124 = vmatprep.subr.bf16.mxu0 %v9816_v59  ;;  %v1754_v58 = vld [vmem:[#allocation12 + $0xc00] sm:$0xff] }
 0x4fc   :  { %6382 = vmatprep.subr.bf16.mxu1 %v9818_v9  ;;  %v1758_v59 = vld [vmem:[#allocation12 + $0xc20] sm:$0xff]  ;;  %v1755_v9 = vld [vmem:[#allocation12 + $0xc08] sm:$0xff] }
 0x4fd   :  { %v9872_v56 = vcombine.high %v1754_v58, %v1758_v59  ;;  %v9873_v4 = vcombine.low %v1755_v9, %v1759_v43 }
 0x4fe   :  { %6125 = vmatpush1.bf16.msra.mxu0 %v9815_v39  ;;  %v9874_v39 = vcombine.high %v1755_v9, %v1759_v43 }
 0x4ff   :  { %6383 = vmatpush1.bf16.msra.mxu1 %v9817_v8  ;;  %6126 = vmatprep.subr.bf16.mxu0 %v9824_v24  ;;  %v1762_v8 = vld [vmem:[#allocation12 + $0xc40] sm:$0xff] }
 0x500   :  { %6384 = vmatprep.subr.bf16.mxu1 %v9826_v3  ;;  %v1766_v24 = vld [vmem:[#allocation12 + $0xc60] sm:$0xff]  ;;  %v9871_v3 = vcombine.low %v1754_v58, %v1758_v59  ;;  %v1807_v58 = vld [vmem:[#allocation12 + $0xda8] sm:$0xff] }
 0x501   :  { %v9880_v34 = vcombine.high %v1762_v8, %v1766_v24  ;;  %v9879_v25 = vcombine.low %v1762_v8, %v1766_v24  ;;  %v1815_v8 = vld [vmem:[#allocation12 + $0xde8] sm:$0xff] }
 0x502   :  { %6127 = vmatpush1.bf16.msra.mxu0 %v9823_v57  ;;  %v1770_v57 = vld [vmem:[#allocation12 + $0xc80] sm:$0xff] }
 0x503   :  { %6385 = vmatpush1.bf16.msra.mxu1 %v9825_v27  ;;  %6128 = vmatprep.subr.bf16.mxu0 %v9832_v14  ;;  %v1774_v27 = vld [vmem:[#allocation12 + $0xca0] sm:$0xff]  ;;  %v9882_v14 = vcombine.high %v1763_v40, %v1767_v38 }
 0x504   :  { %6386 = vmatprep.subr.bf16.mxu1 %v9834_v55  ;;  %v1771_v55 = vld [vmem:[#allocation12 + $0xc88] sm:$0xff]  ;;  %v9888_v6 = vcombine.high %v1770_v57, %v1774_v27  ;;  %v9887_v1 = vcombine.low %v1770_v57, %v1774_v27 }
 0x505   :  { %v9889_v10 = vcombine.low %v1771_v55, %v1775_v46  ;;  %v1819_v57 = vld [vmem:[#allocation12 + $0xe08] sm:$0xff] }
 0x506   :  { %6129 = vmatpush1.bf16.msra.mxu0 %v9831_v30  ;;  %v9890_v30 = vcombine.high %v1771_v55, %v1775_v46  ;;  %v1823_v27 = vld [vmem:[#allocation12 + $0xe28] sm:$0xff] }
 0x507   :  { %6387 = vmatpush1.bf16.msra.mxu1 %v9833_v60  ;;  %6130 = vmatprep.subr.bf16.mxu0 %v9840_v62  ;;  %v1778_v60 = vld [vmem:[#allocation12 + $0xcc0] sm:$0xff] }
 0x508   :  { %6388 = vmatprep.subr.bf16.mxu1 %v9842_v35  ;;  %v1782_v62 = vld [vmem:[#allocation12 + $0xce0] sm:$0xff]  ;;  %v1779_v35 = vld [vmem:[#allocation12 + $0xcc8] sm:$0xff] }
 0x509   :  { %v9896_v5 = vcombine.high %v1778_v60, %v1782_v62  ;;  %v9895_v15 = vcombine.low %v1778_v60, %v1782_v62  ;;  %v9897_v32 = vcombine.low %v1779_v35, %v1783_v17  ;;  %v1831_v60 = vld [vmem:[#allocation12 + $0xe68] sm:$0xff] }
 0x50a   :  { %6131 = vmatpush1.bf16.msra.mxu0 %v9839_v23  ;;  %v9898_v23 = vcombine.high %v1779_v35, %v1783_v17  ;;  %v9937_v35 = vcombine.low %v1819_v57, %v1823_v27 }
 0x50b   :  { %6389 = vmatpush1.bf16.msra.mxu1 %v9841_v26  ;;  %6132 = vmatprep.subr.bf16.mxu0 %v9848_v20  ;;  %v1786_v26 = vld [vmem:[#allocation12 + $0xd00] sm:$0xff] }
 0x50c   :  { %6390 = vmatprep.subr.bf16.mxu1 %v9850_v33  ;;  %v1790_v20 = vld [vmem:[#allocation12 + $0xd20] sm:$0xff]  ;;  %v1787_v33 = vld [vmem:[#allocation12 + $0xd08] sm:$0xff] }
 0x50d   :  { %v9904_v50 = vcombine.high %v1786_v26, %v1790_v20  ;;  %v9903_v54 = vcombine.low %v1786_v26, %v1790_v20  ;;  %v9905_v12 = vcombine.low %v1787_v33, %v1791_v42  ;;  %v1839_v26 = vld [vmem:[#allocation12 + $0xea8] sm:$0xff] }
 0x50e   :  { %6133 = vmatpush1.bf16.msra.mxu0 %v9847_v47  ;;  %v9906_v47 = vcombine.high %v1787_v33, %v1791_v42 }
 0x50f   :  { %6391 = vmatpush1.bf16.msra.mxu1 %v9849_v41  ;;  %6134 = vmatprep.subr.bf16.mxu0 %v9856_v11  ;;  %v1794_v41 = vld [vmem:[#allocation12 + $0xd40] sm:$0xff] }
 0x510   :  { %6392 = vmatprep.subr.bf16.mxu1 %v9858_v21  ;;  %v1798_v11 = vld [vmem:[#allocation12 + $0xd60] sm:$0xff]  ;;  %v1795_v21 = vld [vmem:[#allocation12 + $0xd48] sm:$0xff] }
 0x511   :  { %v9912_v36 = vcombine.high %v1794_v41, %v1798_v11  ;;  %v9911_v59 = vcombine.low %v1794_v41, %v1798_v11  ;;  %v9913_v9 = vcombine.low %v1795_v21, %v1799_v48  ;;  %v1847_v41 = vld [vmem:[#allocation12 + $0xee8] sm:$0xff] }
 0x512   :  { %6135 = vmatpush1.bf16.msra.mxu0 %v9855_v51  ;;  %v9914_v51 = vcombine.high %v1795_v21, %v1799_v48 }
 0x513   :  { %6393 = vmatpush1.bf16.msra.mxu1 %v9857_v53  ;;  %6136 = vmatprep.subr.bf16.mxu0 %v9864_v13  ;;  %v1802_v53 = vld [vmem:[#allocation12 + $0xd80] sm:$0xff] }
 0x514   :  { %6394 = vmatprep.subr.bf16.mxu1 %v9866_v28  ;;  %v1806_v13 = vld [vmem:[#allocation12 + $0xda0] sm:$0xff]  ;;  %v1803_v28 = vld [vmem:[#allocation12 + $0xd88] sm:$0xff] }
 0x515   :  { %v9920_v43 = vcombine.high %v1802_v53, %v1806_v13  ;;  %v9919_v24 = vcombine.low %v1802_v53, %v1806_v13  ;;  %v1855_v53 = vld [vmem:[#allocation12 + $0xf28] sm:$0xff] }
 0x516   :  { %6137 = vmatpush1.bf16.msra.mxu0 %v9863_v52  ;;  %v9922_v52 = vcombine.high %v1803_v28, %v1807_v58 }
 0x517   :  { %6395 = vmatpush1.bf16.msra.mxu1 %v9865_v63  ;;  %6149 = vmatprep.subr.bf16.mxu0 %v9872_v56  ;;  %v1810_v63 = vld [vmem:[#allocation12 + $0xdc0] sm:$0xff] }
 0x518   :  { %6407 = vmatprep.subr.bf16.mxu1 %v9874_v39  ;;  %v1814_v56 = vld [vmem:[#allocation12 + $0xde0] sm:$0xff]  ;;  %v1811_v39 = vld [vmem:[#allocation12 + $0xdc8] sm:$0xff] }
 0x519   :  { %6139 = vmatmul.mubr.bf16.vlgmr.msra.gmra.mrb[12].mxu0 %v12523_v22  ;;  %v9928_v40 = vcombine.high %v1810_v63, %v1814_v56  ;;  %v9930_v38 = vcombine.high %v1811_v39, %v1815_v8  ;;  %v9929_v55 = vcombine.low %v1811_v39, %v1815_v8 }
 0x51a   :  { %6397 = vmatmul.mubr.bf16.vlgmr.msra.gmra.mrb[12].mxu1 %v12523_v22  ;;  %6150 = vmatpush1.bf16.msra.mxu0 %v9871_v3  ;;  %v9921_v3 = vcombine.low %v1803_v28, %v1807_v58 }
 0x51b   :  { %6181 = vmatprep.mubr.bf16.mxu0 %v12532_v18  ;;  %6408 = vmatpush1.bf16.msra.mxu1 %v9873_v4  ;;  %v1818_v4 = vld [vmem:[#allocation12 + $0xe00] sm:$0xff] }
 0x51c   :  { %6439 = vmatprep.mubr.bf16.mxu1 %v12532_v18  ;;  %6151 = vmatprep.subr.bf16.mxu0 %v9880_v34  ;;  %v1822_v34 = vld [vmem:[#allocation12 + $0xe20] sm:$0xff] }
 0x51d   :  { %6409 = vmatprep.subr.bf16.mxu1 %v9882_v14  ;;  %v9927_v14 = vcombine.low %v1810_v63, %v1814_v56  ;;  %v9936_v46 = vcombine.high %v1818_v4, %v1822_v34  ;;  %v9935_v62 = vcombine.low %v1818_v4, %v1822_v34  ;;  %v1863_v63 = vld [vmem:[#allocation12 + $0xf68] sm:$0xff] }
 0x51e   :  { %6152 = vmatpush1.bf16.msra.mxu0 %v9879_v25  ;;  %v9938_v25 = vcombine.high %v1819_v57, %v1823_v27  ;;  %v1871_v4 = vld [vmem:[#allocation12 + $0xfa8] sm:$0xff] }
 0x51f   :  { %6410 = vmatpush1.bf16.msra.mxu1 %v9881_v0  ;;  %6153 = vmatprep.subr.bf16.mxu0 %v9888_v6  ;;  %v1826_v0 = vld [vmem:[#allocation12 + $0xe40] sm:$0xff] }
 0x520   :  { %6411 = vmatprep.subr.bf16.mxu1 %v9890_v30  ;;  %v1830_v6 = vld [vmem:[#allocation12 + $0xe60] sm:$0xff]  ;;  %v1827_v30 = vld [vmem:[#allocation12 + $0xe48] sm:$0xff] }
 0x521   :  { %v9944_v17 = vcombine.high %v1826_v0, %v1830_v6  ;;  %v9943_v20 = vcombine.low %v1826_v0, %v1830_v6  ;;  %v9945_v33 = vcombine.low %v1827_v30, %v1831_v60  ;;  %v1879_v0 = vld [vmem:[#allocation12 + $0xfe8] sm:$0xff] }
 0x522   :  { %6154 = vmatpush1.bf16.msra.mxu0 %v9887_v1  ;;  %v9946_v1 = vcombine.high %v1827_v30, %v1831_v60 }
 0x523   :  { %6412 = vmatpush1.bf16.msra.mxu1 %v9889_v10  ;;  %6155 = vmatprep.subr.bf16.mxu0 %v9896_v5  ;;  %v1834_v10 = vld [vmem:[#allocation12 + $0xe80] sm:$0xff] }
 0x524   :  { %6413 = vmatprep.subr.bf16.mxu1 %v9898_v23  ;;  %v1838_v5 = vld [vmem:[#allocation12 + $0xea0] sm:$0xff]  ;;  %v1835_v23 = vld [vmem:[#allocation12 + $0xe88] sm:$0xff] }
 0x525   :  { %v9952_v42 = vcombine.high %v1834_v10, %v1838_v5  ;;  %v9951_v11 = vcombine.low %v1834_v10, %v1838_v5  ;;  %v9953_v21 = vcombine.low %v1835_v23, %v1839_v26  ;;  %v1887_v10 = vld [vmem:[#allocation12 + $0x1028] sm:$0xff] }
 0x526   :  { %6156 = vmatpush1.bf16.msra.mxu0 %v9895_v15  ;;  %v9954_v15 = vcombine.high %v1835_v23, %v1839_v26 }
 0x527   :  { %6414 = vmatpush1.bf16.msra.mxu1 %v9897_v32  ;;  %6157 = vmatprep.subr.bf16.mxu0 %v9904_v50  ;;  %v1842_v32 = vld [vmem:[#allocation12 + $0xec0] sm:$0xff] }
 0x528   :  { %6415 = vmatprep.subr.bf16.mxu1 %v9906_v47  ;;  %v1846_v50 = vld [vmem:[#allocation12 + $0xee0] sm:$0xff]  ;;  %v1843_v47 = vld [vmem:[#allocation12 + $0xec8] sm:$0xff] }
 0x529   :  { %v9960_v48 = vcombine.high %v1842_v32, %v1846_v50  ;;  %v9959_v13 = vcombine.low %v1842_v32, %v1846_v50  ;;  %v9961_v28 = vcombine.low %v1843_v47, %v1847_v41  ;;  %v1891_v32 = vld [vmem:[#allocation12 + $0x1048] sm:$0xff] }
 0x52a   :  { %6158 = vmatpush1.bf16.msra.mxu0 %v9903_v54  ;;  %v9962_v54 = vcombine.high %v1843_v47, %v1847_v41  ;;  %v1895_v50 = vld [vmem:[#allocation12 + $0x1068] sm:$0xff] }
 0x52b   :  { %6416 = vmatpush1.bf16.msra.mxu1 %v9905_v12  ;;  %6159 = vmatprep.subr.bf16.mxu0 %v9912_v36  ;;  %v1850_v12 = vld [vmem:[#allocation12 + $0xf00] sm:$0xff] }
 0x52c   :  { %6417 = vmatprep.subr.bf16.mxu1 %v9914_v51  ;;  %v1854_v36 = vld [vmem:[#allocation12 + $0xf20] sm:$0xff]  ;;  %v1851_v51 = vld [vmem:[#allocation12 + $0xf08] sm:$0xff] }
 0x52d   :  { %v9968_v58 = vcombine.high %v1850_v12, %v1854_v36  ;;  %v9967_v56 = vcombine.low %v1850_v12, %v1854_v36  ;;  %v9969_v39 = vcombine.low %v1851_v51, %v1855_v53  ;;  %v1903_v12 = vld [vmem:[#allocation12 + $0x10a8] sm:$0xff] }
 0x52e   :  { %6160 = vmatpush1.bf16.msra.mxu0 %v9911_v59  ;;  %v9970_v59 = vcombine.high %v1851_v51, %v1855_v53  ;;  %v10009_v51 = vcombine.low %v1891_v32, %v1895_v50 }
 0x52f   :  { %6418 = vmatpush1.bf16.msra.mxu1 %v9913_v9  ;;  %6161 = vmatprep.subr.bf16.mxu0 %v9920_v43  ;;  %v1858_v9 = vld [vmem:[#allocation12 + $0xf40] sm:$0xff] }
 0x530   :  { %6419 = vmatprep.subr.bf16.mxu1 %v9922_v52  ;;  %v1862_v43 = vld [vmem:[#allocation12 + $0xf60] sm:$0xff]  ;;  %v1859_v52 = vld [vmem:[#allocation12 + $0xf48] sm:$0xff] }
 0x531   :  { %v9976_v8 = vcombine.high %v1858_v9, %v1862_v43  ;;  %v9975_v34 = vcombine.low %v1858_v9, %v1862_v43  ;;  %v9977_v57 = vcombine.low %v1859_v52, %v1863_v63  ;;  %v1911_v9 = vld [vmem:[#allocation12 + $0x10e8] sm:$0xff] }
 0x532   :  { %6162 = vmatpush1.bf16.msra.mxu0 %v9919_v24  ;;  %v9978_v24 = vcombine.high %v1859_v52, %v1863_v63 }
 0x533   :  { %6420 = vmatpush1.bf16.msra.mxu1 %v9921_v3  ;;  %6163 = vmatprep.subr.bf16.mxu0 %v9928_v40  ;;  %v1866_v3 = vld [vmem:[#allocation12 + $0xf80] sm:$0xff] }
 0x534   :  { %6421 = vmatprep.subr.bf16.mxu1 %v9930_v38  ;;  %v1870_v40 = vld [vmem:[#allocation12 + $0xfa0] sm:$0xff]  ;;  %v1867_v38 = vld [vmem:[#allocation12 + $0xf88] sm:$0xff] }
 0x535   :  { %v9984_v27 = vcombine.high %v1866_v3, %v1870_v40  ;;  %v9983_v6 = vcombine.low %v1866_v3, %v1870_v40  ;;  %v9985_v30 = vcombine.low %v1867_v38, %v1871_v4  ;;  %v1919_v3 = vld [vmem:[#allocation12 + $0x1128] sm:$0xff] }
 0x536   :  { %6164 = vmatpush1.bf16.msra.mxu0 %v9927_v14  ;;  %v9986_v14 = vcombine.high %v1867_v38, %v1871_v4 }
 0x537   :  { %6422 = vmatpush1.bf16.msra.mxu1 %v9929_v55  ;;  %6165 = vmatprep.subr.bf16.mxu0 %v9936_v46  ;;  %v1874_v55 = vld [vmem:[#allocation12 + $0xfc0] sm:$0xff] }
 0x538   :  { %6423 = vmatprep.subr.bf16.mxu1 %v9938_v25  ;;  %v1878_v46 = vld [vmem:[#allocation12 + $0xfe0] sm:$0xff]  ;;  %v1875_v25 = vld [vmem:[#allocation12 + $0xfc8] sm:$0xff] }
 0x539   :  { %v9992_v60 = vcombine.high %v1874_v55, %v1878_v46  ;;  %v9991_v5 = vcombine.low %v1874_v55, %v1878_v46  ;;  %v9993_v23 = vcombine.low %v1875_v25, %v1879_v0  ;;  %v1927_v55 = vld [vmem:[#allocation12 + $0x1168] sm:$0xff] }
 0x53a   :  { %6166 = vmatpush1.bf16.msra.mxu0 %v9935_v62  ;;  %v9994_v62 = vcombine.high %v1875_v25, %v1879_v0 }
 0x53b   :  { %6424 = vmatpush1.bf16.msra.mxu1 %v9937_v35  ;;  %6167 = vmatprep.subr.bf16.mxu0 %v9944_v17  ;;  %v1882_v35 = vld [vmem:[#allocation12 + $0x1000] sm:$0xff] }
 0x53c   :  { %6425 = vmatprep.subr.bf16.mxu1 %v9946_v1  ;;  %v1886_v17 = vld [vmem:[#allocation12 + $0x1020] sm:$0xff]  ;;  %v1883_v1 = vld [vmem:[#allocation12 + $0x1008] sm:$0xff] }
 0x53d   :  { %v10000_v26 = vcombine.high %v1882_v35, %v1886_v17  ;;  %v10001_v47 = vcombine.low %v1883_v1, %v1887_v10 }
 0x53e   :  { %6168 = vmatpush1.bf16.msra.mxu0 %v9943_v20  ;;  %v10002_v20 = vcombine.high %v1883_v1, %v1887_v10 }
 0x53f   :  { %6426 = vmatpush1.bf16.msra.mxu1 %v9945_v33  ;;  %6169 = vmatprep.subr.bf16.mxu0 %v9952_v42  ;;  %v1890_v33 = vld [vmem:[#allocation12 + $0x1040] sm:$0xff] }
 0x540   :  { %6427 = vmatprep.subr.bf16.mxu1 %v9954_v15  ;;  %v1894_v42 = vld [vmem:[#allocation12 + $0x1060] sm:$0xff]  ;;  %v9999_v15 = vcombine.low %v1882_v35, %v1886_v17  ;;  %v1935_v35 = vld [vmem:[#allocation12 + $0x11a8] sm:$0xff] }
 0x541   :  { %v10008_v41 = vcombine.high %v1890_v33, %v1894_v42  ;;  %v10007_v36 = vcombine.low %v1890_v33, %v1894_v42  ;;  %v1943_v33 = vld [vmem:[#allocation12 + $0x11e8] sm:$0xff] }
 0x542   :  { %6170 = vmatpush1.bf16.msra.mxu0 %v9951_v11  ;;  %v1898_v11 = vld [vmem:[#allocation12 + $0x1080] sm:$0xff] }
 0x543   :  { %6428 = vmatpush1.bf16.msra.mxu1 %v9953_v21  ;;  %6171 = vmatprep.subr.bf16.mxu0 %v9960_v48  ;;  %v1902_v21 = vld [vmem:[#allocation12 + $0x10a0] sm:$0xff]  ;;  %v10010_v48 = vcombine.high %v1891_v32, %v1895_v50 }
 0x544   :  { %6429 = vmatprep.subr.bf16.mxu1 %v9962_v54  ;;  %v1899_v54 = vld [vmem:[#allocation12 + $0x1088] sm:$0xff]  ;;  %v10016_v53 = vcombine.high %v1898_v11, %v1902_v21  ;;  %v10015_v43 = vcombine.low %v1898_v11, %v1902_v21 }
 0x545   :  { %v10017_v52 = vcombine.low %v1899_v54, %v1903_v12  ;;  %v1947_v11 = vld [vmem:[#allocation12 + $0x1208] sm:$0xff] }
 0x546   :  { %6172 = vmatpush1.bf16.msra.mxu0 %v9959_v13  ;;  %v10018_v13 = vcombine.high %v1899_v54, %v1903_v12  ;;  %v1951_v21 = vld [vmem:[#allocation12 + $0x1228] sm:$0xff] }
 0x547   :  { %6430 = vmatpush1.bf16.msra.mxu1 %v9961_v28  ;;  %6173 = vmatprep.subr.bf16.mxu0 %v9968_v58  ;;  %v1906_v28 = vld [vmem:[#allocation12 + $0x10c0] sm:$0xff] }
 0x548   :  { %6431 = vmatprep.subr.bf16.mxu1 %v9970_v59  ;;  %v1910_v58 = vld [vmem:[#allocation12 + $0x10e0] sm:$0xff]  ;;  %v1907_v59 = vld [vmem:[#allocation12 + $0x10c8] sm:$0xff] }
 0x549   :  { %v10024_v63 = vcombine.high %v1906_v28, %v1910_v58  ;;  %v10023_v40 = vcombine.low %v1906_v28, %v1910_v58  ;;  %v10025_v38 = vcombine.low %v1907_v59, %v1911_v9  ;;  %v1959_v28 = vld [vmem:[#allocation12 + $0x1268] sm:$0xff] }
 0x54a   :  { %6174 = vmatpush1.bf16.msra.mxu0 %v9967_v56  ;;  %v10026_v56 = vcombine.high %v1907_v59, %v1911_v9  ;;  %v10065_v59 = vcombine.low %v1947_v11, %v1951_v21 }
 0x54b   :  { %6432 = vmatpush1.bf16.msra.mxu1 %v9969_v39  ;;  %6175 = vmatprep.subr.bf16.mxu0 %v9976_v8  ;;  %v1914_v39 = vld [vmem:[#allocation12 + $0x1100] sm:$0xff] }
 0x54c   :  { %6433 = vmatprep.subr.bf16.mxu1 %v9978_v24  ;;  %v1918_v8 = vld [vmem:[#allocation12 + $0x1120] sm:$0xff]  ;;  %v1915_v24 = vld [vmem:[#allocation12 + $0x1108] sm:$0xff] }
 0x54d   :  { %v10032_v4 = vcombine.high %v1914_v39, %v1918_v8  ;;  %v10031_v46 = vcombine.low %v1914_v39, %v1918_v8  ;;  %v10033_v25 = vcombine.low %v1915_v24, %v1919_v3  ;;  %v1967_v39 = vld [vmem:[#allocation12 + $0x12a8] sm:$0xff] }
 0x54e   :  { %6176 = vmatpush1.bf16.msra.mxu0 %v9975_v34  ;;  %v10034_v34 = vcombine.high %v1915_v24, %v1919_v3 }
 0x54f   :  { %6434 = vmatpush1.bf16.msra.mxu1 %v9977_v57  ;;  %6177 = vmatprep.subr.bf16.mxu0 %v9984_v27  ;;  %v1922_v57 = vld [vmem:[#allocation12 + $0x1140] sm:$0xff] }
 0x550   :  { %6435 = vmatprep.subr.bf16.mxu1 %v9986_v14  ;;  %v1926_v27 = vld [vmem:[#allocation12 + $0x1160] sm:$0xff]  ;;  %v1923_v14 = vld [vmem:[#allocation12 + $0x1148] sm:$0xff] }
 0x551   :  { %v10040_v0 = vcombine.high %v1922_v57, %v1926_v27  ;;  %v10039_v17 = vcombine.low %v1922_v57, %v1926_v27  ;;  %v10041_v1 = vcombine.low %v1923_v14, %v1927_v55  ;;  %v1975_v57 = vld [vmem:[#allocation12 + $0x12e8] sm:$0xff] }
 0x552   :  { %6178 = vmatpush1.bf16.msra.mxu0 %v9983_v6  ;;  %v10042_v6 = vcombine.high %v1923_v14, %v1927_v55 }
 0x553   :  { %6436 = vmatpush1.bf16.msra.mxu1 %v9985_v30  ;;  %6179 = vmatprep.subr.bf16.mxu0 %v9992_v60  ;;  %v1930_v30 = vld [vmem:[#allocation12 + $0x1180] sm:$0xff] }
 0x554   :  { %6437 = vmatprep.subr.bf16.mxu1 %v9994_v62  ;;  %v1934_v60 = vld [vmem:[#allocation12 + $0x11a0] sm:$0xff]  ;;  %v1931_v62 = vld [vmem:[#allocation12 + $0x1188] sm:$0xff] }
 0x555   :  { %v10048_v10 = vcombine.high %v1930_v30, %v1934_v60  ;;  %v10047_v42 = vcombine.low %v1930_v30, %v1934_v60  ;;  %v1983_v30 = vld [vmem:[#allocation12 + $0x1328] sm:$0xff] }
 0x556   :  { %6180 = vmatpush1.bf16.msra.mxu0 %v9991_v5  ;;  %v10050_v5 = vcombine.high %v1931_v62, %v1935_v35 }
 0x557   :  { %6438 = vmatpush1.bf16.msra.mxu1 %v9993_v23  ;;  %6192 = vmatprep.subr.bf16.mxu0 %v10000_v26  ;;  %v1938_v23 = vld [vmem:[#allocation12 + $0x11c0] sm:$0xff] }
 0x558   :  { %6450 = vmatprep.subr.bf16.mxu1 %v10002_v20  ;;  %v1942_v26 = vld [vmem:[#allocation12 + $0x11e0] sm:$0xff]  ;;  %v1939_v20 = vld [vmem:[#allocation12 + $0x11c8] sm:$0xff] }
 0x559   :  { %6182 = vmatmul.mubr.bf16.vlgmr.msra.gmra.mrb[12].mxu0 %v12547_v2  ;;  %v10056_v32 = vcombine.high %v1938_v23, %v1942_v26  ;;  %v10058_v50 = vcombine.high %v1939_v20, %v1943_v33  ;;  %v10057_v54 = vcombine.low %v1939_v20, %v1943_v33 }
 0x55a   :  { %6440 = vmatmul.mubr.bf16.vlgmr.msra.gmra.mrb[12].mxu1 %v12547_v2  ;;  %6193 = vmatpush1.bf16.msra.mxu0 %v9999_v15  ;;  %v10049_v15 = vcombine.low %v1931_v62, %v1935_v35 }
 0x55b   :  { %6224 = vmatprep.mubr.bf16.mxu0 %v12562_v37  ;;  %6451 = vmatpush1.bf16.msra.mxu1 %v10001_v47  ;;  %v1946_v47 = vld [vmem:[#allocation12 + $0x1200] sm:$0xff] }
 0x55c   :  { %6482 = vmatprep.mubr.bf16.mxu1 %v12562_v37  ;;  %6194 = vmatprep.subr.bf16.mxu0 %v10008_v41  ;;  %v1950_v41 = vld [vmem:[#allocation12 + $0x1220] sm:$0xff] }
 0x55d   :  { %6452 = vmatprep.subr.bf16.mxu1 %v10010_v48  ;;  %v10055_v48 = vcombine.low %v1938_v23, %v1942_v26  ;;  %v10064_v12 = vcombine.high %v1946_v47, %v1950_v41  ;;  %v10063_v58 = vcombine.low %v1946_v47, %v1950_v41  ;;  %v1991_v23 = vld [vmem:[#allocation12 + $0x1368] sm:$0xff] }
 0x55e   :  { %6195 = vmatpush1.bf16.msra.mxu0 %v10007_v36  ;;  %v10066_v36 = vcombine.high %v1947_v11, %v1951_v21  ;;  %v1999_v47 = vld [vmem:[#allocation12 + $0x13a8] sm:$0xff] }
 0x55f   :  { %6453 = vmatpush1.bf16.msra.mxu1 %v10009_v51  ;;  %6196 = vmatprep.subr.bf16.mxu0 %v10016_v53  ;;  %v1954_v51 = vld [vmem:[#allocation12 + $0x1240] sm:$0xff] }
 0x560   :  { %6454 = vmatprep.subr.bf16.mxu1 %v10018_v13  ;;  %v1958_v53 = vld [vmem:[#allocation12 + $0x1260] sm:$0xff]  ;;  %v1955_v13 = vld [vmem:[#allocation12 + $0x1248] sm:$0xff] }
 0x561   :  { %v10072_v9 = vcombine.high %v1954_v51, %v1958_v53  ;;  %v10071_v8 = vcombine.low %v1954_v51, %v1958_v53  ;;  %v10073_v24 = vcombine.low %v1955_v13, %v1959_v28  ;;  %v2007_v51 = vld [vmem:[#allocation12 + $0x13e8] sm:$0xff] }
 0x562   :  { %6197 = vmatpush1.bf16.msra.mxu0 %v10015_v43  ;;  %v10074_v43 = vcombine.high %v1955_v13, %v1959_v28 }
 0x563   :  { %6455 = vmatpush1.bf16.msra.mxu1 %v10017_v52  ;;  %6198 = vmatprep.subr.bf16.mxu0 %v10024_v63  ;;  %v1962_v52 = vld [vmem:[#allocation12 + $0x1280] sm:$0xff] }
 0x564   :  { %6456 = vmatprep.subr.bf16.mxu1 %v10026_v56  ;;  %v1966_v63 = vld [vmem:[#allocation12 + $0x12a0] sm:$0xff]  ;;  %v1963_v56 = vld [vmem:[#allocation12 + $0x1288] sm:$0xff] }
 0x565   :  { %v10080_v3 = vcombine.high %v1962_v52, %v1966_v63  ;;  %v10079_v27 = vcombine.low %v1962_v52, %v1966_v63  ;;  %v10081_v14 = vcombine.low %v1963_v56, %v1967_v39  ;;  %v2015_v52 = vld [vmem:[#allocation12 + $0x1428] sm:$0xff] }
 0x566   :  { %6199 = vmatpush1.bf16.msra.mxu0 %v10023_v40  ;;  %v10082_v40 = vcombine.high %v1963_v56, %v1967_v39 }
 0x567   :  { %6457 = vmatpush1.bf16.msra.mxu1 %v10025_v38  ;;  %6200 = vmatprep.subr.bf16.mxu0 %v10032_v4  ;;  %v1970_v38 = vld [vmem:[#allocation12 + $0x12c0] sm:$0xff] }
 0x568   :  { %6458 = vmatprep.subr.bf16.mxu1 %v10034_v34  ;;  %v1974_v4 = vld [vmem:[#allocation12 + $0x12e0] sm:$0xff]  ;;  %v1971_v34 = vld [vmem:[#allocation12 + $0x12c8] sm:$0xff] }
 0x569   :  { %v10088_v55 = vcombine.high %v1970_v38, %v1974_v4  ;;  %v10087_v60 = vcombine.low %v1970_v38, %v1974_v4  ;;  %v10089_v62 = vcombine.low %v1971_v34, %v1975_v57  ;;  %v2019_v38 = vld [vmem:[#allocation12 + $0x1448] sm:$0xff] }
 0x56a   :  { %6201 = vmatpush1.bf16.msra.mxu0 %v10031_v46  ;;  %v10090_v46 = vcombine.high %v1971_v34, %v1975_v57  ;;  %v2023_v4 = vld [vmem:[#allocation12 + $0x1468] sm:$0xff] }
 0x56b   :  { %6459 = vmatpush1.bf16.msra.mxu1 %v10033_v25  ;;  %6202 = vmatprep.subr.bf16.mxu0 %v10040_v0  ;;  %v1978_v25 = vld [vmem:[#allocation12 + $0x1300] sm:$0xff] }
 0x56c   :  { %6460 = vmatprep.subr.bf16.mxu1 %v10042_v6  ;;  %v1982_v0 = vld [vmem:[#allocation12 + $0x1320] sm:$0xff]  ;;  %v1979_v6 = vld [vmem:[#allocation12 + $0x1308] sm:$0xff] }
 0x56d   :  { %v10096_v35 = vcombine.high %v1978_v25, %v1982_v0  ;;  %v10095_v26 = vcombine.low %v1978_v25, %v1982_v0  ;;  %v10097_v20 = vcombine.low %v1979_v6, %v1983_v30  ;;  %v2031_v25 = vld [vmem:[#allocation12 + $0x14a8] sm:$0xff] }
 0x56e   :  { %6203 = vmatpush1.bf16.msra.mxu0 %v10039_v17  ;;  %v10098_v17 = vcombine.high %v1979_v6, %v1983_v30  ;;  %v10137_v6 = vcombine.low %v2019_v38, %v2023_v4 }
 0x56f   :  { %6461 = vmatpush1.bf16.msra.mxu1 %v10041_v1  ;;  %6204 = vmatprep.subr.bf16.mxu0 %v10048_v10  ;;  %v1986_v1 = vld [vmem:[#allocation12 + $0x1340] sm:$0xff] }
 0x570   :  { %6462 = vmatprep.subr.bf16.mxu1 %v10050_v5  ;;  %v1990_v10 = vld [vmem:[#allocation12 + $0x1360] sm:$0xff]  ;;  %v1987_v5 = vld [vmem:[#allocation12 + $0x1348] sm:$0xff] }
 0x571   :  { %v10104_v33 = vcombine.high %v1986_v1, %v1990_v10  ;;  %v10103_v41 = vcombine.low %v1986_v1, %v1990_v10  ;;  %v10105_v11 = vcombine.low %v1987_v5, %v1991_v23  ;;  %v2039_v1 = vld [vmem:[#allocation12 + $0x14e8] sm:$0xff] }
 0x572   :  { %6205 = vmatpush1.bf16.msra.mxu0 %v10047_v42  ;;  %v10106_v42 = vcombine.high %v1987_v5, %v1991_v23 }
 0x573   :  { %6463 = vmatpush1.bf16.msra.mxu1 %v10049_v15  ;;  %6206 = vmatprep.subr.bf16.mxu0 %v10056_v32  ;;  %v1994_v15 = vld [vmem:[#allocation12 + $0x1380] sm:$0xff] }
 0x574   :  { %6464 = vmatprep.subr.bf16.mxu1 %v10058_v50  ;;  %v1998_v32 = vld [vmem:[#allocation12 + $0x13a0] sm:$0xff]  ;;  %v1995_v50 = vld [vmem:[#allocation12 + $0x1388] sm:$0xff] }
 0x575   :  { %v10112_v21 = vcombine.high %v1994_v15, %v1998_v32  ;;  %v10111_v53 = vcombine.low %v1994_v15, %v1998_v32  ;;  %v10113_v13 = vcombine.low %v1995_v50, %v1999_v47  ;;  %v2047_v15 = vld [vmem:[#allocation12 + $0x1528] sm:$0xff] }
 0x576   :  { %6207 = vmatpush1.bf16.msra.mxu0 %v10055_v48  ;;  %v10114_v48 = vcombine.high %v1995_v50, %v1999_v47 }
 0x577   :  { %6465 = vmatpush1.bf16.msra.mxu1 %v10057_v54  ;;  %6208 = vmatprep.subr.bf16.mxu0 %v10064_v12  ;;  %v2002_v54 = vld [vmem:[#allocation12 + $0x13c0] sm:$0xff] }
 0x578   :  { %6466 = vmatprep.subr.bf16.mxu1 %v10066_v36  ;;  %v2006_v12 = vld [vmem:[#allocation12 + $0x13e0] sm:$0xff]  ;;  %v2003_v36 = vld [vmem:[#allocation12 + $0x13c8] sm:$0xff] }
 0x579   :  { %v10120_v28 = vcombine.high %v2002_v54, %v2006_v12  ;;  %v10119_v63 = vcombine.low %v2002_v54, %v2006_v12  ;;  %v10121_v56 = vcombine.low %v2003_v36, %v2007_v51  ;;  %v2055_v54 = vld [vmem:[#allocation12 + $0x1568] sm:$0xff] }
 0x57a   :  { %6209 = vmatpush1.bf16.msra.mxu0 %v10063_v58  ;;  %v10122_v58 = vcombine.high %v2003_v36, %v2007_v51 }
 0x57b   :  { %6467 = vmatpush1.bf16.msra.mxu1 %v10065_v59  ;;  %6210 = vmatprep.subr.bf16.mxu0 %v10072_v9  ;;  %v2010_v59 = vld [vmem:[#allocation12 + $0x1400] sm:$0xff] }
 0x57c   :  { %6468 = vmatprep.subr.bf16.mxu1 %v10074_v43  ;;  %v2014_v9 = vld [vmem:[#allocation12 + $0x1420] sm:$0xff]  ;;  %v2011_v43 = vld [vmem:[#allocation12 + $0x1408] sm:$0xff] }
 0x57d   :  { %v10128_v39 = vcombine.high %v2010_v59, %v2014_v9  ;;  %v10129_v34 = vcombine.low %v2011_v43, %v2015_v52 }
 0x57e   :  { %6211 = vmatpush1.bf16.msra.mxu0 %v10071_v8  ;;  %v10130_v8 = vcombine.high %v2011_v43, %v2015_v52 }
 0x57f   :  { %6469 = vmatpush1.bf16.msra.mxu1 %v10073_v24  ;;  %6212 = vmatprep.subr.bf16.mxu0 %v10080_v3  ;;  %v2018_v24 = vld [vmem:[#allocation12 + $0x1440] sm:$0xff] }
 0x580   :  { %6470 = vmatprep.subr.bf16.mxu1 %v10082_v40  ;;  %v2022_v3 = vld [vmem:[#allocation12 + $0x1460] sm:$0xff]  ;;  %v10127_v40 = vcombine.low %v2010_v59, %v2014_v9  ;;  %v2063_v59 = vld [vmem:[#allocation12 + $0x15a8] sm:$0xff] }
 0x581   :  { %v10136_v57 = vcombine.high %v2018_v24, %v2022_v3  ;;  %v10135_v0 = vcombine.low %v2018_v24, %v2022_v3  ;;  %v2071_v24 = vld [vmem:[#allocation12 + $0x15e8] sm:$0xff] }
 0x582   :  { %6213 = vmatpush1.bf16.msra.mxu0 %v10079_v27  ;;  %v2026_v27 = vld [vmem:[#allocation12 + $0x1480] sm:$0xff] }
 0x583   :  { %6471 = vmatpush1.bf16.msra.mxu1 %v10081_v14  ;;  %6214 = vmatprep.subr.bf16.mxu0 %v10088_v55  ;;  %v2030_v14 = vld [vmem:[#allocation12 + $0x14a0] sm:$0xff]  ;;  %v10138_v55 = vcombine.high %v2019_v38, %v2023_v4 }
 0x584   :  { %6472 = vmatprep.subr.bf16.mxu1 %v10090_v46  ;;  %v2027_v46 = vld [vmem:[#allocation12 + $0x1488] sm:$0xff]  ;;  %v10144_v30 = vcombine.high %v2026_v27, %v2030_v14  ;;  %v10143_v10 = vcombine.low %v2026_v27, %v2030_v14 }
 0x585   :  { %v10145_v5 = vcombine.low %v2027_v46, %v2031_v25  ;;  %v2075_v27 = vld [vmem:[#allocation12 + $0x1608] sm:$0xff] }
 0x586   :  { %6215 = vmatpush1.bf16.msra.mxu0 %v10087_v60  ;;  %v10146_v60 = vcombine.high %v2027_v46, %v2031_v25  ;;  %v2079_v14 = vld [vmem:[#allocation12 + $0x1628] sm:$0xff] }
 0x587   :  { %6473 = vmatpush1.bf16.msra.mxu1 %v10089_v62  ;;  %6216 = vmatprep.subr.bf16.mxu0 %v10096_v35  ;;  %v2034_v62 = vld [vmem:[#allocation12 + $0x14c0] sm:$0xff] }
 0x588   :  { %6474 = vmatprep.subr.bf16.mxu1 %v10098_v17  ;;  %v2038_v35 = vld [vmem:[#allocation12 + $0x14e0] sm:$0xff]  ;;  %v2035_v17 = vld [vmem:[#allocation12 + $0x14c8] sm:$0xff] }
 0x589   :  { %v10152_v23 = vcombine.high %v2034_v62, %v2038_v35  ;;  %v10151_v32 = vcombine.low %v2034_v62, %v2038_v35  ;;  %v10153_v50 = vcombine.low %v2035_v17, %v2039_v1  ;;  %v2087_v62 = vld [vmem:[#allocation12 + $0x1668] sm:$0xff] }
 0x58a   :  { %6217 = vmatpush1.bf16.msra.mxu0 %v10095_v26  ;;  %v10154_v26 = vcombine.high %v2035_v17, %v2039_v1  ;;  %v10193_v17 = vcombine.low %v2075_v27, %v2079_v14 }
 0x58b   :  { %6475 = vmatpush1.bf16.msra.mxu1 %v10097_v20  ;;  %6218 = vmatprep.subr.bf16.mxu0 %v10104_v33  ;;  %v2042_v20 = vld [vmem:[#allocation12 + $0x1500] sm:$0xff] }
 0x58c   :  { %6476 = vmatprep.subr.bf16.mxu1 %v10106_v42  ;;  %v2046_v33 = vld [vmem:[#allocation12 + $0x1520] sm:$0xff]  ;;  %v2043_v42 = vld [vmem:[#allocation12 + $0x1508] sm:$0xff] }
 0x58d   :  { %v10160_v47 = vcombine.high %v2042_v20, %v2046_v33  ;;  %v10159_v12 = vcombine.low %v2042_v20, %v2046_v33  ;;  %v10161_v36 = vcombine.low %v2043_v42, %v2047_v15  ;;  %v2095_v20 = vld [vmem:[#allocation12 + $0x16a8] sm:$0xff] }
 0x58e   :  { %6219 = vmatpush1.bf16.msra.mxu0 %v10103_v41  ;;  %v10162_v41 = vcombine.high %v2043_v42, %v2047_v15 }
 0x58f   :  { %6477 = vmatpush1.bf16.msra.mxu1 %v10105_v11  ;;  %6220 = vmatprep.subr.bf16.mxu0 %v10112_v21  ;;  %v2050_v11 = vld [vmem:[#allocation12 + $0x1540] sm:$0xff] }
 0x590   :  { %6478 = vmatprep.subr.bf16.mxu1 %v10114_v48  ;;  %v2054_v21 = vld [vmem:[#allocation12 + $0x1560] sm:$0xff]  ;;  %v2051_v48 = vld [vmem:[#allocation12 + $0x1548] sm:$0xff] }
 0x591   :  { %v10168_v51 = vcombine.high %v2050_v11, %v2054_v21  ;;  %v10167_v9 = vcombine.low %v2050_v11, %v2054_v21  ;;  %v10169_v43 = vcombine.low %v2051_v48, %v2055_v54  ;;  %v2103_v11 = vld [vmem:[#allocation12 + $0x16e8] sm:$0xff] }
 0x592   :  { %6221 = vmatpush1.bf16.msra.mxu0 %v10111_v53  ;;  %v10170_v53 = vcombine.high %v2051_v48, %v2055_v54 }
 0x593   :  { %6479 = vmatpush1.bf16.msra.mxu1 %v10113_v13  ;;  %6222 = vmatprep.subr.bf16.mxu0 %v10120_v28  ;;  %v2058_v13 = vld [vmem:[#allocation12 + $0x1580] sm:$0xff] }
 0x594   :  { %6480 = vmatprep.subr.bf16.mxu1 %v10122_v58  ;;  %v2062_v28 = vld [vmem:[#allocation12 + $0x15a0] sm:$0xff]  ;;  %v2059_v58 = vld [vmem:[#allocation12 + $0x1588] sm:$0xff] }
 0x595   :  { %v10176_v52 = vcombine.high %v2058_v13, %v2062_v28  ;;  %v10175_v3 = vcombine.low %v2058_v13, %v2062_v28  ;;  %v2111_v13 = vld [vmem:[#allocation12 + $0x1728] sm:$0xff] }
 0x596   :  { %6223 = vmatpush1.bf16.msra.mxu0 %v10119_v63  ;;  %v10178_v63 = vcombine.high %v2059_v58, %v2063_v59 }
 0x597   :  { %6481 = vmatpush1.bf16.msra.mxu1 %v10121_v56  ;;  %6235 = vmatprep.subr.bf16.mxu0 %v10128_v39  ;;  %v2066_v56 = vld [vmem:[#allocation12 + $0x15c0] sm:$0xff] }
 0x598   :  { %6493 = vmatprep.subr.bf16.mxu1 %v10130_v8  ;;  %v2070_v39 = vld [vmem:[#allocation12 + $0x15e0] sm:$0xff]  ;;  %v2067_v8 = vld [vmem:[#allocation12 + $0x15c8] sm:$0xff] }
 0x599   :  { %6225 = vmatmul.mubr.bf16.vlgmr.msra.gmra.mrb[12].mxu0 %v12564_v31  ;;  %v10184_v38 = vcombine.high %v2066_v56, %v2070_v39  ;;  %v10186_v4 = vcombine.high %v2067_v8, %v2071_v24  ;;  %v10185_v46 = vcombine.low %v2067_v8, %v2071_v24 }
 0x59a   :  { %6483 = vmatmul.mubr.bf16.vlgmr.msra.gmra.mrb[12].mxu1 %v12564_v31  ;;  %6236 = vmatpush1.bf16.msra.mxu0 %v10127_v40  ;;  %v10177_v40 = vcombine.low %v2059_v58, %v2063_v59 }
 0x59b   :  { %6267 = vmatprep.mubr.bf16.mxu0 %v12573_v61  ;;  %6494 = vmatpush1.bf16.msra.mxu1 %v10129_v34  ;;  %v2074_v34 = vld [vmem:[#allocation12 + $0x1600] sm:$0xff] }
 0x59c   :  { %6525 = vmatprep.mubr.bf16.mxu1 %v12573_v61  ;;  %6237 = vmatprep.subr.bf16.mxu0 %v10136_v57  ;;  %v2078_v57 = vld [vmem:[#allocation12 + $0x1620] sm:$0xff] }
 0x59d   :  { %6495 = vmatprep.subr.bf16.mxu1 %v10138_v55  ;;  %v10183_v55 = vcombine.low %v2066_v56, %v2070_v39  ;;  %v10192_v25 = vcombine.high %v2074_v34, %v2078_v57  ;;  %v10191_v35 = vcombine.low %v2074_v34, %v2078_v57  ;;  %v2119_v56 = vld [vmem:[#allocation12 + $0x1768] sm:$0xff] }
 0x59e   :  { %6238 = vmatpush1.bf16.msra.mxu0 %v10135_v0  ;;  %v10194_v0 = vcombine.high %v2075_v27, %v2079_v14  ;;  %v2127_v34 = vld [vmem:[#allocation12 + $0x17a8] sm:$0xff] }
 0x59f   :  { %6496 = vmatpush1.bf16.msra.mxu1 %v10137_v6  ;;  %6239 = vmatprep.subr.bf16.mxu0 %v10144_v30  ;;  %v2082_v6 = vld [vmem:[#allocation12 + $0x1640] sm:$0xff] }
 0x5a0   :  { %6497 = vmatprep.subr.bf16.mxu1 %v10146_v60  ;;  %v2086_v30 = vld [vmem:[#allocation12 + $0x1660] sm:$0xff]  ;;  %v2083_v60 = vld [vmem:[#allocation12 + $0x1648] sm:$0xff] }
 0x5a1   :  { %v10200_v1 = vcombine.high %v2082_v6, %v2086_v30  ;;  %v10199_v33 = vcombine.low %v2082_v6, %v2086_v30  ;;  %v10201_v42 = vcombine.low %v2083_v60, %v2087_v62  ;;  %v2135_v6 = vld [vmem:[#allocation12 + $0x17e8] sm:$0xff] }
 0x5a2   :  { %6240 = vmatpush1.bf16.msra.mxu0 %v10143_v10  ;;  %v10202_v10 = vcombine.high %v2083_v60, %v2087_v62 }
 0x5a3   :  { %6498 = vmatpush1.bf16.msra.mxu1 %v10145_v5  ;;  %6241 = vmatprep.subr.bf16.mxu0 %v10152_v23  ;;  %v2090_v5 = vld [vmem:[#allocation12 + $0x1680] sm:$0xff] }
 0x5a4   :  { %6499 = vmatprep.subr.bf16.mxu1 %v10154_v26  ;;  %v2094_v23 = vld [vmem:[#allocation12 + $0x16a0] sm:$0xff]  ;;  %v2091_v26 = vld [vmem:[#allocation12 + $0x1688] sm:$0xff] }
 0x5a5   :  { %v10208_v15 = vcombine.high %v2090_v5, %v2094_v23  ;;  %v10207_v21 = vcombine.low %v2090_v5, %v2094_v23  ;;  %v10209_v48 = vcombine.low %v2091_v26, %v2095_v20  ;;  %v1377_v5 = vld [vmem:[#allocation12 + $0x38] sm:$0xff] }
 0x5a6   :  { %6242 = vmatpush1.bf16.msra.mxu0 %v10151_v32  ;;  %v10210_v32 = vcombine.high %v2091_v26, %v2095_v20 }
 0x5a7   :  { %6500 = vmatpush1.bf16.msra.mxu1 %v10153_v50  ;;  %6243 = vmatprep.subr.bf16.mxu0 %v10160_v47  ;;  %v2098_v50 = vld [vmem:[#allocation12 + $0x16c0] sm:$0xff] }
 0x5a8   :  { %6501 = vmatprep.subr.bf16.mxu1 %v10162_v41  ;;  %v2102_v47 = vld [vmem:[#allocation12 + $0x16e0] sm:$0xff]  ;;  %v2099_v41 = vld [vmem:[#allocation12 + $0x16c8] sm:$0xff] }
 0x5a9   :  { %v10216_v54 = vcombine.high %v2098_v50, %v2102_v47  ;;  %v10215_v28 = vcombine.low %v2098_v50, %v2102_v47  ;;  %v10217_v58 = vcombine.low %v2099_v41, %v2103_v11  ;;  %v1381_v50 = vld [vmem:[#allocation12 + $0x58] sm:$0xff] }
 0x5aa   :  { %6244 = vmatpush1.bf16.msra.mxu0 %v10159_v12  ;;  %v10218_v12 = vcombine.high %v2099_v41, %v2103_v11  ;;  %v1385_v47 = vld [vmem:[#allocation12 + $0x78] sm:$0xff] }
 0x5ab   :  { %6502 = vmatpush1.bf16.msra.mxu1 %v10161_v36  ;;  %6245 = vmatprep.subr.bf16.mxu0 %v10168_v51  ;;  %v2106_v36 = vld [vmem:[#allocation12 + $0x1700] sm:$0xff] }
 0x5ac   :  { %6503 = vmatprep.subr.bf16.mxu1 %v10170_v53  ;;  %v2110_v51 = vld [vmem:[#allocation12 + $0x1720] sm:$0xff]  ;;  %v2107_v53 = vld [vmem:[#allocation12 + $0x1708] sm:$0xff] }
 0x5ad   :  { %v10224_v59 = vcombine.high %v2106_v36, %v2110_v51  ;;  %v10223_v39 = vcombine.low %v2106_v36, %v2110_v51  ;;  %v10225_v8 = vcombine.low %v2107_v53, %v2111_v13  ;;  %v1393_v36 = vld [vmem:[#allocation12 + $0xb8] sm:$0xff] }
 0x5ae   :  { %6246 = vmatpush1.bf16.msra.mxu0 %v10167_v9  ;;  %v10226_v9 = vcombine.high %v2107_v53, %v2111_v13  ;;  %v9501_v53 = vcombine.low %v1381_v50, %v1385_v47 }
 0x5af   :  { %6504 = vmatpush1.bf16.msra.mxu1 %v10169_v43  ;;  %6247 = vmatprep.subr.bf16.mxu0 %v10176_v52  ;;  %v2114_v43 = vld [vmem:[#allocation12 + $0x1740] sm:$0xff] }
 0x5b0   :  { %6505 = vmatprep.subr.bf16.mxu1 %v10178_v63  ;;  %v2118_v52 = vld [vmem:[#allocation12 + $0x1760] sm:$0xff]  ;;  %v2115_v63 = vld [vmem:[#allocation12 + $0x1748] sm:$0xff] }
 0x5b1   :  { %v10232_v24 = vcombine.high %v2114_v43, %v2118_v52  ;;  %v10231_v57 = vcombine.low %v2114_v43, %v2118_v52  ;;  %v10233_v27 = vcombine.low %v2115_v63, %v2119_v56  ;;  %v1401_v43 = vld [vmem:[#allocation12 + $0xf8] sm:$0xff] }
 0x5b2   :  { %6248 = vmatpush1.bf16.msra.mxu0 %v10175_v3  ;;  %v10234_v3 = vcombine.high %v2115_v63, %v2119_v56 }
 0x5b3   :  { %6506 = vmatpush1.bf16.msra.mxu1 %v10177_v40  ;;  %6249 = vmatprep.subr.bf16.mxu0 %v10184_v38  ;;  %v2122_v40 = vld [vmem:[#allocation12 + $0x1780] sm:$0xff] }
 0x5b4   :  { %6507 = vmatprep.subr.bf16.mxu1 %v10186_v4  ;;  %v2126_v38 = vld [vmem:[#allocation12 + $0x17a0] sm:$0xff]  ;;  %v2123_v4 = vld [vmem:[#allocation12 + $0x1788] sm:$0xff] }
 0x5b5   :  { %v10240_v14 = vcombine.high %v2122_v40, %v2126_v38  ;;  %v10239_v30 = vcombine.low %v2122_v40, %v2126_v38  ;;  %v10241_v60 = vcombine.low %v2123_v4, %v2127_v34  ;;  %v1409_v40 = vld [vmem:[#allocation12 + $0x138] sm:$0xff] }
 0x5b6   :  { %6250 = vmatpush1.bf16.msra.mxu0 %v10183_v55  ;;  %v10242_v55 = vcombine.high %v2123_v4, %v2127_v34 }
 0x5b7   :  { %6508 = vmatpush1.bf16.msra.mxu1 %v10185_v46  ;;  %6251 = vmatprep.subr.bf16.mxu0 %v10192_v25  ;;  %v2130_v46 = vld [vmem:[#allocation12 + $0x17c0] sm:$0xff] }
 0x5b8   :  { %6509 = vmatprep.subr.bf16.mxu1 %v10194_v0  ;;  %v2134_v25 = vld [vmem:[#allocation12 + $0x17e0] sm:$0xff]  ;;  %v2131_v0 = vld [vmem:[#allocation12 + $0x17c8] sm:$0xff] }
 0x5b9   :  { %v10248_v62 = vcombine.high %v2130_v46, %v2134_v25  ;;  %v10247_v23 = vcombine.low %v2130_v46, %v2134_v25  ;;  %v10249_v26 = vcombine.low %v2131_v0, %v2135_v6 }
 0x5ba   :  { %6252 = vmatpush1.bf16.msra.mxu0 %v10191_v35  ;;  %v10250_v35 = vcombine.high %v2131_v0, %v2135_v6 }
 0x5bb   :  { %6510 = vmatpush1.bf16.msra.mxu1 %v10193_v17  ;;  %6253 = vmatprep.subr.bf16.mxu0 %v10200_v1  ;;  %v1372_v17 = vld [vmem:[#allocation12 + $0x10] sm:$0xff] }
 0x5bc   :  { %6511 = vmatprep.subr.bf16.mxu1 %v10202_v10  ;;  %v1376_v1 = vld [vmem:[#allocation12 + $0x30] sm:$0xff]  ;;  %v1373_v10 = vld [vmem:[#allocation12 + $0x18] sm:$0xff] }
 0x5bd   :  { %v9492_v20 = vcombine.high %v1372_v17, %v1376_v1  ;;  %v9493_v41 = vcombine.low %v1373_v10, %v1377_v5 }
 0x5be   :  { %6254 = vmatpush1.bf16.msra.mxu0 %v10199_v33  ;;  %v9494_v33 = vcombine.high %v1373_v10, %v1377_v5 }
 0x5bf   :  { %6512 = vmatpush1.bf16.msra.mxu1 %v10201_v42  ;;  %6255 = vmatprep.subr.bf16.mxu0 %v10208_v15  ;;  %v1380_v42 = vld [vmem:[#allocation12 + $0x50] sm:$0xff] }
 0x5c0   :  { %6513 = vmatprep.subr.bf16.mxu1 %v10210_v32  ;;  %v1384_v15 = vld [vmem:[#allocation12 + $0x70] sm:$0xff]  ;;  %v9491_v32 = vcombine.low %v1372_v17, %v1376_v1 }
 0x5c1   :  { %v9500_v11 = vcombine.high %v1380_v42, %v1384_v15  ;;  %v9499_v51 = vcombine.low %v1380_v42, %v1384_v15 }
 0x5c2   :  { %6256 = vmatpush1.bf16.msra.mxu0 %v10207_v21  ;;  %v1388_v21 = vld [vmem:[#allocation12 + $0x90] sm:$0xff] }
 0x5c3   :  { %6514 = vmatpush1.bf16.msra.mxu1 %v10209_v48  ;;  %6257 = vmatprep.subr.bf16.mxu0 %v10216_v54  ;;  %v1392_v48 = vld [vmem:[#allocation12 + $0xb0] sm:$0xff]  ;;  %v9502_v54 = vcombine.high %v1381_v50, %v1385_v47 }
 0x5c4   :  { %6515 = vmatprep.subr.bf16.mxu1 %v10218_v12  ;;  %v1389_v12 = vld [vmem:[#allocation12 + $0x98] sm:$0xff]  ;;  %v9508_v13 = vcombine.high %v1388_v21, %v1392_v48  ;;  %v9507_v52 = vcombine.low %v1388_v21, %v1392_v48  ;;  %v1436_v47 = vld [vmem:[#allocation12 + $0x210] sm:$0xff] }
 0x5c5   :  { %v9509_v63 = vcombine.low %v1389_v12, %v1393_v36  ;;  %v1441_v21 = vld [vmem:[#allocation12 + $0x238] sm:$0xff] }
 0x5c6   :  { %6258 = vmatpush1.bf16.msra.mxu0 %v10215_v28  ;;  %v9510_v28 = vcombine.high %v1389_v12, %v1393_v36 }
 0x5c7   :  { %6516 = vmatpush1.bf16.msra.mxu1 %v10217_v58  ;;  %6259 = vmatprep.subr.bf16.mxu0 %v10224_v59  ;;  %v1396_v58 = vld [vmem:[#allocation12 + $0xd0] sm:$0xff] }
 0x5c8   :  { %6517 = vmatprep.subr.bf16.mxu1 %v10226_v9  ;;  %v1400_v59 = vld [vmem:[#allocation12 + $0xf0] sm:$0xff]  ;;  %v1397_v9 = vld [vmem:[#allocation12 + $0xd8] sm:$0xff] }
 0x5c9   :  { %v9516_v56 = vcombine.high %v1396_v58, %v1400_v59  ;;  %v9517_v38 = vcombine.low %v1397_v9, %v1401_v43 }
 0x5ca   :  { %6260 = vmatpush1.bf16.msra.mxu0 %v10223_v39  ;;  %v9518_v39 = vcombine.high %v1397_v9, %v1401_v43 }
 0x5cb   :  { %6518 = vmatpush1.bf16.msra.mxu1 %v10225_v8  ;;  %6261 = vmatprep.subr.bf16.mxu0 %v10232_v24  ;;  %v1404_v8 = vld [vmem:[#allocation12 + $0x110] sm:$0xff] }
 0x5cc   :  { %6519 = vmatprep.subr.bf16.mxu1 %v10234_v3  ;;  %v1408_v24 = vld [vmem:[#allocation12 + $0x130] sm:$0xff]  ;;  %v1405_v3 = vld [vmem:[#allocation12 + $0x118] sm:$0xff] }
 0x5cd   :  { %v9524_v4 = vcombine.high %v1404_v8, %v1408_v24  ;;  %v9526_v34 = vcombine.high %v1405_v3, %v1409_v40  ;;  %v9523_v46 = vcombine.low %v1404_v8, %v1408_v24  ;;  %v9525_v25 = vcombine.low %v1405_v3, %v1409_v40 }
 0x5ce   :  { %6262 = vmatpush1.bf16.msra.mxu0 %v10231_v57  ;;  %v1412_v57 = vld [vmem:[#allocation12 + $0x150] sm:$0xff] }
 0x5cf   :  { %6520 = vmatpush1.bf16.msra.mxu1 %v10233_v27  ;;  %6263 = vmatprep.subr.bf16.mxu0 %v10240_v14  ;;  %v1416_v27 = vld [vmem:[#allocation12 + $0x170] sm:$0xff]  ;;  %v1413_v14 = vld [vmem:[#allocation12 + $0x158] sm:$0xff] }
 0x5d0   :  { %6521 = vmatprep.subr.bf16.mxu1 %v10242_v55  ;;  %v1417_v55 = vld [vmem:[#allocation12 + $0x178] sm:$0xff]  ;;  %v9532_v0 = vcombine.high %v1412_v57, %v1416_v27  ;;  %v9531_v17 = vcombine.low %v1412_v57, %v1416_v27 }
 0x5d1   :  { %v9534_v6 = vcombine.high %v1413_v14, %v1417_v55  ;;  %v9533_v1 = vcombine.low %v1413_v14, %v1417_v55 }
 0x5d2   :  { %6264 = vmatpush1.bf16.msra.mxu0 %v10239_v30  ;;  %v1420_v30 = vld [vmem:[#allocation12 + $0x190] sm:$0xff] }
 0x5d3   :  { %6522 = vmatpush1.bf16.msra.mxu1 %v10241_v60  ;;  %6265 = vmatprep.subr.bf16.mxu0 %v10248_v62  ;;  %v1424_v60 = vld [vmem:[#allocation12 + $0x1b0] sm:$0xff]  ;;  %v1421_v62 = vld [vmem:[#allocation12 + $0x198] sm:$0xff] }
 0x5d4   :  { %6523 = vmatprep.subr.bf16.mxu1 %v10250_v35  ;;  %v1425_v35 = vld [vmem:[#allocation12 + $0x1b8] sm:$0xff]  ;;  %v9540_v10 = vcombine.high %v1420_v30, %v1424_v60  ;;  %v9539_v42 = vcombine.low %v1420_v30, %v1424_v60 }
 0x5d5   :  { %v9542_v5 = vcombine.high %v1421_v62, %v1425_v35  ;;  %v9541_v15 = vcombine.low %v1421_v62, %v1425_v35 }
 0x5d6   :  { %6266 = vmatpush1.bf16.msra.mxu0 %v10247_v23  ;;  %v1428_v23 = vld [vmem:[#allocation12 + $0x1d0] sm:$0xff] }
 0x5d7   :  { %6524 = vmatpush1.bf16.msra.mxu1 %v10249_v26  ;;  %6536 = vmatprep.subr.bf16.mxu0 %v9492_v20  ;;  %v1432_v26 = vld [vmem:[#allocation12 + $0x1f0] sm:$0xff]  ;;  %v1429_v20 = vld [vmem:[#allocation12 + $0x1d8] sm:$0xff] }
 0x5d8   :  { %6794 = vmatprep.subr.bf16.mxu1 %v9494_v33  ;;  %v1433_v33 = vld [vmem:[#allocation12 + $0x1f8] sm:$0xff]  ;;  %v9547_v48 = vcombine.low %v1428_v23, %v1432_v26 }
 0x5d9   :  { %6268 = vmatmul.mubr.bf16.vlgmr.msra.gmra.mrb[12].mxu0 %v12575_v45  ;;  %v9550_v50 = vcombine.high %v1429_v20, %v1433_v33 }
 0x5da   :  { %6526 = vmatmul.mubr.bf16.vlgmr.msra.gmra.mrb[12].mxu1 %v12575_v45  ;;  %6537 = vmatpush1.bf16.msra.mxu0 %v9491_v32  ;;  %v9548_v32 = vcombine.high %v1428_v23, %v1432_v26 }
 0x5db   :  { %6568 = vmatprep.mubr.bf16.mxu0 %v12481_v19  ;;  %6795 = vmatpush1.bf16.msra.mxu1 %v9493_v41  ;;  %v1440_v41 = vld [vmem:[#allocation12 + $0x230] sm:$0xff] }
 0x5dc   :  { %6826 = vmatprep.mubr.bf16.mxu1 %v12481_v19  ;;  %6538 = vmatprep.subr.bf16.mxu0 %v9500_v11  ;;  %v9515_v19 = vcombine.low %v1396_v58, %v1400_v59  ;;  %v1437_v11 = vld [vmem:[#allocation12 + $0x218] sm:$0xff]  ;;  %v9556_v12 = vcombine.high %v1436_v47, %v1440_v41  ;;  %v9555_v58 = vcombine.low %v1436_v47, %v1440_v41 }
 0x5dd   :  { %6796 = vmatprep.subr.bf16.mxu1 %v9502_v54  ;;  %v9549_v54 = vcombine.low %v1429_v20, %v1433_v33  ;;  %v9558_v36 = vcombine.high %v1437_v11, %v1441_v21  ;;  %v9557_v59 = vcombine.low %v1437_v11, %v1441_v21 }
 0x5de   :  { %6539 = vmatpush1.bf16.msra.mxu0 %v9499_v51  ;;  %v1444_v51 = vld [vmem:[#allocation12 + $0x250] sm:$0xff] }
 0x5df   :  { %6797 = vmatpush1.bf16.msra.mxu1 %v9501_v53  ;;  %6540 = vmatprep.subr.bf16.mxu0 %v9508_v13  ;;  %v1448_v53 = vld [vmem:[#allocation12 + $0x270] sm:$0xff]  ;;  %v1445_v13 = vld [vmem:[#allocation12 + $0x258] sm:$0xff] }
 0x5e0   :  { %6798 = vmatprep.subr.bf16.mxu1 %v9510_v28  ;;  %v1449_v28 = vld [vmem:[#allocation12 + $0x278] sm:$0xff]  ;;  %v9564_v9 = vcombine.high %v1444_v51, %v1448_v53  ;;  %v9563_v8 = vcombine.low %v1444_v51, %v1448_v53 }
 0x5e1   :  { %v9566_v43 = vcombine.high %v1445_v13, %v1449_v28  ;;  %v9565_v24 = vcombine.low %v1445_v13, %v1449_v28 }
 0x5e2   :  { %6541 = vmatpush1.bf16.msra.mxu0 %v9507_v52  ;;  %v1452_v52 = vld [vmem:[#allocation12 + $0x290] sm:$0xff] }
 0x5e3   :  { %6799 = vmatpush1.bf16.msra.mxu1 %v9509_v63  ;;  %6542 = vmatprep.subr.bf16.mxu0 %v9516_v56  ;;  %v1456_v63 = vld [vmem:[#allocation12 + $0x2b0] sm:$0xff]  ;;  %v1453_v56 = vld [vmem:[#allocation12 + $0x298] sm:$0xff] }
 0x5e4   :  { %6800 = vmatprep.subr.bf16.mxu1 %v9518_v39  ;;  %v1457_v39 = vld [vmem:[#allocation12 + $0x2b8] sm:$0xff]  ;;  %v9572_v3 = vcombine.high %v1452_v52, %v1456_v63  ;;  %v9571_v57 = vcombine.low %v1452_v52, %v1456_v63 }
 0x5e5   :  { %v9574_v40 = vcombine.high %v1453_v56, %v1457_v39  ;;  %v9573_v27 = vcombine.low %v1453_v56, %v1457_v39 }
 0x5e6   :  { %6543 = vmatpush1.bf16.msra.mxu0 %v9515_v19  ;;  %v1460_v19 = vld [vmem:[#allocation12 + $0x2d0] sm:$0xff] }
 0x5e7   :  { %6801 = vmatpush1.bf16.msra.mxu1 %v9517_v38  ;;  %6544 = vmatprep.subr.bf16.mxu0 %v9524_v4  ;;  %v1464_v38 = vld [vmem:[#allocation12 + $0x2f0] sm:$0xff]  ;;  %v1461_v4 = vld [vmem:[#allocation12 + $0x2d8] sm:$0xff] }
 0x5e8   :  { %6802 = vmatprep.subr.bf16.mxu1 %v9526_v34  ;;  %v1465_v34 = vld [vmem:[#allocation12 + $0x2f8] sm:$0xff]  ;;  %v9580_v14 = vcombine.high %v1460_v19, %v1464_v38  ;;  %v9579_v30 = vcombine.low %v1460_v19, %v1464_v38 }
 0x5e9   :  { %v9582_v55 = vcombine.high %v1461_v4, %v1465_v34  ;;  %v9581_v60 = vcombine.low %v1461_v4, %v1465_v34  ;;  %v1513_v19 = vld [vmem:[#allocation12 + $0x478] sm:$0xff]  ;;  %v1516_v34 = vld [vmem:[#allocation12 + $0x490] sm:$0xff] }
 0x5ea   :  { %6545 = vmatpush1.bf16.msra.mxu0 %v9523_v46  ;;  %v1468_v46 = vld [vmem:[#allocation12 + $0x310] sm:$0xff] }
 0x5eb   :  { %6803 = vmatpush1.bf16.msra.mxu1 %v9525_v25  ;;  %6546 = vmatprep.subr.bf16.mxu0 %v9532_v0  ;;  %v1472_v25 = vld [vmem:[#allocation12 + $0x330] sm:$0xff]  ;;  %v1469_v0 = vld [vmem:[#allocation12 + $0x318] sm:$0xff] }
 0x5ec   :  { %6804 = vmatprep.subr.bf16.mxu1 %v9534_v6  ;;  %v1473_v6 = vld [vmem:[#allocation12 + $0x338] sm:$0xff]  ;;  %v9588_v62 = vcombine.high %v1468_v46, %v1472_v25  ;;  %v9587_v23 = vcombine.low %v1468_v46, %v1472_v25 }
 0x5ed   :  { %v9590_v35 = vcombine.high %v1469_v0, %v1473_v6  ;;  %v9589_v26 = vcombine.low %v1469_v0, %v1473_v6 }
 0x5ee   :  { %6547 = vmatpush1.bf16.msra.mxu0 %v9531_v17  ;;  %v1476_v17 = vld [vmem:[#allocation12 + $0x350] sm:$0xff] }
 0x5ef   :  { %6805 = vmatpush1.bf16.msra.mxu1 %v9533_v1  ;;  %6548 = vmatprep.subr.bf16.mxu0 %v9540_v10  ;;  %v1480_v1 = vld [vmem:[#allocation12 + $0x370] sm:$0xff]  ;;  %v1477_v10 = vld [vmem:[#allocation12 + $0x358] sm:$0xff] }
 0x5f0   :  { %6806 = vmatprep.subr.bf16.mxu1 %v9542_v5  ;;  %v1481_v5 = vld [vmem:[#allocation12 + $0x378] sm:$0xff]  ;;  %v9596_v20 = vcombine.high %v1476_v17, %v1480_v1  ;;  %v9595_v47 = vcombine.low %v1476_v17, %v1480_v1 }
 0x5f1   :  { %v9598_v33 = vcombine.high %v1477_v10, %v1481_v5  ;;  %v9597_v41 = vcombine.low %v1477_v10, %v1481_v5  ;;  %v1532_v5 = vld [vmem:[#allocation12 + $0x510] sm:$0xff] }
 0x5f2   :  { %6549 = vmatpush1.bf16.msra.mxu0 %v9539_v42  ;;  %v1484_v42 = vld [vmem:[#allocation12 + $0x390] sm:$0xff] }
 0x5f3   :  { %6807 = vmatpush1.bf16.msra.mxu1 %v9541_v15  ;;  %6550 = vmatprep.subr.bf16.mxu0 %v9548_v32  ;;  %v1488_v15 = vld [vmem:[#allocation12 + $0x3b0] sm:$0xff]  ;;  %v1485_v32 = vld [vmem:[#allocation12 + $0x398] sm:$0xff] }
 0x5f4   :  { %6808 = vmatprep.subr.bf16.mxu1 %v9550_v50  ;;  %v1489_v50 = vld [vmem:[#allocation12 + $0x3b8] sm:$0xff]  ;;  %v9604_v11 = vcombine.high %v1484_v42, %v1488_v15  ;;  %v9603_v51 = vcombine.low %v1484_v42, %v1488_v15 }
 0x5f5   :  { %v9606_v21 = vcombine.high %v1485_v32, %v1489_v50  ;;  %v9605_v53 = vcombine.low %v1485_v32, %v1489_v50  ;;  %v1540_v32 = vld [vmem:[#allocation12 + $0x550] sm:$0xff] }
 0x5f6   :  { %6551 = vmatpush1.bf16.msra.mxu0 %v9547_v48  ;;  %v1492_v48 = vld [vmem:[#allocation12 + $0x3d0] sm:$0xff] }
 0x5f7   :  { %6809 = vmatpush1.bf16.msra.mxu1 %v9549_v54  ;;  %6552 = vmatprep.subr.bf16.mxu0 %v9556_v12  ;;  %v1496_v54 = vld [vmem:[#allocation12 + $0x3f0] sm:$0xff]  ;;  %v1493_v12 = vld [vmem:[#allocation12 + $0x3d8] sm:$0xff] }
 0x5f8   :  { %6810 = vmatprep.subr.bf16.mxu1 %v9558_v36  ;;  %v1497_v36 = vld [vmem:[#allocation12 + $0x3f8] sm:$0xff]  ;;  %v9612_v13 = vcombine.high %v1492_v48, %v1496_v54  ;;  %v9611_v52 = vcombine.low %v1492_v48, %v1496_v54  ;;  %v1544_v50 = vld [vmem:[#allocation12 + $0x570] sm:$0xff] }
 0x5f9   :  { %v9614_v28 = vcombine.high %v1493_v12, %v1497_v36  ;;  %v9613_v63 = vcombine.low %v1493_v12, %v1497_v36  ;;  %v9660_v48 = vcombine.high %v1540_v32, %v1544_v50  ;;  %v1548_v12 = vld [vmem:[#allocation12 + $0x590] sm:$0xff] }
 0x5fa   :  { %6553 = vmatpush1.bf16.msra.mxu0 %v9555_v58  ;;  %v1500_v58 = vld [vmem:[#allocation12 + $0x410] sm:$0xff] }
 0x5fb   :  { %6811 = vmatpush1.bf16.msra.mxu1 %v9557_v59  ;;  %6554 = vmatprep.subr.bf16.mxu0 %v9564_v9  ;;  %v1504_v59 = vld [vmem:[#allocation12 + $0x430] sm:$0xff]  ;;  %v1501_v9 = vld [vmem:[#allocation12 + $0x418] sm:$0xff] }
 0x5fc   :  { %6812 = vmatprep.subr.bf16.mxu1 %v9566_v43  ;;  %v1505_v43 = vld [vmem:[#allocation12 + $0x438] sm:$0xff]  ;;  %v9620_v56 = vcombine.high %v1500_v58, %v1504_v59  ;;  %v1552_v36 = vld [vmem:[#allocation12 + $0x5b0] sm:$0xff] }
 0x5fd   :  { %v9622_v39 = vcombine.high %v1501_v9, %v1505_v43  ;;  %v9621_v38 = vcombine.low %v1501_v9, %v1505_v43  ;;  %v1556_v9 = vld [vmem:[#allocation12 + $0x5d0] sm:$0xff] }
 0x5fe   :  { %6555 = vmatpush1.bf16.msra.mxu0 %v9563_v8  ;;  %v1508_v8 = vld [vmem:[#allocation12 + $0x450] sm:$0xff] }
 0x5ff   :  { %6813 = vmatpush1.bf16.msra.mxu1 %v9565_v24  ;;  %6556 = vmatprep.subr.bf16.mxu0 %v9572_v3  ;;  %v1512_v24 = vld [vmem:[#allocation12 + $0x470] sm:$0xff]  ;;  %v9619_v3 = vcombine.low %v1500_v58, %v1504_v59  ;;  %v9668_v58 = vcombine.high %v1548_v12, %v1552_v36 }
 0x600   :  { %6814 = vmatprep.subr.bf16.mxu1 %v9574_v40  ;;  %v1509_v40 = vld [vmem:[#allocation12 + $0x458] sm:$0xff]  ;;  %v9628_v4 = vcombine.high %v1508_v8, %v1512_v24  ;;  %v9627_v46 = vcombine.low %v1508_v8, %v1512_v24  ;;  %v1560_v43 = vld [vmem:[#allocation12 + $0x5f0] sm:$0xff] }
 0x601   :  { %v9629_v25 = vcombine.low %v1509_v40, %v1513_v19  ;;  %v9676_v8 = vcombine.high %v1556_v9, %v1560_v43 }
 0x602   :  { %6557 = vmatpush1.bf16.msra.mxu0 %v9571_v57  ;;  %v1520_v57 = vld [vmem:[#allocation12 + $0x4b0] sm:$0xff] }
 0x603   :  { %6815 = vmatpush1.bf16.msra.mxu1 %v9573_v27  ;;  %6558 = vmatprep.subr.bf16.mxu0 %v9580_v14  ;;  %v9630_v27 = vcombine.high %v1509_v40, %v1513_v19  ;;  %v1517_v14 = vld [vmem:[#allocation12 + $0x498] sm:$0xff]  ;;  %v9636_v0 = vcombine.high %v1516_v34, %v1520_v57  ;;  %v9635_v17 = vcombine.low %v1516_v34, %v1520_v57  ;;  %v1568_v40 = vld [vmem:[#allocation12 + $0x630] sm:$0xff] }
 0x604   :  { %6816 = vmatprep.subr.bf16.mxu1 %v9582_v55  ;;  %v1521_v55 = vld [vmem:[#allocation12 + $0x4b8] sm:$0xff] }
 0x605   :  { %v9638_v6 = vcombine.high %v1517_v14, %v1521_v55  ;;  %v1565_v19 = vld [vmem:[#allocation12 + $0x618] sm:$0xff] }
 0x606   :  { %6559 = vmatpush1.bf16.msra.mxu0 %v9579_v30  ;;  %v1524_v30 = vld [vmem:[#allocation12 + $0x4d0] sm:$0xff] }
 0x607   :  { %6817 = vmatpush1.bf16.msra.mxu1 %v9581_v60  ;;  %6560 = vmatprep.subr.bf16.mxu0 %v9588_v62  ;;  %v1528_v60 = vld [vmem:[#allocation12 + $0x4f0] sm:$0xff]  ;;  %v1525_v62 = vld [vmem:[#allocation12 + $0x4d8] sm:$0xff] }
 0x608   :  { %6818 = vmatprep.subr.bf16.mxu1 %v9590_v35  ;;  %v1529_v35 = vld [vmem:[#allocation12 + $0x4f8] sm:$0xff]  ;;  %v9644_v1 = vcombine.high %v1524_v30, %v1528_v60 }
 0x609   :  { %v9646_v10 = vcombine.high %v1525_v62, %v1529_v35 }
 0x60a   :  { %6561 = vmatpush1.bf16.msra.mxu0 %v9587_v23  ;;  %v1536_v23 = vld [vmem:[#allocation12 + $0x530] sm:$0xff] }
 0x60b   :  { %6819 = vmatpush1.bf16.msra.mxu1 %v9589_v26  ;;  %6562 = vmatprep.subr.bf16.mxu0 %v9596_v20  ;;  %v1533_v26 = vld [vmem:[#allocation12 + $0x518] sm:$0xff]  ;;  %v9652_v42 = vcombine.high %v1532_v5, %v1536_v23 }
 0x60c   :  { %6820 = vmatprep.subr.bf16.mxu1 %v9598_v33  ;;  %v1537_v20 = vld [vmem:[#allocation12 + $0x538] sm:$0xff]  ;;  %v9645_v33 = vcombine.low %v1525_v62, %v1529_v35  ;;  %v1580_v62 = vld [vmem:[#allocation12 + $0x690] sm:$0xff] }
 0x60d   :  { %v9654_v15 = vcombine.high %v1533_v26, %v1537_v20  ;;  %v1584_v35 = vld [vmem:[#allocation12 + $0x6b0] sm:$0xff] }
 0x60e   :  { %6563 = vmatpush1.bf16.msra.mxu0 %v9595_v47  ;;  %v1541_v47 = vld [vmem:[#allocation12 + $0x558] sm:$0xff] }
 0x60f   :  { %6821 = vmatpush1.bf16.msra.mxu1 %v9597_v41  ;;  %6564 = vmatprep.subr.bf16.mxu0 %v9604_v11  ;;  %v1545_v41 = vld [vmem:[#allocation12 + $0x578] sm:$0xff]  ;;  %v9651_v11 = vcombine.low %v1532_v5, %v1536_v23  ;;  %v9700_v5 = vcombine.high %v1580_v62, %v1584_v35 }
 0x610   :  { %6822 = vmatprep.subr.bf16.mxu1 %v9606_v21  ;;  %v9653_v21 = vcombine.low %v1533_v26, %v1537_v20  ;;  %v9662_v54 = vcombine.high %v1541_v47, %v1545_v41  ;;  %v1588_v26 = vld [vmem:[#allocation12 + $0x6d0] sm:$0xff] }
 0x611   :  { %v1592_v20 = vld [vmem:[#allocation12 + $0x6f0] sm:$0xff] }
 0x612   :  { %6565 = vmatpush1.bf16.msra.mxu0 %v9603_v51  ;;  %v1549_v51 = vld [vmem:[#allocation12 + $0x598] sm:$0xff] }
 0x613   :  { %6823 = vmatpush1.bf16.msra.mxu1 %v9605_v53  ;;  %6566 = vmatprep.subr.bf16.mxu0 %v9612_v13  ;;  %v1553_v53 = vld [vmem:[#allocation12 + $0x5b8] sm:$0xff]  ;;  %v9659_v13 = vcombine.low %v1540_v32, %v1544_v50  ;;  %v9708_v32 = vcombine.high %v1588_v26, %v1592_v20 }
 0x614   :  { %6824 = vmatprep.subr.bf16.mxu1 %v9614_v28  ;;  %v9661_v28 = vcombine.low %v1541_v47, %v1545_v41  ;;  %v9670_v59 = vcombine.high %v1549_v51, %v1553_v53  ;;  %v1596_v47 = vld [vmem:[#allocation12 + $0x710] sm:$0xff] }
 0x615   :  { %v1600_v41 = vld [vmem:[#allocation12 + $0x730] sm:$0xff] }
 0x616   :  { %6567 = vmatpush1.bf16.msra.mxu0 %v9611_v52  ;;  %v1557_v52 = vld [vmem:[#allocation12 + $0x5d8] sm:$0xff] }
 0x617   :  { %6825 = vmatpush1.bf16.msra.mxu1 %v9613_v63  ;;  %6579 = vmatprep.subr.bf16.mxu0 %v9620_v56  ;;  %v1561_v63 = vld [vmem:[#allocation12 + $0x5f8] sm:$0xff]  ;;  %v9667_v56 = vcombine.low %v1548_v12, %v1552_v36  ;;  %v9716_v12 = vcombine.high %v1596_v47, %v1600_v41 }
 0x618   :  { %6837 = vmatprep.subr.bf16.mxu1 %v9622_v39  ;;  %v9669_v39 = vcombine.low %v1549_v51, %v1553_v53  ;;  %v9678_v24 = vcombine.high %v1557_v52, %v1561_v63  ;;  %v9677_v34 = vcombine.low %v1557_v52, %v1561_v63  ;;  %v1604_v51 = vld [vmem:[#allocation12 + $0x750] sm:$0xff] }
 0x619   :  { %6569 = vmatmul.mubr.bf16.vlgmr.msra.gmra.mrb[16].mxu0 %v12483_v49  ;;  %v1608_v53 = vld [vmem:[#allocation12 + $0x770] sm:$0xff] }
 0x61a   :  { %6827 = vmatmul.mubr.bf16.vlgmr.msra.gmra.mrb[16].mxu1 %v12483_v49  ;;  %6580 = vmatpush1.bf16.msra.mxu0 %v9619_v3  ;;  %v9637_v49 = vcombine.low %v1517_v14, %v1521_v55  ;;  %v1564_v3 = vld [vmem:[#allocation12 + $0x610] sm:$0xff] }
 0x61b   :  { %6611 = vmatprep.mubr.bf16.mxu0 %v12497_v7  ;;  %6838 = vmatpush1.bf16.msra.mxu1 %v9621_v38  ;;  %v1569_v38 = vld [vmem:[#allocation12 + $0x638] sm:$0xff]  ;;  %v9684_v57 = vcombine.high %v1564_v3, %v1568_v40  ;;  %v1572_v14 = vld [vmem:[#allocation12 + $0x650] sm:$0xff] }
 0x61c   :  { %6869 = vmatprep.mubr.bf16.mxu1 %v12497_v7  ;;  %6581 = vmatprep.subr.bf16.mxu0 %v9628_v4  ;;  %v9643_v7 = vcombine.low %v1524_v30, %v1528_v60  ;;  %v9675_v4 = vcombine.low %v1556_v9, %v1560_v43  ;;  %v1576_v55 = vld [vmem:[#allocation12 + $0x670] sm:$0xff]  ;;  %v9724_v9 = vcombine.high %v1604_v51, %v1608_v53 }
 0x61d   :  { %6839 = vmatprep.subr.bf16.mxu1 %v9630_v27  ;;  %v9686_v27 = vcombine.high %v1565_v19, %v1569_v38  ;;  %v9692_v30 = vcombine.high %v1572_v14, %v1576_v55  ;;  %v1612_v52 = vld [vmem:[#allocation12 + $0x790] sm:$0xff] }
 0x61e   :  { %6582 = vmatpush1.bf16.msra.mxu0 %v9627_v46  ;;  %v1573_v46 = vld [vmem:[#allocation12 + $0x658] sm:$0xff]  ;;  %v1616_v63 = vld [vmem:[#allocation12 + $0x7b0] sm:$0xff] }
 0x61f   :  { %6840 = vmatpush1.bf16.msra.mxu1 %v9629_v25  ;;  %6583 = vmatprep.subr.bf16.mxu0 %v9636_v0  ;;  %v1577_v25 = vld [vmem:[#allocation12 + $0x678] sm:$0xff]  ;;  %v9683_v0 = vcombine.low %v1564_v3, %v1568_v40  ;;  %v9732_v3 = vcombine.high %v1612_v52, %v1616_v63 }
 0x620   :  { %6841 = vmatprep.subr.bf16.mxu1 %v9638_v6  ;;  %v9685_v6 = vcombine.low %v1565_v19, %v1569_v38  ;;  %v9694_v60 = vcombine.high %v1573_v46, %v1577_v25  ;;  %v1620_v19 = vld [vmem:[#allocation12 + $0x7d0] sm:$0xff] }
 0x621   :  { %v1624_v38 = vld [vmem:[#allocation12 + $0x7f0] sm:$0xff] }
 0x622   :  { %6584 = vmatpush1.bf16.msra.mxu0 %v9635_v17  ;;  %v1581_v17 = vld [vmem:[#allocation12 + $0x698] sm:$0xff] }
 0x623   :  { %6842 = vmatpush1.bf16.msra.mxu1 %v9637_v49  ;;  %6585 = vmatprep.subr.bf16.mxu0 %v9644_v1  ;;  %v1585_v49 = vld [vmem:[#allocation12 + $0x6b8] sm:$0xff]  ;;  %v9691_v1 = vcombine.low %v1572_v14, %v1576_v55  ;;  %v9740_v14 = vcombine.high %v1620_v19, %v1624_v38 }
 0x624   :  { %6843 = vmatprep.subr.bf16.mxu1 %v9646_v10  ;;  %v9693_v10 = vcombine.low %v1573_v46, %v1577_v25  ;;  %v9702_v23 = vcombine.high %v1581_v17, %v1585_v49  ;;  %v1628_v46 = vld [vmem:[#allocation12 + $0x810] sm:$0xff] }
 0x625   :  { %v1632_v25 = vld [vmem:[#allocation12 + $0x830] sm:$0xff] }
 0x626   :  { %6586 = vmatpush1.bf16.msra.mxu0 %v9643_v7  ;;  %v1589_v7 = vld [vmem:[#allocation12 + $0x6d8] sm:$0xff] }
 0x627   :  { %6844 = vmatpush1.bf16.msra.mxu1 %v9645_v33  ;;  %6587 = vmatprep.subr.bf16.mxu0 %v9652_v42  ;;  %v1593_v33 = vld [vmem:[#allocation12 + $0x6f8] sm:$0xff]  ;;  %v9699_v42 = vcombine.low %v1580_v62, %v1584_v35  ;;  %v9748_v62 = vcombine.high %v1628_v46, %v1632_v25 }
 0x628   :  { %6845 = vmatprep.subr.bf16.mxu1 %v9654_v15  ;;  %v9701_v15 = vcombine.low %v1581_v17, %v1585_v49  ;;  %v9710_v50 = vcombine.high %v1589_v7, %v1593_v33  ;;  %v1636_v17 = vld [vmem:[#allocation12 + $0x850] sm:$0xff] }
 0x629   :  { %v1640_v49 = vld [vmem:[#allocation12 + $0x870] sm:$0xff] }
 0x62a   :  { %6588 = vmatpush1.bf16.msra.mxu0 %v9651_v11  ;;  %v1597_v11 = vld [vmem:[#allocation12 + $0x718] sm:$0xff] }
 0x62b   :  { %6846 = vmatpush1.bf16.msra.mxu1 %v9653_v21  ;;  %6589 = vmatprep.subr.bf16.mxu0 %v9660_v48  ;;  %v1601_v21 = vld [vmem:[#allocation12 + $0x738] sm:$0xff]  ;;  %v9707_v48 = vcombine.low %v1588_v26, %v1592_v20  ;;  %v9756_v26 = vcombine.high %v1636_v17, %v1640_v49  ;;  %v1644_v20 = vld [vmem:[#allocation12 + $0x890] sm:$0xff] }
 0x62c   :  { %6847 = vmatprep.subr.bf16.mxu1 %v9662_v54  ;;  %v9709_v54 = vcombine.low %v1589_v7, %v1593_v33  ;;  %v9718_v36 = vcombine.high %v1597_v11, %v1601_v21  ;;  %v1648_v7 = vld [vmem:[#allocation12 + $0x8b0] sm:$0xff] }
 0x62e   :  { %6590 = vmatpush1.bf16.msra.mxu0 %v9659_v13  ;;  %v1605_v13 = vld [vmem:[#allocation12 + $0x758] sm:$0xff] }
 0x62f   :  { %6848 = vmatpush1.bf16.msra.mxu1 %v9661_v28  ;;  %6591 = vmatprep.subr.bf16.mxu0 %v9668_v58  ;;  %v1609_v28 = vld [vmem:[#allocation12 + $0x778] sm:$0xff]  ;;  %v9715_v58 = vcombine.low %v1596_v47, %v1600_v41  ;;  %v9764_v47 = vcombine.high %v1644_v20, %v1648_v7 }
 0x630   :  { %6849 = vmatprep.subr.bf16.mxu1 %v9670_v59  ;;  %v9717_v59 = vcombine.low %v1597_v11, %v1601_v21  ;;  %v9726_v43 = vcombine.high %v1605_v13, %v1609_v28  ;;  %v1652_v11 = vld [vmem:[#allocation12 + $0x8d0] sm:$0xff] }
 0x631   :  { %v1656_v21 = vld [vmem:[#allocation12 + $0x8f0] sm:$0xff] }
 0x632   :  { %6592 = vmatpush1.bf16.msra.mxu0 %v9667_v56  ;;  %v1613_v56 = vld [vmem:[#allocation12 + $0x798] sm:$0xff] }
 0x633   :  { %6850 = vmatpush1.bf16.msra.mxu1 %v9669_v39  ;;  %6593 = vmatprep.subr.bf16.mxu0 %v9676_v8  ;;  %v1617_v39 = vld [vmem:[#allocation12 + $0x7b8] sm:$0xff]  ;;  %v9723_v8 = vcombine.low %v1604_v51, %v1608_v53  ;;  %v1660_v53 = vld [vmem:[#allocation12 + $0x910] sm:$0xff] }
 0x634   :  { %6851 = vmatprep.subr.bf16.mxu1 %v9678_v24  ;;  %v9725_v24 = vcombine.low %v1605_v13, %v1609_v28  ;;  %v9734_v40 = vcombine.high %v1613_v56, %v1617_v39  ;;  %v1664_v13 = vld [vmem:[#allocation12 + $0x930] sm:$0xff]  ;;  %v1661_v28 = vld [vmem:[#allocation12 + $0x918] sm:$0xff] }
 0x636   :  { %6594 = vmatpush1.bf16.msra.mxu0 %v9675_v4  ;;  %v1621_v4 = vld [vmem:[#allocation12 + $0x7d8] sm:$0xff] }
 0x637   :  { %6852 = vmatpush1.bf16.msra.mxu1 %v9677_v34  ;;  %6595 = vmatprep.subr.bf16.mxu0 %v9684_v57  ;;  %v1625_v34 = vld [vmem:[#allocation12 + $0x7f8] sm:$0xff]  ;;  %v9731_v57 = vcombine.low %v1612_v52, %v1616_v63  ;;  %v1668_v52 = vld [vmem:[#allocation12 + $0x950] sm:$0xff] }
 0x638   :  { %6853 = vmatprep.subr.bf16.mxu1 %v9686_v27  ;;  %v9733_v27 = vcombine.low %v1613_v56, %v1617_v39  ;;  %v9742_v55 = vcombine.high %v1621_v4, %v1625_v34  ;;  %v1672_v63 = vld [vmem:[#allocation12 + $0x970] sm:$0xff]  ;;  %v1669_v56 = vld [vmem:[#allocation12 + $0x958] sm:$0xff] }
 0x639   :  { %v1673_v39 = vld [vmem:[#allocation12 + $0x978] sm:$0xff] }
 0x63a   :  { %6596 = vmatpush1.bf16.msra.mxu0 %v9683_v0  ;;  %v1629_v0 = vld [vmem:[#allocation12 + $0x818] sm:$0xff] }
 0x63b   :  { %6854 = vmatpush1.bf16.msra.mxu1 %v9685_v6  ;;  %6597 = vmatprep.subr.bf16.mxu0 %v9692_v30  ;;  %v1633_v6 = vld [vmem:[#allocation12 + $0x838] sm:$0xff]  ;;  %v9739_v30 = vcombine.low %v1620_v19, %v1624_v38  ;;  %v1676_v19 = vld [vmem:[#allocation12 + $0x990] sm:$0xff] }
 0x63c   :  { %6855 = vmatprep.subr.bf16.mxu1 %v9694_v60  ;;  %v9741_v60 = vcombine.low %v1621_v4, %v1625_v34  ;;  %v9750_v35 = vcombine.high %v1629_v0, %v1633_v6  ;;  %v1680_v38 = vld [vmem:[#allocation12 + $0x9b0] sm:$0xff]  ;;  %v1677_v4 = vld [vmem:[#allocation12 + $0x998] sm:$0xff] }
 0x63d   :  { %v1681_v34 = vld [vmem:[#allocation12 + $0x9b8] sm:$0xff] }
 0x63e   :  { %6598 = vmatpush1.bf16.msra.mxu0 %v9691_v1  ;;  %v9747_v1 = vcombine.low %v1628_v46, %v1632_v25  ;;  %v1684_v46 = vld [vmem:[#allocation12 + $0x9d0] sm:$0xff] }
 0x63f   :  { %6856 = vmatpush1.bf16.msra.mxu1 %v9693_v10  ;;  %6599 = vmatprep.subr.bf16.mxu0 %v9700_v5  ;;  %v1637_v10 = vld [vmem:[#allocation12 + $0x858] sm:$0xff]  ;;  %v1688_v25 = vld [vmem:[#allocation12 + $0x9f0] sm:$0xff] }
 0x640   :  { %6857 = vmatprep.subr.bf16.mxu1 %v9702_v23  ;;  %v1641_v5 = vld [vmem:[#allocation12 + $0x878] sm:$0xff]  ;;  %v9749_v23 = vcombine.low %v1629_v0, %v1633_v6 }
 0x641   :  { %v9758_v33 = vcombine.high %v1637_v10, %v1641_v5  ;;  %v1685_v0 = vld [vmem:[#allocation12 + $0x9d8] sm:$0xff] }
 0x642   :  { %6600 = vmatpush1.bf16.msra.mxu0 %v9699_v42  ;;  %v1645_v42 = vld [vmem:[#allocation12 + $0x898] sm:$0xff] }
 0x643   :  { %6858 = vmatpush1.bf16.msra.mxu1 %v9701_v15  ;;  %6601 = vmatprep.subr.bf16.mxu0 %v9708_v32  ;;  %v1649_v15 = vld [vmem:[#allocation12 + $0x8b8] sm:$0xff]  ;;  %v9755_v32 = vcombine.low %v1636_v17, %v1640_v49  ;;  %v1692_v17 = vld [vmem:[#allocation12 + $0xa10] sm:$0xff] }
 0x644   :  { %6859 = vmatprep.subr.bf16.mxu1 %v9710_v50  ;;  %v9757_v50 = vcombine.low %v1637_v10, %v1641_v5  ;;  %v9766_v41 = vcombine.high %v1645_v42, %v1649_v15  ;;  %v1689_v6 = vld [vmem:[#allocation12 + $0x9f8] sm:$0xff]  ;;  %v1696_v49 = vld [vmem:[#allocation12 + $0xa30] sm:$0xff]  ;;  %v9803_v5 = vcombine.low %v1684_v46, %v1688_v25 }
 0x645   :  { %v1697_v10 = vld [vmem:[#allocation12 + $0xa38] sm:$0xff] }
 0x646   :  { %6602 = vmatpush1.bf16.msra.mxu0 %v9707_v48  ;;  %v1653_v48 = vld [vmem:[#allocation12 + $0x8d8] sm:$0xff] }
 0x647   :  { %6860 = vmatpush1.bf16.msra.mxu1 %v9709_v54  ;;  %6603 = vmatprep.subr.bf16.mxu0 %v9716_v12  ;;  %v1657_v54 = vld [vmem:[#allocation12 + $0x8f8] sm:$0xff]  ;;  %v9763_v12 = vcombine.low %v1644_v20, %v1648_v7  ;;  %v1700_v7 = vld [vmem:[#allocation12 + $0xa50] sm:$0xff] }
 0x648   :  { %6861 = vmatprep.subr.bf16.mxu1 %v9718_v36  ;;  %v9772_v36 = vcombine.high %v1652_v11, %v1656_v21  ;;  %v9774_v51 = vcombine.high %v1653_v48, %v1657_v54 }
 0x64a   :  { %6604 = vmatpush1.bf16.msra.mxu0 %v9715_v58  ;;  %v1665_v58 = vld [vmem:[#allocation12 + $0x938] sm:$0xff] }
 0x64b   :  { %6862 = vmatpush1.bf16.msra.mxu1 %v9717_v59  ;;  %6605 = vmatprep.subr.bf16.mxu0 %v9724_v9  ;;  %v9773_v59 = vcombine.low %v1653_v48, %v1657_v54  ;;  %v9780_v9 = vcombine.high %v1660_v53, %v1664_v13  ;;  %v1709_v48 = vld [vmem:[#allocation12 + $0xa98] sm:$0xff] }
 0x64c   :  { %6863 = vmatprep.subr.bf16.mxu1 %v9726_v43  ;;  %v9782_v43 = vcombine.high %v1661_v28, %v1665_v58  ;;  %v1713_v54 = vld [vmem:[#allocation12 + $0xab8] sm:$0xff] }
 0x64e   :  { %6606 = vmatpush1.bf16.msra.mxu0 %v9723_v8  ;;  %v9779_v8 = vcombine.low %v1660_v53, %v1664_v13  ;;  %v1716_v53 = vld [vmem:[#allocation12 + $0xad0] sm:$0xff] }
 0x64f   :  { %6864 = vmatpush1.bf16.msra.mxu1 %v9725_v24  ;;  %6607 = vmatprep.subr.bf16.mxu0 %v9732_v3  ;;  %v9781_v24 = vcombine.low %v1661_v28, %v1665_v58  ;;  %v9788_v3 = vcombine.high %v1668_v52, %v1672_v63  ;;  %v1720_v13 = vld [vmem:[#allocation12 + $0xaf0] sm:$0xff]  ;;  %v1717_v28 = vld [vmem:[#allocation12 + $0xad8] sm:$0xff] }
 0x650   :  { %6865 = vmatprep.subr.bf16.mxu1 %v9734_v40  ;;  %v9790_v40 = vcombine.high %v1669_v56, %v1673_v39  ;;  %v1721_v58 = vld [vmem:[#allocation12 + $0xaf8] sm:$0xff] }
 0x652   :  { %6608 = vmatpush1.bf16.msra.mxu0 %v9731_v57  ;;  %v9787_v57 = vcombine.low %v1668_v52, %v1672_v63  ;;  %v1724_v52 = vld [vmem:[#allocation12 + $0xb10] sm:$0xff] }
 0x653   :  { %6866 = vmatpush1.bf16.msra.mxu1 %v9733_v27  ;;  %6609 = vmatprep.subr.bf16.mxu0 %v9740_v14  ;;  %v9789_v27 = vcombine.low %v1669_v56, %v1673_v39  ;;  %v9796_v14 = vcombine.high %v1676_v19, %v1680_v38  ;;  %v1728_v63 = vld [vmem:[#allocation12 + $0xb30] sm:$0xff]  ;;  %v1725_v56 = vld [vmem:[#allocation12 + $0xb18] sm:$0xff] }
 0x654   :  { %6867 = vmatprep.subr.bf16.mxu1 %v9742_v55  ;;  %v9798_v55 = vcombine.high %v1677_v4, %v1681_v34  ;;  %v1729_v39 = vld [vmem:[#allocation12 + $0xb38] sm:$0xff] }
 0x656   :  { %6610 = vmatpush1.bf16.msra.mxu0 %v9739_v30  ;;  %v9795_v30 = vcombine.low %v1676_v19, %v1680_v38  ;;  %v1732_v19 = vld [vmem:[#allocation12 + $0xb50] sm:$0xff] }
 0x657   :  { %6868 = vmatpush1.bf16.msra.mxu1 %v9741_v60  ;;  %6622 = vmatprep.subr.bf16.mxu0 %v9748_v62  ;;  %v9797_v60 = vcombine.low %v1677_v4, %v1681_v34  ;;  %v9804_v62 = vcombine.high %v1684_v46, %v1688_v25  ;;  %v1736_v38 = vld [vmem:[#allocation12 + $0xb70] sm:$0xff]  ;;  %v1733_v4 = vld [vmem:[#allocation12 + $0xb58] sm:$0xff] }
 0x658   :  { %6880 = vmatprep.subr.bf16.mxu1 %v9750_v35  ;;  %v9806_v35 = vcombine.high %v1685_v0, %v1689_v6  ;;  %v1737_v34 = vld [vmem:[#allocation12 + $0xb78] sm:$0xff]  ;;  %v1740_v46 = vld [vmem:[#allocation12 + $0xb90] sm:$0xff] }
 0x659   :  { %6612 = vmatmul.mubr.bf16.vlgmr.msra.gmra.mrb[16].mxu0 %v12485_v29  ;;  %v1744_v25 = vld [vmem:[#allocation12 + $0xbb0] sm:$0xff] }
 0x65a   :  { %6870 = vmatmul.mubr.bf16.vlgmr.msra.gmra.mrb[16].mxu1 %v12485_v29  ;;  %6623 = vmatpush1.bf16.msra.mxu0 %v9747_v1  ;;  %v9765_v29 = vcombine.low %v1645_v42, %v1649_v15  ;;  %v1693_v1 = vld [vmem:[#allocation12 + $0xa18] sm:$0xff] }
 0x65b   :  { %6654 = vmatprep.mubr.bf16.mxu0 %v12491_v16  ;;  %6881 = vmatpush1.bf16.msra.mxu1 %v9749_v23  ;;  %v9805_v23 = vcombine.low %v1685_v0, %v1689_v6  ;;  %v9814_v20 = vcombine.high %v1693_v1, %v1697_v10  ;;  %v1701_v42 = vld [vmem:[#allocation12 + $0xa58] sm:$0xff] }
 0x65c   :  { %6912 = vmatprep.mubr.bf16.mxu1 %v12491_v16  ;;  %6624 = vmatprep.subr.bf16.mxu0 %v9756_v26  ;;  %v9771_v16 = vcombine.low %v1652_v11, %v1656_v21  ;;  %v9812_v26 = vcombine.high %v1692_v17, %v1696_v49  ;;  %v1705_v15 = vld [vmem:[#allocation12 + $0xa78] sm:$0xff]  ;;  %v1708_v11 = vld [vmem:[#allocation12 + $0xa90] sm:$0xff] }
 0x65d   :  { %6882 = vmatprep.subr.bf16.mxu1 %v9758_v33  ;;  %v1704_v33 = vld [vmem:[#allocation12 + $0xa70] sm:$0xff]  ;;  %v1741_v0 = vld [vmem:[#allocation12 + $0xb98] sm:$0xff] }
 0x65e   :  { %6625 = vmatpush1.bf16.msra.mxu0 %v9755_v32  ;;  %v9811_v32 = vcombine.low %v1692_v17, %v1696_v49  ;;  %v1712_v21 = vld [vmem:[#allocation12 + $0xab0] sm:$0xff]  ;;  %v1745_v6 = vld [vmem:[#allocation12 + $0xbb8] sm:$0xff] }
 0x65f   :  { %6883 = vmatpush1.bf16.msra.mxu1 %v9757_v50  ;;  %6626 = vmatprep.subr.bf16.mxu0 %v9764_v47  ;;  %v9813_v50 = vcombine.low %v1693_v1, %v1697_v10  ;;  %v9820_v47 = vcombine.high %v1700_v7, %v1704_v33  ;;  %v1748_v17 = vld [vmem:[#allocation12 + $0xbd0] sm:$0xff]  ;;  %v1749_v1 = vld [vmem:[#allocation12 + $0xbd8] sm:$0xff] }
 0x660   :  { %6884 = vmatprep.subr.bf16.mxu1 %v9766_v41  ;;  %v9822_v41 = vcombine.high %v1701_v42, %v1705_v15  ;;  %v1752_v49 = vld [vmem:[#allocation12 + $0xbf0] sm:$0xff]  ;;  %v1753_v10 = vld [vmem:[#allocation12 + $0xbf8] sm:$0xff] }
 0x662   :  { %6627 = vmatpush1.bf16.msra.mxu0 %v9763_v12  ;;  %v9819_v12 = vcombine.low %v1700_v7, %v1704_v33  ;;  %v1756_v7 = vld [vmem:[#allocation12 + $0xc10] sm:$0xff] }
 0x663   :  { %6885 = vmatpush1.bf16.msra.mxu1 %v9765_v29  ;;  %6628 = vmatprep.subr.bf16.mxu0 %v9772_v36  ;;  %v9821_v29 = vcombine.low %v1701_v42, %v1705_v15  ;;  %v9828_v36 = vcombine.high %v1708_v11, %v1712_v21  ;;  %v1760_v33 = vld [vmem:[#allocation12 + $0xc30] sm:$0xff]  ;;  %v1757_v42 = vld [vmem:[#allocation12 + $0xc18] sm:$0xff] }
 0x664   :  { %6886 = vmatprep.subr.bf16.mxu1 %v9774_v51  ;;  %v9830_v51 = vcombine.high %v1709_v48, %v1713_v54  ;;  %v1761_v15 = vld [vmem:[#allocation12 + $0xc38] sm:$0xff] }
 0x666   :  { %6629 = vmatpush1.bf16.msra.mxu0 %v9771_v16  ;;  %v9827_v16 = vcombine.low %v1708_v11, %v1712_v21  ;;  %v1764_v11 = vld [vmem:[#allocation12 + $0xc50] sm:$0xff] }
 0x667   :  { %6887 = vmatpush1.bf16.msra.mxu1 %v9773_v59  ;;  %6630 = vmatprep.subr.bf16.mxu0 %v9780_v9  ;;  %v9829_v59 = vcombine.low %v1709_v48, %v1713_v54  ;;  %v9836_v9 = vcombine.high %v1716_v53, %v1720_v13  ;;  %v1768_v21 = vld [vmem:[#allocation12 + $0xc70] sm:$0xff]  ;;  %v9875_v48 = vcombine.low %v1756_v7, %v1760_v33  ;;  %v1765_v54 = vld [vmem:[#allocation12 + $0xc58] sm:$0xff] }
 0x668   :  { %6888 = vmatprep.subr.bf16.mxu1 %v9782_v43  ;;  %v9838_v43 = vcombine.high %v1717_v28, %v1721_v58 }
 0x66a   :  { %6631 = vmatpush1.bf16.msra.mxu0 %v9779_v8  ;;  %v9835_v8 = vcombine.low %v1716_v53, %v1720_v13  ;;  %v1776_v53 = vld [vmem:[#allocation12 + $0xcb0] sm:$0xff] }
 0x66b   :  { %6889 = vmatpush1.bf16.msra.mxu1 %v9781_v24  ;;  %6632 = vmatprep.subr.bf16.mxu0 %v9788_v3  ;;  %v9837_v24 = vcombine.low %v1717_v28, %v1721_v58  ;;  %v9844_v3 = vcombine.high %v1724_v52, %v1728_v63  ;;  %v1773_v28 = vld [vmem:[#allocation12 + $0xc98] sm:$0xff] }
 0x66c   :  { %6890 = vmatprep.subr.bf16.mxu1 %v9790_v40  ;;  %v9846_v40 = vcombine.high %v1725_v56, %v1729_v39  ;;  %v1777_v58 = vld [vmem:[#allocation12 + $0xcb8] sm:$0xff] }
 0x66e   :  { %6633 = vmatpush1.bf16.msra.mxu0 %v9787_v57  ;;  %v9843_v57 = vcombine.low %v1724_v52, %v1728_v63  ;;  %v1780_v52 = vld [vmem:[#allocation12 + $0xcd0] sm:$0xff] }
 0x66f   :  { %6891 = vmatpush1.bf16.msra.mxu1 %v9789_v27  ;;  %6634 = vmatprep.subr.bf16.mxu0 %v9796_v14  ;;  %v9845_v27 = vcombine.low %v1725_v56, %v1729_v39  ;;  %v9852_v14 = vcombine.high %v1732_v19, %v1736_v38  ;;  %v1784_v63 = vld [vmem:[#allocation12 + $0xcf0] sm:$0xff]  ;;  %v1781_v56 = vld [vmem:[#allocation12 + $0xcd8] sm:$0xff] }
 0x670   :  { %6892 = vmatprep.subr.bf16.mxu1 %v9798_v55  ;;  %v9854_v55 = vcombine.high %v1733_v4, %v1737_v34  ;;  %v1785_v39 = vld [vmem:[#allocation12 + $0xcf8] sm:$0xff] }
 0x672   :  { %6635 = vmatpush1.bf16.msra.mxu0 %v9795_v30  ;;  %v9851_v30 = vcombine.low %v1732_v19, %v1736_v38  ;;  %v1792_v19 = vld [vmem:[#allocation12 + $0xd30] sm:$0xff]  ;;  %v1789_v38 = vld [vmem:[#allocation12 + $0xd18] sm:$0xff] }
 0x673   :  { %6893 = vmatpush1.bf16.msra.mxu1 %v9797_v60  ;;  %6636 = vmatprep.subr.bf16.mxu0 %v9804_v62  ;;  %v9853_v60 = vcombine.low %v1733_v4, %v1737_v34  ;;  %v9860_v62 = vcombine.high %v1740_v46, %v1744_v25  ;;  %v1793_v4 = vld [vmem:[#allocation12 + $0xd38] sm:$0xff]  ;;  %v9901_v34 = vcombine.low %v1781_v56, %v1785_v39 }
 0x674   :  { %6894 = vmatprep.subr.bf16.mxu1 %v9806_v35  ;;  %v9862_v35 = vcombine.high %v1741_v0, %v1745_v6 }
 0x676   :  { %6637 = vmatpush1.bf16.msra.mxu0 %v9803_v5  ;;  %v9859_v5 = vcombine.low %v1740_v46, %v1744_v25  ;;  %v1797_v46 = vld [vmem:[#allocation12 + $0xd58] sm:$0xff] }
 0x677   :  { %6895 = vmatpush1.bf16.msra.mxu1 %v9805_v23  ;;  %6638 = vmatprep.subr.bf16.mxu0 %v9812_v26  ;;  %v9861_v23 = vcombine.low %v1741_v0, %v1745_v6  ;;  %v9868_v26 = vcombine.high %v1748_v17, %v1752_v49  ;;  %v1801_v25 = vld [vmem:[#allocation12 + $0xd78] sm:$0xff]  ;;  %v2138_v6 = vld [vmem:[#allocation13] sm:$0xff] }
 0x678   :  { %6896 = vmatprep.subr.bf16.mxu1 %v9814_v20  ;;  %v9870_v20 = vcombine.high %v1749_v1, %v1753_v10 }
 0x67a   :  { %6639 = vmatpush1.bf16.msra.mxu0 %v9811_v32  ;;  %v9867_v32 = vcombine.low %v1748_v17, %v1752_v49  ;;  %v1808_v17 = vld [vmem:[#allocation12 + $0xdb0] sm:$0xff] }
 0x67b   :  { %6897 = vmatpush1.bf16.msra.mxu1 %v9813_v50  ;;  %6640 = vmatprep.subr.bf16.mxu0 %v9820_v47  ;;  %v9869_v50 = vcombine.low %v1749_v1, %v1753_v10  ;;  %v9876_v47 = vcombine.high %v1756_v7, %v1760_v33  ;;  %v12768_v49 = vld [vmem:[#allocation28_spill] sm:$0xff]  ;;  %v1805_v10 = vld [vmem:[#allocation12 + $0xd98] sm:$0xff] }
 0x67c   :  { %6898 = vmatprep.subr.bf16.mxu1 %v9822_v41  ;;  %v9878_v41 = vcombine.high %v1757_v42, %v1761_v15  ;;  %v2143_v1 = vrot.slane %v2138_v6, %v12768_v49  ;;  %v12770_v33 = vld [vmem:[#allocation30_spill] sm:$0xff] }
 0x67e   :  { %6641 = vmatpush1.bf16.msra.mxu0 %v9819_v12  ;;  %v1769_v12 = vld [vmem:[#allocation12 + $0xc78] sm:$0xff] }
 0x67f   :  { %6899 = vmatpush1.bf16.msra.mxu1 %v9821_v29  ;;  %6642 = vmatprep.subr.bf16.mxu0 %v9828_v36  ;;  %v9877_v29 = vcombine.low %v1757_v42, %v1761_v15  ;;  %v9884_v36 = vcombine.high %v1764_v11, %v1768_v21  ;;  %v9886_v13 = vcombine.high %v1765_v54, %v1769_v12 }
 0x680   :  { %6900 = vmatprep.subr.bf16.mxu1 %v9830_v51  ;;  %v1772_v51 = vld [vmem:[#allocation12 + $0xc90] sm:$0xff]  ;;  %v2155_v42 = vrot.slane %v2138_v6, %v12770_v33  ;;  %v9917_v15 = vcombine.low %v1797_v46, %v1801_v25 }
 0x682   :  { %6643 = vmatpush1.bf16.msra.mxu0 %v9827_v16  ;;  %v9883_v16 = vcombine.low %v1764_v11, %v1768_v21  ;;  %v1816_v11 = vld [vmem:[#allocation12 + $0xdf0] sm:$0xff] }
 0x683   :  { %6901 = vmatpush1.bf16.msra.mxu1 %v9829_v59  ;;  %6644 = vmatprep.subr.bf16.mxu0 %v9836_v9  ;;  %v9885_v59 = vcombine.low %v1765_v54, %v1769_v12  ;;  %v9892_v9 = vcombine.high %v1772_v51, %v1776_v53  ;;  %v1813_v12 = vld [vmem:[#allocation12 + $0xdd8] sm:$0xff] }
 0x684   :  { %6902 = vmatprep.subr.bf16.mxu1 %v9838_v43  ;;  %v9894_v43 = vcombine.high %v1773_v28, %v1777_v58 }
 0x686   :  { %6645 = vmatpush1.bf16.msra.mxu0 %v9835_v8  ;;  %v9891_v8 = vcombine.low %v1772_v51, %v1776_v53 }
 0x687   :  { %6903 = vmatpush1.bf16.msra.mxu1 %v9837_v24  ;;  %6646 = vmatprep.subr.bf16.mxu0 %v9844_v3  ;;  %v9900_v24 = vcombine.high %v1780_v52, %v1784_v63  ;;  %v9902_v3 = vcombine.high %v1781_v56, %v1785_v39 }
 0x688   :  { %6904 = vmatprep.subr.bf16.mxu1 %v9846_v40  ;;  %v1788_v40 = vld [vmem:[#allocation12 + $0xd10] sm:$0xff] }
 0x689   :  { %v9907_v0 = vcombine.low %v1788_v40, %v1792_v19 }
 0x68a   :  { %6647 = vmatpush1.bf16.msra.mxu0 %v9843_v57  ;;  %v9908_v57 = vcombine.high %v1788_v40, %v1792_v19 }
 0x68b   :  { %6905 = vmatpush1.bf16.msra.mxu1 %v9845_v27  ;;  %6648 = vmatprep.subr.bf16.mxu0 %v9852_v14  ;;  %v9910_v27 = vcombine.high %v1789_v38, %v1793_v4  ;;  %v1796_v14 = vld [vmem:[#allocation12 + $0xd50] sm:$0xff] }
 0x68c   :  { %6906 = vmatprep.subr.bf16.mxu1 %v9854_v55  ;;  %v1800_v55 = vld [vmem:[#allocation12 + $0xd70] sm:$0xff] }
 0x68d   :  { %v9915_v7 = vcombine.low %v1796_v14, %v1800_v55 }
 0x68e   :  { %6649 = vmatpush1.bf16.msra.mxu0 %v9851_v30  ;;  %v9909_v30 = vcombine.low %v1789_v38, %v1793_v4  ;;  %v1821_v38 = vld [vmem:[#allocation12 + $0xe18] sm:$0xff] }
 0x68f   :  { %6907 = vmatpush1.bf16.msra.mxu1 %v9853_v60  ;;  %6650 = vmatprep.subr.bf16.mxu0 %v9860_v62  ;;  %v9916_v60 = vcombine.high %v1796_v14, %v1800_v55  ;;  %v9918_v62 = vcombine.high %v1797_v46, %v1801_v25  ;;  %v1825_v4 = vld [vmem:[#allocation12 + $0xe38] sm:$0xff] }
 0x690   :  { %6908 = vmatprep.subr.bf16.mxu1 %v9862_v35  ;;  %v1804_v35 = vld [vmem:[#allocation12 + $0xd90] sm:$0xff]  ;;  %v9942_v25 = vcombine.high %v1821_v38, %v1825_v4 }
 0x692   :  { %6651 = vmatpush1.bf16.msra.mxu0 %v9859_v5  ;;  %v1809_v5 = vld [vmem:[#allocation12 + $0xdb8] sm:$0xff] }
 0x693   :  { %6909 = vmatpush1.bf16.msra.mxu1 %v9861_v23  ;;  %6652 = vmatprep.subr.bf16.mxu0 %v9868_v26  ;;  %v2151_v23 = vrot.slane %v2138_v6, %v11805_v44  ;;  %v12769_v26 = vld [vmem:[#allocation29_spill] sm:$0xff] }
 0x694   :  { %6910 = vmatprep.subr.bf16.mxu1 %v9870_v20  ;;  %v2147_v20 = vrot.slane %v2138_v6, %v12769_v26  ;;  %v1832_v6 = vld [vmem:[#allocation12 + $0xe70] sm:$0xff] }
 0x696   :  { %6653 = vmatpush1.bf16.msra.mxu0 %v9867_v32  ;;  %v9924_v32 = vcombine.high %v1804_v35, %v1808_v17 }
 0x697   :  { %6911 = vmatpush1.bf16.msra.mxu1 %v9869_v50  ;;  %6665 = vmatprep.subr.bf16.mxu0 %v9876_v47  ;;  %v9926_v47 = vcombine.high %v1805_v10, %v1809_v5 }
 0x698   :  { %6923 = vmatprep.subr.bf16.mxu1 %v9878_v41  ;;  %v1812_v41 = vld [vmem:[#allocation12 + $0xdd0] sm:$0xff] }
 0x699   :  { %6655 = vmatmul.mubr.bf16.vlgmr.msra.gmra.mrb[16].mxu0 %v12523_v22  ;;  %v9931_v19 = vcombine.low %v1812_v41, %v1816_v11 }
 0x69a   :  { %6913 = vmatmul.mubr.bf16.vlgmr.msra.gmra.mrb[16].mxu1 %v12523_v22  ;;  %6666 = vmatpush1.bf16.msra.mxu0 %v9875_v48  ;;  %v9893_v22 = vcombine.low %v1773_v28, %v1777_v58  ;;  %v9923_v28 = vcombine.low %v1804_v35, %v1808_v17  ;;  %v9925_v58 = vcombine.low %v1805_v10, %v1809_v5  ;;  %v1833_v35 = vld [vmem:[#allocation12 + $0xe78] sm:$0xff] }
 0x69b   :  { %6697 = vmatprep.mubr.bf16.mxu0 %v12532_v18  ;;  %6924 = vmatpush1.bf16.msra.mxu1 %v9877_v29  ;;  %v1817_v29 = vld [vmem:[#allocation12 + $0xdf8] sm:$0xff] }
 0x69c   :  { %6955 = vmatprep.mubr.bf16.mxu1 %v12532_v18  ;;  %6667 = vmatprep.subr.bf16.mxu0 %v9884_v36  ;;  %v9899_v18 = vcombine.low %v1780_v52, %v1784_v63  ;;  %v9932_v63 = vcombine.high %v1812_v41, %v1816_v11  ;;  %v9933_v14 = vcombine.low %v1813_v12, %v1817_v29 }
 0x69d   :  { %6925 = vmatprep.subr.bf16.mxu1 %v9886_v13 }
 0x69e   :  { %6668 = vmatpush1.bf16.msra.mxu0 %v9883_v16 }
 0x69f   :  { %6926 = vmatpush1.bf16.msra.mxu1 %v9885_v59  ;;  %6669 = vmatprep.subr.bf16.mxu0 %v9892_v9 }
 0x6a0   :  { %6927 = vmatprep.subr.bf16.mxu1 %v9894_v43 }
 0x6a2   :  { %6670 = vmatpush1.bf16.msra.mxu0 %v9891_v8  ;;  %v9934_v8 = vcombine.high %v1813_v12, %v1817_v29 }
 0x6a3   :  { %6928 = vmatpush1.bf16.msra.mxu1 %v9893_v22  ;;  %6671 = vmatprep.subr.bf16.mxu0 %v9900_v24  ;;  %v1820_v22 = vld [vmem:[#allocation12 + $0xe10] sm:$0xff] }
 0x6a4   :  { %6929 = vmatprep.subr.bf16.mxu1 %v9902_v3  ;;  %v1824_v24 = vld [vmem:[#allocation12 + $0xe30] sm:$0xff] }
 0x6a5   :  { %v9940_v55 = vcombine.high %v1820_v22, %v1824_v24  ;;  %v9939_v17 = vcombine.low %v1820_v22, %v1824_v24 }
 0x6a6   :  { %6672 = vmatpush1.bf16.msra.mxu0 %v9899_v18 }
 0x6a7   :  { %6930 = vmatpush1.bf16.msra.mxu1 %v9901_v34  ;;  %6673 = vmatprep.subr.bf16.mxu0 %v9908_v57 }
 0x6a8   :  { %6931 = vmatprep.subr.bf16.mxu1 %v9910_v27 }
 0x6aa   :  { %6674 = vmatpush1.bf16.msra.mxu0 %v9907_v0  ;;  %v1828_v0 = vld [vmem:[#allocation12 + $0xe50] sm:$0xff] }
 0x6ab   :  { %6932 = vmatpush1.bf16.msra.mxu1 %v9909_v30  ;;  %6675 = vmatprep.subr.bf16.mxu0 %v9916_v60  ;;  %v9948_v10 = vcombine.high %v1828_v0, %v1832_v6 }
 0x6ac   :  { %v6269_v50 = vpop.f32.mrb[12].mxu0  ;;  %6933 = vmatprep.subr.bf16.mxu1 %v9918_v62  ;;  %v1829_v62 = vld [vmem:[#allocation12 + $0xe58] sm:$0xff] }
 0x6ad   :  { %v12613_v21 = vadd.f32 %v6269_v50, %v2143_v1  ;;  %v6527_v48 = vpop.f32.mrb[12].mxu1  ;;  %v6271_v54 = vpop.f32.mrb[13].mxu0  ;;  %v9950_v5 = vcombine.high %v1829_v62, %v1833_v35  ;;  %v12639_v50 = vld [vmem:[#allocation12 + $0xef0] sm:$0xff]  ;;  %v9949_v41 = vcombine.low %v1829_v62, %v1833_v35 }
 0x6ae   :  { %v12615_v36 = vadd.f32 %v6527_v48, %v2151_v23  ;;  %v12617_v51 = vadd.f32 %v6271_v54, %v2147_v20  ;;  %v6529_v53 = vpop.f32.mrb[13].mxu1  ;;  %v6273_v13 = vpop.f32.mrb[14].mxu0  ;;  %6676 = vmatpush1.bf16.msra.mxu0 %v9915_v7  ;;  %v1837_v7 = vld [vmem:[#allocation12 + $0xe98] sm:$0xff] }
 0x6af   :  { %v7068_v16 = vmul.f32 0.70710677, %v12613_v21  ;;  %v12620_v59 = vadd.f32 %v6529_v53, %v2155_v42  ;;  %v12622_v9 = vadd.f32 %v6273_v13, %v2143_v1  ;;  %v6531_v43 = vpop.f32.mrb[14].mxu1  ;;  %6934 = vmatpush1.bf16.msra.mxu1 %v9917_v15  ;;  %v6275_v52 = vpop.f32.mrb[15].mxu0  ;;  %6677 = vmatprep.subr.bf16.mxu0 %v9924_v32  ;;  %v9941_v1 = vcombine.low %v1821_v38, %v1825_v4  ;;  %v12637_v32 = vld [vmem:[#allocation12 + $0xed0] sm:$0xff]  ;;  %v12641_v48 = vld [vmem:[#allocation12 + $0xed8] sm:$0xff] }
 0x6b0   :  { %v7070_v56 = vmul.f32 0.70710677, %v12615_v36  ;;  %v7069_v39 = vmul.f32 0.70710677, %v12617_v51  ;;  %6935 = vmatprep.subr.bf16.mxu1 %v9926_v47  ;;  %v6533_v40 = vpop.f32.mrb[15].mxu1  ;;  %v12628_v34 = vadd.f32 %v6531_v43, %v2151_v23  ;;  %v12630_v57 = vadd.f32 %v6275_v52, %v2147_v20  ;;  %v1836_v23 = vld [vmem:[#allocation12 + $0xe90] sm:$0xff] }
 0x6b1   :  { %11216 = verf.f32 %v7068_v16  ;;  %v7071_v3 = vmul.f32 0.70710677, %v12620_v59  ;;  %v7076_v18 = vmul.f32 0.70710677, %v12622_v9  ;;  %v12632_v27 = vadd.f32 %v6533_v40, %v2155_v42  ;;  %v1840_v20 = vld [vmem:[#allocation12 + $0xeb0] sm:$0xff]  ;;  %v1841_v42 = vld [vmem:[#allocation12 + $0xeb8] sm:$0xff] }
 0x6b2   :  { %11218 = verf.f32 %v7070_v56  ;;  %6678 = vmatpush1.bf16.msra.mxu0 %v9923_v28  ;;  %v7078_v46 = vmul.f32 0.70710677, %v12628_v34  ;;  %v7077_v30 = vmul.f32 0.70710677, %v12630_v57  ;;  %v9947_v15 = vcombine.low %v1828_v0, %v1832_v6  ;;  %v12643_v54 = vld [vmem:[#allocation12 + $0xef8] sm:$0xff]  ;;  %v12645_v53 = vld [vmem:[#allocation12 + $0xf10] sm:$0xff] }
 0x6b3   :  { %11220 = verf.f32 %v7069_v39  ;;  %6936 = vmatpush1.bf16.msra.mxu1 %v9925_v58  ;;  %6679 = vmatprep.subr.bf16.mxu0 %v9932_v63  ;;  %v7079_v60 = vmul.f32 0.70710677, %v12632_v27  ;;  %v9956_v11 = vcombine.high %v1836_v23, %v1840_v20  ;;  %v9958_v29 = vcombine.high %v1837_v7, %v1841_v42  ;;  %v12647_v13 = vld [vmem:[#allocation12 + $0xf30] sm:$0xff]  ;;  %v1853_v6 = vld [vmem:[#allocation12 + $0xf18] sm:$0xff] }
 0x6b4   :  { %11222 = verf.f32 %v7071_v3  ;;  %6937 = vmatprep.subr.bf16.mxu1 %v9934_v8  ;;  %v9955_v58 = vcombine.low %v1836_v23, %v1840_v20  ;;  %v9957_v16 = vcombine.low %v1837_v7, %v1841_v42  ;;  %v9963_v43 = vcombine.low %v12637_v32, %v12639_v50  ;;  %v1860_v7 = vld [vmem:[#allocation12 + $0xf50] sm:$0xff] }
 0x6b5   :  { %11224 = verf.f32 %v7076_v18  ;;  %v9964_v56 = vcombine.high %v12637_v32, %v12639_v50  ;;  %v9965_v39 = vcombine.low %v12641_v48, %v12643_v54  ;;  %v9966_v8 = vcombine.high %v12641_v48, %v12643_v54  ;;  %v1864_v42 = vld [vmem:[#allocation12 + $0xf70] sm:$0xff]  ;;  %v1861_v50 = vld [vmem:[#allocation12 + $0xf58] sm:$0xff] }
 0x6b6   :  { %11226 = verf.f32 %v7078_v46  ;;  %6680 = vmatpush1.bf16.msra.mxu0 %v9931_v19  ;;  %v7052_v24 = vmul.f32 0.5, %v12613_v21  ;;  %v7054_v3 = vmul.f32 0.5, %v12615_v36  ;;  %v9972_v19 = vcombine.high %v12645_v53, %v12647_v13 }
 0x6b7   :  { %11228 = verf.f32 %v7077_v30  ;;  %6938 = vmatpush1.bf16.msra.mxu1 %v9933_v14  ;;  %6681 = vmatprep.subr.bf16.mxu0 %v9940_v55  ;;  %v7053_v4 = vmul.f32 0.5, %v12617_v51  ;;  %v7060_v14 = vmul.f32 0.5, %v12622_v9  ;;  %v7062_v36 = vmul.f32 0.5, %v12628_v34  ;;  %v1857_v30 = vld [vmem:[#allocation12 + $0xf38] sm:$0xff] }
 0x6b8   :  { %11230 = verf.f32 %v7079_v60  ;;  %6939 = vmatprep.subr.bf16.mxu1 %v9942_v25  ;;  %v7055_v25 = vmul.f32 0.5, %v12620_v59  ;;  %v9974_v20 = vcombine.high %v1853_v6, %v1857_v30  ;;  %v9980_v48 = vcombine.high %v1860_v7, %v1864_v42 }
 0x6ba   :  { %6682 = vmatpush1.bf16.msra.mxu0 %v9939_v17  ;;  %v7061_v17 = vmul.f32 0.5, %v12630_v57 }
 0x6bb   :  { %v11217_v47 = vpop.eup %11216  ;;  %6940 = vmatpush1.bf16.msra.mxu1 %v9941_v1  ;;  %6683 = vmatprep.subr.bf16.mxu0 %v9948_v10  ;;  %v7063_v10 = vmul.f32 0.5, %v12632_v27  ;;  %v9971_v27 = vcombine.low %v12645_v53, %v12647_v13 }
 0x6bc   :  { %v11219_v12 = vpop.eup %11218  ;;  %6941 = vmatprep.subr.bf16.mxu1 %v9950_v5  ;;  %v7100_v63 = vadd.f32 1.0, %v11217_v47  ;;  %v1865_v47 = vld [vmem:[#allocation12 + $0xf78] sm:$0xff] }
 0x6bd   :  { %v11221_v28 = vpop.eup %11220  ;;  %v7102_v40 = vadd.f32 1.0, %v11219_v12  ;;  %v9982_v12 = vcombine.high %v1861_v50, %v1865_v47 }
 0x6be   :  { %v11223_v52 = vpop.eup %11222  ;;  %6684 = vmatpush1.bf16.msra.mxu0 %v9947_v15  ;;  %v7101_v18 = vadd.f32 1.0, %v11221_v28  ;;  %v7116_v62 = vmul.f32 %v7100_v63, %v7052_v24  ;;  %v1872_v28 = vld [vmem:[#allocation12 + $0xfb0] sm:$0xff] }
 0x6bf   :  { %v11225_v22 = vpop.eup %11224  ;;  %6942 = vmatpush1.bf16.msra.mxu1 %v9949_v41  ;;  %6685 = vmatprep.subr.bf16.mxu0 %v9956_v11  ;;  %v7103_v21 = vadd.f32 1.0, %v11223_v52  ;;  %v7118_v1 = vmul.f32 %v7102_v40, %v7054_v3  ;;  %v9973_v11 = vcombine.low %v1853_v6, %v1857_v30  ;;  %v9979_v52 = vcombine.low %v1860_v7, %v1864_v42  ;;  %v1876_v63 = vld [vmem:[#allocation12 + $0xfd0] sm:$0xff]  ;;  %v1893_v6 = vld [vmem:[#allocation12 + $0x1058] sm:$0xff] }
 0x6c0   :  { %v11227_v38 = vpop.eup %11226  ;;  %v7108_v55 = vadd.f32 1.0, %v11225_v22  ;;  %6943 = vmatprep.subr.bf16.mxu1 %v9958_v29  ;;  %v7117_v59 = vmul.f32 %v7101_v18, %v7053_v4  ;;  %v1868_v29 = vld [vmem:[#allocation12 + $0xf90] sm:$0xff]  ;;  %v1885_v4 = vld [vmem:[#allocation12 + $0x1018] sm:$0xff] }
 0x6c1   :  { %v11229_v46 = vpop.eup %11228  ;;  %v7110_v0 = vadd.f32 1.0, %v11227_v38  ;;  %v7119_v15 = vmul.f32 %v7103_v21, %v7055_v25  ;;  %v9988_v53 = vcombine.high %v1868_v29, %v1872_v28  ;;  %v9987_v22 = vcombine.low %v1868_v29, %v1872_v28  ;;  %v1888_v38 = vld [vmem:[#allocation12 + $0x1030] sm:$0xff]  ;;  %v1889_v18 = vld [vmem:[#allocation12 + $0x1038] sm:$0xff] }
 0x6c2   :  { %v11231_v60 = vpop.eup %11230  ;;  %v7124_v35 = vmul.f32 %v7108_v55, %v7060_v14  ;;  %v7109_v51 = vadd.f32 1.0, %v11229_v46  ;;  %6686 = vmatpush1.bf16.msra.mxu0 %v9955_v58  ;;  %v1869_v58 = vld [vmem:[#allocation12 + $0xf98] sm:$0xff]  ;;  %v10006_v25 = vcombine.high %v1885_v4, %v1889_v18  ;;  %v1892_v21 = vld [vmem:[#allocation12 + $0x1050] sm:$0xff] }
 0x6c3   :  { %v7126_v9 = vmul.f32 %v7110_v0, %v7062_v36  ;;  %v7111_v5 = vadd.f32 1.0, %v11231_v60  ;;  %6944 = vmatpush1.bf16.msra.mxu1 %v9957_v16  ;;  %6687 = vmatprep.subr.bf16.mxu0 %v9964_v56  ;;  %v1873_v16 = vld [vmem:[#allocation12 + $0xfb8] sm:$0xff]  ;;  %v1880_v56 = vld [vmem:[#allocation12 + $0xff0] sm:$0xff]  ;;  %v10005_v60 = vcombine.low %v1885_v4, %v1889_v18 }
 0x6c4   :  { %v12667_v23 = vpack.c.bf16 %v7124_v35, %v7116_v62  ;;  %v7125_v34 = vmul.f32 %v7109_v51, %v7061_v17  ;;  %6945 = vmatprep.subr.bf16.mxu1 %v9966_v8  ;;  %v9990_v13 = vcombine.high %v1869_v58, %v1873_v16  ;;  %v1881_v8 = vld [vmem:[#allocation12 + $0xff8] sm:$0xff]  ;;  %v9989_v24 = vcombine.low %v1869_v58, %v1873_v16  ;;  %v1896_v36 = vld [vmem:[#allocation12 + $0x1070] sm:$0xff] }
 0x6c5   :  { %v12669_v32 = vpack.c.bf16 %v7126_v9, %v7118_v1  ;;  %v7127_v57 = vmul.f32 %v7111_v5, %v7063_v10  ;;  %v9996_v3 = vcombine.high %v1876_v63, %v1880_v56  ;;  %v9995_v14 = vcombine.low %v1876_v63, %v1880_v56  ;;  %v1897_v30 = vld [vmem:[#allocation12 + $0x1078] sm:$0xff]  ;;  %v1900_v35 = vld [vmem:[#allocation12 + $0x1090] sm:$0xff] }
 0x6c6   :  { %6688 = vmatpush1.bf16.msra.mxu0 %v9963_v43  ;;  %v12673_v41 = vpack.c.bf16 %v7125_v34, %v7117_v59  ;;  %v9981_v43 = vcombine.low %v1861_v50, %v1865_v47  ;;  %v10012_v62 = vcombine.high %v1892_v21, %v1896_v36  ;;  %v1904_v17 = vld [vmem:[#allocation12 + $0x10b0] sm:$0xff]  ;;  %v10014_v51 = vcombine.high %v1893_v6, %v1897_v30  ;;  %v1901_v1 = vld [vmem:[#allocation12 + $0x1098] sm:$0xff] }
 0x6c7   :  { %6946 = vmatpush1.bf16.msra.mxu1 %v9965_v39  ;;  %6689 = vmatprep.subr.bf16.mxu0 %v9972_v19  ;;  %v12675_v54 = vpack.c.bf16 %v7127_v57, %v7119_v15  ;;  %v1877_v39 = vld [vmem:[#allocation12 + $0xfd8] sm:$0xff]  ;;  %v1884_v19 = vld [vmem:[#allocation12 + $0x1010] sm:$0xff]  ;;  %v10011_v10 = vcombine.low %v1892_v21, %v1896_v36  ;;  %v10013_v5 = vcombine.low %v1893_v6, %v1897_v30 }
 0x6c8   :  { %6947 = vmatprep.subr.bf16.mxu1 %v9974_v20  ;;  %v9998_v40 = vcombine.high %v1877_v39, %v1881_v8  ;;  %v9997_v55 = vcombine.low %v1877_v39, %v1881_v8  ;;  %v10004_v46 = vcombine.high %v1884_v19, %v1888_v38  ;;  %v10003_v0 = vcombine.low %v1884_v19, %v1888_v38  ;;  %v1905_v9 = vld [vmem:[#allocation12 + $0x10b8] sm:$0xff]  ;;  %v1908_v20 = vld [vmem:[#allocation12 + $0x10d0] sm:$0xff] }
 0x6c9   :  { %v10020_v59 = vcombine.high %v1900_v35, %v1904_v17  ;;  %v10022_v34 = vcombine.high %v1901_v1, %v1905_v9  ;;  %v1912_v7 = vld [vmem:[#allocation12 + $0x10f0] sm:$0xff]  ;;  %v1909_v42 = vld [vmem:[#allocation12 + $0x10d8] sm:$0xff]  ;;  %v10019_v57 = vcombine.low %v1900_v35, %v1904_v17 }
 0x6ca   :  { %6690 = vmatpush1.bf16.msra.mxu0 %v9971_v27  ;;  %v1913_v15 = vld [vmem:[#allocation12 + $0x10f8] sm:$0xff]  ;;  %v10028_v50 = vcombine.high %v1908_v20, %v1912_v7  ;;  %v1916_v27 = vld [vmem:[#allocation12 + $0x1110] sm:$0xff] }
 0x6cb   :  { %6948 = vmatpush1.bf16.msra.mxu1 %v9973_v11  ;;  %6691 = vmatprep.subr.bf16.mxu0 %v9980_v48  ;;  %v10030_v47 = vcombine.high %v1909_v42, %v1913_v15  ;;  %v1920_v11 = vld [vmem:[#allocation12 + $0x1130] sm:$0xff]  ;;  %v1917_v48 = vld [vmem:[#allocation12 + $0x1118] sm:$0xff]  ;;  %v10029_v29 = vcombine.low %v1909_v42, %v1913_v15 }
 0x6cc   :  { %6949 = vmatprep.subr.bf16.mxu1 %v9982_v12  ;;  %v1921_v12 = vld [vmem:[#allocation12 + $0x1138] sm:$0xff]  ;;  %v10036_v28 = vcombine.high %v1916_v27, %v1920_v11  ;;  %v1924_v16 = vld [vmem:[#allocation12 + $0x1150] sm:$0xff] }
 0x6cd   :  { %v10038_v58 = vcombine.high %v1917_v48, %v1921_v12  ;;  %v10037_v63 = vcombine.low %v1917_v48, %v1921_v12  ;;  %v1932_v8 = vld [vmem:[#allocation12 + $0x1190] sm:$0xff] }
 0x6ce   :  { %6692 = vmatpush1.bf16.msra.mxu0 %v9979_v52  ;;  %v1928_v52 = vld [vmem:[#allocation12 + $0x1170] sm:$0xff] }
 0x6cf   :  { %6950 = vmatpush1.bf16.msra.mxu1 %v9981_v43  ;;  %6693 = vmatprep.subr.bf16.mxu0 %v9988_v53  ;;  %v1925_v43 = vld [vmem:[#allocation12 + $0x1158] sm:$0xff]  ;;  %v10044_v56 = vcombine.high %v1924_v16, %v1928_v52  ;;  %v1940_v18 = vld [vmem:[#allocation12 + $0x11d0] sm:$0xff] }
 0x6d0   :  { %6951 = vmatprep.subr.bf16.mxu1 %v9990_v13  ;;  %v1929_v53 = vld [vmem:[#allocation12 + $0x1178] sm:$0xff]  ;;  %v10035_v13 = vcombine.low %v1916_v27, %v1920_v11  ;;  %v1948_v6 = vld [vmem:[#allocation12 + $0x1210] sm:$0xff] }
 0x6d1   :  { %v10046_v39 = vcombine.high %v1925_v43, %v1929_v53  ;;  %v10045_v19 = vcombine.low %v1925_v43, %v1929_v53  ;;  %v1952_v30 = vld [vmem:[#allocation12 + $0x1230] sm:$0xff] }
 0x6d2   :  { %6694 = vmatpush1.bf16.msra.mxu0 %v9987_v22  ;;  %v1936_v22 = vld [vmem:[#allocation12 + $0x11b0] sm:$0xff] }
 0x6d3   :  { %6952 = vmatpush1.bf16.msra.mxu1 %v9989_v24  ;;  %6695 = vmatprep.subr.bf16.mxu0 %v9996_v3  ;;  %v1933_v24 = vld [vmem:[#allocation12 + $0x1198] sm:$0xff]  ;;  %v10052_v38 = vcombine.high %v1932_v8, %v1936_v22  ;;  %v1964_v15 = vld [vmem:[#allocation12 + $0x1290] sm:$0xff] }
 0x6d4   :  { %6953 = vmatprep.subr.bf16.mxu1 %v9998_v40  ;;  %v1937_v3 = vld [vmem:[#allocation12 + $0x11b8] sm:$0xff]  ;;  %v10043_v40 = vcombine.low %v1924_v16, %v1928_v52  ;;  %v1972_v12 = vld [vmem:[#allocation12 + $0x12d0] sm:$0xff] }
 0x6d5   :  { %v10054_v4 = vcombine.high %v1933_v24, %v1937_v3  ;;  %v10053_v21 = vcombine.low %v1933_v24, %v1937_v3  ;;  %v1980_v53 = vld [vmem:[#allocation12 + $0x1310] sm:$0xff] }
 0x6d6   :  { %6696 = vmatpush1.bf16.msra.mxu0 %v9995_v14  ;;  %v1944_v14 = vld [vmem:[#allocation12 + $0x11f0] sm:$0xff] }
 0x6d7   :  { %6954 = vmatpush1.bf16.msra.mxu1 %v9997_v55  ;;  %6708 = vmatprep.subr.bf16.mxu0 %v10004_v46  ;;  %v1941_v55 = vld [vmem:[#allocation12 + $0x11d8] sm:$0xff]  ;;  %v10060_v36 = vcombine.high %v1940_v18, %v1944_v14  ;;  %v10059_v35 = vcombine.low %v1940_v18, %v1944_v14  ;;  %v1988_v3 = vld [vmem:[#allocation12 + $0x1350] sm:$0xff] }
 0x6d8   :  { %6966 = vmatprep.subr.bf16.mxu1 %v10006_v25  ;;  %v1945_v46 = vld [vmem:[#allocation12 + $0x11f8] sm:$0xff]  ;;  %v10051_v25 = vcombine.low %v1932_v8, %v1936_v22 }
 0x6d9   :  { %6698 = vmatmul.mubr.bf16.vlgmr.msra.gmra.mrb[16].mxu0 %v12547_v2  ;;  %v10061_v17 = vcombine.low %v1941_v55, %v1945_v46 }
 0x6da   :  { %6956 = vmatmul.mubr.bf16.vlgmr.msra.gmra.mrb[16].mxu1 %v12547_v2  ;;  %6709 = vmatpush1.bf16.msra.mxu0 %v10003_v0  ;;  %v10021_v2 = vcombine.low %v1901_v1, %v1905_v9  ;;  %v10062_v0 = vcombine.high %v1941_v55, %v1945_v46  ;;  %v1956_v9 = vld [vmem:[#allocation12 + $0x1250] sm:$0xff] }
 0x6db   :  { %6740 = vmatprep.mubr.bf16.mxu0 %v12562_v37  ;;  %6967 = vmatpush1.bf16.msra.mxu1 %v10005_v60  ;;  %v1949_v60 = vld [vmem:[#allocation12 + $0x1218] sm:$0xff]  ;;  %v1996_v46 = vld [vmem:[#allocation12 + $0x1390] sm:$0xff] }
 0x6dc   :  { %6998 = vmatprep.mubr.bf16.mxu1 %v12562_v37  ;;  %6710 = vmatprep.subr.bf16.mxu0 %v10012_v62  ;;  %v10027_v37 = vcombine.low %v1908_v20, %v1912_v7  ;;  %v1953_v62 = vld [vmem:[#allocation12 + $0x1238] sm:$0xff] }
 0x6dd   :  { %6968 = vmatprep.subr.bf16.mxu1 %v10014_v51  ;;  %v10068_v51 = vcombine.high %v1948_v6, %v1952_v30  ;;  %v10070_v1 = vcombine.high %v1949_v60, %v1953_v62  ;;  %v10069_v20 = vcombine.low %v1949_v60, %v1953_v62  ;;  %v2004_v62 = vld [vmem:[#allocation12 + $0x13d0] sm:$0xff] }
 0x6de   :  { %6711 = vmatpush1.bf16.msra.mxu0 %v10011_v10  ;;  %v1960_v10 = vld [vmem:[#allocation12 + $0x1270] sm:$0xff] }
 0x6df   :  { %6969 = vmatpush1.bf16.msra.mxu1 %v10013_v5  ;;  %6712 = vmatprep.subr.bf16.mxu0 %v10020_v59  ;;  %v1957_v5 = vld [vmem:[#allocation12 + $0x1258] sm:$0xff]  ;;  %v10076_v7 = vcombine.high %v1956_v9, %v1960_v10 }
 0x6e0   :  { %6970 = vmatprep.subr.bf16.mxu1 %v10022_v34  ;;  %v1961_v59 = vld [vmem:[#allocation12 + $0x1278] sm:$0xff]  ;;  %v10067_v34 = vcombine.low %v1948_v6, %v1952_v30 }
 0x6e1   :  { %v10078_v42 = vcombine.high %v1957_v5, %v1961_v59  ;;  %v10077_v27 = vcombine.low %v1957_v5, %v1961_v59  ;;  %v2012_v59 = vld [vmem:[#allocation12 + $0x1410] sm:$0xff] }
 0x6e2   :  { %6713 = vmatpush1.bf16.msra.mxu0 %v10019_v57  ;;  %v1968_v57 = vld [vmem:[#allocation12 + $0x12b0] sm:$0xff] }
 0x6e3   :  { %6971 = vmatpush1.bf16.msra.mxu1 %v10021_v2  ;;  %6714 = vmatprep.subr.bf16.mxu0 %v10028_v50  ;;  %v1965_v2 = vld [vmem:[#allocation12 + $0x1298] sm:$0xff]  ;;  %v10084_v11 = vcombine.high %v1964_v15, %v1968_v57 }
 0x6e4   :  { %6972 = vmatprep.subr.bf16.mxu1 %v10030_v47  ;;  %v1969_v50 = vld [vmem:[#allocation12 + $0x12b8] sm:$0xff]  ;;  %v10075_v47 = vcombine.low %v1956_v9, %v1960_v10 }
 0x6e5   :  { %v10086_v48 = vcombine.high %v1965_v2, %v1969_v50  ;;  %v10085_v16 = vcombine.low %v1965_v2, %v1969_v50  ;;  %v2020_v50 = vld [vmem:[#allocation12 + $0x1450] sm:$0xff] }
 0x6e6   :  { %6715 = vmatpush1.bf16.msra.mxu0 %v10027_v37  ;;  %v1976_v37 = vld [vmem:[#allocation12 + $0x12f0] sm:$0xff] }
 0x6e7   :  { %6973 = vmatpush1.bf16.msra.mxu1 %v10029_v29  ;;  %6716 = vmatprep.subr.bf16.mxu0 %v10036_v28  ;;  %v1973_v29 = vld [vmem:[#allocation12 + $0x12d8] sm:$0xff]  ;;  %v10092_v52 = vcombine.high %v1972_v12, %v1976_v37 }
 0x6e8   :  { %6974 = vmatprep.subr.bf16.mxu1 %v10038_v58  ;;  %v1977_v28 = vld [vmem:[#allocation12 + $0x12f8] sm:$0xff]  ;;  %v10083_v58 = vcombine.low %v1964_v15, %v1968_v57 }
 0x6e9   :  { %v10094_v43 = vcombine.high %v1973_v29, %v1977_v28  ;;  %v10093_v8 = vcombine.low %v1973_v29, %v1977_v28  ;;  %v2028_v29 = vld [vmem:[#allocation12 + $0x1490] sm:$0xff] }
 0x6ea   :  { %6717 = vmatpush1.bf16.msra.mxu0 %v10035_v13  ;;  %v1984_v13 = vld [vmem:[#allocation12 + $0x1330] sm:$0xff] }
 0x6eb   :  { %6975 = vmatpush1.bf16.msra.mxu1 %v10037_v63  ;;  %6718 = vmatprep.subr.bf16.mxu0 %v10044_v56  ;;  %v1981_v63 = vld [vmem:[#allocation12 + $0x1318] sm:$0xff]  ;;  %v10100_v22 = vcombine.high %v1980_v53, %v1984_v13  ;;  %v2032_v28 = vld [vmem:[#allocation12 + $0x14b0] sm:$0xff] }
 0x6ec   :  { %6976 = vmatprep.subr.bf16.mxu1 %v10046_v39  ;;  %v1985_v56 = vld [vmem:[#allocation12 + $0x1338] sm:$0xff]  ;;  %v10091_v39 = vcombine.low %v1972_v12, %v1976_v37 }
 0x6ed   :  { %v10102_v24 = vcombine.high %v1981_v63, %v1985_v56  ;;  %v10101_v18 = vcombine.low %v1981_v63, %v1985_v56  ;;  %v2036_v56 = vld [vmem:[#allocation12 + $0x14d0] sm:$0xff] }
 0x6ee   :  { %6719 = vmatpush1.bf16.msra.mxu0 %v10043_v40  ;;  %v1992_v40 = vld [vmem:[#allocation12 + $0x1370] sm:$0xff] }
 0x6ef   :  { %6977 = vmatpush1.bf16.msra.mxu1 %v10045_v19  ;;  %6720 = vmatprep.subr.bf16.mxu0 %v10052_v38  ;;  %v1989_v19 = vld [vmem:[#allocation12 + $0x1358] sm:$0xff]  ;;  %v10108_v14 = vcombine.high %v1988_v3, %v1992_v40 }
 0x6f0   :  { %6978 = vmatprep.subr.bf16.mxu1 %v10054_v4  ;;  %v1993_v38 = vld [vmem:[#allocation12 + $0x1378] sm:$0xff]  ;;  %v10099_v4 = vcombine.low %v1980_v53, %v1984_v13  ;;  %v10148_v13 = vcombine.high %v2028_v29, %v2032_v28 }
 0x6f1   :  { %v10110_v55 = vcombine.high %v1989_v19, %v1993_v38  ;;  %v10109_v6 = vcombine.low %v1989_v19, %v1993_v38  ;;  %v2044_v19 = vld [vmem:[#allocation12 + $0x1510] sm:$0xff] }
 0x6f2   :  { %6721 = vmatpush1.bf16.msra.mxu0 %v10051_v25  ;;  %v2000_v25 = vld [vmem:[#allocation12 + $0x13b0] sm:$0xff] }
 0x6f3   :  { %6979 = vmatpush1.bf16.msra.mxu1 %v10053_v21  ;;  %6722 = vmatprep.subr.bf16.mxu0 %v10060_v36  ;;  %v1997_v21 = vld [vmem:[#allocation12 + $0x1398] sm:$0xff]  ;;  %v10116_v30 = vcombine.high %v1996_v46, %v2000_v25  ;;  %v2048_v38 = vld [vmem:[#allocation12 + $0x1530] sm:$0xff] }
 0x6f4   :  { %6980 = vmatprep.subr.bf16.mxu1 %v10062_v0  ;;  %v2001_v36 = vld [vmem:[#allocation12 + $0x13b8] sm:$0xff]  ;;  %v10107_v0 = vcombine.low %v1988_v3, %v1992_v40 }
 0x6f5   :  { %v10118_v60 = vcombine.high %v1997_v21, %v2001_v36  ;;  %v10117_v9 = vcombine.low %v1997_v21, %v2001_v36  ;;  %v2056_v21 = vld [vmem:[#allocation12 + $0x1570] sm:$0xff]  ;;  %v2053_v36 = vld [vmem:[#allocation12 + $0x1558] sm:$0xff] }
 0x6f6   :  { %6723 = vmatpush1.bf16.msra.mxu0 %v10059_v35  ;;  %v2008_v35 = vld [vmem:[#allocation12 + $0x13f0] sm:$0xff] }
 0x6f7   :  { %6981 = vmatpush1.bf16.msra.mxu1 %v10061_v17  ;;  %6724 = vmatprep.subr.bf16.mxu0 %v10068_v51  ;;  %v2005_v17 = vld [vmem:[#allocation12 + $0x13d8] sm:$0xff]  ;;  %v10124_v10 = vcombine.high %v2004_v62, %v2008_v35 }
 0x6f8   :  { %6982 = vmatprep.subr.bf16.mxu1 %v10070_v1  ;;  %v2009_v51 = vld [vmem:[#allocation12 + $0x13f8] sm:$0xff]  ;;  %v10115_v1 = vcombine.low %v1996_v46, %v2000_v25  ;;  %v2052_v25 = vld [vmem:[#allocation12 + $0x1550] sm:$0xff] }
 0x6f9   :  { %v10126_v5 = vcombine.high %v2005_v17, %v2009_v51  ;;  %v10125_v15 = vcombine.low %v2005_v17, %v2009_v51  ;;  %v2064_v17 = vld [vmem:[#allocation12 + $0x15b0] sm:$0xff]  ;;  %v2061_v51 = vld [vmem:[#allocation12 + $0x1598] sm:$0xff] }
 0x6fa   :  { %6725 = vmatpush1.bf16.msra.mxu0 %v10067_v34  ;;  %v2016_v34 = vld [vmem:[#allocation12 + $0x1430] sm:$0xff] }
 0x6fb   :  { %6983 = vmatpush1.bf16.msra.mxu1 %v10069_v20  ;;  %6726 = vmatprep.subr.bf16.mxu0 %v10076_v7  ;;  %v2013_v20 = vld [vmem:[#allocation12 + $0x1418] sm:$0xff]  ;;  %v10132_v57 = vcombine.high %v2012_v59, %v2016_v34 }
 0x6fc   :  { %6984 = vmatprep.subr.bf16.mxu1 %v10078_v42  ;;  %v2017_v7 = vld [vmem:[#allocation12 + $0x1438] sm:$0xff]  ;;  %v10123_v42 = vcombine.low %v2004_v62, %v2008_v35  ;;  %v2060_v35 = vld [vmem:[#allocation12 + $0x1590] sm:$0xff] }
 0x6fd   :  { %v10134_v2 = vcombine.high %v2013_v20, %v2017_v7  ;;  %v10133_v12 = vcombine.low %v2013_v20, %v2017_v7  ;;  %v2072_v20 = vld [vmem:[#allocation12 + $0x15f0] sm:$0xff]  ;;  %v2069_v7 = vld [vmem:[#allocation12 + $0x15d8] sm:$0xff] }
 0x6fe   :  { %6727 = vmatpush1.bf16.msra.mxu0 %v10075_v47  ;;  %v2024_v47 = vld [vmem:[#allocation12 + $0x1470] sm:$0xff] }
 0x6ff   :  { %6985 = vmatpush1.bf16.msra.mxu1 %v10077_v27  ;;  %6728 = vmatprep.subr.bf16.mxu0 %v10084_v11  ;;  %v10131_v27 = vcombine.low %v2012_v59, %v2016_v34  ;;  %v2021_v11 = vld [vmem:[#allocation12 + $0x1458] sm:$0xff]  ;;  %v10140_v37 = vcombine.high %v2020_v50, %v2024_v47  ;;  %v2068_v34 = vld [vmem:[#allocation12 + $0x15d0] sm:$0xff] }
 0x700   :  { %6986 = vmatprep.subr.bf16.mxu1 %v10086_v48  ;;  %v2025_v48 = vld [vmem:[#allocation12 + $0x1478] sm:$0xff] }
 0x701   :  { %v10141_v53 = vcombine.low %v2021_v11, %v2025_v48 }
 0x702   :  { %6729 = vmatpush1.bf16.msra.mxu0 %v10083_v58  ;;  %v10142_v58 = vcombine.high %v2021_v11, %v2025_v48  ;;  %v2077_v11 = vld [vmem:[#allocation12 + $0x1618] sm:$0xff] }
 0x703   :  { %6987 = vmatpush1.bf16.msra.mxu1 %v10085_v16  ;;  %6730 = vmatprep.subr.bf16.mxu0 %v10092_v52  ;;  %v2029_v16 = vld [vmem:[#allocation12 + $0x1498] sm:$0xff] }
 0x704   :  { %6988 = vmatprep.subr.bf16.mxu1 %v10094_v43  ;;  %v2033_v52 = vld [vmem:[#allocation12 + $0x14b8] sm:$0xff]  ;;  %v10139_v43 = vcombine.low %v2020_v50, %v2024_v47  ;;  %v2076_v47 = vld [vmem:[#allocation12 + $0x1610] sm:$0xff] }
 0x705   :  { %v10150_v63 = vcombine.high %v2029_v16, %v2033_v52  ;;  %v2081_v48 = vld [vmem:[#allocation12 + $0x1638] sm:$0xff] }
 0x706   :  { %6731 = vmatpush1.bf16.msra.mxu0 %v10091_v39  ;;  %v2040_v39 = vld [vmem:[#allocation12 + $0x14f0] sm:$0xff] }
 0x707   :  { %6989 = vmatpush1.bf16.msra.mxu1 %v10093_v8  ;;  %6732 = vmatprep.subr.bf16.mxu0 %v10100_v22  ;;  %v2037_v8 = vld [vmem:[#allocation12 + $0x14d8] sm:$0xff]  ;;  %v10156_v3 = vcombine.high %v2036_v56, %v2040_v39 }
 0x708   :  { %6990 = vmatprep.subr.bf16.mxu1 %v10102_v24  ;;  %v2041_v22 = vld [vmem:[#allocation12 + $0x14f8] sm:$0xff]  ;;  %v10147_v24 = vcombine.low %v2028_v29, %v2032_v28  ;;  %v10198_v28 = vcombine.high %v2077_v11, %v2081_v48 }
 0x709   :  { %v10158_v40 = vcombine.high %v2037_v8, %v2041_v22 }
 0x70a   :  { %6733 = vmatpush1.bf16.msra.mxu0 %v10099_v4  ;;  %v2045_v4 = vld [vmem:[#allocation12 + $0x1518] sm:$0xff] }
 0x70b   :  { %6991 = vmatpush1.bf16.msra.mxu1 %v10101_v18  ;;  %6734 = vmatprep.subr.bf16.mxu0 %v10108_v14  ;;  %v2049_v18 = vld [vmem:[#allocation12 + $0x1538] sm:$0xff]  ;;  %v10157_v14 = vcombine.low %v2037_v8, %v2041_v22  ;;  %v2096_v8 = vld [vmem:[#allocation12 + $0x16b0] sm:$0xff] }
 0x70c   :  { %6992 = vmatprep.subr.bf16.mxu1 %v10110_v55  ;;  %v10164_v55 = vcombine.high %v2044_v19, %v2048_v38  ;;  %v10166_v46 = vcombine.high %v2045_v4, %v2049_v18  ;;  %v2093_v22 = vld [vmem:[#allocation12 + $0x1698] sm:$0xff] }
 0x70e   :  { %6735 = vmatpush1.bf16.msra.mxu0 %v10107_v0  ;;  %v2057_v0 = vld [vmem:[#allocation12 + $0x1578] sm:$0xff] }
 0x70f   :  { %6993 = vmatpush1.bf16.msra.mxu1 %v10109_v6  ;;  %6736 = vmatprep.subr.bf16.mxu0 %v10116_v30  ;;  %v10163_v6 = vcombine.low %v2044_v19, %v2048_v38  ;;  %v10165_v30 = vcombine.low %v2045_v4, %v2049_v18  ;;  %v10174_v62 = vcombine.high %v2053_v36, %v2057_v0  ;;  %v2100_v38 = vld [vmem:[#allocation12 + $0x16d0] sm:$0xff]  ;;  %v2101_v18 = vld [vmem:[#allocation12 + $0x16d8] sm:$0xff] }
 0x710   :  { %6994 = vmatprep.subr.bf16.mxu1 %v10118_v60  ;;  %v10172_v60 = vcombine.high %v2052_v25, %v2056_v21  ;;  %v2104_v4 = vld [vmem:[#allocation12 + $0x16f0] sm:$0xff] }
 0x712   :  { %6737 = vmatpush1.bf16.msra.mxu0 %v10115_v1  ;;  %v2065_v1 = vld [vmem:[#allocation12 + $0x15b8] sm:$0xff] }
 0x713   :  { %6995 = vmatpush1.bf16.msra.mxu1 %v10117_v9  ;;  %6738 = vmatprep.subr.bf16.mxu0 %v10124_v10  ;;  %v10171_v9 = vcombine.low %v2052_v25, %v2056_v21  ;;  %v10173_v10 = vcombine.low %v2053_v36, %v2057_v0  ;;  %v10182_v59 = vcombine.high %v2061_v51, %v2065_v1  ;;  %v2108_v21 = vld [vmem:[#allocation12 + $0x1710] sm:$0xff]  ;;  %v2109_v0 = vld [vmem:[#allocation12 + $0x1718] sm:$0xff] }
 0x714   :  { %6996 = vmatprep.subr.bf16.mxu1 %v10126_v5  ;;  %v10180_v5 = vcombine.high %v2060_v35, %v2064_v17  ;;  %v2112_v36 = vld [vmem:[#allocation12 + $0x1730] sm:$0xff] }
 0x716   :  { %6739 = vmatpush1.bf16.msra.mxu0 %v10123_v42  ;;  %v2073_v42 = vld [vmem:[#allocation12 + $0x15f8] sm:$0xff] }
 0x717   :  { %6997 = vmatpush1.bf16.msra.mxu1 %v10125_v15  ;;  %6751 = vmatprep.subr.bf16.mxu0 %v10132_v57  ;;  %v10179_v15 = vcombine.low %v2060_v35, %v2064_v17  ;;  %v10181_v57 = vcombine.low %v2061_v51, %v2065_v1  ;;  %v10190_v50 = vcombine.high %v2069_v7, %v2073_v42  ;;  %v2116_v17 = vld [vmem:[#allocation12 + $0x1750] sm:$0xff]  ;;  %v2117_v1 = vld [vmem:[#allocation12 + $0x1758] sm:$0xff] }
 0x718   :  { %7009 = vmatprep.subr.bf16.mxu1 %v10134_v2  ;;  %v10188_v2 = vcombine.high %v2068_v34, %v2072_v20  ;;  %v2120_v51 = vld [vmem:[#allocation12 + $0x1770] sm:$0xff] }
 0x719   :  { %6741 = vmatmul.mubr.bf16.vlgmr.msra.gmra.mrb[16].mxu0 %v12564_v31 }
 0x71a   :  { %6999 = vmatmul.mubr.bf16.vlgmr.msra.gmra.mrb[16].mxu1 %v12564_v31  ;;  %6752 = vmatpush1.bf16.msra.mxu0 %v10131_v27  ;;  %v10149_v31 = vcombine.low %v2029_v16, %v2033_v52  ;;  %v2080_v27 = vld [vmem:[#allocation12 + $0x1630] sm:$0xff]  ;;  %v2085_v52 = vld [vmem:[#allocation12 + $0x1658] sm:$0xff] }
 0x71b   :  { %6783 = vmatprep.mubr.bf16.mxu0 %v12573_v61  ;;  %7010 = vmatpush1.bf16.msra.mxu1 %v10133_v12  ;;  %v10187_v12 = vcombine.low %v2068_v34, %v2072_v20  ;;  %v10196_v29 = vcombine.high %v2076_v47, %v2080_v27  ;;  %v2088_v16 = vld [vmem:[#allocation12 + $0x1670] sm:$0xff] }
 0x71c   :  { %7041 = vmatprep.mubr.bf16.mxu1 %v12573_v61  ;;  %6753 = vmatprep.subr.bf16.mxu0 %v10140_v37  ;;  %v10155_v61 = vcombine.low %v2036_v56, %v2040_v39  ;;  %v10189_v37 = vcombine.low %v2069_v7, %v2073_v42  ;;  %v2092_v39 = vld [vmem:[#allocation12 + $0x1690] sm:$0xff]  ;;  %v2125_v42 = vld [vmem:[#allocation12 + $0x1798] sm:$0xff] }
 0x71d   :  { %7011 = vmatprep.subr.bf16.mxu1 %v10142_v58  ;;  %v2084_v58 = vld [vmem:[#allocation12 + $0x1650] sm:$0xff] }
 0x71e   :  { %6754 = vmatpush1.bf16.msra.mxu0 %v10139_v43  ;;  %v2089_v43 = vld [vmem:[#allocation12 + $0x1678] sm:$0xff]  ;;  %v2124_v20 = vld [vmem:[#allocation12 + $0x1790] sm:$0xff] }
 0x71f   :  { %7012 = vmatpush1.bf16.msra.mxu1 %v10141_v53  ;;  %6755 = vmatprep.subr.bf16.mxu0 %v10148_v13  ;;  %v10195_v53 = vcombine.low %v2076_v47, %v2080_v27  ;;  %v10197_v13 = vcombine.low %v2077_v11, %v2081_v48  ;;  %v10206_v56 = vcombine.high %v2085_v52, %v2089_v43  ;;  %v2128_v7 = vld [vmem:[#allocation12 + $0x17b0] sm:$0xff]  ;;  %v2133_v48 = vld [vmem:[#allocation12 + $0x17d8] sm:$0xff] }
 0x720   :  { %7013 = vmatprep.subr.bf16.mxu1 %v10150_v63  ;;  %v10204_v63 = vcombine.high %v2084_v58, %v2088_v16  ;;  %v2132_v27 = vld [vmem:[#allocation12 + $0x17d0] sm:$0xff] }
 0x721   :  { %v2136_v11 = vld [vmem:[#allocation12 + $0x17f0] sm:$0xff] }
 0x722   :  { %6756 = vmatpush1.bf16.msra.mxu0 %v10147_v24  ;;  %v2097_v24 = vld [vmem:[#allocation12 + $0x16b8] sm:$0xff] }
 0x723   :  { %7014 = vmatpush1.bf16.msra.mxu1 %v10149_v31  ;;  %6757 = vmatprep.subr.bf16.mxu0 %v10156_v3  ;;  %v10203_v31 = vcombine.low %v2084_v58, %v2088_v16  ;;  %v10205_v3 = vcombine.low %v2085_v52, %v2089_v43  ;;  %v10214_v19 = vcombine.high %v2093_v22, %v2097_v24  ;;  %v10794_v43 = vld [vmem:[#allocation15 + $0x4] ss:$16 sps:$4 sm:$0xff]  }
 0x724   :  { %7015 = vmatprep.subr.bf16.mxu1 %v10158_v40  ;;  %v10212_v40 = vcombine.high %v2092_v39, %v2096_v8  ;;  %v10251_v16 = vcombine.low %v2132_v27, %v2136_v11 }
 0x726   :  { %6758 = vmatpush1.bf16.msra.mxu0 %v10155_v61  ;;  %v2105_v61 = vld [vmem:[#allocation12 + $0x16f8] sm:$0xff] }
 0x727   :  { %7016 = vmatpush1.bf16.msra.mxu1 %v10157_v14  ;;  %6759 = vmatprep.subr.bf16.mxu0 %v10164_v55  ;;  %v10211_v14 = vcombine.low %v2092_v39, %v2096_v8  ;;  %v10213_v55 = vcombine.low %v2093_v22, %v2097_v24  ;;  %v10222_v25 = vcombine.high %v2101_v18, %v2105_v61  ;;  %v10803_v39 = vld [vmem:[#allocation15 + $0x2c] ss:$16 sps:$4 sm:$0xff]   ;;  %v10798_v8 = vld [vmem:[#allocation15 + $0x20] ss:$16 sps:$4 sm:$0xff]   ;;  %v10801_v22 = vld [vmem:[#allocation15 + $0x28] ss:$16 sps:$4 sm:$0xff]  }
 0x728   :  { %7017 = vmatprep.subr.bf16.mxu1 %v10166_v46  ;;  %v10220_v46 = vcombine.high %v2100_v38, %v2104_v4  ;;  %v10806_v24 = vld [vmem:[#allocation15 + $0x44] ss:$16 sps:$4 sm:$0xff]  }
 0x72a   :  { %6760 = vmatpush1.bf16.msra.mxu0 %v10163_v6  ;;  %v2113_v6 = vld [vmem:[#allocation12 + $0x1738] sm:$0xff] }
 0x72b   :  { %7018 = vmatpush1.bf16.msra.mxu1 %v10165_v30  ;;  %6761 = vmatprep.subr.bf16.mxu0 %v10172_v60  ;;  %v10219_v30 = vcombine.low %v2100_v38, %v2104_v4  ;;  %v10221_v60 = vcombine.low %v2101_v18, %v2105_v61  ;;  %v10230_v35 = vcombine.high %v2109_v0, %v2113_v6  ;;  %v10810_v38 = vld [vmem:[#allocation15 + $0x60] ss:$16 sps:$4 sm:$0xff]   ;;  %v10813_v4 = vld [vmem:[#allocation15 + $0x68] ss:$16 sps:$4 sm:$0xff]   ;;  %v10818_v18 = vld [vmem:[#allocation15 + $0x84] ss:$16 sps:$4 sm:$0xff]  }
 0x72c   :  { %7019 = vmatprep.subr.bf16.mxu1 %v10174_v62  ;;  %v10228_v62 = vcombine.high %v2108_v21, %v2112_v36  ;;  %v10821_v61 = vld [vmem:[#allocation15 + $0x8c] ss:$16 sps:$4 sm:$0xff]  }
 0x72e   :  { %6762 = vmatpush1.bf16.msra.mxu0 %v10171_v9  ;;  %v2121_v9 = vld [vmem:[#allocation12 + $0x1778] sm:$0xff] }
 0x72f   :  { %7020 = vmatpush1.bf16.msra.mxu1 %v10173_v10  ;;  %6763 = vmatprep.subr.bf16.mxu0 %v10180_v5  ;;  %v10227_v10 = vcombine.low %v2108_v21, %v2112_v36  ;;  %v10229_v5 = vcombine.low %v2109_v0, %v2113_v6  ;;  %v10238_v34 = vcombine.high %v2117_v1, %v2121_v9  ;;  %v10825_v21 = vld [vmem:[#allocation15 + $0xa8] ss:$16 sps:$4 sm:$0xff]   ;;  %v10830_v36 = vld [vmem:[#allocation15 + $0xc4] ss:$16 sps:$4 sm:$0xff]   ;;  %v10833_v0 = vld [vmem:[#allocation15 + $0xcc] ss:$16 sps:$4 sm:$0xff]  }
 0x730   :  { %7021 = vmatprep.subr.bf16.mxu1 %v10182_v59  ;;  %v10236_v59 = vcombine.high %v2116_v17, %v2120_v51  ;;  %v10828_v6 = vld [vmem:[#allocation15 + $0xc0] ss:$16 sps:$4 sm:$0xff]  }
 0x732   :  { %6764 = vmatpush1.bf16.msra.mxu0 %v10179_v15  ;;  %v2129_v15 = vld [vmem:[#allocation12 + $0x17b8] sm:$0xff] }
 0x733   :  { %7022 = vmatpush1.bf16.msra.mxu1 %v10181_v57  ;;  %6765 = vmatprep.subr.bf16.mxu0 %v10188_v2  ;;  %v10235_v57 = vcombine.low %v2116_v17, %v2120_v51  ;;  %v10237_v2 = vcombine.low %v2117_v1, %v2121_v9  ;;  %v10246_v47 = vcombine.high %v2125_v42, %v2129_v15  ;;  %v10837_v17 = vld [vmem:[#allocation15 + $0xe8] ss:$16 sps:$4 sm:$0xff]   ;;  %v10842_v51 = vld [vmem:[#allocation15 + $0x104] ss:$16 sps:$4 sm:$0xff]   ;;  %v10845_v1 = vld [vmem:[#allocation15 + $0x10c] ss:$16 sps:$4 sm:$0xff]  }
 0x734   :  { %7023 = vmatprep.subr.bf16.mxu1 %v10190_v50  ;;  %v10244_v50 = vcombine.high %v2124_v20, %v2128_v7  ;;  %v10840_v9 = vld [vmem:[#allocation15 + $0x100] ss:$16 sps:$4 sm:$0xff]  }
 0x736   :  { %6766 = vmatpush1.bf16.msra.mxu0 %v10187_v12  ;;  %v2137_v12 = vld [vmem:[#allocation12 + $0x17f8] sm:$0xff] }
 0x737   :  { %7024 = vmatpush1.bf16.msra.mxu1 %v10189_v37  ;;  %6767 = vmatprep.subr.bf16.mxu0 %v10196_v29  ;;  %v10243_v37 = vcombine.low %v2124_v20, %v2128_v7  ;;  %v10245_v29 = vcombine.low %v2125_v42, %v2129_v15  ;;  %v10254_v58 = vcombine.high %v2133_v48, %v2137_v12  ;;  %v10849_v20 = vld [vmem:[#allocation15 + $0x128] ss:$16 sps:$4 sm:$0xff]   ;;  %v10854_v7 = vld [vmem:[#allocation15 + $0x144] ss:$16 sps:$4 sm:$0xff]   ;;  %v10857_v42 = vld [vmem:[#allocation15 + $0x14c] ss:$16 sps:$4 sm:$0xff]  }
 0x738   :  { %7025 = vmatprep.subr.bf16.mxu1 %v10198_v28  ;;  %v10252_v28 = vcombine.high %v2132_v27, %v2136_v11  ;;  %v10253_v52 = vcombine.low %v2133_v48, %v2137_v12  ;;  %v10852_v15 = vld [vmem:[#allocation15 + $0x140] ss:$16 sps:$4 sm:$0xff]   ;;  %v10861_v27 = vld [vmem:[#allocation15 + $0x168] ss:$16 sps:$4 sm:$0xff]   ;;  %v10866_v11 = vld [vmem:[#allocation15 + $0x184] ss:$16 sps:$4 sm:$0xff]  }
 0x739   :  { %v10869_v48 = vld [vmem:[#allocation15 + $0x18c] ss:$16 sps:$4 sm:$0xff]   ;;  %v10864_v12 = vld [vmem:[#allocation15 + $0x180] ss:$16 sps:$4 sm:$0xff]  }
 0x73a   :  { %6768 = vmatpush1.bf16.msra.mxu0 %v10195_v53  ;;  %v10797_v53 = vld [vmem:[#allocation15 + $0xc] ss:$16 sps:$4 sm:$0xff]  }
 0x73b   :  { %7026 = vmatpush1.bf16.msra.mxu1 %v10197_v13  ;;  %6769 = vmatprep.subr.bf16.mxu0 %v10204_v63  ;;  %v10792_v13 = vld [vmem:[#allocation15] ss:$16 sps:$4 sm:$0xff]   ;;  %v10795_v63 = vld [vmem:[#allocation15 + $0x8] ss:$16 sps:$4 sm:$0xff]  }
 0x73c   :  { %7027 = vmatprep.subr.bf16.mxu1 %v10206_v56  ;;  %v10800_v56 = vld [vmem:[#allocation15 + $0x24] ss:$16 sps:$4 sm:$0xff]  }
 0x73e   :  { %6770 = vmatpush1.bf16.msra.mxu0 %v10203_v31  ;;  %v10809_v31 = vld [vmem:[#allocation15 + $0x4c] ss:$16 sps:$4 sm:$0xff]  }
 0x73f   :  { %7028 = vmatpush1.bf16.msra.mxu1 %v10205_v3  ;;  %6771 = vmatprep.subr.bf16.mxu0 %v10212_v40  ;;  %v10804_v3 = vld [vmem:[#allocation15 + $0x40] ss:$16 sps:$4 sm:$0xff]   ;;  %v10807_v40 = vld [vmem:[#allocation15 + $0x48] ss:$16 sps:$4 sm:$0xff]  }
 0x740   :  { %7029 = vmatprep.subr.bf16.mxu1 %v10214_v19  ;;  %v10812_v19 = vld [vmem:[#allocation15 + $0x64] ss:$16 sps:$4 sm:$0xff]  }
 0x742   :  { %6772 = vmatpush1.bf16.msra.mxu0 %v10211_v14  ;;  %v10819_v14 = vld [vmem:[#allocation15 + $0x88] ss:$16 sps:$4 sm:$0xff]  }
 0x743   :  { %7030 = vmatpush1.bf16.msra.mxu1 %v10213_v55  ;;  %6773 = vmatprep.subr.bf16.mxu0 %v10220_v46  ;;  %v10824_v55 = vld [vmem:[#allocation15 + $0xa4] ss:$16 sps:$4 sm:$0xff]   ;;  %v10827_v46 = vld [vmem:[#allocation15 + $0xac] ss:$16 sps:$4 sm:$0xff]  }
 0x744   :  { %7031 = vmatprep.subr.bf16.mxu1 %v10222_v25  ;;  %v10822_v25 = vld [vmem:[#allocation15 + $0xa0] ss:$16 sps:$4 sm:$0xff]  }
 0x746   :  { %6774 = vmatpush1.bf16.msra.mxu0 %v10219_v30  ;;  %v10831_v30 = vld [vmem:[#allocation15 + $0xc8] ss:$16 sps:$4 sm:$0xff]  }
 0x747   :  { %7032 = vmatpush1.bf16.msra.mxu1 %v10221_v60  ;;  %6775 = vmatprep.subr.bf16.mxu0 %v10228_v62  ;;  %v10836_v60 = vld [vmem:[#allocation15 + $0xe4] ss:$16 sps:$4 sm:$0xff]   ;;  %v10839_v62 = vld [vmem:[#allocation15 + $0xec] ss:$16 sps:$4 sm:$0xff]  }
 0x748   :  { %7033 = vmatprep.subr.bf16.mxu1 %v10230_v35  ;;  %v10834_v35 = vld [vmem:[#allocation15 + $0xe0] ss:$16 sps:$4 sm:$0xff]  }
 0x74a   :  { %6776 = vmatpush1.bf16.msra.mxu0 %v10227_v10  ;;  %v10843_v10 = vld [vmem:[#allocation15 + $0x108] ss:$16 sps:$4 sm:$0xff]  }
 0x74b   :  { %7034 = vmatpush1.bf16.msra.mxu1 %v10229_v5  ;;  %6777 = vmatprep.subr.bf16.mxu0 %v10236_v59  ;;  %v10848_v5 = vld [vmem:[#allocation15 + $0x124] ss:$16 sps:$4 sm:$0xff]   ;;  %v10851_v59 = vld [vmem:[#allocation15 + $0x12c] ss:$16 sps:$4 sm:$0xff]  }
 0x74c   :  { %7035 = vmatprep.subr.bf16.mxu1 %v10238_v34  ;;  %v10846_v34 = vld [vmem:[#allocation15 + $0x120] ss:$16 sps:$4 sm:$0xff]  }
 0x74e   :  { %6778 = vmatpush1.bf16.msra.mxu0 %v10235_v57  ;;  %v10855_v57 = vld [vmem:[#allocation15 + $0x148] ss:$16 sps:$4 sm:$0xff]  }
 0x74f   :  { %7036 = vmatpush1.bf16.msra.mxu1 %v10237_v2  ;;  %6779 = vmatprep.subr.bf16.mxu0 %v10244_v50  ;;  %v10860_v2 = vld [vmem:[#allocation15 + $0x164] ss:$16 sps:$4 sm:$0xff]   ;;  %v10863_v50 = vld [vmem:[#allocation15 + $0x16c] ss:$16 sps:$4 sm:$0xff]  }
 0x750   :  { %7037 = vmatprep.subr.bf16.mxu1 %v10246_v47  ;;  %v10858_v47 = vld [vmem:[#allocation15 + $0x160] ss:$16 sps:$4 sm:$0xff]  }
 0x752   :  { %6780 = vmatpush1.bf16.msra.mxu0 %v10243_v37  ;;  %v10867_v37 = vld [vmem:[#allocation15 + $0x188] ss:$16 sps:$4 sm:$0xff]  }
 0x753   :  { %7038 = vmatpush1.bf16.msra.mxu1 %v10245_v29  ;;  %6781 = vmatprep.subr.bf16.mxu0 %v10252_v28  ;;  %v10872_v29 = vld [vmem:[#allocation15 + $0x1a4] ss:$16 sps:$4 sm:$0xff]   ;;  %v10875_v28 = vld [vmem:[#allocation15 + $0x1ac] ss:$16 sps:$4 sm:$0xff]  }
 0x754   :  { %7039 = vmatprep.subr.bf16.mxu1 %v10254_v58  ;;  %v10870_v58 = vld [vmem:[#allocation15 + $0x1a0] ss:$16 sps:$4 sm:$0xff]  }
 0x756   :  { %6782 = vmatpush1.bf16.msra.mxu0 %v10251_v16  ;;  %v10873_v16 = vld [vmem:[#allocation15 + $0x1a8] ss:$16 sps:$4 sm:$0xff]  }
 0x757   :  { %7040 = vmatpush1.bf16.msra.mxu1 %v10253_v52  ;;  %8698 = vmatprep.subr.bf16.mxu0 %v10794_v43  ;;  %v10878_v52 = vld [vmem:[#allocation15 + $0x1c4] ss:$16 sps:$4 sm:$0xff]   ;;  %v10881_v43 = vld [vmem:[#allocation15 + $0x1cc] ss:$16 sps:$4 sm:$0xff]  }
 0x758   :  { %8870 = vmatprep.subr.bf16.mxu1 %v10797_v53  ;;  %v10876_v53 = vld [vmem:[#allocation15 + $0x1c0] ss:$16 sps:$4 sm:$0xff]  }
 0x759   :  { %6784 = vmatmul.mubr.bf16.vlgmr.msra.gmra.mrb[16].mxu0 %v12575_v45 }
 0x75a   :  { %7042 = vmatmul.mubr.bf16.vlgmr.msra.gmra.mrb[16].mxu1 %v12575_v45  ;;  %8699 = vmatpush1.bf16.msra.mxu0 %v10792_v13  ;;  %v10815_v45 = vld [vmem:[#allocation15 + $0x6c] ss:$16 sps:$4 sm:$0xff]   ;;  %v10879_v13 = vld [vmem:[#allocation15 + $0x1c8] ss:$16 sps:$4 sm:$0xff]  }
 0x75b   :  { %8730 = vmatprep.mubr.bf16.mxu0 %v12673_v41  ;;  %8871 = vmatpush1.bf16.msra.mxu1 %v10795_v63  ;;  %v10884_v63 = vld [vmem:[#allocation15 + $0x1e4] ss:$16 sps:$4 sm:$0xff]  }
 0x75c   :  { %8902 = vmatprep.mubr.bf16.mxu1 %v12673_v41  ;;  %8700 = vmatprep.subr.bf16.mxu0 %v10800_v56  ;;  %v10816_v41 = vld [vmem:[#allocation15 + $0x80] ss:$16 sps:$4 sm:$0xff]   ;;  %v10887_v56 = vld [vmem:[#allocation15 + $0x1ec] ss:$16 sps:$4 sm:$0xff]  }
 0x75d   :  { %8872 = vmatprep.subr.bf16.mxu1 %v10803_v39  ;;  %v10882_v39 = vld [vmem:[#allocation15 + $0x1e0] ss:$16 sps:$4 sm:$0xff]  }
 0x75e   :  { %8701 = vmatpush1.bf16.msra.mxu0 %v10798_v8  ;;  %v10885_v8 = vld [vmem:[#allocation15 + $0x1e8] ss:$16 sps:$4 sm:$0xff]  }
 0x75f   :  { %8873 = vmatpush1.bf16.msra.mxu1 %v10801_v22  ;;  %8702 = vmatprep.subr.bf16.mxu0 %v10806_v24  ;;  %v10890_v22 = vld [vmem:[#allocation15 + $0x204] ss:$16 sps:$4 sm:$0xff]   ;;  %v10893_v24 = vld [vmem:[#allocation15 + $0x20c] ss:$16 sps:$4 sm:$0xff]  }
 0x760   :  { %8874 = vmatprep.subr.bf16.mxu1 %v10809_v31  ;;  %v10888_v31 = vld [vmem:[#allocation15 + $0x200] ss:$16 sps:$4 sm:$0xff]  }
 0x762   :  { %8703 = vmatpush1.bf16.msra.mxu0 %v10804_v3  ;;  %v10891_v3 = vld [vmem:[#allocation15 + $0x208] ss:$16 sps:$4 sm:$0xff]  }
 0x763   :  { %8875 = vmatpush1.bf16.msra.mxu1 %v10807_v40  ;;  %8704 = vmatprep.subr.bf16.mxu0 %v10812_v19  ;;  %v10896_v40 = vld [vmem:[#allocation15 + $0x224] ss:$16 sps:$4 sm:$0xff]   ;;  %v10899_v19 = vld [vmem:[#allocation15 + $0x22c] ss:$16 sps:$4 sm:$0xff]  }
 0x764   :  { %8876 = vmatprep.subr.bf16.mxu1 %v10815_v45  ;;  %v10894_v45 = vld [vmem:[#allocation15 + $0x220] ss:$16 sps:$4 sm:$0xff]  }
 0x766   :  { %8705 = vmatpush1.bf16.msra.mxu0 %v10810_v38  ;;  %v10897_v38 = vld [vmem:[#allocation15 + $0x228] ss:$16 sps:$4 sm:$0xff]  }
 0x767   :  { %8877 = vmatpush1.bf16.msra.mxu1 %v10813_v4  ;;  %8706 = vmatprep.subr.bf16.mxu0 %v10818_v18  ;;  %v10902_v4 = vld [vmem:[#allocation15 + $0x244] ss:$16 sps:$4 sm:$0xff]   ;;  %v10905_v18 = vld [vmem:[#allocation15 + $0x24c] ss:$16 sps:$4 sm:$0xff]  }
 0x768   :  { %8878 = vmatprep.subr.bf16.mxu1 %v10821_v61  ;;  %v10900_v61 = vld [vmem:[#allocation15 + $0x240] ss:$16 sps:$4 sm:$0xff]  }
 0x76a   :  { %8707 = vmatpush1.bf16.msra.mxu0 %v10816_v41  ;;  %v10903_v41 = vld [vmem:[#allocation15 + $0x248] ss:$16 sps:$4 sm:$0xff]  }
 0x76b   :  { %8879 = vmatpush1.bf16.msra.mxu1 %v10819_v14  ;;  %8708 = vmatprep.subr.bf16.mxu0 %v10824_v55  ;;  %v10908_v14 = vld [vmem:[#allocation15 + $0x264] ss:$16 sps:$4 sm:$0xff]   ;;  %v10906_v55 = vld [vmem:[#allocation15 + $0x260] ss:$16 sps:$4 sm:$0xff]  }
 0x76c   :  { %8880 = vmatprep.subr.bf16.mxu1 %v10827_v46  ;;  %v10909_v46 = vld [vmem:[#allocation15 + $0x268] ss:$16 sps:$4 sm:$0xff]  }
 0x76e   :  { %8709 = vmatpush1.bf16.msra.mxu0 %v10822_v25  ;;  %v10914_v25 = vld [vmem:[#allocation15 + $0x284] ss:$16 sps:$4 sm:$0xff]  }
 0x76f   :  { %8881 = vmatpush1.bf16.msra.mxu1 %v10825_v21  ;;  %8710 = vmatprep.subr.bf16.mxu0 %v10830_v36  ;;  %v10917_v21 = vld [vmem:[#allocation15 + $0x28c] ss:$16 sps:$4 sm:$0xff]   ;;  %v10915_v36 = vld [vmem:[#allocation15 + $0x288] ss:$16 sps:$4 sm:$0xff]  }
 0x770   :  { %8882 = vmatprep.subr.bf16.mxu1 %v10833_v0  ;;  %v10920_v0 = vld [vmem:[#allocation15 + $0x2a4] ss:$16 sps:$4 sm:$0xff]  }
 0x772   :  { %8711 = vmatpush1.bf16.msra.mxu0 %v10828_v6  ;;  %v10923_v6 = vld [vmem:[#allocation15 + $0x2ac] ss:$16 sps:$4 sm:$0xff]  }
 0x773   :  { %8883 = vmatpush1.bf16.msra.mxu1 %v10831_v30  ;;  %8712 = vmatprep.subr.bf16.mxu0 %v10836_v60  ;;  %v10918_v30 = vld [vmem:[#allocation15 + $0x2a0] ss:$16 sps:$4 sm:$0xff]   ;;  %v10921_v60 = vld [vmem:[#allocation15 + $0x2a8] ss:$16 sps:$4 sm:$0xff]  }
 0x774   :  { %8884 = vmatprep.subr.bf16.mxu1 %v10839_v62  ;;  %v10926_v62 = vld [vmem:[#allocation15 + $0x2c4] ss:$16 sps:$4 sm:$0xff]  }
 0x776   :  { %8713 = vmatpush1.bf16.msra.mxu0 %v10834_v35  ;;  %v10929_v35 = vld [vmem:[#allocation15 + $0x2cc] ss:$16 sps:$4 sm:$0xff]  }
 0x777   :  { %8885 = vmatpush1.bf16.msra.mxu1 %v10837_v17  ;;  %8714 = vmatprep.subr.bf16.mxu0 %v10842_v51  ;;  %v10924_v17 = vld [vmem:[#allocation15 + $0x2c0] ss:$16 sps:$4 sm:$0xff]   ;;  %v10927_v51 = vld [vmem:[#allocation15 + $0x2c8] ss:$16 sps:$4 sm:$0xff]  }
 0x778   :  { %8886 = vmatprep.subr.bf16.mxu1 %v10845_v1  ;;  %v10932_v1 = vld [vmem:[#allocation15 + $0x2e4] ss:$16 sps:$4 sm:$0xff]  }
 0x77a   :  { %8715 = vmatpush1.bf16.msra.mxu0 %v10840_v9  ;;  %v10935_v9 = vld [vmem:[#allocation15 + $0x2ec] ss:$16 sps:$4 sm:$0xff]  }
 0x77b   :  { %8887 = vmatpush1.bf16.msra.mxu1 %v10843_v10  ;;  %8716 = vmatprep.subr.bf16.mxu0 %v10848_v5  ;;  %v10930_v10 = vld [vmem:[#allocation15 + $0x2e0] ss:$16 sps:$4 sm:$0xff]   ;;  %v10933_v5 = vld [vmem:[#allocation15 + $0x2e8] ss:$16 sps:$4 sm:$0xff]  }
 0x77c   :  { %8888 = vmatprep.subr.bf16.mxu1 %v10851_v59  ;;  %v10938_v59 = vld [vmem:[#allocation15 + $0x304] ss:$16 sps:$4 sm:$0xff]  }
 0x77e   :  { %8717 = vmatpush1.bf16.msra.mxu0 %v10846_v34  ;;  %v10941_v34 = vld [vmem:[#allocation15 + $0x30c] ss:$16 sps:$4 sm:$0xff]  }
 0x77f   :  { %8889 = vmatpush1.bf16.msra.mxu1 %v10849_v20  ;;  %8718 = vmatprep.subr.bf16.mxu0 %v10854_v7  ;;  %v10936_v20 = vld [vmem:[#allocation15 + $0x300] ss:$16 sps:$4 sm:$0xff]   ;;  %v10939_v7 = vld [vmem:[#allocation15 + $0x308] ss:$16 sps:$4 sm:$0xff]  }
 0x780   :  { %8890 = vmatprep.subr.bf16.mxu1 %v10857_v42  ;;  %v10944_v42 = vld [vmem:[#allocation15 + $0x324] ss:$16 sps:$4 sm:$0xff]  }
 0x782   :  { %8719 = vmatpush1.bf16.msra.mxu0 %v10852_v15  ;;  %v10947_v15 = vld [vmem:[#allocation15 + $0x32c] ss:$16 sps:$4 sm:$0xff]  }
 0x783   :  { %8891 = vmatpush1.bf16.msra.mxu1 %v10855_v57  ;;  %8720 = vmatprep.subr.bf16.mxu0 %v10860_v2  ;;  %v10942_v57 = vld [vmem:[#allocation15 + $0x320] ss:$16 sps:$4 sm:$0xff]   ;;  %v10945_v2 = vld [vmem:[#allocation15 + $0x328] ss:$16 sps:$4 sm:$0xff]  }
 0x784   :  { %8892 = vmatprep.subr.bf16.mxu1 %v10863_v50  ;;  %v10950_v50 = vld [vmem:[#allocation15 + $0x344] ss:$16 sps:$4 sm:$0xff]  }
 0x786   :  { %8721 = vmatpush1.bf16.msra.mxu0 %v10858_v47  ;;  %v10953_v47 = vld [vmem:[#allocation15 + $0x34c] ss:$16 sps:$4 sm:$0xff]  }
 0x787   :  { %8893 = vmatpush1.bf16.msra.mxu1 %v10861_v27  ;;  %8722 = vmatprep.subr.bf16.mxu0 %v10866_v11  ;;  %v10948_v27 = vld [vmem:[#allocation15 + $0x340] ss:$16 sps:$4 sm:$0xff]   ;;  %v10951_v11 = vld [vmem:[#allocation15 + $0x348] ss:$16 sps:$4 sm:$0xff]  }
 0x788   :  { %8894 = vmatprep.subr.bf16.mxu1 %v10869_v48  ;;  %v10956_v48 = vld [vmem:[#allocation15 + $0x364] ss:$16 sps:$4 sm:$0xff]  }
 0x78a   :  { %8723 = vmatpush1.bf16.msra.mxu0 %v10864_v12  ;;  %v10959_v12 = vld [vmem:[#allocation15 + $0x36c] ss:$16 sps:$4 sm:$0xff]  }
 0x78b   :  { %8895 = vmatpush1.bf16.msra.mxu1 %v10867_v37  ;;  %8724 = vmatprep.subr.bf16.mxu0 %v10872_v29  ;;  %v10954_v37 = vld [vmem:[#allocation15 + $0x360] ss:$16 sps:$4 sm:$0xff]   ;;  %v10957_v29 = vld [vmem:[#allocation15 + $0x368] ss:$16 sps:$4 sm:$0xff]  }
 0x78c   :  { %8896 = vmatprep.subr.bf16.mxu1 %v10875_v28  ;;  %v10962_v28 = vld [vmem:[#allocation15 + $0x384] ss:$16 sps:$4 sm:$0xff]  }
 0x78e   :  { %8725 = vmatpush1.bf16.msra.mxu0 %v10870_v58  ;;  %v10965_v58 = vld [vmem:[#allocation15 + $0x38c] ss:$16 sps:$4 sm:$0xff]  }
 0x78f   :  { %8897 = vmatpush1.bf16.msra.mxu1 %v10873_v16  ;;  %8726 = vmatprep.subr.bf16.mxu0 %v10878_v52  ;;  %v10960_v16 = vld [vmem:[#allocation15 + $0x380] ss:$16 sps:$4 sm:$0xff]   ;;  %v10963_v52 = vld [vmem:[#allocation15 + $0x388] ss:$16 sps:$4 sm:$0xff]  }
 0x790   :  { %8898 = vmatprep.subr.bf16.mxu1 %v10881_v43  ;;  %v10968_v43 = vld [vmem:[#allocation15 + $0x3a4] ss:$16 sps:$4 sm:$0xff]  }
 0x792   :  { %8727 = vmatpush1.bf16.msra.mxu0 %v10876_v53  ;;  %v10971_v53 = vld [vmem:[#allocation15 + $0x3ac] ss:$16 sps:$4 sm:$0xff]  }
 0x793   :  { %8899 = vmatpush1.bf16.msra.mxu1 %v10879_v13  ;;  %8728 = vmatprep.subr.bf16.mxu0 %v10884_v63  ;;  %v10966_v13 = vld [vmem:[#allocation15 + $0x3a0] ss:$16 sps:$4 sm:$0xff]   ;;  %v10969_v63 = vld [vmem:[#allocation15 + $0x3a8] ss:$16 sps:$4 sm:$0xff]  }
 0x794   :  { %8900 = vmatprep.subr.bf16.mxu1 %v10887_v56  ;;  %v10974_v56 = vld [vmem:[#allocation15 + $0x3c4] ss:$16 sps:$4 sm:$0xff]  }
 0x796   :  { %8729 = vmatpush1.bf16.msra.mxu0 %v10882_v39  ;;  %v10977_v39 = vld [vmem:[#allocation15 + $0x3cc] ss:$16 sps:$4 sm:$0xff]  }
 0x797   :  { %8901 = vmatpush1.bf16.msra.mxu1 %v10885_v8  ;;  %8741 = vmatprep.subr.bf16.mxu0 %v10890_v22  ;;  %v10972_v8 = vld [vmem:[#allocation15 + $0x3c0] ss:$16 sps:$4 sm:$0xff]   ;;  %v10975_v22 = vld [vmem:[#allocation15 + $0x3c8] ss:$16 sps:$4 sm:$0xff]  }
 0x798   :  { %8913 = vmatprep.subr.bf16.mxu1 %v10893_v24  ;;  %v10980_v24 = vld [vmem:[#allocation15 + $0x3e4] ss:$16 sps:$4 sm:$0xff]  }
 0x799   :  { %8731 = vmatmul.mubr.bf16.vlgmr.msra.gmra.mrb[20].mxu0 %v12667_v23 }
 0x79a   :  { %8903 = vmatmul.mubr.bf16.vlgmr.msra.gmra.mrb[20].mxu1 %v12667_v23  ;;  %8742 = vmatpush1.bf16.msra.mxu0 %v10888_v31  ;;  %v10911_v23 = vld [vmem:[#allocation15 + $0x26c] ss:$16 sps:$4 sm:$0xff]  }
 0x79b   :  { %8773 = vmatprep.mubr.bf16.mxu0 %v12675_v54  ;;  %8914 = vmatpush1.bf16.msra.mxu1 %v10891_v3  ;;  %v10983_v31 = vld [vmem:[#allocation15 + $0x3ec] ss:$16 sps:$4 sm:$0xff]   ;;  %v10978_v3 = vld [vmem:[#allocation15 + $0x3e0] ss:$16 sps:$4 sm:$0xff]  }
 0x79c   :  { %8945 = vmatprep.mubr.bf16.mxu1 %v12675_v54  ;;  %8743 = vmatprep.subr.bf16.mxu0 %v10896_v40  ;;  %v10912_v54 = vld [vmem:[#allocation15 + $0x280] ss:$16 sps:$4 sm:$0xff]   ;;  %v10981_v40 = vld [vmem:[#allocation15 + $0x3e8] ss:$16 sps:$4 sm:$0xff]  }
 0x79d   :  { %8915 = vmatprep.subr.bf16.mxu1 %v10899_v19  ;;  %v10986_v19 = vld [vmem:[#allocation15 + $0x404] ss:$16 sps:$4 sm:$0xff]  }
 0x79e   :  { %8744 = vmatpush1.bf16.msra.mxu0 %v10894_v45  ;;  %v10989_v45 = vld [vmem:[#allocation15 + $0x40c] ss:$16 sps:$4 sm:$0xff]  }
 0x79f   :  { %8916 = vmatpush1.bf16.msra.mxu1 %v10897_v38  ;;  %8745 = vmatprep.subr.bf16.mxu0 %v10902_v4  ;;  %v10984_v38 = vld [vmem:[#allocation15 + $0x400] ss:$16 sps:$4 sm:$0xff]   ;;  %v10987_v4 = vld [vmem:[#allocation15 + $0x408] ss:$16 sps:$4 sm:$0xff]  }
 0x7a0   :  { %8917 = vmatprep.subr.bf16.mxu1 %v10905_v18  ;;  %v10992_v18 = vld [vmem:[#allocation15 + $0x424] ss:$16 sps:$4 sm:$0xff]  }
 0x7a2   :  { %8746 = vmatpush1.bf16.msra.mxu0 %v10900_v61  ;;  %v10995_v61 = vld [vmem:[#allocation15 + $0x42c] ss:$16 sps:$4 sm:$0xff]  }
 0x7a3   :  { %8918 = vmatpush1.bf16.msra.mxu1 %v10903_v41  ;;  %8747 = vmatprep.subr.bf16.mxu0 %v10908_v14  ;;  %v10990_v41 = vld [vmem:[#allocation15 + $0x420] ss:$16 sps:$4 sm:$0xff]   ;;  %v10993_v14 = vld [vmem:[#allocation15 + $0x428] ss:$16 sps:$4 sm:$0xff]  }
 0x7a4   :  { %8919 = vmatprep.subr.bf16.mxu1 %v10911_v23  ;;  %v10998_v23 = vld [vmem:[#allocation15 + $0x444] ss:$16 sps:$4 sm:$0xff]  }
 0x7a6   :  { %8748 = vmatpush1.bf16.msra.mxu0 %v10906_v55  ;;  %v11001_v55 = vld [vmem:[#allocation15 + $0x44c] ss:$16 sps:$4 sm:$0xff]  }
 0x7a7   :  { %8920 = vmatpush1.bf16.msra.mxu1 %v10909_v46  ;;  %8749 = vmatprep.subr.bf16.mxu0 %v10914_v25  ;;  %v10996_v46 = vld [vmem:[#allocation15 + $0x440] ss:$16 sps:$4 sm:$0xff]   ;;  %v10999_v25 = vld [vmem:[#allocation15 + $0x448] ss:$16 sps:$4 sm:$0xff]  }
 0x7a8   :  { %8921 = vmatprep.subr.bf16.mxu1 %v10917_v21  ;;  %v11004_v21 = vld [vmem:[#allocation15 + $0x464] ss:$16 sps:$4 sm:$0xff]  }
 0x7aa   :  { %8750 = vmatpush1.bf16.msra.mxu0 %v10912_v54  ;;  %v11007_v54 = vld [vmem:[#allocation15 + $0x46c] ss:$16 sps:$4 sm:$0xff]  }
 0x7ab   :  { %8922 = vmatpush1.bf16.msra.mxu1 %v10915_v36  ;;  %8751 = vmatprep.subr.bf16.mxu0 %v10920_v0  ;;  %v11002_v36 = vld [vmem:[#allocation15 + $0x460] ss:$16 sps:$4 sm:$0xff]   ;;  %v11010_v0 = vld [vmem:[#allocation15 + $0x484] ss:$16 sps:$4 sm:$0xff]  }
 0x7ac   :  { %8923 = vmatprep.subr.bf16.mxu1 %v10923_v6  ;;  %v11013_v6 = vld [vmem:[#allocation15 + $0x48c] ss:$16 sps:$4 sm:$0xff]  }
 0x7ae   :  { %8752 = vmatpush1.bf16.msra.mxu0 %v10918_v30  ;;  %v11008_v30 = vld [vmem:[#allocation15 + $0x480] ss:$16 sps:$4 sm:$0xff]  }
 0x7af   :  { %8924 = vmatpush1.bf16.msra.mxu1 %v10921_v60  ;;  %8753 = vmatprep.subr.bf16.mxu0 %v10926_v62  ;;  %v11011_v60 = vld [vmem:[#allocation15 + $0x488] ss:$16 sps:$4 sm:$0xff]   ;;  %v11016_v62 = vld [vmem:[#allocation15 + $0x4a4] ss:$16 sps:$4 sm:$0xff]  }
 0x7b0   :  { %8925 = vmatprep.subr.bf16.mxu1 %v10929_v35  ;;  %v11019_v35 = vld [vmem:[#allocation15 + $0x4ac] ss:$16 sps:$4 sm:$0xff]  }
 0x7b2   :  { %8754 = vmatpush1.bf16.msra.mxu0 %v10924_v17  ;;  %v11014_v17 = vld [vmem:[#allocation15 + $0x4a0] ss:$16 sps:$4 sm:$0xff]  }
 0x7b3   :  { %8926 = vmatpush1.bf16.msra.mxu1 %v10927_v51  ;;  %8755 = vmatprep.subr.bf16.mxu0 %v10932_v1  ;;  %v11017_v51 = vld [vmem:[#allocation15 + $0x4a8] ss:$16 sps:$4 sm:$0xff]   ;;  %v11022_v1 = vld [vmem:[#allocation15 + $0x4c4] ss:$16 sps:$4 sm:$0xff]  }
 0x7b4   :  { %8927 = vmatprep.subr.bf16.mxu1 %v10935_v9  ;;  %v11025_v9 = vld [vmem:[#allocation15 + $0x4cc] ss:$16 sps:$4 sm:$0xff]  }
 0x7b6   :  { %8756 = vmatpush1.bf16.msra.mxu0 %v10930_v10  ;;  %v11020_v10 = vld [vmem:[#allocation15 + $0x4c0] ss:$16 sps:$4 sm:$0xff]  }
 0x7b7   :  { %8928 = vmatpush1.bf16.msra.mxu1 %v10933_v5  ;;  %8757 = vmatprep.subr.bf16.mxu0 %v10938_v59  ;;  %v11023_v5 = vld [vmem:[#allocation15 + $0x4c8] ss:$16 sps:$4 sm:$0xff]   ;;  %v11028_v59 = vld [vmem:[#allocation15 + $0x4e4] ss:$16 sps:$4 sm:$0xff]  }
 0x7b8   :  { %8929 = vmatprep.subr.bf16.mxu1 %v10941_v34  ;;  %v11031_v34 = vld [vmem:[#allocation15 + $0x4ec] ss:$16 sps:$4 sm:$0xff]  }
 0x7ba   :  { %8758 = vmatpush1.bf16.msra.mxu0 %v10936_v20  ;;  %v11026_v20 = vld [vmem:[#allocation15 + $0x4e0] ss:$16 sps:$4 sm:$0xff]  }
 0x7bb   :  { %8930 = vmatpush1.bf16.msra.mxu1 %v10939_v7  ;;  %8759 = vmatprep.subr.bf16.mxu0 %v10944_v42  ;;  %v11029_v7 = vld [vmem:[#allocation15 + $0x4e8] ss:$16 sps:$4 sm:$0xff]   ;;  %v11034_v42 = vld [vmem:[#allocation15 + $0x504] ss:$16 sps:$4 sm:$0xff]  }
 0x7bc   :  { %8931 = vmatprep.subr.bf16.mxu1 %v10947_v15  ;;  %v11037_v15 = vld [vmem:[#allocation15 + $0x50c] ss:$16 sps:$4 sm:$0xff]  }
 0x7be   :  { %8760 = vmatpush1.bf16.msra.mxu0 %v10942_v57  ;;  %v11032_v57 = vld [vmem:[#allocation15 + $0x500] ss:$16 sps:$4 sm:$0xff]  }
 0x7bf   :  { %8932 = vmatpush1.bf16.msra.mxu1 %v10945_v2  ;;  %8761 = vmatprep.subr.bf16.mxu0 %v10950_v50  ;;  %v11035_v2 = vld [vmem:[#allocation15 + $0x508] ss:$16 sps:$4 sm:$0xff]   ;;  %v11040_v50 = vld [vmem:[#allocation15 + $0x524] ss:$16 sps:$4 sm:$0xff]  }
 0x7c0   :  { %8933 = vmatprep.subr.bf16.mxu1 %v10953_v47  ;;  %v11043_v47 = vld [vmem:[#allocation15 + $0x52c] ss:$16 sps:$4 sm:$0xff]  }
 0x7c2   :  { %8762 = vmatpush1.bf16.msra.mxu0 %v10948_v27  ;;  %v11038_v27 = vld [vmem:[#allocation15 + $0x520] ss:$16 sps:$4 sm:$0xff]  }
 0x7c3   :  { %8934 = vmatpush1.bf16.msra.mxu1 %v10951_v11  ;;  %8763 = vmatprep.subr.bf16.mxu0 %v10956_v48  ;;  %v11041_v11 = vld [vmem:[#allocation15 + $0x528] ss:$16 sps:$4 sm:$0xff]   ;;  %v11046_v48 = vld [vmem:[#allocation15 + $0x544] ss:$16 sps:$4 sm:$0xff]  }
 0x7c4   :  { %8935 = vmatprep.subr.bf16.mxu1 %v10959_v12  ;;  %v11049_v12 = vld [vmem:[#allocation15 + $0x54c] ss:$16 sps:$4 sm:$0xff]  }
 0x7c6   :  { %8764 = vmatpush1.bf16.msra.mxu0 %v10954_v37  ;;  %v11044_v37 = vld [vmem:[#allocation15 + $0x540] ss:$16 sps:$4 sm:$0xff]  }
 0x7c7   :  { %8936 = vmatpush1.bf16.msra.mxu1 %v10957_v29  ;;  %8765 = vmatprep.subr.bf16.mxu0 %v10962_v28  ;;  %v11047_v29 = vld [vmem:[#allocation15 + $0x548] ss:$16 sps:$4 sm:$0xff]   ;;  %v11052_v28 = vld [vmem:[#allocation15 + $0x564] ss:$16 sps:$4 sm:$0xff]  }
 0x7c8   :  { %8937 = vmatprep.subr.bf16.mxu1 %v10965_v58  ;;  %v11055_v58 = vld [vmem:[#allocation15 + $0x56c] ss:$16 sps:$4 sm:$0xff]  }
 0x7ca   :  { %8766 = vmatpush1.bf16.msra.mxu0 %v10960_v16  ;;  %v11050_v16 = vld [vmem:[#allocation15 + $0x560] ss:$16 sps:$4 sm:$0xff]  }
 0x7cb   :  { %8938 = vmatpush1.bf16.msra.mxu1 %v10963_v52  ;;  %8767 = vmatprep.subr.bf16.mxu0 %v10968_v43  ;;  %v11053_v52 = vld [vmem:[#allocation15 + $0x568] ss:$16 sps:$4 sm:$0xff]   ;;  %v11058_v43 = vld [vmem:[#allocation15 + $0x584] ss:$16 sps:$4 sm:$0xff]  }
 0x7cc   :  { %8939 = vmatprep.subr.bf16.mxu1 %v10971_v53  ;;  %v11061_v53 = vld [vmem:[#allocation15 + $0x58c] ss:$16 sps:$4 sm:$0xff]  }
 0x7ce   :  { %8768 = vmatpush1.bf16.msra.mxu0 %v10966_v13  ;;  %v11056_v13 = vld [vmem:[#allocation15 + $0x580] ss:$16 sps:$4 sm:$0xff]  }
 0x7cf   :  { %8940 = vmatpush1.bf16.msra.mxu1 %v10969_v63  ;;  %8769 = vmatprep.subr.bf16.mxu0 %v10974_v56  ;;  %v11059_v63 = vld [vmem:[#allocation15 + $0x588] ss:$16 sps:$4 sm:$0xff]   ;;  %v11064_v56 = vld [vmem:[#allocation15 + $0x5a4] ss:$16 sps:$4 sm:$0xff]  }
 0x7d0   :  { %8941 = vmatprep.subr.bf16.mxu1 %v10977_v39  ;;  %v11067_v39 = vld [vmem:[#allocation15 + $0x5ac] ss:$16 sps:$4 sm:$0xff]  }
 0x7d2   :  { %8770 = vmatpush1.bf16.msra.mxu0 %v10972_v8  ;;  %v11062_v8 = vld [vmem:[#allocation15 + $0x5a0] ss:$16 sps:$4 sm:$0xff]  }
 0x7d3   :  { %8942 = vmatpush1.bf16.msra.mxu1 %v10975_v22  ;;  %8771 = vmatprep.subr.bf16.mxu0 %v10980_v24  ;;  %v11065_v22 = vld [vmem:[#allocation15 + $0x5a8] ss:$16 sps:$4 sm:$0xff]   ;;  %v11070_v24 = vld [vmem:[#allocation15 + $0x5c4] ss:$16 sps:$4 sm:$0xff]  }
 0x7d4   :  { %8943 = vmatprep.subr.bf16.mxu1 %v10983_v31  ;;  %v11073_v31 = vld [vmem:[#allocation15 + $0x5cc] ss:$16 sps:$4 sm:$0xff]  }
 0x7d6   :  { %8772 = vmatpush1.bf16.msra.mxu0 %v10978_v3  ;;  %v11068_v3 = vld [vmem:[#allocation15 + $0x5c0] ss:$16 sps:$4 sm:$0xff]  }
 0x7d7   :  { %8944 = vmatpush1.bf16.msra.mxu1 %v10981_v40  ;;  %8784 = vmatprep.subr.bf16.mxu0 %v10986_v19  ;;  %v11071_v40 = vld [vmem:[#allocation15 + $0x5c8] ss:$16 sps:$4 sm:$0xff]   ;;  %v11076_v19 = vld [vmem:[#allocation15 + $0x5e4] ss:$16 sps:$4 sm:$0xff]  }
 0x7d8   :  { %8956 = vmatprep.subr.bf16.mxu1 %v10989_v45  ;;  %v11079_v45 = vld [vmem:[#allocation15 + $0x5ec] ss:$16 sps:$4 sm:$0xff]  }
 0x7d9   :  { %8774 = vmatmul.mubr.bf16.vlgmr.msra.gmra.mrb[20].mxu0 %v12669_v32 }
 0x7da   :  { %8946 = vmatmul.mubr.bf16.vlgmr.msra.gmra.mrb[20].mxu1 %v12669_v32  ;;  %8785 = vmatpush1.bf16.msra.mxu0 %v10984_v38  ;;  %v11005_v32 = vld [vmem:[#allocation15 + $0x468] ss:$16 sps:$4 sm:$0xff]   ;;  %v11074_v38 = vld [vmem:[#allocation15 + $0x5e0] ss:$16 sps:$4 sm:$0xff]  }
 0x7db   :  { %8957 = vmatpush1.bf16.msra.mxu1 %v10987_v4  ;;  %8786 = vmatprep.subr.bf16.mxu0 %v10992_v18  ;;  %v11077_v4 = vld [vmem:[#allocation15 + $0x5e8] ss:$16 sps:$4 sm:$0xff]   ;;  %v11082_v18 = vld [vmem:[#allocation15 + $0x604] ss:$16 sps:$4 sm:$0xff]  }
 0x7dc   :  { %8958 = vmatprep.subr.bf16.mxu1 %v10995_v61  ;;  %v11085_v61 = vld [vmem:[#allocation15 + $0x60c] ss:$16 sps:$4 sm:$0xff]  }
 0x7de   :  { %8787 = vmatpush1.bf16.msra.mxu0 %v10990_v41  ;;  %v11264_v41 = vld [vmem:[#allocation13] sm:$0xff] }
 0x7df   :  { %8959 = vmatpush1.bf16.msra.mxu1 %v10993_v14  ;;  %8788 = vmatprep.subr.bf16.mxu0 %v10998_v23  ;;  %v12771_v14 = vld [vmem:[#allocation31_spill] sm:$0xff] }
 0x7e0   :  { %8960 = vmatprep.subr.bf16.mxu1 %v11001_v55  ;;  %v2159_v23 = vrot.slane %v11264_v41, %v12771_v14  ;;  %v12772_v55 = vld [vmem:[#allocation33_spill] sm:$0xff] }
 0x7e2   :  { %8789 = vmatpush1.bf16.msra.mxu0 %v10996_v46  ;;  %v2167_v46 = vrot.slane %v11264_v41, %v12772_v55 }
 0x7e3   :  { %8961 = vmatpush1.bf16.msra.mxu1 %v10999_v25  ;;  %8790 = vmatprep.subr.bf16.mxu0 %v11004_v21  ;;  %v12773_v25 = vld [vmem:[#allocation32_spill] sm:$0xff] }
 0x7e4   :  { %8962 = vmatprep.subr.bf16.mxu1 %v11007_v54  ;;  %v2163_v21 = vrot.slane %v11264_v41, %v12773_v25  ;;  %v12774_v54 = vld [vmem:[#allocation34_spill] sm:$0xff] }
 0x7e6   :  { %8791 = vmatpush1.bf16.msra.mxu0 %v11002_v36  ;;  %v2171_v36 = vrot.slane %v11264_v41, %v12774_v54 }
 0x7e7   :  { %8963 = vmatpush1.bf16.msra.mxu1 %v11005_v32  ;;  %8792 = vmatprep.subr.bf16.mxu0 %v11010_v0 }
 0x7e8   :  { %8964 = vmatprep.subr.bf16.mxu1 %v11013_v6 }
 0x7ea   :  { %8793 = vmatpush1.bf16.msra.mxu0 %v11008_v30 }
 0x7eb   :  { %8965 = vmatpush1.bf16.msra.mxu1 %v11011_v60  ;;  %8794 = vmatprep.subr.bf16.mxu0 %v11016_v62 }
 0x7ec   :  { %8966 = vmatprep.subr.bf16.mxu1 %v11019_v35 }
 0x7ee   :  { %8795 = vmatpush1.bf16.msra.mxu0 %v11014_v17 }
 0x7ef   :  { %8967 = vmatpush1.bf16.msra.mxu1 %v11017_v51  ;;  %8796 = vmatprep.subr.bf16.mxu0 %v11022_v1 }
 0x7f0   :  { %8968 = vmatprep.subr.bf16.mxu1 %v11025_v9 }
 0x7f2   :  { %8797 = vmatpush1.bf16.msra.mxu0 %v11020_v10 }
 0x7f3   :  { %8969 = vmatpush1.bf16.msra.mxu1 %v11023_v5  ;;  %8798 = vmatprep.subr.bf16.mxu0 %v11028_v59 }
 0x7f4   :  { %8970 = vmatprep.subr.bf16.mxu1 %v11031_v34 }
 0x7f6   :  { %8799 = vmatpush1.bf16.msra.mxu0 %v11026_v20 }
 0x7f7   :  { %8971 = vmatpush1.bf16.msra.mxu1 %v11029_v7  ;;  %8800 = vmatprep.subr.bf16.mxu0 %v11034_v42 }
 0x7f8   :  { %8972 = vmatprep.subr.bf16.mxu1 %v11037_v15 }
 0x7fa   :  { %8801 = vmatpush1.bf16.msra.mxu0 %v11032_v57 }
 0x7fb   :  { %8973 = vmatpush1.bf16.msra.mxu1 %v11035_v2  ;;  %8802 = vmatprep.subr.bf16.mxu0 %v11040_v50 }
 0x7fc   :  { %8974 = vmatprep.subr.bf16.mxu1 %v11043_v47 }
 0x7fe   :  { %8803 = vmatpush1.bf16.msra.mxu0 %v11038_v27 }
 0x7ff   :  { %8975 = vmatpush1.bf16.msra.mxu1 %v11041_v11  ;;  %8804 = vmatprep.subr.bf16.mxu0 %v11046_v48 }
 0x800   :  { %8976 = vmatprep.subr.bf16.mxu1 %v11049_v12 }
 0x802   :  { %8805 = vmatpush1.bf16.msra.mxu0 %v11044_v37 }
 0x803   :  { %8977 = vmatpush1.bf16.msra.mxu1 %v11047_v29  ;;  %8806 = vmatprep.subr.bf16.mxu0 %v11052_v28 }
 0x804   :  { %8978 = vmatprep.subr.bf16.mxu1 %v11055_v58 }
 0x806   :  { %8807 = vmatpush1.bf16.msra.mxu0 %v11050_v16 }
 0x807   :  { %8979 = vmatpush1.bf16.msra.mxu1 %v11053_v52  ;;  %8808 = vmatprep.subr.bf16.mxu0 %v11058_v43 }
 0x808   :  { %8980 = vmatprep.subr.bf16.mxu1 %v11061_v53 }
 0x80a   :  { %8809 = vmatpush1.bf16.msra.mxu0 %v11056_v13 }
 0x80b   :  { %8981 = vmatpush1.bf16.msra.mxu1 %v11059_v63  ;;  %8810 = vmatprep.subr.bf16.mxu0 %v11064_v56 }
 0x80c   :  { %8982 = vmatprep.subr.bf16.mxu1 %v11067_v39 }
 0x80e   :  { %8811 = vmatpush1.bf16.msra.mxu0 %v11062_v8 }
 0x80f   :  { %8983 = vmatpush1.bf16.msra.mxu1 %v11065_v22  ;;  %8812 = vmatprep.subr.bf16.mxu0 %v11070_v24 }
 0x810   :  { %8984 = vmatprep.subr.bf16.mxu1 %v11073_v31 }
 0x812   :  { %8813 = vmatpush1.bf16.msra.mxu0 %v11068_v3 }
 0x813   :  { %8985 = vmatpush1.bf16.msra.mxu1 %v11071_v40  ;;  %8814 = vmatprep.subr.bf16.mxu0 %v11076_v19 }
 0x814   :  { %8986 = vmatprep.subr.bf16.mxu1 %v11079_v45 }
 0x816   :  { %8815 = vmatpush1.bf16.msra.mxu0 %v11074_v38 }
 0x817   :  { %8987 = vmatpush1.bf16.msra.mxu1 %v11077_v4  ;;  %8827 = vmatprep.subr.bf16.mxu0 %v11082_v18 }
 0x818   :  { %8999 = vmatprep.subr.bf16.mxu1 %v11085_v61 }
 0x82c   :  { %v6785_v32 = vpop.f32.mrb[16].mxu0 }
 0x82d   :  { %v10596_v0 = vadd.f32 %v6785_v32, %v2159_v23  ;;  %v7043_v6 = vpop.f32.mrb[16].mxu1  ;;  %v6787_v30 = vpop.f32.mrb[17].mxu0  ;;  %v11083_v32 = vld [vmem:[#allocation15 + $0x608] ss:$16 sps:$4 sm:$0xff]  }
 0x82e   :  { %v10600_v60 = vadd.f32 %v7043_v6, %v2167_v46  ;;  %v10597_v62 = vadd.f32 %v6787_v30, %v2163_v21  ;;  %v7045_v35 = vpop.f32.mrb[17].mxu1  ;;  %v6789_v17 = vpop.f32.mrb[18].mxu0  ;;  %v11088_v6 = vld [vmem:[#allocation15 + $0x624] ss:$16 sps:$4 sm:$0xff]   ;;  %v11091_v30 = vld [vmem:[#allocation15 + $0x62c] ss:$16 sps:$4 sm:$0xff]  }
 0x82f   :  { %v7072_v51 = vmul.f32 0.70710677, %v10596_v0  ;;  %v10601_v1 = vadd.f32 %v7045_v35, %v2171_v36  ;;  %v10598_v9 = vadd.f32 %v6789_v17, %v2159_v23  ;;  %v7047_v10 = vpop.f32.mrb[18].mxu1  ;;  %v6791_v5 = vpop.f32.mrb[19].mxu0  ;;  %v7056_v58 = vmul.f32 0.5, %v10596_v0 }
 0x830   :  { %v7074_v59 = vmul.f32 0.70710677, %v10600_v60  ;;  %v7073_v34 = vmul.f32 0.70710677, %v10597_v62  ;;  %v7049_v7 = vpop.f32.mrb[19].mxu1  ;;  %v10602_v15 = vadd.f32 %v7047_v10, %v2167_v46  ;;  %v10599_v57 = vadd.f32 %v6791_v5, %v2163_v21 }
 0x831   :  { %11232 = verf.f32 %v7072_v51  ;;  %v7075_v20 = vmul.f32 0.70710677, %v10601_v1  ;;  %v7080_v42 = vmul.f32 0.70710677, %v10598_v9  ;;  %v10603_v2 = vadd.f32 %v7049_v7, %v2171_v36  ;;  %v11080_v36 = vld [vmem:[#allocation15 + $0x600] ss:$16 sps:$4 sm:$0xff]  }
 0x832   :  { %11234 = verf.f32 %v7074_v59  ;;  %v7082_v50 = vmul.f32 0.70710677, %v10602_v15  ;;  %v7081_v47 = vmul.f32 0.70710677, %v10599_v57  ;;  %v7058_v16 = vmul.f32 0.5, %v10600_v60 }
 0x833   :  { %11236 = verf.f32 %v7073_v34  ;;  %v7083_v27 = vmul.f32 0.70710677, %v10603_v2  ;;  %v7057_v53 = vmul.f32 0.5, %v10597_v62  ;;  %v7064_v63 = vmul.f32 0.5, %v10598_v9  ;;  %v11086_v60 = vld [vmem:[#allocation15 + $0x620] ss:$16 sps:$4 sm:$0xff]  }
 0x834   :  { %11238 = verf.f32 %v7075_v20  ;;  %v7059_v8 = vmul.f32 0.5, %v10601_v1  ;;  %v7066_v24 = vmul.f32 0.5, %v10602_v15  ;;  %v7065_v45 = vmul.f32 0.5, %v10599_v57  ;;  %v11089_v62 = vld [vmem:[#allocation15 + $0x628] ss:$16 sps:$4 sm:$0xff]  }
 0x835   :  { %11240 = verf.f32 %v7080_v42  ;;  %v7067_v61 = vmul.f32 0.5, %v10603_v2  ;;  %v11094_v35 = vld [vmem:[#allocation15 + $0x644] ss:$16 sps:$4 sm:$0xff]   ;;  %v11097_v17 = vld [vmem:[#allocation15 + $0x64c] ss:$16 sps:$4 sm:$0xff]  }
 0x836   :  { %11242 = verf.f32 %v7082_v50  ;;  %v11092_v51 = vld [vmem:[#allocation15 + $0x640] ss:$16 sps:$4 sm:$0xff]   ;;  %v11095_v1 = vld [vmem:[#allocation15 + $0x648] ss:$16 sps:$4 sm:$0xff]   ;;  %v11100_v9 = vld [vmem:[#allocation15 + $0x664] ss:$16 sps:$4 sm:$0xff]  }
 0x837   :  { %11244 = verf.f32 %v7081_v47  ;;  %v11103_v10 = vld [vmem:[#allocation15 + $0x66c] ss:$16 sps:$4 sm:$0xff]   ;;  %v11098_v5 = vld [vmem:[#allocation15 + $0x660] ss:$16 sps:$4 sm:$0xff]   ;;  %v11101_v59 = vld [vmem:[#allocation15 + $0x668] ss:$16 sps:$4 sm:$0xff]  }
 0x838   :  { %11246 = verf.f32 %v7083_v27  ;;  %v11106_v34 = vld [vmem:[#allocation15 + $0x684] ss:$16 sps:$4 sm:$0xff]   ;;  %v11109_v20 = vld [vmem:[#allocation15 + $0x68c] ss:$16 sps:$4 sm:$0xff]   ;;  %v11104_v7 = vld [vmem:[#allocation15 + $0x680] ss:$16 sps:$4 sm:$0xff]  }
 0x839   :  { %v11107_v42 = vld [vmem:[#allocation15 + $0x688] ss:$16 sps:$4 sm:$0xff]   ;;  %v11112_v15 = vld [vmem:[#allocation15 + $0x6a4] ss:$16 sps:$4 sm:$0xff]   ;;  %v11115_v57 = vld [vmem:[#allocation15 + $0x6ac] ss:$16 sps:$4 sm:$0xff]  }
 0x83a   :  { %v11110_v2 = vld [vmem:[#allocation15 + $0x6a0] ss:$16 sps:$4 sm:$0xff]   ;;  %v11113_v50 = vld [vmem:[#allocation15 + $0x6a8] ss:$16 sps:$4 sm:$0xff]   ;;  %v11118_v47 = vld [vmem:[#allocation15 + $0x6c4] ss:$16 sps:$4 sm:$0xff]  }
 0x83b   :  { %v11233_v11 = vpop.eup %11232  ;;  %v11121_v27 = vld [vmem:[#allocation15 + $0x6cc] ss:$16 sps:$4 sm:$0xff]  }
 0x83c   :  { %v11235_v48 = vpop.eup %11234  ;;  %v7104_v29 = vadd.f32 1.0, %v11233_v11  ;;  %v11116_v11 = vld [vmem:[#allocation15 + $0x6c0] ss:$16 sps:$4 sm:$0xff]  }
 0x83d   :  { %v11237_v12 = vpop.eup %11236  ;;  %v7106_v52 = vadd.f32 1.0, %v11235_v48  ;;  %v11119_v48 = vld [vmem:[#allocation15 + $0x6c8] ss:$16 sps:$4 sm:$0xff]  }
 0x83e   :  { %v11239_v37 = vpop.eup %11238  ;;  %v7105_v13 = vadd.f32 1.0, %v11237_v12  ;;  %v7120_v40 = vmul.f32 %v7104_v29, %v7056_v58  ;;  %v11124_v12 = vld [vmem:[#allocation15 + $0x6e4] ss:$16 sps:$4 sm:$0xff]   ;;  %v11122_v29 = vld [vmem:[#allocation15 + $0x6e0] ss:$16 sps:$4 sm:$0xff]  }
 0x83f   :  { %v11241_v28 = vpop.eup %11240  ;;  %v7107_v22 = vadd.f32 1.0, %v11239_v37  ;;  %v7122_v4 = vmul.f32 %v7106_v52, %v7058_v16  ;;  %v11127_v37 = vld [vmem:[#allocation15 + $0x6ec] ss:$16 sps:$4 sm:$0xff]   ;;  %v11130_v58 = vld [vmem:[#allocation15 + $0x704] ss:$16 sps:$4 sm:$0xff]  }
 0x840   :  { %v11243_v43 = vpop.eup %11242  ;;  %v7112_v56 = vadd.f32 1.0, %v11241_v28  ;;  %v7121_v14 = vmul.f32 %v7105_v13, %v7057_v53  ;;  %v11125_v28 = vld [vmem:[#allocation15 + $0x6e8] ss:$16 sps:$4 sm:$0xff]   ;;  %v11133_v16 = vld [vmem:[#allocation15 + $0x70c] ss:$16 sps:$4 sm:$0xff]  }
 0x841   :  { %v11245_v39 = vpop.eup %11244  ;;  %v7114_v31 = vadd.f32 1.0, %v11243_v43  ;;  %v7123_v46 = vmul.f32 %v7107_v22, %v7059_v8  ;;  %v11128_v52 = vld [vmem:[#allocation15 + $0x700] ss:$16 sps:$4 sm:$0xff]   ;;  %v11131_v43 = vld [vmem:[#allocation15 + $0x708] ss:$16 sps:$4 sm:$0xff]  }
 0x842   :  { %v11247_v3 = vpop.eup %11246  ;;  %v7128_v19 = vmul.f32 %v7112_v56, %v7064_v63  ;;  %v7113_v38 = vadd.f32 1.0, %v11245_v39  ;;  %v11136_v53 = vld [vmem:[#allocation15 + $0x724] ss:$16 sps:$4 sm:$0xff]   ;;  %v11139_v13 = vld [vmem:[#allocation15 + $0x72c] ss:$16 sps:$4 sm:$0xff]  }
 0x843   :  { %v7130_v18 = vmul.f32 %v7114_v31, %v7066_v24  ;;  %v7115_v41 = vadd.f32 1.0, %v11247_v3  ;;  %v11134_v63 = vld [vmem:[#allocation15 + $0x720] ss:$16 sps:$4 sm:$0xff]   ;;  %v11137_v56 = vld [vmem:[#allocation15 + $0x728] ss:$16 sps:$4 sm:$0xff]  }
 0x844   :  { %v7136_v23 = vpack.c.bf16 %v7128_v19, %v7120_v40  ;;  %v7129_v55 = vmul.f32 %v7113_v38, %v7065_v45  ;;  %v11142_v39 = vld [vmem:[#allocation15 + $0x744] ss:$16 sps:$4 sm:$0xff]   ;;  %v11145_v8 = vld [vmem:[#allocation15 + $0x74c] ss:$16 sps:$4 sm:$0xff]   ;;  %v11140_v22 = vld [vmem:[#allocation15 + $0x740] ss:$16 sps:$4 sm:$0xff]  }
 0x845   :  { %v12699_v25 = vpack.c.bf16 %v7130_v18, %v7122_v4  ;;  %v7131_v21 = vmul.f32 %v7115_v41, %v7067_v61  ;;  %v11143_v24 = vld [vmem:[#allocation15 + $0x748] ss:$16 sps:$4 sm:$0xff]   ;;  %v11148_v31 = vld [vmem:[#allocation15 + $0x764] ss:$16 sps:$4 sm:$0xff]   ;;  %v11151_v3 = vld [vmem:[#allocation15 + $0x76c] ss:$16 sps:$4 sm:$0xff]  }
 0x846   :  { %v7137_v54 = vpack.c.bf16 %v7129_v55, %v7121_v14  ;;  %v11146_v40 = vld [vmem:[#allocation15 + $0x760] ss:$16 sps:$4 sm:$0xff]   ;;  %v11149_v19 = vld [vmem:[#allocation15 + $0x768] ss:$16 sps:$4 sm:$0xff]   ;;  %v11154_v45 = vld [vmem:[#allocation15 + $0x784] ss:$16 sps:$4 sm:$0xff]  }
 0x847   :  { %v7139_v0 = vpack.c.bf16 %v7131_v21, %v7123_v46  ;;  %v11157_v38 = vld [vmem:[#allocation15 + $0x78c] ss:$16 sps:$4 sm:$0xff]   ;;  %v11152_v4 = vld [vmem:[#allocation15 + $0x780] ss:$16 sps:$4 sm:$0xff]   ;;  %v11155_v18 = vld [vmem:[#allocation15 + $0x788] ss:$16 sps:$4 sm:$0xff]  }
 0x848   :  { %8816 = vmatprep.mubr.bf16.mxu0 %v7137_v54  ;;  %8988 = vmatprep.mubr.bf16.mxu1 %v7137_v54  ;;  %v11160_v61 = vld [vmem:[#allocation15 + $0x7a4] ss:$16 sps:$4 sm:$0xff]   ;;  %v11163_v41 = vld [vmem:[#allocation15 + $0x7ac] ss:$16 sps:$4 sm:$0xff]   ;;  %v11158_v14 = vld [vmem:[#allocation15 + $0x7a0] ss:$16 sps:$4 sm:$0xff]  }
 0x849   :  { %8817 = vmatmul.mubr.bf16.vlgmr.msra.gmra.mrb[20].mxu0 %v7136_v23  ;;  %8989 = vmatmul.mubr.bf16.vlgmr.msra.gmra.mrb[20].mxu1 %v7136_v23  ;;  %v11161_v23 = vld [vmem:[#allocation15 + $0x7a8] ss:$16 sps:$4 sm:$0xff]   ;;  %v11166_v55 = vld [vmem:[#allocation15 + $0x7c4] ss:$16 sps:$4 sm:$0xff]   ;;  %v11169_v46 = vld [vmem:[#allocation15 + $0x7cc] ss:$16 sps:$4 sm:$0xff]  }
 0x84a   :  { %8828 = vmatpush1.bf16.msra.mxu0 %v11080_v36  ;;  %9000 = vmatpush1.bf16.msra.mxu1 %v11083_v32  ;;  %v11164_v21 = vld [vmem:[#allocation15 + $0x7c0] ss:$16 sps:$4 sm:$0xff]   ;;  %v11167_v54 = vld [vmem:[#allocation15 + $0x7c8] ss:$16 sps:$4 sm:$0xff]   ;;  %v11172_v36 = vld [vmem:[#allocation15 + $0x7e4] ss:$16 sps:$4 sm:$0xff]  }
 0x84b   :  { %8859 = vmatprep.mubr.bf16.mxu0 %v7139_v0  ;;  %9031 = vmatprep.mubr.bf16.mxu1 %v7139_v0  ;;  %v11175_v32 = vld [vmem:[#allocation15 + $0x7ec] ss:$16 sps:$4 sm:$0xff]   ;;  %v11170_v0 = vld [vmem:[#allocation15 + $0x7e0] ss:$16 sps:$4 sm:$0xff]  }
 0x84c   :  { %8829 = vmatprep.subr.bf16.mxu0 %v11088_v6  ;;  %9001 = vmatprep.subr.bf16.mxu1 %v11091_v30  ;;  %v11173_v6 = vld [vmem:[#allocation15 + $0x7e8] ss:$16 sps:$4 sm:$0xff]  }
 0x84d   :  { %v11176_v30 = vld [vmem:[#allocation18 + $0x40] sm:$0xff]  }
 0x84e   :  { %8830 = vmatpush1.bf16.msra.mxu0 %v11086_v60  ;;  %9002 = vmatpush1.bf16.msra.mxu1 %v11089_v62  ;;  %v11177_v60 = vld [vmem:[#allocation18 + $0xc0] sm:$0xff]  }
 0x84f   :  { %8831 = vmatprep.subr.bf16.mxu0 %v11094_v35  ;;  %9003 = vmatprep.subr.bf16.mxu1 %v11097_v17  ;;  %v11178_v62 = vld [vmem:[#allocation18] sm:$0xff]   ;;  %v11180_v17 = vld [vmem:[#allocation18 + $0x48] sm:$0xff]  }
 0x850   :  { %v11179_v35 = vld [vmem:[#allocation18 + $0x80] sm:$0xff]  }
 0x852   :  { %8832 = vmatpush1.bf16.msra.mxu0 %v11092_v51  ;;  %9004 = vmatpush1.bf16.msra.mxu1 %v11095_v1  ;;  %v11181_v51 = vld [vmem:[#allocation18 + $0xc8] sm:$0xff]  }
 0x853   :  { %8833 = vmatprep.subr.bf16.mxu0 %v11100_v9  ;;  %9005 = vmatprep.subr.bf16.mxu1 %v11103_v10  ;;  %v11182_v1 = vld [vmem:[#allocation18 + $0x8] sm:$0xff]   ;;  %v11184_v10 = vld [vmem:[#allocation18 + $0x50] sm:$0xff]  }
 0x854   :  { %v11183_v9 = vld [vmem:[#allocation18 + $0x88] sm:$0xff]  }
 0x856   :  { %8834 = vmatpush1.bf16.msra.mxu0 %v11098_v5  ;;  %9006 = vmatpush1.bf16.msra.mxu1 %v11101_v59  ;;  %v11185_v5 = vld [vmem:[#allocation18 + $0xd0] sm:$0xff]  }
 0x857   :  { %8835 = vmatprep.subr.bf16.mxu0 %v11106_v34  ;;  %9007 = vmatprep.subr.bf16.mxu1 %v11109_v20  ;;  %v11186_v59 = vld [vmem:[#allocation18 + $0x10] sm:$0xff]   ;;  %v11188_v20 = vld [vmem:[#allocation18 + $0x58] sm:$0xff]  }
 0x858   :  { %v11187_v34 = vld [vmem:[#allocation18 + $0x90] sm:$0xff]  }
 0x85a   :  { %8836 = vmatpush1.bf16.msra.mxu0 %v11104_v7  ;;  %9008 = vmatpush1.bf16.msra.mxu1 %v11107_v42  ;;  %v11189_v7 = vld [vmem:[#allocation18 + $0xd8] sm:$0xff]  }
 0x85b   :  { %8837 = vmatprep.subr.bf16.mxu0 %v11112_v15  ;;  %9009 = vmatprep.subr.bf16.mxu1 %v11115_v57  ;;  %v11190_v42 = vld [vmem:[#allocation18 + $0x18] sm:$0xff]   ;;  %v11192_v15 = vld [vmem:[#allocation18 + $0x60] sm:$0xff]  }
 0x85c   :  { %v11193_v57 = vld [vmem:[#allocation18 + $0xe0] sm:$0xff]  }
 0x85e   :  { %8838 = vmatpush1.bf16.msra.mxu0 %v11110_v2  ;;  %9010 = vmatpush1.bf16.msra.mxu1 %v11113_v50  ;;  %v11194_v2 = vld [vmem:[#allocation18 + $0x20] sm:$0xff]  }
 0x85f   :  { %8839 = vmatprep.subr.bf16.mxu0 %v11118_v47  ;;  %9011 = vmatprep.subr.bf16.mxu1 %v11121_v27  ;;  %v11195_v50 = vld [vmem:[#allocation18 + $0xa0] sm:$0xff]   ;;  %v11196_v47 = vld [vmem:[#allocation18 + $0x68] sm:$0xff]  }
 0x860   :  { %v11197_v27 = vld [vmem:[#allocation18 + $0xe8] sm:$0xff]  }
 0x862   :  { %8840 = vmatpush1.bf16.msra.mxu0 %v11116_v11  ;;  %9012 = vmatpush1.bf16.msra.mxu1 %v11119_v48  ;;  %v11198_v11 = vld [vmem:[#allocation18 + $0x28] sm:$0xff]  }
 0x863   :  { %8841 = vmatprep.subr.bf16.mxu0 %v11124_v12  ;;  %9013 = vmatprep.subr.bf16.mxu1 %v11127_v37  ;;  %v11199_v48 = vld [vmem:[#allocation18 + $0xa8] sm:$0xff]   ;;  %v11200_v12 = vld [vmem:[#allocation18 + $0x70] sm:$0xff]  }
 0x864   :  { %v11201_v37 = vld [vmem:[#allocation18 + $0xf0] sm:$0xff]  }
 0x866   :  { %8842 = vmatpush1.bf16.msra.mxu0 %v11122_v29  ;;  %9014 = vmatpush1.bf16.msra.mxu1 %v11125_v28  ;;  %v11202_v29 = vld [vmem:[#allocation18 + $0x30] sm:$0xff]  }
 0x867   :  { %8843 = vmatprep.subr.bf16.mxu0 %v11130_v58  ;;  %9015 = vmatprep.subr.bf16.mxu1 %v11133_v16  ;;  %v11203_v28 = vld [vmem:[#allocation18 + $0xb0] sm:$0xff]   ;;  %v11204_v58 = vld [vmem:[#allocation18 + $0x78] sm:$0xff]  }
 0x868   :  { %v11205_v16 = vld [vmem:[#allocation18 + $0xf8] sm:$0xff]  }
 0x86a   :  { %8844 = vmatpush1.bf16.msra.mxu0 %v11128_v52  ;;  %9016 = vmatpush1.bf16.msra.mxu1 %v11131_v43  ;;  %v11206_v52 = vld [vmem:[#allocation18 + $0x38] sm:$0xff]  }
 0x86b   :  { %8845 = vmatprep.subr.bf16.mxu0 %v11136_v53  ;;  %9017 = vmatprep.subr.bf16.mxu1 %v11139_v13  ;;  %v11207_v43 = vld [vmem:[#allocation18 + $0xb8] sm:$0xff]  }
 0x86c   :  { %v7396_v53 = vld [vmem:[#allocation16] sm:$0xf] }
 0x86d   :  { %v7401_v13 = vrot.slane %v7396_v53, %v12768_v49 }
 0x86e   :  { %8846 = vmatpush1.bf16.msra.mxu0 %v11134_v63  ;;  %9018 = vmatpush1.bf16.msra.mxu1 %v11137_v56  ;;  %v7409_v63 = vrot.slane %v7396_v53, %v11805_v44  ;;  %v7405_v56 = vrot.slane %v7396_v53, %v12769_v26 }
 0x86f   :  { %8847 = vmatprep.subr.bf16.mxu0 %v11142_v39  ;;  %9019 = vmatprep.subr.bf16.mxu1 %v11145_v8  ;;  %v7413_v39 = vrot.slane %v7396_v53, %v12770_v33 }
 0x872   :  { %8848 = vmatpush1.bf16.msra.mxu0 %v11140_v22  ;;  %9020 = vmatpush1.bf16.msra.mxu1 %v11143_v24 }
 0x873   :  { %8849 = vmatprep.subr.bf16.mxu0 %v11148_v31  ;;  %9021 = vmatprep.subr.bf16.mxu1 %v11151_v3 }
 0x876   :  { %8850 = vmatpush1.bf16.msra.mxu0 %v11146_v40  ;;  %9022 = vmatpush1.bf16.msra.mxu1 %v11149_v19 }
 0x877   :  { %8851 = vmatprep.subr.bf16.mxu0 %v11154_v45  ;;  %9023 = vmatprep.subr.bf16.mxu1 %v11157_v38 }
 0x87a   :  { %8852 = vmatpush1.bf16.msra.mxu0 %v11152_v4  ;;  %9024 = vmatpush1.bf16.msra.mxu1 %v11155_v18 }
 0x87b   :  { %8853 = vmatprep.subr.bf16.mxu0 %v11160_v61  ;;  %9025 = vmatprep.subr.bf16.mxu1 %v11163_v41 }
 0x87e   :  { %8854 = vmatpush1.bf16.msra.mxu0 %v11158_v14  ;;  %9026 = vmatpush1.bf16.msra.mxu1 %v11161_v23 }
 0x87f   :  { %8855 = vmatprep.subr.bf16.mxu0 %v11166_v55  ;;  %9027 = vmatprep.subr.bf16.mxu1 %v11169_v46 }
 0x882   :  { %8856 = vmatpush1.bf16.msra.mxu0 %v11164_v21  ;;  %9028 = vmatpush1.bf16.msra.mxu1 %v11167_v54 }
 0x883   :  { %8857 = vmatprep.subr.bf16.mxu0 %v11172_v36  ;;  %9029 = vmatprep.subr.bf16.mxu1 %v11175_v32 }
 0x886   :  { %8858 = vmatpush1.bf16.msra.mxu0 %v11170_v0  ;;  %9030 = vmatpush1.bf16.msra.mxu1 %v11173_v6 }
 0x887   :  { %10544 = vmatprep.subr.bf16.mxu0 %v11176_v30  ;;  %10566 = vmatprep.subr.bf16.mxu1 %v11177_v60 }
 0x889   :  { %8860 = vmatmul.mubr.bf16.vlgmr.msra.gmra.mrb[20].mxu0 %v12699_v25  ;;  %9032 = vmatmul.mubr.bf16.vlgmr.msra.gmra.mrb[20].mxu1 %v12699_v25  ;;  %v11191_v25 = vld [vmem:[#allocation18 + $0x98] sm:$0xff]  }
 0x88a   :  { %10545 = vmatpush3.bf16.msra.mxu0 %v11178_v62  ;;  %10567 = vmatpush3.bf16.msra.mxu1 %v11179_v35 }
 0x88b   :  { %10546 = vmatprep.subr.bf16.mxu0 %v11180_v17  ;;  %10568 = vmatprep.subr.bf16.mxu1 %v11181_v51 }
 0x88e   :  { %10547 = vmatpush3.bf16.msra.mxu0 %v11182_v1  ;;  %10569 = vmatpush3.bf16.msra.mxu1 %v11183_v9 }
 0x88f   :  { %10548 = vmatprep.subr.bf16.mxu0 %v11184_v10  ;;  %10570 = vmatprep.subr.bf16.mxu1 %v11185_v5 }
 0x892   :  { %10549 = vmatpush3.bf16.msra.mxu0 %v11186_v59  ;;  %10571 = vmatpush3.bf16.msra.mxu1 %v11187_v34 }
 0x893   :  { %10550 = vmatprep.subr.bf16.mxu0 %v11188_v20  ;;  %10572 = vmatprep.subr.bf16.mxu1 %v11189_v7 }
 0x896   :  { %10551 = vmatpush3.bf16.msra.mxu0 %v11190_v42  ;;  %10573 = vmatpush3.bf16.msra.mxu1 %v11191_v25 }
 0x897   :  { %10552 = vmatprep.subr.bf16.mxu0 %v11192_v15  ;;  %10574 = vmatprep.subr.bf16.mxu1 %v11193_v57 }
 0x89a   :  { %10553 = vmatpush3.bf16.msra.mxu0 %v11194_v2  ;;  %10575 = vmatpush3.bf16.msra.mxu1 %v11195_v50 }
 0x89b   :  { %10554 = vmatprep.subr.bf16.mxu0 %v11196_v47  ;;  %10576 = vmatprep.subr.bf16.mxu1 %v11197_v27 }
 0x89e   :  { %10555 = vmatpush3.bf16.msra.mxu0 %v11198_v11  ;;  %10577 = vmatpush3.bf16.msra.mxu1 %v11199_v48 }
 0x89f   :  { %10556 = vmatprep.subr.bf16.mxu0 %v11200_v12  ;;  %10578 = vmatprep.subr.bf16.mxu1 %v11201_v37 }
 0x8a2   :  { %10557 = vmatpush3.bf16.msra.mxu0 %v11202_v29  ;;  %10579 = vmatpush3.bf16.msra.mxu1 %v11203_v28 }
 0x8a3   :  { %10558 = vmatprep.subr.bf16.mxu0 %v11204_v58  ;;  %10580 = vmatprep.subr.bf16.mxu1 %v11205_v16 }
 0x8a6   :  { %10559 = vmatpush3.bf16.msra.mxu0 %v11206_v52  ;;  %10581 = vmatpush3.bf16.msra.mxu1 %v11207_v43 }
 0x95c   :  { %v8861_v8 = vpop.f32.mrb[20].mxu0  ;;  %v9033_v22 = vpop.f32.mrb[20].mxu1 }
 0x95d   :  { %v10604_v24 = vadd.f32 %v8861_v8, %v7401_v13  ;;  %v10608_v31 = vadd.f32 %v9033_v22, %v7409_v63  ;;  %v8863_v3 = vpop.f32.mrb[21].mxu0  ;;  %v9035_v40 = vpop.f32.mrb[21].mxu1 }
 0x95e   :  { %v10605_v19 = vadd.f32 %v8863_v3, %v7405_v56  ;;  %v10609_v45 = vadd.f32 %v9035_v40, %v7413_v39  ;;  %v8865_v38 = vpop.f32.mrb[22].mxu0  ;;  %v9037_v4 = vpop.f32.mrb[22].mxu1 }
 0x95f   :  { %v9050_v18 = vmul.f32 0.70710677, %v10604_v24  ;;  %v9052_v61 = vmul.f32 0.70710677, %v10608_v31  ;;  %v10606_v44 = vadd.f32 %v8865_v38, %v7401_v13  ;;  %v10610_v14 = vadd.f32 %v9037_v4, %v7409_v63  ;;  %v8867_v26 = vpop.f32.mrb[23].mxu0  ;;  %v9039_v23 = vpop.f32.mrb[23].mxu1 }
 0x960   :  { %v9051_v41 = vmul.f32 0.70710677, %v10605_v19  ;;  %v9053_v49 = vmul.f32 0.70710677, %v10609_v45  ;;  %v10607_v33 = vadd.f32 %v8867_v26, %v7405_v56  ;;  %v10611_v55 = vadd.f32 %v9039_v23, %v7413_v39  ;;  %v10511_v56 = vld [vmem:[#allocation19] ss:$0 sm:$0xff] }
 0x961   :  { %11248 = verf.f32 %v9050_v18  ;;  %v9054_v46 = vmul.f32 0.70710677, %v10606_v44  ;;  %v9056_v21 = vmul.f32 0.70710677, %v10610_v14  ;;  %v9042_v35 = vmul.f32 0.5, %v10604_v24 }
 0x962   :  { %11250 = verf.f32 %v9052_v61  ;;  %v9055_v54 = vmul.f32 0.70710677, %v10607_v33  ;;  %v9057_v36 = vmul.f32 0.70710677, %v10611_v55  ;;  %v9044_v17 = vmul.f32 0.5, %v10608_v31 }
 0x963   :  { %11252 = verf.f32 %v9051_v41  ;;  %v9043_v9 = vmul.f32 0.5, %v10605_v19  ;;  %v9046_v5 = vmul.f32 0.5, %v10606_v44  ;;  %v9045_v20 = vmul.f32 0.5, %v10609_v45 }
 0x964   :  { %11254 = verf.f32 %v9053_v49  ;;  %v9048_v42 = vmul.f32 0.5, %v10610_v14  ;;  %v9047_v50 = vmul.f32 0.5, %v10607_v33  ;;  %v9049_v48 = vmul.f32 0.5, %v10611_v55 }
 0x965   :  { %11256 = verf.f32 %v9054_v46 }
 0x966   :  { %11258 = verf.f32 %v9056_v21 }
 0x967   :  { %11260 = verf.f32 %v9055_v54 }
 0x968   :  { %11262 = verf.f32 %v9057_v36 }
 0x96b   :  { %v11249_v32 = vpop.eup %11248 }
 0x96c   :  { %v11251_v0 = vpop.eup %11250  ;;  %v9066_v60 = vadd.f32 1.0, %v11249_v32 }
 0x96d   :  { %v11253_v6 = vpop.eup %11252  ;;  %v9068_v51 = vadd.f32 1.0, %v11251_v0 }
 0x96e   :  { %v11255_v30 = vpop.eup %11254  ;;  %v9067_v10 = vadd.f32 1.0, %v11253_v6  ;;  %v9074_v57 = vmul.f32 %v9066_v60, %v9042_v35 }
 0x96f   :  { %v11257_v62 = vpop.eup %11256  ;;  %v9069_v7 = vadd.f32 1.0, %v11255_v30  ;;  %v9076_v27 = vmul.f32 %v9068_v51, %v9044_v17 }
 0x970   :  { %v11259_v1 = vpop.eup %11258  ;;  %v9070_v59 = vadd.f32 1.0, %v11257_v62  ;;  %v9075_v37 = vmul.f32 %v9067_v10, %v9043_v9 }
 0x971   :  { %v11261_v34 = vpop.eup %11260  ;;  %v9072_v25 = vadd.f32 1.0, %v11259_v1  ;;  %v9077_v58 = vmul.f32 %v9069_v7, %v9045_v20 }
 0x972   :  { %v11263_v15 = vpop.eup %11262  ;;  %v9078_v2 = vmul.f32 %v9070_v59, %v9046_v5  ;;  %v9071_v47 = vadd.f32 1.0, %v11261_v34 }
 0x973   :  { %v9080_v11 = vmul.f32 %v9072_v25, %v9048_v42  ;;  %v9073_v12 = vadd.f32 1.0, %v11263_v15 }
 0x974   :  { %v9082_v29 = vpack.c.bf16 %v9078_v2, %v9074_v57  ;;  %v9079_v28 = vmul.f32 %v9071_v47, %v9047_v50 }
 0x975   :  { %v9084_v16 = vpack.c.bf16 %v9080_v11, %v9076_v27  ;;  %v9081_v52 = vmul.f32 %v9073_v12, %v9049_v48 }
 0x976   :  { %v9083_v43 = vpack.c.bf16 %v9079_v28, %v9075_v37 }
 0x977   :  { %v9085_v53 = vpack.c.bf16 %v9081_v52, %v9077_v58 }
 0x978   :  { %9381 = vmatprep.mubr.bf16.mxu0 %v9083_v43 }
 0x979   :  { %9422 = vmatprep.mubr.bf16.mxu1 %v9085_v53  ;;  %9382 = vmatmul.mubr.bf16.vlgmr.msra.gmra.mrb[24].mxu0 %v9082_v29 }
 0x97a   :  { %9423 = vmatmul.mubr.bf16.vlgmr.msra.gmra.mrb[24].mxu1 %v9084_v16 }
 0xa4c   :  { %v10560_v13 = vpop.f32.mrb[24].mxu0 }
 0xa4d   :  { %v10582_v63 = vpop.f32.mrb[24].mxu1  ;;  %v10561_v39 = vpop.f32.mrb[25].mxu0 }
 0xa4e   :  { %v10562_v8 = vadd.f32 %v10561_v39, %v10560_v13  ;;  %v10583_v22 = vpop.f32.mrb[25].mxu1  ;;  %v10563_v24 = vpop.f32.mrb[26].mxu0 }
 0xa4f   :  { %v10584_v31 = vadd.f32 %v10583_v22, %v10582_v63  ;;  %v10585_v3 = vpop.f32.mrb[26].mxu1  ;;  %v10564_v40 = vpop.f32.mrb[27].mxu0 }
 0xa50   :  { %v9384_v19 = vadd.f32 %v10562_v8, %v10511_v56  ;;  %v10565_v45 = vadd.f32 %v10564_v40, %v10563_v24  ;;  %v10586_v38 = vpop.f32.mrb[27].mxu1 }
 0xa51   :  { %v10587_v4 = vadd.f32 %v10586_v38, %v10585_v3 }
 0xa52   :  { %v9425_v18 = vadd.f32 %v10584_v31, %v9384_v19  ;;  %v9387_v61 = vadd.f32 %v10565_v45, %v10511_v56 }
 0xa54   :  { %9431 = vst [vmem:[%s12726_s13] sm:$0xff] %v9425_v18  ;;  %v9428_v41 = vadd.f32 %v10587_v4, %v9387_v61 }
 0xa56   :  { %9432 = vst [vmem:[%s12726_s13 + $0x8] sm:$0xff] %v9428_v41 }
 0xa57   :  { %9437 = vsyncpa [#allocation3], 1 }
 0xa58   :  { %9438 = vsyncpa [#allocation5], 1 }
 0xa59   :  { %9439 = vsyncpa [#allocation8], 1 }
 0xa5a   :  { %9440 = vsyncpa [#allocation11], 1 }
 0xa5b   :  { %9441 = vsyncpa [#allocation14], 1 }
 0xa5c   :  { %9442 = vsyncpa [#allocation17], 1 }
 0xa5d   :  { %9443 = vsyncpa [#allocation20], 1 }

</bundles_post_ra>
